<compile_context>
chip_gen: v6e
topology: v6e:2x2x1
jax: 0.10.0
libtpu: 0.0.40
codegen_flags: <defaults>
</compile_context>

<pallas_src>
import math
from functools import partial

import numpy as np
import jax
import jax.numpy as jnp
from jax.experimental import pallas as pl
from jax.experimental.pallas import tpu as pltpu

# ----------------------- scaled-down config (static) ------------------------
IN_CHANS = 3
EMBED_DIMS = (32, 64)
NUM_HEADS = (2, 4)
MLP_RATIOS = (4, 4)
SR_RATIOS = (4, 2)
WSS = (4, 4)
PATCH_SIZES = (4, 2)
NUM_STAGES = 2  # "layer = 2" in the PyTorch forward

_BF16 = jnp.bfloat16
_F32 = jnp.float32


# =========================== in-kernel math helpers ===========================
def _mm(a, b):
    """2-D matmul on the MXU: bf16 operands, f32 accumulation."""
    return jnp.dot(a.astype(_BF16), b.astype(_BF16), preferred_element_type=_F32)


def _bmm_nt(a, b):
    """Head-batched a @ b^T: (h, m, d), (h, n, d) -> (h, m, n)."""
    return jax.lax.dot_general(a.astype(_BF16), b.astype(_BF16),
                               (((2,), (2,)), ((0,), (0,))),
                               preferred_element_type=_F32)


def _bmm_nn(a, b):
    """Head-batched a @ b: (h, m, k), (h, k, n) -> (h, m, n)."""
    return jax.lax.dot_general(a.astype(_BF16), b.astype(_BF16),
                               (((2,), (1,)), ((0,), (0,))),
                               preferred_element_type=_F32)


def _layernorm(x, g, b, eps):
    mu = jnp.mean(x, axis=-1, keepdims=True)
    xc = x - mu
    var = jnp.mean(xc * xc, axis=-1, keepdims=True)
    return xc * jax.lax.rsqrt(var + eps) * g + b


def _gelu_erf(x):
    # exact erf-GELU (torch nn.GELU) via A&S 7.1.26 polynomial (abs err < 1.5e-7)
    z = x * (1.0 / math.sqrt(2.0))
    a = jnp.abs(z)
    t = 1.0 / (1.0 + 0.3275911 * a)
    poly = t * (0.254829592 + t * (-0.284496736 + t * (1.421413741
                + t * (-1.453152027 + t * 1.061405429))))
    erf_abs = 1.0 - poly * jnp.exp(-a * a)
    erf = jnp.where(z >= 0.0, erf_abs, -erf_abs)
    return 0.5 * x * (1.0 + erf)


def _softmax_lastdim(s):
    s = s - jnp.max(s, axis=-1, keepdims=True)
    p = jnp.exp(s)
    return p * pl.reciprocal(jnp.sum(p, axis=-1, keepdims=True), approx=True)


# ============================ fused per-stage kernel ==========================
def _stage_kernel(pat_ref,
                  pe_w, pe_b, pe_g, pe_beta,
                  a_n1g, a_n1b, a_qkvw, a_qkvb, a_projw, a_projb,
                  a_n2g, a_n2b, a_fc1w, a_fc1b, a_fc2w, a_fc2b,
                  attn_bias,
                  pos_sel, pos_w, pos_b,
                  g_n1g, g_n1b, g_qw, g_qb,
                  sr_sel, g_srw, g_srb, g_srlng, g_srlnb,
                  g_kvw, g_kvb, g_projw, g_projb,
                  g_n2g, g_n2b, g_fc1w, g_fc1b, g_fc2w, g_fc2b,
                  out_sel,
                  o_ref,
                  *, heads, dh, sr, out_taps, eps_pe, eps_blk, eps_sr):
    """One whole Twins stage for one image, entirely inside VMEM.

    pat_ref: (1, N, p*p*Cin) patchified image (patch-conv as a single matmul).
    pos_sel / sr_sel / out_sel: constant one-hot gather matrices (row gathers done
    on the MXU -> no in-kernel transposes / strided slices).
    """
    # ---------------- PatchEmbed: conv(k=s=p) as one matmul + LayerNorm ------
    x = _layernorm(_mm(pat_ref[0], pe_w[...]) + pe_b[...],
                   pe_g[...], pe_beta[...], eps_pe)
    N, C = x.shape

    def heads_split(m, base):
        # (rows, *) -> (heads, rows, dh) via lane slices + leading-dim stack
        return jnp.stack([m[:, base + h * dh: base + (h + 1) * dh]
                          for h in range(heads)], axis=0)

    def heads_merge(m3):
        return jnp.concatenate([m3[h] for h in range(heads)], axis=-1)

    # ---------------- Block 0: LocallyGroupedAttn (windowed via additive mask)
    h1 = _layernorm(x, a_n1g[...], a_n1b[...], eps_blk)
    qkv = _mm(h1, a_qkvw[...]) + a_qkvb[...]                  # (N, 3C); q pre-scaled
    q3 = heads_split(qkv, 0)
    k3 = heads_split(qkv, C)
    v3 = heads_split(qkv, 2 * C)
    s = _bmm_nt(q3, k3) + attn_bias[...][None, :, :]          # (h, N, N)
    o = heads_merge(_bmm_nn(_softmax_lastdim(s), v3))         # (N, C)
    x = x + _mm(o, a_projw[...]) + a_projb[...]
    h2 = _layernorm(x, a_n2g[...], a_n2b[...], eps_blk)
    x = x + _mm(_gelu_erf(_mm(h2, a_fc1w[...]) + a_fc1b[...]), a_fc2w[...]) + a_fc2b[...]

    # ---------------- PosConv: depthwise 3x3 (pad 1) + bias + residual -------
    # one gather matmul builds the 9 shifted, zero-padded copies of x
    z3 = _mm(pos_sel[...], x).reshape(9, N, C)
    conv = z3[0] * pos_w[0:1, :]
    for kk in range(1, 9):
        conv = conv + z3[kk] * pos_w[kk:kk + 1, :]
    x = x + conv + pos_b[...]

    # ---------------- Block 1: GlobalSubSampleAttn ---------------------------
    h1 = _layernorm(x, g_n1g[...], g_n1b[...], eps_blk)
    q = _mm(h1, g_qw[...]) + g_qb[...]                        # (N, C); q pre-scaled
    # spatial-reduction conv (k = s = sr) from h1: one-hot gather matmul, then a
    # single wide-contraction matmul with K = sr*sr*C (no duplicate LN, no xp input)
    p_taps = sr * sr
    nk = sr_sel.shape[0] // p_taps
    zs = _mm(sr_sel[...], h1).reshape(p_taps, nk, C)
    zw = jnp.concatenate([zs[t] for t in range(p_taps)], axis=-1)   # (nk, sr*sr*C)
    xs = _layernorm(_mm(zw, g_srw[...]) + g_srb[...],
                    g_srlng[...], g_srlnb[...], eps_sr)
    kv = _mm(xs, g_kvw[...]) + g_kvb[...]                     # (nk, 2C)
    q3 = heads_split(q, 0)
    k3 = heads_split(kv, 0)
    v3 = heads_split(kv, C)
    o = heads_merge(_bmm_nn(_softmax_lastdim(_bmm_nt(q3, k3)), v3))
    x = x + _mm(o, g_projw[...]) + g_projb[...]
    h2 = _layernorm(x, g_n2g[...], g_n2b[...], eps_blk)
    x = x + _mm(_gelu_erf(_mm(h2, g_fc1w[...]) + g_fc1b[...]), g_fc2w[...]) + g_fc2b[...]

    # ---------------- Epilogue ------------------------------------------------
    if out_taps == 0:
        # final stage: emit tokens
        o_ref[0] = x.astype(o_ref.dtype)
    else:
        # emit next stage's patchified layout directly (lane-dense store)
        mo = out_sel.shape[0] // out_taps
        ze = _mm(out_sel[...], x).reshape(out_taps, mo, C)
        o_ref[0] = jnp.concatenate([ze[t] for t in range(out_taps)],
                                   axis=-1).astype(o_ref.dtype)


# ======================= constant gather-matrix builders ======================
def _window_bias(Hn, Wn, ws):
    """(N, N) additive bias: 0 within the same ws x ws window, -1e30 across."""
    n = Hn * Wn
    r = np.arange(n)
    wid = (r // Wn // ws) * (Wn // ws) + (r % Wn) // ws
    same = wid[:, None] == wid[None, :]
    return jnp.asarray(np.where(same, 0.0, -1e30).astype(np.float32))


def _posconv_gather(Hn, Wn):
    """(9N, N) one-hot: row k*N + n picks x at offset (di, dj), zero-padded OOB."""
    n = Hn * Wn
    sel = np.zeros((9 * n, n), np.float32)
    r = np.arange(n)
    row, col = r // Wn, r % Wn
    k = 0
    for di in (-1, 0, 1):
        for dj in (-1, 0, 1):
            rr, cc = row + di, col + dj
            valid = (rr >= 0) & (rr < Hn) & (cc >= 0) & (cc < Wn)
            src = rr * Wn + cc
            idx = np.where(valid)[0]
            sel[k * n + idx, src[idx]] = 1.0
            k += 1
    return jnp.asarray(sel, dtype=jnp.bfloat16)


def _tap_gather(Hn, Wn, s):
    """(s*s*Mo, N) one-hot im2col for a k=s, stride=s conv (also used for the
    patchified-output epilogue); Mo = (Hn//s)*(Wn//s)."""
    Ho, Wo = Hn // s, Wn // s
    mo = Ho * Wo
    sel = np.zeros((s * s * mo, Hn * Wn), np.float32)
    for ti in range(s):
        for tj in range(s):
            t = ti * s + tj
            for ph in range(Ho):
                for pw in range(Wo):
                    k = ph * Wo + pw
                    src = (ph * s + ti) * Wn + (pw * s + tj)
                    sel[t * mo + k, src] = 1.0
    return jnp.asarray(sel, dtype=jnp.bfloat16)


# =============================== Pallas wrappers ==============================
def _full_spec(a):
    nd = a.ndim
    return pl.BlockSpec(a.shape, lambda i, _nd=nd: (0,) * _nd)


def _r2(v):
    return v.reshape(1, -1)


def _run_stage(pat, sp, *, size, stage_idx):
    """pat: (BT, N, K) patchified stage input -> (BT, Mout, Kout) stage output."""
    BT, M, K = pat.shape
    Hn, Wn = size
    D, heads = EMBED_DIMS[stage_idx], NUM_HEADS[stage_idx]
    ws, sr = WSS[stage_idx], SR_RATIOS[stage_idx]
    N = Hn * Wn
    assert M == N and D % heads == 0 and Hn % ws == 0 and Hn % sr == 0

    attn_bias = _window_bias(Hn, Wn, ws)
    pos_sel = _posconv_gather(Hn, Wn)
    sr_sel = _tap_gather(Hn, Wn, sr)

    last = stage_idx == NUM_STAGES - 1
    if last:
        out_taps = 0
        out_sel = jnp.zeros((8, 128), jnp.bfloat16)    # unused dummy
        Mout, Kout, odt = N, D, jnp.float32
    else:
        p_next = PATCH_SIZES[stage_idx + 1]
        out_taps = p_next * p_next
        out_sel = _tap_gather(Hn, Wn, p_next)
        Mout = (Hn // p_next) * (Wn // p_next)
        Kout = out_taps * D                            # lane-dense (>=128) bf16 store
        odt = jnp.bfloat16

    args = (pat,
            sp["pe_w"], _r2(sp["pe_b"]), _r2(sp["pe_ln_w"]), _r2(sp["pe_ln_b"]),
            _r2(sp["a_n1_w"]), _r2(sp["a_n1_b"]), sp["a_qkv_w"], _r2(sp["a_qkv_b"]),
            sp["a_proj_w"], _r2(sp["a_proj_b"]), _r2(sp["a_n2_w"]), _r2(sp["a_n2_b"]),
            sp["a_fc1_w"], _r2(sp["a_fc1_b"]), sp["a_fc2_w"], _r2(sp["a_fc2_b"]),
            attn_bias,
            pos_sel, sp["pos_w"], _r2(sp["pos_b"]),
            _r2(sp["g_n1_w"]), _r2(sp["g_n1_b"]), sp["g_q_w"], _r2(sp["g_q_b"]),
            sr_sel, sp["g_sr_w"], _r2(sp["g_sr_b"]),
            _r2(sp["g_sr_ln_w"]), _r2(sp["g_sr_ln_b"]),
            sp["g_kv_w"], _r2(sp["g_kv_b"]), sp["g_proj_w"], _r2(sp["g_proj_b"]),
            _r2(sp["g_n2_w"]), _r2(sp["g_n2_b"]),
            sp["g_fc1_w"], _r2(sp["g_fc1_b"]), sp["g_fc2_w"], _r2(sp["g_fc2_b"]),
            out_sel)

    kern = partial(_stage_kernel, heads=heads, dh=D // heads, sr=sr,
                   out_taps=out_taps, eps_pe=1e-5, eps_blk=1e-6, eps_sr=1e-5)
    # grid over images: natural data parallelism on multi-TC chips; on 1-TC chips
    # it is a short serial loop whose constant-index weight blocks are fetched once.
    # (Weight operands stay small here; single-buffering them is a TODO for full widths.)
    return pl.pallas_call(
        kern,
        out_shape=jax.ShapeDtypeStruct((BT, Mout, Kout), odt),
        grid=(BT,),
        in_specs=[pl.BlockSpec((1, M, K), lambda i: (i, 0, 0))]
                 + [_full_spec(a) for a in args[1:]],
        out_specs=pl.BlockSpec((1, Mout, Kout), lambda i: (i, 0, 0)),
        compiler_params=pltpu.CompilerParams(dimension_semantics=("parallel",)),
    )(*args)


# ================================== forward ===================================
def twins_forward(x, params):
    """x: (B, T, C, H, W) -> (B, T, EMBED_DIMS[-1], H/8, W/8)."""
    B, T, C, H, W = x.shape
    BT = B * T
    xi = x.reshape(BT, C, H, W).transpose(0, 2, 3, 1)        # channels-last
    # patchify the raw input once (tiny XLA relayout); stage-0 kernel emits the
    # patchified layout for stage 1, so no relayout is needed between stages.
    p0 = PATCH_SIZES[0]
    Hn, Wn = H // p0, W // p0
    cur = xi.reshape(BT, Hn, p0, Wn, p0, C).transpose(0, 1, 3, 2, 4, 5)
    cur = cur.reshape(BT, Hn * Wn, p0 * p0 * C)
    for i in range(NUM_STAGES):
        cur = _run_stage(cur, params["stages"][i], size=(Hn, Wn), stage_idx=i)
        if i + 1 < NUM_STAGES:
            p = PATCH_SIZES[i + 1]
            Hn, Wn = Hn // p, Wn // p
    D = EMBED_DIMS[-1]
    img = cur.reshape(BT, Hn, Wn, D).transpose(0, 3, 1, 2)   # tokens -> (BT, C, H', W')
    return img.reshape(B, T, D, Hn, Wn)


# =============================== parameter init ===============================
def init_params(key):
    keys = iter(jax.random.split(key, 128))

    def nrm(shape, scale=0.02):
        return scale * jax.random.normal(next(keys), shape, dtype=jnp.float32)

    def ones(n):
        return jnp.ones((n,), jnp.float32)

    def zeros(n):
        return jnp.zeros((n,), jnp.float32)

    stages = []
    in_ch = IN_CHANS
    for i in range(NUM_STAGES):
        D, patch = EMBED_DIMS[i], PATCH_SIZES[i]
        sr, heads = SR_RATIOS[i], NUM_HEADS[i]
        hid = D * MLP_RATIOS[i]
        dh = D // heads
        scale = dh ** -0.5
        qkv_w, qkv_b = nrm((D, 3 * D)), nrm((3 * D,))
        # fold the attention scale into the q columns (free at runtime)
        qmask = jnp.concatenate([jnp.full((D,), scale, jnp.float32),
                                 jnp.ones((2 * D,), jnp.float32)])
        st = dict(
            # PatchEmbed (conv weight flattened as (ti*p+tj)*Cin + c rows)
            pe_w=nrm((patch * patch * in_ch, D)), pe_b=nrm((D,)),
            pe_ln_w=ones(D), pe_ln_b=zeros(D),
            # Block 0: LocallyGroupedAttn
            a_n1_w=ones(D), a_n1_b=zeros(D),
            a_qkv_w=qkv_w * qmask[None, :], a_qkv_b=qkv_b * qmask,
            a_proj_w=nrm((D, D)), a_proj_b=nrm((D,)),
            a_n2_w=ones(D), a_n2_b=zeros(D),
            a_fc1_w=nrm((D, hid)), a_fc1_b=nrm((hid,)),
            a_fc2_w=nrm((hid, D)), a_fc2_b=nrm((D,)),
            # PosConv (depthwise 3x3 weight stored as (9, D): row (di+1)*3+(dj+1))
            pos_w=nrm((9, D)), pos_b=nrm((D,)),
            # Block 1: GlobalSubSampleAttn (sr conv weight stored flat (sr*sr*D, D))
            g_n1_w=ones(D), g_n1_b=zeros(D),
            g_q_w=nrm((D, D)) * scale, g_q_b=nrm((D,)) * scale,
            g_sr_w=nrm((sr * sr * D, D)), g_sr_b=nrm((D,)),
            g_sr_ln_w=ones(D), g_sr_ln_b=zeros(D),
            g_kv_w=nrm((D, 2 * D)), g_kv_b=nrm((2 * D,)),
            g_proj_w=nrm((D, D)), g_proj_b=nrm((D,)),
            g_n2_w=ones(D), g_n2_b=zeros(D),
            g_fc1_w=nrm((D, hid)), g_fc1_b=nrm((hid,)),
            g_fc2_w=nrm((hid, D)), g_fc2_b=nrm((D,)),
        )
        stages.append(st)
        in_ch = D
    return {"stages": stages}


# ==================================== main ====================================
if __name__ == "__main__":
    B, T, C, H, W = 1, 2, 3, 32, 32
    x = jax.random.normal(jax.random.PRNGKey(0), (B, T, C, H, W), dtype=jnp.float32)
    params = init_params(jax.random.PRNGKey(1))

    fwd = jax.jit(twins_forward)
    out = fwd(x, params)
    jax.block_until_ready(out)

    expected = (B, T, EMBED_DIMS[-1],
                H // (PATCH_SIZES[0] * PATCH_SIZES[1]),
                W // (PATCH_SIZES[0] * PATCH_SIZES[1]))
    assert out.shape == expected, (out.shape, expected)
    assert out.dtype == jnp.float32
    print("KERNEL_OK")
</pallas_src>

<mosaic_0001>
module attributes {stable_mosaic.version = 11 : i64} {
  func.func @_stage_kernel(%arg0: i32, %arg1: memref<1x16x128xbf16, #tpu.memory_space<vmem>>, %arg2: memref<128x64xf32, #tpu.memory_space<vmem>>, %arg3: memref<1x64xf32, #tpu.memory_space<vmem>>, %arg4: memref<1x64xf32, #tpu.memory_space<vmem>>, %arg5: memref<1x64xf32, #tpu.memory_space<vmem>>, %arg6: memref<1x64xf32, #tpu.memory_space<vmem>>, %arg7: memref<1x64xf32, #tpu.memory_space<vmem>>, %arg8: memref<64x192xf32, #tpu.memory_space<vmem>>, %arg9: memref<1x192xf32, #tpu.memory_space<vmem>>, %arg10: memref<64x64xf32, #tpu.memory_space<vmem>>, %arg11: memref<1x64xf32, #tpu.memory_space<vmem>>, %arg12: memref<1x64xf32, #tpu.memory_space<vmem>>, %arg13: memref<1x64xf32, #tpu.memory_space<vmem>>, %arg14: memref<64x256xf32, #tpu.memory_space<vmem>>, %arg15: memref<1x256xf32, #tpu.memory_space<vmem>>, %arg16: memref<256x64xf32, #tpu.memory_space<vmem>>, %arg17: memref<1x64xf32, #tpu.memory_space<vmem>>, %arg18: memref<16x16xf32, #tpu.memory_space<vmem>>, %arg19: memref<144x16xbf16, #tpu.memory_space<vmem>>, %arg20: memref<9x64xf32, #tpu.memory_space<vmem>>, %arg21: memref<1x64xf32, #tpu.memory_space<vmem>>, %arg22: memref<1x64xf32, #tpu.memory_space<vmem>>, %arg23: memref<1x64xf32, #tpu.memory_space<vmem>>, %arg24: memref<64x64xf32, #tpu.memory_space<vmem>>, %arg25: memref<1x64xf32, #tpu.memory_space<vmem>>, %arg26: memref<16x16xbf16, #tpu.memory_space<vmem>>, %arg27: memref<256x64xf32, #tpu.memory_space<vmem>>, %arg28: memref<1x64xf32, #tpu.memory_space<vmem>>, %arg29: memref<1x64xf32, #tpu.memory_space<vmem>>, %arg30: memref<1x64xf32, #tpu.memory_space<vmem>>, %arg31: memref<64x128xf32, #tpu.memory_space<vmem>>, %arg32: memref<1x128xf32, #tpu.memory_space<vmem>>, %arg33: memref<64x64xf32, #tpu.memory_space<vmem>>, %arg34: memref<1x64xf32, #tpu.memory_space<vmem>>, %arg35: memref<1x64xf32, #tpu.memory_space<vmem>>, %arg36: memref<1x64xf32, #tpu.memory_space<vmem>>, %arg37: memref<64x256xf32, #tpu.memory_space<vmem>>, %arg38: memref<1x256xf32, #tpu.memory_space<vmem>>, %arg39: memref<256x64xf32, #tpu.memory_space<vmem>>, %arg40: memref<1x64xf32, #tpu.memory_space<vmem>>, %arg41: memref<8x128xbf16, #tpu.memory_space<vmem>>, %arg42: memref<1x16x64xf32, #tpu.memory_space<vmem>>) attributes {dimension_semantics = [#tpu.dimension_semantics<parallel>], iteration_bounds = array<i64: 2>, scalar_prefetch = 0 : i64, scratch_operands = 0 : i64, tpu.core_type = #tpu.core_type<tc>, window_params = [{transform_indices = @transform_0, window_bounds = array<i64: 1, 16, 128>}, {pipeline_mode = #tpu.pipeline_mode<synchronous>, transform_indices = @transform_1, window_bounds = array<i64: 128, 64>}, {pipeline_mode = #tpu.pipeline_mode<synchronous>, transform_indices = @transform_2, window_bounds = array<i64: 1, 64>}, {pipeline_mode = #tpu.pipeline_mode<synchronous>, transform_indices = @transform_3, window_bounds = array<i64: 1, 64>}, {pipeline_mode = #tpu.pipeline_mode<synchronous>, transform_indices = @transform_4, window_bounds = array<i64: 1, 64>}, {pipeline_mode = #tpu.pipeline_mode<synchronous>, transform_indices = @transform_5, window_bounds = array<i64: 1, 64>}, {pipeline_mode = #tpu.pipeline_mode<synchronous>, transform_indices = @transform_6, window_bounds = array<i64: 1, 64>}, {pipeline_mode = #tpu.pipeline_mode<synchronous>, transform_indices = @transform_7, window_bounds = array<i64: 64, 192>}, {pipeline_mode = #tpu.pipeline_mode<synchronous>, transform_indices = @transform_8, window_bounds = array<i64: 1, 192>}, {pipeline_mode = #tpu.pipeline_mode<synchronous>, transform_indices = @transform_9, window_bounds = array<i64: 64, 64>}, {pipeline_mode = #tpu.pipeline_mode<synchronous>, transform_indices = @transform_10, window_bounds = array<i64: 1, 64>}, {pipeline_mode = #tpu.pipeline_mode<synchronous>, transform_indices = @transform_11, window_bounds = array<i64: 1, 64>}, {pipeline_mode = #tpu.pipeline_mode<synchronous>, transform_indices = @transform_12, window_bounds = array<i64: 1, 64>}, {pipeline_mode = #tpu.pipeline_mode<synchronous>, transform_indices = @transform_13, window_bounds = array<i64: 64, 256>}, {pipeline_mode = #tpu.pipeline_mode<synchronous>, transform_indices = @transform_14, window_bounds = array<i64: 1, 256>}, {pipeline_mode = #tpu.pipeline_mode<synchronous>, transform_indices = @transform_15, window_bounds = array<i64: 256, 64>}, {pipeline_mode = #tpu.pipeline_mode<synchronous>, transform_indices = @transform_16, window_bounds = array<i64: 1, 64>}, {pipeline_mode = #tpu.pipeline_mode<synchronous>, transform_indices = @transform_17, window_bounds = array<i64: 16, 16>}, {pipeline_mode = #tpu.pipeline_mode<synchronous>, transform_indices = @transform_18, window_bounds = array<i64: 144, 16>}, {pipeline_mode = #tpu.pipeline_mode<synchronous>, transform_indices = @transform_19, window_bounds = array<i64: 9, 64>}, {pipeline_mode = #tpu.pipeline_mode<synchronous>, transform_indices = @transform_20, window_bounds = array<i64: 1, 64>}, {pipeline_mode = #tpu.pipeline_mode<synchronous>, transform_indices = @transform_21, window_bounds = array<i64: 1, 64>}, {pipeline_mode = #tpu.pipeline_mode<synchronous>, transform_indices = @transform_22, window_bounds = array<i64: 1, 64>}, {pipeline_mode = #tpu.pipeline_mode<synchronous>, transform_indices = @transform_23, window_bounds = array<i64: 64, 64>}, {pipeline_mode = #tpu.pipeline_mode<synchronous>, transform_indices = @transform_24, window_bounds = array<i64: 1, 64>}, {pipeline_mode = #tpu.pipeline_mode<synchronous>, transform_indices = @transform_25, window_bounds = array<i64: 16, 16>}, {pipeline_mode = #tpu.pipeline_mode<synchronous>, transform_indices = @transform_26, window_bounds = array<i64: 256, 64>}, {pipeline_mode = #tpu.pipeline_mode<synchronous>, transform_indices = @transform_27, window_bounds = array<i64: 1, 64>}, {pipeline_mode = #tpu.pipeline_mode<synchronous>, transform_indices = @transform_28, window_bounds = array<i64: 1, 64>}, {pipeline_mode = #tpu.pipeline_mode<synchronous>, transform_indices = @transform_29, window_bounds = array<i64: 1, 64>}, {pipeline_mode = #tpu.pipeline_mode<synchronous>, transform_indices = @transform_30, window_bounds = array<i64: 64, 128>}, {pipeline_mode = #tpu.pipeline_mode<synchronous>, transform_indices = @transform_31, window_bounds = array<i64: 1, 128>}, {pipeline_mode = #tpu.pipeline_mode<synchronous>, transform_indices = @transform_32, window_bounds = array<i64: 64, 64>}, {pipeline_mode = #tpu.pipeline_mode<synchronous>, transform_indices = @transform_33, window_bounds = array<i64: 1, 64>}, {pipeline_mode = #tpu.pipeline_mode<synchronous>, transform_indices = @transform_34, window_bounds = array<i64: 1, 64>}, {pipeline_mode = #tpu.pipeline_mode<synchronous>, transform_indices = @transform_35, window_bounds = array<i64: 1, 64>}, {pipeline_mode = #tpu.pipeline_mode<synchronous>, transform_indices = @transform_36, window_bounds = array<i64: 64, 256>}, {pipeline_mode = #tpu.pipeline_mode<synchronous>, transform_indices = @transform_37, window_bounds = array<i64: 1, 256>}, {pipeline_mode = #tpu.pipeline_mode<synchronous>, transform_indices = @transform_38, window_bounds = array<i64: 256, 64>}, {pipeline_mode = #tpu.pipeline_mode<synchronous>, transform_indices = @transform_39, window_bounds = array<i64: 1, 64>}, {pipeline_mode = #tpu.pipeline_mode<synchronous>, transform_indices = @transform_40, window_bounds = array<i64: 8, 128>}, {transform_indices = @transform_41, window_bounds = array<i64: 1, 16, 64>}]} {
    %c0 = arith.constant 0 : index
    %c0_0 = arith.constant 0 : index
    %c0_1 = arith.constant 0 : index
    %0 = vector.load %arg1[%c0, %c0_0, %c0_1] : memref<1x16x128xbf16, #tpu.memory_space<vmem>>, vector<1x16x128xbf16>
    %1 = vector.shape_cast %0 : vector<1x16x128xbf16> to vector<16x128xbf16>
    %c0_2 = arith.constant 0 : index
    %c0_3 = arith.constant 0 : index
    %2 = vector.load %arg2[%c0_2, %c0_3] : memref<128x64xf32, #tpu.memory_space<vmem>>, vector<128x64xf32>
    %3 = arith.truncf %2 : vector<128x64xf32> to vector<128x64xbf16>
    %cst = arith.constant dense<0.000000e+00> : vector<16x64xf32>
    %4 = tpu.matmul %1, %3, %cst {dimension_numbers = #tpu.dot_dimension_numbers<[1], [0], [0], [1], [0, 0, 1, 1], [], []>} : vector<16x128xbf16>, vector<128x64xbf16>, vector<16x64xf32> -> vector<16x64xf32>
    %c0_4 = arith.constant 0 : index
    %c0_5 = arith.constant 0 : index
    %5 = vector.load %arg3[%c0_4, %c0_5] : memref<1x64xf32, #tpu.memory_space<vmem>>, vector<1x64xf32>
    %6 = vector.broadcast %5 : vector<1x64xf32> to vector<16x64xf32>
    %7 = arith.addf %4, %6 : vector<16x64xf32>
    %c0_6 = arith.constant 0 : index
    %c0_7 = arith.constant 0 : index
    %8 = vector.load %arg4[%c0_6, %c0_7] : memref<1x64xf32, #tpu.memory_space<vmem>>, vector<1x64xf32>
    %c0_8 = arith.constant 0 : index
    %c0_9 = arith.constant 0 : index
    %9 = vector.load %arg5[%c0_8, %c0_9] : memref<1x64xf32, #tpu.memory_space<vmem>>, vector<1x64xf32>
    %cst_10 = arith.constant dense<0.000000e+00> : vector<16xf32>
    %10 = vector.multi_reduction <add>, %7, %cst_10 [1] : vector<16x64xf32> to vector<16xf32>
    %11 = vector.shape_cast %10 : vector<16xf32> to vector<16x1xf32>
    %cst_11 = arith.constant 6.400000e+01 : f32
    %12 = vector.broadcast %cst_11 : f32 to vector<16x1xf32>
    %13 = arith.divf %11, %12 : vector<16x1xf32>
    %14 = vector.broadcast %13 : vector<16x1xf32> to vector<16x64xf32>
    %15 = arith.subf %7, %14 : vector<16x64xf32>
    %16 = arith.mulf %15, %15 : vector<16x64xf32>
    %cst_12 = arith.constant dense<0.000000e+00> : vector<16xf32>
    %17 = vector.multi_reduction <add>, %16, %cst_12 [1] : vector<16x64xf32> to vector<16xf32>
    %18 = vector.shape_cast %17 : vector<16xf32> to vector<16x1xf32>
    %cst_13 = arith.constant 6.400000e+01 : f32
    %19 = vector.broadcast %cst_13 : f32 to vector<16x1xf32>
    %20 = arith.divf %18, %19 : vector<16x1xf32>
    %cst_14 = arith.constant 9.99999974E-6 : f32
    %21 = vector.broadcast %cst_14 : f32 to vector<16x1xf32>
    %22 = arith.addf %20, %21 : vector<16x1xf32>
    %23 = math.rsqrt %22 : vector<16x1xf32>
    %24 = vector.broadcast %23 : vector<16x1xf32> to vector<16x64xf32>
    %25 = arith.mulf %15, %24 : vector<16x64xf32>
    %26 = vector.broadcast %8 : vector<1x64xf32> to vector<16x64xf32>
    %27 = arith.mulf %25, %26 : vector<16x64xf32>
    %28 = vector.broadcast %9 : vector<1x64xf32> to vector<16x64xf32>
    %29 = arith.addf %27, %28 : vector<16x64xf32>
    %c0_15 = arith.constant 0 : index
    %c0_16 = arith.constant 0 : index
    %30 = vector.load %arg6[%c0_15, %c0_16] : memref<1x64xf32, #tpu.memory_space<vmem>>, vector<1x64xf32>
    %c0_17 = arith.constant 0 : index
    %c0_18 = arith.constant 0 : index
    %31 = vector.load %arg7[%c0_17, %c0_18] : memref<1x64xf32, #tpu.memory_space<vmem>>, vector<1x64xf32>
    %cst_19 = arith.constant dense<0.000000e+00> : vector<16xf32>
    %32 = vector.multi_reduction <add>, %29, %cst_19 [1] : vector<16x64xf32> to vector<16xf32>
    %33 = vector.shape_cast %32 : vector<16xf32> to vector<16x1xf32>
    %cst_20 = arith.constant 6.400000e+01 : f32
    %34 = vector.broadcast %cst_20 : f32 to vector<16x1xf32>
    %35 = arith.divf %33, %34 : vector<16x1xf32>
    %36 = vector.broadcast %35 : vector<16x1xf32> to vector<16x64xf32>
    %37 = arith.subf %29, %36 : vector<16x64xf32>
    %38 = arith.mulf %37, %37 : vector<16x64xf32>
    %cst_21 = arith.constant dense<0.000000e+00> : vector<16xf32>
    %39 = vector.multi_reduction <add>, %38, %cst_21 [1] : vector<16x64xf32> to vector<16xf32>
    %40 = vector.shape_cast %39 : vector<16xf32> to vector<16x1xf32>
    %cst_22 = arith.constant 6.400000e+01 : f32
    %41 = vector.broadcast %cst_22 : f32 to vector<16x1xf32>
    %42 = arith.divf %40, %41 : vector<16x1xf32>
    %cst_23 = arith.constant 9.99999997E-7 : f32
    %43 = vector.broadcast %cst_23 : f32 to vector<16x1xf32>
    %44 = arith.addf %42, %43 : vector<16x1xf32>
    %45 = math.rsqrt %44 : vector<16x1xf32>
    %46 = vector.broadcast %45 : vector<16x1xf32> to vector<16x64xf32>
    %47 = arith.mulf %37, %46 : vector<16x64xf32>
    %48 = vector.broadcast %30 : vector<1x64xf32> to vector<16x64xf32>
    %49 = arith.mulf %47, %48 : vector<16x64xf32>
    %50 = vector.broadcast %31 : vector<1x64xf32> to vector<16x64xf32>
    %51 = arith.addf %49, %50 : vector<16x64xf32>
    %c0_24 = arith.constant 0 : index
    %c0_25 = arith.constant 0 : index
    %52 = vector.load %arg8[%c0_24, %c0_25] : memref<64x192xf32, #tpu.memory_space<vmem>>, vector<64x192xf32>
    %53 = arith.truncf %51 : vector<16x64xf32> to vector<16x64xbf16>
    %54 = arith.truncf %52 : vector<64x192xf32> to vector<64x192xbf16>
    %cst_26 = arith.constant dense<0.000000e+00> : vector<16x192xf32>
    %55 = tpu.matmul %53, %54, %cst_26 {dimension_numbers = #tpu.dot_dimension_numbers<[1], [0], [0], [1], [0, 0, 1, 1], [], []>} : vector<16x64xbf16>, vector<64x192xbf16>, vector<16x192xf32> -> vector<16x192xf32>
    %c0_27 = arith.constant 0 : index
    %c0_28 = arith.constant 0 : index
    %56 = vector.load %arg9[%c0_27, %c0_28] : memref<1x192xf32, #tpu.memory_space<vmem>>, vector<1x192xf32>
    %57 = vector.broadcast %56 : vector<1x192xf32> to vector<16x192xf32>
    %58 = arith.addf %55, %57 : vector<16x192xf32>
    %59 = vector.extract_strided_slice %58 {offsets = [0, 0], sizes = [16, 16], strides = [1, 1]} : vector<16x192xf32> to vector<16x16xf32>
    %60 = vector.extract_strided_slice %58 {offsets = [0, 16], sizes = [16, 16], strides = [1, 1]} : vector<16x192xf32> to vector<16x16xf32>
    %61 = vector.extract_strided_slice %58 {offsets = [0, 32], sizes = [16, 16], strides = [1, 1]} : vector<16x192xf32> to vector<16x16xf32>
    %62 = vector.extract_strided_slice %58 {offsets = [0, 48], sizes = [16, 16], strides = [1, 1]} : vector<16x192xf32> to vector<16x16xf32>
    %63 = vector.shape_cast %59 : vector<16x16xf32> to vector<1x16x16xf32>
    %64 = vector.shape_cast %60 : vector<16x16xf32> to vector<1x16x16xf32>
    %65 = vector.shape_cast %61 : vector<16x16xf32> to vector<1x16x16xf32>
    %66 = vector.shape_cast %62 : vector<16x16xf32> to vector<1x16x16xf32>
    %67 = tpu.concatenate %63, %64, %65, %66 in 0 : vector<1x16x16xf32>, vector<1x16x16xf32>, vector<1x16x16xf32>, vector<1x16x16xf32> -> vector<4x16x16xf32>
    %68 = vector.extract_strided_slice %58 {offsets = [0, 64], sizes = [16, 16], strides = [1, 1]} : vector<16x192xf32> to vector<16x16xf32>
    %69 = vector.extract_strided_slice %58 {offsets = [0, 80], sizes = [16, 16], strides = [1, 1]} : vector<16x192xf32> to vector<16x16xf32>
    %70 = vector.extract_strided_slice %58 {offsets = [0, 96], sizes = [16, 16], strides = [1, 1]} : vector<16x192xf32> to vector<16x16xf32>
    %71 = vector.extract_strided_slice %58 {offsets = [0, 112], sizes = [16, 16], strides = [1, 1]} : vector<16x192xf32> to vector<16x16xf32>
    %72 = vector.shape_cast %68 : vector<16x16xf32> to vector<1x16x16xf32>
    %73 = vector.shape_cast %69 : vector<16x16xf32> to vector<1x16x16xf32>
    %74 = vector.shape_cast %70 : vector<16x16xf32> to vector<1x16x16xf32>
    %75 = vector.shape_cast %71 : vector<16x16xf32> to vector<1x16x16xf32>
    %76 = tpu.concatenate %72, %73, %74, %75 in 0 : vector<1x16x16xf32>, vector<1x16x16xf32>, vector<1x16x16xf32>, vector<1x16x16xf32> -> vector<4x16x16xf32>
    %77 = vector.extract_strided_slice %58 {offsets = [0, 128], sizes = [16, 16], strides = [1, 1]} : vector<16x192xf32> to vector<16x16xf32>
    %78 = vector.extract_strided_slice %58 {offsets = [0, 144], sizes = [16, 16], strides = [1, 1]} : vector<16x192xf32> to vector<16x16xf32>
    %79 = vector.extract_strided_slice %58 {offsets = [0, 160], sizes = [16, 16], strides = [1, 1]} : vector<16x192xf32> to vector<16x16xf32>
    %80 = vector.extract_strided_slice %58 {offsets = [0, 176], sizes = [16, 16], strides = [1, 1]} : vector<16x192xf32> to vector<16x16xf32>
    %81 = vector.shape_cast %77 : vector<16x16xf32> to vector<1x16x16xf32>
    %82 = vector.shape_cast %78 : vector<16x16xf32> to vector<1x16x16xf32>
    %83 = vector.shape_cast %79 : vector<16x16xf32> to vector<1x16x16xf32>
    %84 = vector.shape_cast %80 : vector<16x16xf32> to vector<1x16x16xf32>
    %85 = tpu.concatenate %81, %82, %83, %84 in 0 : vector<1x16x16xf32>, vector<1x16x16xf32>, vector<1x16x16xf32>, vector<1x16x16xf32> -> vector<4x16x16xf32>
    %86 = arith.truncf %67 : vector<4x16x16xf32> to vector<4x16x16xbf16>
    %87 = arith.truncf %76 : vector<4x16x16xf32> to vector<4x16x16xbf16>
    %cst_29 = arith.constant dense<0.000000e+00> : vector<4x16x16xf32>
    %88 = tpu.matmul %86, %87, %cst_29 {dimension_numbers = #tpu.dot_dimension_numbers<[2], [2], [1], [1], [0, 0, 0, 1, 1, 1], [0], [0]>} : vector<4x16x16xbf16>, vector<4x16x16xbf16>, vector<4x16x16xf32> -> vector<4x16x16xf32>
    %c0_30 = arith.constant 0 : index
    %c0_31 = arith.constant 0 : index
    %89 = vector.load %arg18[%c0_30, %c0_31] : memref<16x16xf32, #tpu.memory_space<vmem>>, vector<16x16xf32>
    %90 = vector.shape_cast %89 : vector<16x16xf32> to vector<1x16x16xf32>
    %91 = vector.broadcast %90 : vector<1x16x16xf32> to vector<4x16x16xf32>
    %92 = arith.addf %88, %91 : vector<4x16x16xf32>
    %cst_32 = arith.constant dense<0xFF800000> : vector<4x16xf32>
    %93 = vector.multi_reduction <maximumf>, %92, %cst_32 [2] : vector<4x16x16xf32> to vector<4x16xf32>
    %94 = vector.shape_cast %93 : vector<4x16xf32> to vector<4x16x1xf32>
    %95 = vector.broadcast %94 : vector<4x16x1xf32> to vector<4x16x16xf32>
    %96 = arith.subf %92, %95 : vector<4x16x16xf32>
    %97 = math.exp %96 : vector<4x16x16xf32>
    %cst_33 = arith.constant dense<0.000000e+00> : vector<4x16xf32>
    %98 = vector.multi_reduction <add>, %97, %cst_33 [2] : vector<4x16x16xf32> to vector<4x16xf32>
    %99 = vector.shape_cast %98 : vector<4x16xf32> to vector<4x16x1xf32>
    %100 = tpu.reciprocal %99 {approx = true} : vector<4x16x1xf32> -> vector<4x16x1xf32>
    %101 = vector.broadcast %100 : vector<4x16x1xf32> to vector<4x16x16xf32>
    %102 = arith.mulf %97, %101 : vector<4x16x16xf32>
    %103 = arith.truncf %102 : vector<4x16x16xf32> to vector<4x16x16xbf16>
    %104 = arith.truncf %85 : vector<4x16x16xf32> to vector<4x16x16xbf16>
    %cst_34 = arith.constant dense<0.000000e+00> : vector<4x16x16xf32>
    %105 = tpu.matmul %103, %104, %cst_34 {dimension_numbers = #tpu.dot_dimension_numbers<[2], [1], [1], [2], [0, 0, 0, 1, 1, 2], [0], [0]>} : vector<4x16x16xbf16>, vector<4x16x16xbf16>, vector<4x16x16xf32> -> vector<4x16x16xf32>
    %106 = vector.extract_strided_slice %105 {offsets = [0, 0, 0], sizes = [1, 16, 16], strides = [1, 1, 1]} : vector<4x16x16xf32> to vector<1x16x16xf32>
    %107 = vector.shape_cast %106 : vector<1x16x16xf32> to vector<16x16xf32>
    %108 = vector.extract_strided_slice %105 {offsets = [1, 0, 0], sizes = [1, 16, 16], strides = [1, 1, 1]} : vector<4x16x16xf32> to vector<1x16x16xf32>
    %109 = vector.shape_cast %108 : vector<1x16x16xf32> to vector<16x16xf32>
    %110 = vector.extract_strided_slice %105 {offsets = [2, 0, 0], sizes = [1, 16, 16], strides = [1, 1, 1]} : vector<4x16x16xf32> to vector<1x16x16xf32>
    %111 = vector.shape_cast %110 : vector<1x16x16xf32> to vector<16x16xf32>
    %112 = vector.extract_strided_slice %105 {offsets = [3, 0, 0], sizes = [1, 16, 16], strides = [1, 1, 1]} : vector<4x16x16xf32> to vector<1x16x16xf32>
    %113 = vector.shape_cast %112 : vector<1x16x16xf32> to vector<16x16xf32>
    %114 = tpu.concatenate %107, %109, %111, %113 in 1 : vector<16x16xf32>, vector<16x16xf32>, vector<16x16xf32>, vector<16x16xf32> -> vector<16x64xf32>
    %c0_35 = arith.constant 0 : index
    %c0_36 = arith.constant 0 : index
    %115 = vector.load %arg10[%c0_35, %c0_36] : memref<64x64xf32, #tpu.memory_space<vmem>>, vector<64x64xf32>
    %116 = arith.truncf %114 : vector<16x64xf32> to vector<16x64xbf16>
    %117 = arith.truncf %115 : vector<64x64xf32> to vector<64x64xbf16>
    %cst_37 = arith.constant dense<0.000000e+00> : vector<16x64xf32>
    %118 = tpu.matmul %116, %117, %cst_37 {dimension_numbers = #tpu.dot_dimension_numbers<[1], [0], [0], [1], [0, 0, 1, 1], [], []>} : vector<16x64xbf16>, vector<64x64xbf16>, vector<16x64xf32> -> vector<16x64xf32>
    %119 = arith.addf %29, %118 : vector<16x64xf32>
    %c0_38 = arith.constant 0 : index
    %c0_39 = arith.constant 0 : index
    %120 = vector.load %arg11[%c0_38, %c0_39] : memref<1x64xf32, #tpu.memory_space<vmem>>, vector<1x64xf32>
    %121 = vector.broadcast %120 : vector<1x64xf32> to vector<16x64xf32>
    %122 = arith.addf %119, %121 : vector<16x64xf32>
    %c0_40 = arith.constant 0 : index
    %c0_41 = arith.constant 0 : index
    %123 = vector.load %arg12[%c0_40, %c0_41] : memref<1x64xf32, #tpu.memory_space<vmem>>, vector<1x64xf32>
    %c0_42 = arith.constant 0 : index
    %c0_43 = arith.constant 0 : index
    %124 = vector.load %arg13[%c0_42, %c0_43] : memref<1x64xf32, #tpu.memory_space<vmem>>, vector<1x64xf32>
    %cst_44 = arith.constant dense<0.000000e+00> : vector<16xf32>
    %125 = vector.multi_reduction <add>, %122, %cst_44 [1] : vector<16x64xf32> to vector<16xf32>
    %126 = vector.shape_cast %125 : vector<16xf32> to vector<16x1xf32>
    %cst_45 = arith.constant 6.400000e+01 : f32
    %127 = vector.broadcast %cst_45 : f32 to vector<16x1xf32>
    %128 = arith.divf %126, %127 : vector<16x1xf32>
    %129 = vector.broadcast %128 : vector<16x1xf32> to vector<16x64xf32>
    %130 = arith.subf %122, %129 : vector<16x64xf32>
    %131 = arith.mulf %130, %130 : vector<16x64xf32>
    %cst_46 = arith.constant dense<0.000000e+00> : vector<16xf32>
    %132 = vector.multi_reduction <add>, %131, %cst_46 [1] : vector<16x64xf32> to vector<16xf32>
    %133 = vector.shape_cast %132 : vector<16xf32> to vector<16x1xf32>
    %cst_47 = arith.constant 6.400000e+01 : f32
    %134 = vector.broadcast %cst_47 : f32 to vector<16x1xf32>
    %135 = arith.divf %133, %134 : vector<16x1xf32>
    %cst_48 = arith.constant 9.99999997E-7 : f32
    %136 = vector.broadcast %cst_48 : f32 to vector<16x1xf32>
    %137 = arith.addf %135, %136 : vector<16x1xf32>
    %138 = math.rsqrt %137 : vector<16x1xf32>
    %139 = vector.broadcast %138 : vector<16x1xf32> to vector<16x64xf32>
    %140 = arith.mulf %130, %139 : vector<16x64xf32>
    %141 = vector.broadcast %123 : vector<1x64xf32> to vector<16x64xf32>
    %142 = arith.mulf %140, %141 : vector<16x64xf32>
    %143 = vector.broadcast %124 : vector<1x64xf32> to vector<16x64xf32>
    %144 = arith.addf %142, %143 : vector<16x64xf32>
    %c0_49 = arith.constant 0 : index
    %c0_50 = arith.constant 0 : index
    %145 = vector.load %arg14[%c0_49, %c0_50] : memref<64x256xf32, #tpu.memory_space<vmem>>, vector<64x256xf32>
    %146 = arith.truncf %144 : vector<16x64xf32> to vector<16x64xbf16>
    %147 = arith.truncf %145 : vector<64x256xf32> to vector<64x256xbf16>
    %cst_51 = arith.constant dense<0.000000e+00> : vector<16x256xf32>
    %148 = tpu.matmul %146, %147, %cst_51 {dimension_numbers = #tpu.dot_dimension_numbers<[1], [0], [0], [1], [0, 0, 1, 1], [], []>} : vector<16x64xbf16>, vector<64x256xbf16>, vector<16x256xf32> -> vector<16x256xf32>
    %c0_52 = arith.constant 0 : index
    %c0_53 = arith.constant 0 : index
    %149 = vector.load %arg15[%c0_52, %c0_53] : memref<1x256xf32, #tpu.memory_space<vmem>>, vector<1x256xf32>
    %150 = vector.broadcast %149 : vector<1x256xf32> to vector<16x256xf32>
    %151 = arith.addf %148, %150 : vector<16x256xf32>
    %cst_54 = arith.constant 0.707106769 : f32
    %152 = vector.broadcast %cst_54 : f32 to vector<16x256xf32>
    %153 = arith.mulf %151, %152 : vector<16x256xf32>
    %154 = math.absf %153 : vector<16x256xf32>
    %cst_55 = arith.constant 0.327591091 : f32
    %155 = vector.broadcast %cst_55 : f32 to vector<16x256xf32>
    %156 = arith.mulf %155, %154 : vector<16x256xf32>
    %cst_56 = arith.constant 1.000000e+00 : f32
    %157 = vector.broadcast %cst_56 : f32 to vector<16x256xf32>
    %158 = arith.addf %157, %156 : vector<16x256xf32>
    %cst_57 = arith.constant 1.000000e+00 : f32
    %159 = vector.broadcast %cst_57 : f32 to vector<16x256xf32>
    %160 = arith.divf %159, %158 : vector<16x256xf32>
    %cst_58 = arith.constant 1.06140542 : f32
    %161 = vector.broadcast %cst_58 : f32 to vector<16x256xf32>
    %162 = arith.mulf %160, %161 : vector<16x256xf32>
    %cst_59 = arith.constant -1.45315206 : f32
    %163 = vector.broadcast %cst_59 : f32 to vector<16x256xf32>
    %164 = arith.addf %163, %162 : vector<16x256xf32>
    %165 = arith.mulf %160, %164 : vector<16x256xf32>
    %cst_60 = arith.constant 1.42141378 : f32
    %166 = vector.broadcast %cst_60 : f32 to vector<16x256xf32>
    %167 = arith.addf %166, %165 : vector<16x256xf32>
    %168 = arith.mulf %160, %167 : vector<16x256xf32>
    %cst_61 = arith.constant -0.284496725 : f32
    %169 = vector.broadcast %cst_61 : f32 to vector<16x256xf32>
    %170 = arith.addf %169, %168 : vector<16x256xf32>
    %171 = arith.mulf %160, %170 : vector<16x256xf32>
    %cst_62 = arith.constant 0.254829586 : f32
    %172 = vector.broadcast %cst_62 : f32 to vector<16x256xf32>
    %173 = arith.addf %172, %171 : vector<16x256xf32>
    %174 = arith.mulf %160, %173 : vector<16x256xf32>
    %cst_63 = arith.constant 0.000000e+00 : f32
    %175 = vector.broadcast %cst_63 : f32 to vector<16x256xf32>
    %176 = arith.subf %175, %154 : vector<16x256xf32>
    %177 = arith.mulf %176, %154 : vector<16x256xf32>
    %178 = math.exp %177 : vector<16x256xf32>
    %179 = arith.mulf %174, %178 : vector<16x256xf32>
    %cst_64 = arith.constant 1.000000e+00 : f32
    %180 = vector.broadcast %cst_64 : f32 to vector<16x256xf32>
    %181 = arith.subf %180, %179 : vector<16x256xf32>
    %cst_65 = arith.constant 0.000000e+00 : f32
    %182 = vector.broadcast %cst_65 : f32 to vector<16x256xf32>
    %183 = arith.cmpf oge, %153, %182 : vector<16x256xf32>
    %cst_66 = arith.constant 0.000000e+00 : f32
    %184 = vector.broadcast %cst_66 : f32 to vector<16x256xf32>
    %185 = arith.subf %184, %181 : vector<16x256xf32>
    %186 = arith.select %183, %181, %185 : vector<16x256xi1>, vector<16x256xf32>
    %cst_67 = arith.constant 5.000000e-01 : f32
    %187 = vector.broadcast %cst_67 : f32 to vector<16x256xf32>
    %188 = arith.mulf %187, %151 : vector<16x256xf32>
    %cst_68 = arith.constant 1.000000e+00 : f32
    %189 = vector.broadcast %cst_68 : f32 to vector<16x256xf32>
    %190 = arith.addf %189, %186 : vector<16x256xf32>
    %191 = arith.mulf %188, %190 : vector<16x256xf32>
    %c0_69 = arith.constant 0 : index
    %c0_70 = arith.constant 0 : index
    %192 = vector.load %arg16[%c0_69, %c0_70] : memref<256x64xf32, #tpu.memory_space<vmem>>, vector<256x64xf32>
    %193 = arith.truncf %191 : vector<16x256xf32> to vector<16x256xbf16>
    %194 = arith.truncf %192 : vector<256x64xf32> to vector<256x64xbf16>
    %cst_71 = arith.constant dense<0.000000e+00> : vector<16x64xf32>
    %195 = tpu.matmul %193, %194, %cst_71 {dimension_numbers = #tpu.dot_dimension_numbers<[1], [0], [0], [1], [0, 0, 1, 1], [], []>} : vector<16x256xbf16>, vector<256x64xbf16>, vector<16x64xf32> -> vector<16x64xf32>
    %196 = arith.addf %122, %195 : vector<16x64xf32>
    %c0_72 = arith.constant 0 : index
    %c0_73 = arith.constant 0 : index
    %197 = vector.load %arg17[%c0_72, %c0_73] : memref<1x64xf32, #tpu.memory_space<vmem>>, vector<1x64xf32>
    %198 = vector.broadcast %197 : vector<1x64xf32> to vector<16x64xf32>
    %199 = arith.addf %196, %198 : vector<16x64xf32>
    %c0_74 = arith.constant 0 : index
    %c0_75 = arith.constant 0 : index
    %200 = vector.load %arg19[%c0_74, %c0_75] : memref<144x16xbf16, #tpu.memory_space<vmem>>, vector<144x16xbf16>
    %201 = arith.truncf %199 : vector<16x64xf32> to vector<16x64xbf16>
    %cst_76 = arith.constant dense<0.000000e+00> : vector<144x64xf32>
    %202 = tpu.matmul %200, %201, %cst_76 {dimension_numbers = #tpu.dot_dimension_numbers<[1], [0], [0], [1], [0, 0, 1, 1], [], []>} : vector<144x16xbf16>, vector<16x64xbf16>, vector<144x64xf32> -> vector<144x64xf32>
    %203 = vector.shape_cast %202 : vector<144x64xf32> to vector<9x16x64xf32>
    %204 = vector.extract_strided_slice %203 {offsets = [0, 0, 0], sizes = [1, 16, 64], strides = [1, 1, 1]} : vector<9x16x64xf32> to vector<1x16x64xf32>
    %205 = vector.shape_cast %204 : vector<1x16x64xf32> to vector<16x64xf32>
    %c0_77 = arith.constant 0 : index
    %c0_78 = arith.constant 0 : index
    %206 = vector.load %arg20[%c0_77, %c0_78] : memref<9x64xf32, #tpu.memory_space<vmem>>, vector<1x64xf32>
    %207 = vector.broadcast %206 : vector<1x64xf32> to vector<16x64xf32>
    %208 = arith.mulf %205, %207 : vector<16x64xf32>
    %209 = vector.extract_strided_slice %203 {offsets = [1, 0, 0], sizes = [1, 16, 64], strides = [1, 1, 1]} : vector<9x16x64xf32> to vector<1x16x64xf32>
    %210 = vector.shape_cast %209 : vector<1x16x64xf32> to vector<16x64xf32>
    %c1 = arith.constant 1 : index
    %c0_79 = arith.constant 0 : index
    %211 = vector.load %arg20[%c1, %c0_79] : memref<9x64xf32, #tpu.memory_space<vmem>>, vector<1x64xf32>
    %212 = vector.broadcast %211 : vector<1x64xf32> to vector<16x64xf32>
    %213 = arith.mulf %210, %212 : vector<16x64xf32>
    %214 = arith.addf %208, %213 : vector<16x64xf32>
    %215 = vector.extract_strided_slice %203 {offsets = [2, 0, 0], sizes = [1, 16, 64], strides = [1, 1, 1]} : vector<9x16x64xf32> to vector<1x16x64xf32>
    %216 = vector.shape_cast %215 : vector<1x16x64xf32> to vector<16x64xf32>
    %c2 = arith.constant 2 : index
    %c0_80 = arith.constant 0 : index
    %217 = vector.load %arg20[%c2, %c0_80] : memref<9x64xf32, #tpu.memory_space<vmem>>, vector<1x64xf32>
    %218 = vector.broadcast %217 : vector<1x64xf32> to vector<16x64xf32>
    %219 = arith.mulf %216, %218 : vector<16x64xf32>
    %220 = arith.addf %214, %219 : vector<16x64xf32>
    %221 = vector.extract_strided_slice %203 {offsets = [3, 0, 0], sizes = [1, 16, 64], strides = [1, 1, 1]} : vector<9x16x64xf32> to vector<1x16x64xf32>
    %222 = vector.shape_cast %221 : vector<1x16x64xf32> to vector<16x64xf32>
    %c3 = arith.constant 3 : index
    %c0_81 = arith.constant 0 : index
    %223 = vector.load %arg20[%c3, %c0_81] : memref<9x64xf32, #tpu.memory_space<vmem>>, vector<1x64xf32>
    %224 = vector.broadcast %223 : vector<1x64xf32> to vector<16x64xf32>
    %225 = arith.mulf %222, %224 : vector<16x64xf32>
    %226 = arith.addf %220, %225 : vector<16x64xf32>
    %227 = vector.extract_strided_slice %203 {offsets = [4, 0, 0], sizes = [1, 16, 64], strides = [1, 1, 1]} : vector<9x16x64xf32> to vector<1x16x64xf32>
    %228 = vector.shape_cast %227 : vector<1x16x64xf32> to vector<16x64xf32>
    %c4 = arith.constant 4 : index
    %c0_82 = arith.constant 0 : index
    %229 = vector.load %arg20[%c4, %c0_82] : memref<9x64xf32, #tpu.memory_space<vmem>>, vector<1x64xf32>
    %230 = vector.broadcast %229 : vector<1x64xf32> to vector<16x64xf32>
    %231 = arith.mulf %228, %230 : vector<16x64xf32>
    %232 = arith.addf %226, %231 : vector<16x64xf32>
    %233 = vector.extract_strided_slice %203 {offsets = [5, 0, 0], sizes = [1, 16, 64], strides = [1, 1, 1]} : vector<9x16x64xf32> to vector<1x16x64xf32>
    %234 = vector.shape_cast %233 : vector<1x16x64xf32> to vector<16x64xf32>
    %c5 = arith.constant 5 : index
    %c0_83 = arith.constant 0 : index
    %235 = vector.load %arg20[%c5, %c0_83] : memref<9x64xf32, #tpu.memory_space<vmem>>, vector<1x64xf32>
    %236 = vector.broadcast %235 : vector<1x64xf32> to vector<16x64xf32>
    %237 = arith.mulf %234, %236 : vector<16x64xf32>
    %238 = arith.addf %232, %237 : vector<16x64xf32>
    %239 = vector.extract_strided_slice %203 {offsets = [6, 0, 0], sizes = [1, 16, 64], strides = [1, 1, 1]} : vector<9x16x64xf32> to vector<1x16x64xf32>
    %240 = vector.shape_cast %239 : vector<1x16x64xf32> to vector<16x64xf32>
    %c6 = arith.constant 6 : index
    %c0_84 = arith.constant 0 : index
    %241 = vector.load %arg20[%c6, %c0_84] : memref<9x64xf32, #tpu.memory_space<vmem>>, vector<1x64xf32>
    %242 = vector.broadcast %241 : vector<1x64xf32> to vector<16x64xf32>
    %243 = arith.mulf %240, %242 : vector<16x64xf32>
    %244 = arith.addf %238, %243 : vector<16x64xf32>
    %245 = vector.extract_strided_slice %203 {offsets = [7, 0, 0], sizes = [1, 16, 64], strides = [1, 1, 1]} : vector<9x16x64xf32> to vector<1x16x64xf32>
    %246 = vector.shape_cast %245 : vector<1x16x64xf32> to vector<16x64xf32>
    %c7 = arith.constant 7 : index
    %c0_85 = arith.constant 0 : index
    %247 = vector.load %arg20[%c7, %c0_85] : memref<9x64xf32, #tpu.memory_space<vmem>>, vector<1x64xf32>
    %248 = vector.broadcast %247 : vector<1x64xf32> to vector<16x64xf32>
    %249 = arith.mulf %246, %248 : vector<16x64xf32>
    %250 = arith.addf %244, %249 : vector<16x64xf32>
    %251 = vector.extract_strided_slice %203 {offsets = [8, 0, 0], sizes = [1, 16, 64], strides = [1, 1, 1]} : vector<9x16x64xf32> to vector<1x16x64xf32>
    %252 = vector.shape_cast %251 : vector<1x16x64xf32> to vector<16x64xf32>
    %c8 = arith.constant 8 : index
    %c0_86 = arith.constant 0 : index
    %253 = vector.load %arg20[%c8, %c0_86] : memref<9x64xf32, #tpu.memory_space<vmem>>, vector<1x64xf32>
    %254 = vector.broadcast %253 : vector<1x64xf32> to vector<16x64xf32>
    %255 = arith.mulf %252, %254 : vector<16x64xf32>
    %256 = arith.addf %250, %255 : vector<16x64xf32>
    %257 = arith.addf %199, %256 : vector<16x64xf32>
    %c0_87 = arith.constant 0 : index
    %c0_88 = arith.constant 0 : index
    %258 = vector.load %arg21[%c0_87, %c0_88] : memref<1x64xf32, #tpu.memory_space<vmem>>, vector<1x64xf32>
    %259 = vector.broadcast %258 : vector<1x64xf32> to vector<16x64xf32>
    %260 = arith.addf %257, %259 : vector<16x64xf32>
    %c0_89 = arith.constant 0 : index
    %c0_90 = arith.constant 0 : index
    %261 = vector.load %arg22[%c0_89, %c0_90] : memref<1x64xf32, #tpu.memory_space<vmem>>, vector<1x64xf32>
    %c0_91 = arith.constant 0 : index
    %c0_92 = arith.constant 0 : index
    %262 = vector.load %arg23[%c0_91, %c0_92] : memref<1x64xf32, #tpu.memory_space<vmem>>, vector<1x64xf32>
    %cst_93 = arith.constant dense<0.000000e+00> : vector<16xf32>
    %263 = vector.multi_reduction <add>, %260, %cst_93 [1] : vector<16x64xf32> to vector<16xf32>
    %264 = vector.shape_cast %263 : vector<16xf32> to vector<16x1xf32>
    %cst_94 = arith.constant 6.400000e+01 : f32
    %265 = vector.broadcast %cst_94 : f32 to vector<16x1xf32>
    %266 = arith.divf %264, %265 : vector<16x1xf32>
    %267 = vector.broadcast %266 : vector<16x1xf32> to vector<16x64xf32>
    %268 = arith.subf %260, %267 : vector<16x64xf32>
    %269 = arith.mulf %268, %268 : vector<16x64xf32>
    %cst_95 = arith.constant dense<0.000000e+00> : vector<16xf32>
    %270 = vector.multi_reduction <add>, %269, %cst_95 [1] : vector<16x64xf32> to vector<16xf32>
    %271 = vector.shape_cast %270 : vector<16xf32> to vector<16x1xf32>
    %cst_96 = arith.constant 6.400000e+01 : f32
    %272 = vector.broadcast %cst_96 : f32 to vector<16x1xf32>
    %273 = arith.divf %271, %272 : vector<16x1xf32>
    %cst_97 = arith.constant 9.99999997E-7 : f32
    %274 = vector.broadcast %cst_97 : f32 to vector<16x1xf32>
    %275 = arith.addf %273, %274 : vector<16x1xf32>
    %276 = math.rsqrt %275 : vector<16x1xf32>
    %277 = vector.broadcast %276 : vector<16x1xf32> to vector<16x64xf32>
    %278 = arith.mulf %268, %277 : vector<16x64xf32>
    %279 = vector.broadcast %261 : vector<1x64xf32> to vector<16x64xf32>
    %280 = arith.mulf %278, %279 : vector<16x64xf32>
    %281 = vector.broadcast %262 : vector<1x64xf32> to vector<16x64xf32>
    %282 = arith.addf %280, %281 : vector<16x64xf32>
    %c0_98 = arith.constant 0 : index
    %c0_99 = arith.constant 0 : index
    %283 = vector.load %arg24[%c0_98, %c0_99] : memref<64x64xf32, #tpu.memory_space<vmem>>, vector<64x64xf32>
    %284 = arith.truncf %282 : vector<16x64xf32> to vector<16x64xbf16>
    %285 = arith.truncf %283 : vector<64x64xf32> to vector<64x64xbf16>
    %cst_100 = arith.constant dense<0.000000e+00> : vector<16x64xf32>
    %286 = tpu.matmul %284, %285, %cst_100 {dimension_numbers = #tpu.dot_dimension_numbers<[1], [0], [0], [1], [0, 0, 1, 1], [], []>} : vector<16x64xbf16>, vector<64x64xbf16>, vector<16x64xf32> -> vector<16x64xf32>
    %c0_101 = arith.constant 0 : index
    %c0_102 = arith.constant 0 : index
    %287 = vector.load %arg25[%c0_101, %c0_102] : memref<1x64xf32, #tpu.memory_space<vmem>>, vector<1x64xf32>
    %288 = vector.broadcast %287 : vector<1x64xf32> to vector<16x64xf32>
    %289 = arith.addf %286, %288 : vector<16x64xf32>
    %c0_103 = arith.constant 0 : index
    %c0_104 = arith.constant 0 : index
    %290 = vector.load %arg26[%c0_103, %c0_104] : memref<16x16xbf16, #tpu.memory_space<vmem>>, vector<16x16xbf16>
    %291 = arith.truncf %282 : vector<16x64xf32> to vector<16x64xbf16>
    %cst_105 = arith.constant dense<0.000000e+00> : vector<16x64xf32>
    %292 = tpu.matmul %290, %291, %cst_105 {dimension_numbers = #tpu.dot_dimension_numbers<[1], [0], [0], [1], [0, 0, 1, 1], [], []>} : vector<16x16xbf16>, vector<16x64xbf16>, vector<16x64xf32> -> vector<16x64xf32>
    %293 = vector.shape_cast %292 : vector<16x64xf32> to vector<4x4x64xf32>
    %294 = vector.extract_strided_slice %293 {offsets = [0, 0, 0], sizes = [1, 4, 64], strides = [1, 1, 1]} : vector<4x4x64xf32> to vector<1x4x64xf32>
    %295 = vector.shape_cast %294 : vector<1x4x64xf32> to vector<4x64xf32>
    %296 = vector.extract_strided_slice %293 {offsets = [1, 0, 0], sizes = [1, 4, 64], strides = [1, 1, 1]} : vector<4x4x64xf32> to vector<1x4x64xf32>
    %297 = vector.shape_cast %296 : vector<1x4x64xf32> to vector<4x64xf32>
    %298 = vector.extract_strided_slice %293 {offsets = [2, 0, 0], sizes = [1, 4, 64], strides = [1, 1, 1]} : vector<4x4x64xf32> to vector<1x4x64xf32>
    %299 = vector.shape_cast %298 : vector<1x4x64xf32> to vector<4x64xf32>
    %300 = vector.extract_strided_slice %293 {offsets = [3, 0, 0], sizes = [1, 4, 64], strides = [1, 1, 1]} : vector<4x4x64xf32> to vector<1x4x64xf32>
    %301 = vector.shape_cast %300 : vector<1x4x64xf32> to vector<4x64xf32>
    %302 = tpu.concatenate %295, %297, %299, %301 in 1 : vector<4x64xf32>, vector<4x64xf32>, vector<4x64xf32>, vector<4x64xf32> -> vector<4x256xf32>
    %c0_106 = arith.constant 0 : index
    %c0_107 = arith.constant 0 : index
    %303 = vector.load %arg27[%c0_106, %c0_107] : memref<256x64xf32, #tpu.memory_space<vmem>>, vector<256x64xf32>
    %304 = arith.truncf %302 : vector<4x256xf32> to vector<4x256xbf16>
    %305 = arith.truncf %303 : vector<256x64xf32> to vector<256x64xbf16>
    %cst_108 = arith.constant dense<0.000000e+00> : vector<4x64xf32>
    %306 = tpu.matmul %304, %305, %cst_108 {dimension_numbers = #tpu.dot_dimension_numbers<[1], [0], [0], [1], [0, 0, 1, 1], [], []>} : vector<4x256xbf16>, vector<256x64xbf16>, vector<4x64xf32> -> vector<4x64xf32>
    %c0_109 = arith.constant 0 : index
    %c0_110 = arith.constant 0 : index
    %307 = vector.load %arg28[%c0_109, %c0_110] : memref<1x64xf32, #tpu.memory_space<vmem>>, vector<1x64xf32>
    %308 = vector.broadcast %307 : vector<1x64xf32> to vector<4x64xf32>
    %309 = arith.addf %306, %308 : vector<4x64xf32>
    %c0_111 = arith.constant 0 : index
    %c0_112 = arith.constant 0 : index
    %310 = vector.load %arg29[%c0_111, %c0_112] : memref<1x64xf32, #tpu.memory_space<vmem>>, vector<1x64xf32>
    %c0_113 = arith.constant 0 : index
    %c0_114 = arith.constant 0 : index
    %311 = vector.load %arg30[%c0_113, %c0_114] : memref<1x64xf32, #tpu.memory_space<vmem>>, vector<1x64xf32>
    %cst_115 = arith.constant dense<0.000000e+00> : vector<4xf32>
    %312 = vector.multi_reduction <add>, %309, %cst_115 [1] : vector<4x64xf32> to vector<4xf32>
    %313 = vector.shape_cast %312 : vector<4xf32> to vector<4x1xf32>
    %cst_116 = arith.constant 6.400000e+01 : f32
    %314 = vector.broadcast %cst_116 : f32 to vector<4x1xf32>
    %315 = arith.divf %313, %314 : vector<4x1xf32>
    %316 = vector.broadcast %315 : vector<4x1xf32> to vector<4x64xf32>
    %317 = arith.subf %309, %316 : vector<4x64xf32>
    %318 = arith.mulf %317, %317 : vector<4x64xf32>
    %cst_117 = arith.constant dense<0.000000e+00> : vector<4xf32>
    %319 = vector.multi_reduction <add>, %318, %cst_117 [1] : vector<4x64xf32> to vector<4xf32>
    %320 = vector.shape_cast %319 : vector<4xf32> to vector<4x1xf32>
    %cst_118 = arith.constant 6.400000e+01 : f32
    %321 = vector.broadcast %cst_118 : f32 to vector<4x1xf32>
    %322 = arith.divf %320, %321 : vector<4x1xf32>
    %cst_119 = arith.constant 9.99999974E-6 : f32
    %323 = vector.broadcast %cst_119 : f32 to vector<4x1xf32>
    %324 = arith.addf %322, %323 : vector<4x1xf32>
    %325 = math.rsqrt %324 : vector<4x1xf32>
    %326 = vector.broadcast %325 : vector<4x1xf32> to vector<4x64xf32>
    %327 = arith.mulf %317, %326 : vector<4x64xf32>
    %328 = vector.broadcast %310 : vector<1x64xf32> to vector<4x64xf32>
    %329 = arith.mulf %327, %328 : vector<4x64xf32>
    %330 = vector.broadcast %311 : vector<1x64xf32> to vector<4x64xf32>
    %331 = arith.addf %329, %330 : vector<4x64xf32>
    %c0_120 = arith.constant 0 : index
    %c0_121 = arith.constant 0 : index
    %332 = vector.load %arg31[%c0_120, %c0_121] : memref<64x128xf32, #tpu.memory_space<vmem>>, vector<64x128xf32>
    %333 = arith.truncf %331 : vector<4x64xf32> to vector<4x64xbf16>
    %334 = arith.truncf %332 : vector<64x128xf32> to vector<64x128xbf16>
    %cst_122 = arith.constant dense<0.000000e+00> : vector<4x128xf32>
    %335 = tpu.matmul %333, %334, %cst_122 {dimension_numbers = #tpu.dot_dimension_numbers<[1], [0], [0], [1], [0, 0, 1, 1], [], []>} : vector<4x64xbf16>, vector<64x128xbf16>, vector<4x128xf32> -> vector<4x128xf32>
    %c0_123 = arith.constant 0 : index
    %c0_124 = arith.constant 0 : index
    %336 = vector.load %arg32[%c0_123, %c0_124] : memref<1x128xf32, #tpu.memory_space<vmem>>, vector<1x128xf32>
    %337 = vector.broadcast %336 : vector<1x128xf32> to vector<4x128xf32>
    %338 = arith.addf %335, %337 : vector<4x128xf32>
    %339 = vector.extract_strided_slice %289 {offsets = [0, 0], sizes = [16, 16], strides = [1, 1]} : vector<16x64xf32> to vector<16x16xf32>
    %340 = vector.extract_strided_slice %289 {offsets = [0, 16], sizes = [16, 16], strides = [1, 1]} : vector<16x64xf32> to vector<16x16xf32>
    %341 = vector.extract_strided_slice %289 {offsets = [0, 32], sizes = [16, 16], strides = [1, 1]} : vector<16x64xf32> to vector<16x16xf32>
    %342 = vector.extract_strided_slice %289 {offsets = [0, 48], sizes = [16, 16], strides = [1, 1]} : vector<16x64xf32> to vector<16x16xf32>
    %343 = vector.shape_cast %339 : vector<16x16xf32> to vector<1x16x16xf32>
    %344 = vector.shape_cast %340 : vector<16x16xf32> to vector<1x16x16xf32>
    %345 = vector.shape_cast %341 : vector<16x16xf32> to vector<1x16x16xf32>
    %346 = vector.shape_cast %342 : vector<16x16xf32> to vector<1x16x16xf32>
    %347 = tpu.concatenate %343, %344, %345, %346 in 0 : vector<1x16x16xf32>, vector<1x16x16xf32>, vector<1x16x16xf32>, vector<1x16x16xf32> -> vector<4x16x16xf32>
    %348 = vector.extract_strided_slice %338 {offsets = [0, 0], sizes = [4, 16], strides = [1, 1]} : vector<4x128xf32> to vector<4x16xf32>
    %349 = vector.extract_strided_slice %338 {offsets = [0, 16], sizes = [4, 16], strides = [1, 1]} : vector<4x128xf32> to vector<4x16xf32>
    %350 = vector.extract_strided_slice %338 {offsets = [0, 32], sizes = [4, 16], strides = [1, 1]} : vector<4x128xf32> to vector<4x16xf32>
    %351 = vector.extract_strided_slice %338 {offsets = [0, 48], sizes = [4, 16], strides = [1, 1]} : vector<4x128xf32> to vector<4x16xf32>
    %352 = vector.shape_cast %348 : vector<4x16xf32> to vector<1x4x16xf32>
    %353 = vector.shape_cast %349 : vector<4x16xf32> to vector<1x4x16xf32>
    %354 = vector.shape_cast %350 : vector<4x16xf32> to vector<1x4x16xf32>
    %355 = vector.shape_cast %351 : vector<4x16xf32> to vector<1x4x16xf32>
    %356 = tpu.concatenate %352, %353, %354, %355 in 0 : vector<1x4x16xf32>, vector<1x4x16xf32>, vector<1x4x16xf32>, vector<1x4x16xf32> -> vector<4x4x16xf32>
    %357 = vector.extract_strided_slice %338 {offsets = [0, 64], sizes = [4, 16], strides = [1, 1]} : vector<4x128xf32> to vector<4x16xf32>
    %358 = vector.extract_strided_slice %338 {offsets = [0, 80], sizes = [4, 16], strides = [1, 1]} : vector<4x128xf32> to vector<4x16xf32>
    %359 = vector.extract_strided_slice %338 {offsets = [0, 96], sizes = [4, 16], strides = [1, 1]} : vector<4x128xf32> to vector<4x16xf32>
    %360 = vector.extract_strided_slice %338 {offsets = [0, 112], sizes = [4, 16], strides = [1, 1]} : vector<4x128xf32> to vector<4x16xf32>
    %361 = vector.shape_cast %357 : vector<4x16xf32> to vector<1x4x16xf32>
    %362 = vector.shape_cast %358 : vector<4x16xf32> to vector<1x4x16xf32>
    %363 = vector.shape_cast %359 : vector<4x16xf32> to vector<1x4x16xf32>
    %364 = vector.shape_cast %360 : vector<4x16xf32> to vector<1x4x16xf32>
    %365 = tpu.concatenate %361, %362, %363, %364 in 0 : vector<1x4x16xf32>, vector<1x4x16xf32>, vector<1x4x16xf32>, vector<1x4x16xf32> -> vector<4x4x16xf32>
    %366 = arith.truncf %347 : vector<4x16x16xf32> to vector<4x16x16xbf16>
    %367 = arith.truncf %356 : vector<4x4x16xf32> to vector<4x4x16xbf16>
    %cst_125 = arith.constant dense<0.000000e+00> : vector<4x16x4xf32>
    %368 = tpu.matmul %366, %367, %cst_125 {dimension_numbers = #tpu.dot_dimension_numbers<[2], [2], [1], [1], [0, 0, 0, 1, 1, 1], [0], [0]>} : vector<4x16x16xbf16>, vector<4x4x16xbf16>, vector<4x16x4xf32> -> vector<4x16x4xf32>
    %cst_126 = arith.constant dense<0xFF800000> : vector<4x16xf32>
    %369 = vector.multi_reduction <maximumf>, %368, %cst_126 [2] : vector<4x16x4xf32> to vector<4x16xf32>
    %370 = vector.shape_cast %369 : vector<4x16xf32> to vector<4x16x1xf32>
    %371 = vector.broadcast %370 : vector<4x16x1xf32> to vector<4x16x4xf32>
    %372 = arith.subf %368, %371 : vector<4x16x4xf32>
    %373 = math.exp %372 : vector<4x16x4xf32>
    %cst_127 = arith.constant dense<0.000000e+00> : vector<4x16xf32>
    %374 = vector.multi_reduction <add>, %373, %cst_127 [2] : vector<4x16x4xf32> to vector<4x16xf32>
    %375 = vector.shape_cast %374 : vector<4x16xf32> to vector<4x16x1xf32>
    %376 = tpu.reciprocal %375 {approx = true} : vector<4x16x1xf32> -> vector<4x16x1xf32>
    %377 = vector.broadcast %376 : vector<4x16x1xf32> to vector<4x16x4xf32>
    %378 = arith.mulf %373, %377 : vector<4x16x4xf32>
    %379 = arith.truncf %378 : vector<4x16x4xf32> to vector<4x16x4xbf16>
    %380 = arith.truncf %365 : vector<4x4x16xf32> to vector<4x4x16xbf16>
    %cst_128 = arith.constant dense<0.000000e+00> : vector<4x16x16xf32>
    %381 = tpu.matmul %379, %380, %cst_128 {dimension_numbers = #tpu.dot_dimension_numbers<[2], [1], [1], [2], [0, 0, 0, 1, 1, 2], [0], [0]>} : vector<4x16x4xbf16>, vector<4x4x16xbf16>, vector<4x16x16xf32> -> vector<4x16x16xf32>
    %382 = vector.extract_strided_slice %381 {offsets = [0, 0, 0], sizes = [1, 16, 16], strides = [1, 1, 1]} : vector<4x16x16xf32> to vector<1x16x16xf32>
    %383 = vector.shape_cast %382 : vector<1x16x16xf32> to vector<16x16xf32>
    %384 = vector.extract_strided_slice %381 {offsets = [1, 0, 0], sizes = [1, 16, 16], strides = [1, 1, 1]} : vector<4x16x16xf32> to vector<1x16x16xf32>
    %385 = vector.shape_cast %384 : vector<1x16x16xf32> to vector<16x16xf32>
    %386 = vector.extract_strided_slice %381 {offsets = [2, 0, 0], sizes = [1, 16, 16], strides = [1, 1, 1]} : vector<4x16x16xf32> to vector<1x16x16xf32>
    %387 = vector.shape_cast %386 : vector<1x16x16xf32> to vector<16x16xf32>
    %388 = vector.extract_strided_slice %381 {offsets = [3, 0, 0], sizes = [1, 16, 16], strides = [1, 1, 1]} : vector<4x16x16xf32> to vector<1x16x16xf32>
    %389 = vector.shape_cast %388 : vector<1x16x16xf32> to vector<16x16xf32>
    %390 = tpu.concatenate %383, %385, %387, %389 in 1 : vector<16x16xf32>, vector<16x16xf32>, vector<16x16xf32>, vector<16x16xf32> -> vector<16x64xf32>
    %c0_129 = arith.constant 0 : index
    %c0_130 = arith.constant 0 : index
    %391 = vector.load %arg33[%c0_129, %c0_130] : memref<64x64xf32, #tpu.memory_space<vmem>>, vector<64x64xf32>
    %392 = arith.truncf %390 : vector<16x64xf32> to vector<16x64xbf16>
    %393 = arith.truncf %391 : vector<64x64xf32> to vector<64x64xbf16>
    %cst_131 = arith.constant dense<0.000000e+00> : vector<16x64xf32>
    %394 = tpu.matmul %392, %393, %cst_131 {dimension_numbers = #tpu.dot_dimension_numbers<[1], [0], [0], [1], [0, 0, 1, 1], [], []>} : vector<16x64xbf16>, vector<64x64xbf16>, vector<16x64xf32> -> vector<16x64xf32>
    %395 = arith.addf %260, %394 : vector<16x64xf32>
    %c0_132 = arith.constant 0 : index
    %c0_133 = arith.constant 0 : index
    %396 = vector.load %arg34[%c0_132, %c0_133] : memref<1x64xf32, #tpu.memory_space<vmem>>, vector<1x64xf32>
    %397 = vector.broadcast %396 : vector<1x64xf32> to vector<16x64xf32>
    %398 = arith.addf %395, %397 : vector<16x64xf32>
    %c0_134 = arith.constant 0 : index
    %c0_135 = arith.constant 0 : index
    %399 = vector.load %arg35[%c0_134, %c0_135] : memref<1x64xf32, #tpu.memory_space<vmem>>, vector<1x64xf32>
    %c0_136 = arith.constant 0 : index
    %c0_137 = arith.constant 0 : index
    %400 = vector.load %arg36[%c0_136, %c0_137] : memref<1x64xf32, #tpu.memory_space<vmem>>, vector<1x64xf32>
    %cst_138 = arith.constant dense<0.000000e+00> : vector<16xf32>
    %401 = vector.multi_reduction <add>, %398, %cst_138 [1] : vector<16x64xf32> to vector<16xf32>
    %402 = vector.shape_cast %401 : vector<16xf32> to vector<16x1xf32>
    %cst_139 = arith.constant 6.400000e+01 : f32
    %403 = vector.broadcast %cst_139 : f32 to vector<16x1xf32>
    %404 = arith.divf %402, %403 : vector<16x1xf32>
    %405 = vector.broadcast %404 : vector<16x1xf32> to vector<16x64xf32>
    %406 = arith.subf %398, %405 : vector<16x64xf32>
    %407 = arith.mulf %406, %406 : vector<16x64xf32>
    %cst_140 = arith.constant dense<0.000000e+00> : vector<16xf32>
    %408 = vector.multi_reduction <add>, %407, %cst_140 [1] : vector<16x64xf32> to vector<16xf32>
    %409 = vector.shape_cast %408 : vector<16xf32> to vector<16x1xf32>
    %cst_141 = arith.constant 6.400000e+01 : f32
    %410 = vector.broadcast %cst_141 : f32 to vector<16x1xf32>
    %411 = arith.divf %409, %410 : vector<16x1xf32>
    %cst_142 = arith.constant 9.99999997E-7 : f32
    %412 = vector.broadcast %cst_142 : f32 to vector<16x1xf32>
    %413 = arith.addf %411, %412 : vector<16x1xf32>
    %414 = math.rsqrt %413 : vector<16x1xf32>
    %415 = vector.broadcast %414 : vector<16x1xf32> to vector<16x64xf32>
    %416 = arith.mulf %406, %415 : vector<16x64xf32>
    %417 = vector.broadcast %399 : vector<1x64xf32> to vector<16x64xf32>
    %418 = arith.mulf %416, %417 : vector<16x64xf32>
    %419 = vector.broadcast %400 : vector<1x64xf32> to vector<16x64xf32>
    %420 = arith.addf %418, %419 : vector<16x64xf32>
    %c0_143 = arith.constant 0 : index
    %c0_144 = arith.constant 0 : index
    %421 = vector.load %arg37[%c0_143, %c0_144] : memref<64x256xf32, #tpu.memory_space<vmem>>, vector<64x256xf32>
    %422 = arith.truncf %420 : vector<16x64xf32> to vector<16x64xbf16>
    %423 = arith.truncf %421 : vector<64x256xf32> to vector<64x256xbf16>
    %cst_145 = arith.constant dense<0.000000e+00> : vector<16x256xf32>
    %424 = tpu.matmul %422, %423, %cst_145 {dimension_numbers = #tpu.dot_dimension_numbers<[1], [0], [0], [1], [0, 0, 1, 1], [], []>} : vector<16x64xbf16>, vector<64x256xbf16>, vector<16x256xf32> -> vector<16x256xf32>
    %c0_146 = arith.constant 0 : index
    %c0_147 = arith.constant 0 : index
    %425 = vector.load %arg38[%c0_146, %c0_147] : memref<1x256xf32, #tpu.memory_space<vmem>>, vector<1x256xf32>
    %426 = vector.broadcast %425 : vector<1x256xf32> to vector<16x256xf32>
    %427 = arith.addf %424, %426 : vector<16x256xf32>
    %cst_148 = arith.constant 0.707106769 : f32
    %428 = vector.broadcast %cst_148 : f32 to vector<16x256xf32>
    %429 = arith.mulf %427, %428 : vector<16x256xf32>
    %430 = math.absf %429 : vector<16x256xf32>
    %cst_149 = arith.constant 0.327591091 : f32
    %431 = vector.broadcast %cst_149 : f32 to vector<16x256xf32>
    %432 = arith.mulf %431, %430 : vector<16x256xf32>
    %cst_150 = arith.constant 1.000000e+00 : f32
    %433 = vector.broadcast %cst_150 : f32 to vector<16x256xf32>
    %434 = arith.addf %433, %432 : vector<16x256xf32>
    %cst_151 = arith.constant 1.000000e+00 : f32
    %435 = vector.broadcast %cst_151 : f32 to vector<16x256xf32>
    %436 = arith.divf %435, %434 : vector<16x256xf32>
    %cst_152 = arith.constant 1.06140542 : f32
    %437 = vector.broadcast %cst_152 : f32 to vector<16x256xf32>
    %438 = arith.mulf %436, %437 : vector<16x256xf32>
    %cst_153 = arith.constant -1.45315206 : f32
    %439 = vector.broadcast %cst_153 : f32 to vector<16x256xf32>
    %440 = arith.addf %439, %438 : vector<16x256xf32>
    %441 = arith.mulf %436, %440 : vector<16x256xf32>
    %cst_154 = arith.constant 1.42141378 : f32
    %442 = vector.broadcast %cst_154 : f32 to vector<16x256xf32>
    %443 = arith.addf %442, %441 : vector<16x256xf32>
    %444 = arith.mulf %436, %443 : vector<16x256xf32>
    %cst_155 = arith.constant -0.284496725 : f32
    %445 = vector.broadcast %cst_155 : f32 to vector<16x256xf32>
    %446 = arith.addf %445, %444 : vector<16x256xf32>
    %447 = arith.mulf %436, %446 : vector<16x256xf32>
    %cst_156 = arith.constant 0.254829586 : f32
    %448 = vector.broadcast %cst_156 : f32 to vector<16x256xf32>
    %449 = arith.addf %448, %447 : vector<16x256xf32>
    %450 = arith.mulf %436, %449 : vector<16x256xf32>
    %cst_157 = arith.constant 0.000000e+00 : f32
    %451 = vector.broadcast %cst_157 : f32 to vector<16x256xf32>
    %452 = arith.subf %451, %430 : vector<16x256xf32>
    %453 = arith.mulf %452, %430 : vector<16x256xf32>
    %454 = math.exp %453 : vector<16x256xf32>
    %455 = arith.mulf %450, %454 : vector<16x256xf32>
    %cst_158 = arith.constant 1.000000e+00 : f32
    %456 = vector.broadcast %cst_158 : f32 to vector<16x256xf32>
    %457 = arith.subf %456, %455 : vector<16x256xf32>
    %cst_159 = arith.constant 0.000000e+00 : f32
    %458 = vector.broadcast %cst_159 : f32 to vector<16x256xf32>
    %459 = arith.cmpf oge, %429, %458 : vector<16x256xf32>
    %cst_160 = arith.constant 0.000000e+00 : f32
    %460 = vector.broadcast %cst_160 : f32 to vector<16x256xf32>
    %461 = arith.subf %460, %457 : vector<16x256xf32>
    %462 = arith.select %459, %457, %461 : vector<16x256xi1>, vector<16x256xf32>
    %cst_161 = arith.constant 5.000000e-01 : f32
    %463 = vector.broadcast %cst_161 : f32 to vector<16x256xf32>
    %464 = arith.mulf %463, %427 : vector<16x256xf32>
    %cst_162 = arith.constant 1.000000e+00 : f32
    %465 = vector.broadcast %cst_162 : f32 to vector<16x256xf32>
    %466 = arith.addf %465, %462 : vector<16x256xf32>
    %467 = arith.mulf %464, %466 : vector<16x256xf32>
    %c0_163 = arith.constant 0 : index
    %c0_164 = arith.constant 0 : index
    %468 = vector.load %arg39[%c0_163, %c0_164] : memref<256x64xf32, #tpu.memory_space<vmem>>, vector<256x64xf32>
    %469 = arith.truncf %467 : vector<16x256xf32> to vector<16x256xbf16>
    %470 = arith.truncf %468 : vector<256x64xf32> to vector<256x64xbf16>
    %cst_165 = arith.constant dense<0.000000e+00> : vector<16x64xf32>
    %471 = tpu.matmul %469, %470, %cst_165 {dimension_numbers = #tpu.dot_dimension_numbers<[1], [0], [0], [1], [0, 0, 1, 1], [], []>} : vector<16x256xbf16>, vector<256x64xbf16>, vector<16x64xf32> -> vector<16x64xf32>
    %472 = arith.addf %398, %471 : vector<16x64xf32>
    %c0_166 = arith.constant 0 : index
    %c0_167 = arith.constant 0 : index
    %473 = vector.load %arg40[%c0_166, %c0_167] : memref<1x64xf32, #tpu.memory_space<vmem>>, vector<1x64xf32>
    %474 = vector.broadcast %473 : vector<1x64xf32> to vector<16x64xf32>
    %475 = arith.addf %472, %474 : vector<16x64xf32>
    %c0_168 = arith.constant 0 : index
    %c0_169 = arith.constant 0 : index
    %c0_170 = arith.constant 0 : index
    %476 = vector.load %arg42[%c0_168, %c0_169, %c0_170] : memref<1x16x64xf32, #tpu.memory_space<vmem>>, vector<1x16x64xf32>
    %477 = vector.shape_cast %476 : vector<1x16x64xf32> to vector<16x64xf32>
    %478 = vector.shape_cast %475 : vector<16x64xf32> to vector<1x16x64xf32>
    tpu.vector_store %arg42[%c0_168, %c0_169, %c0_170], %478 {strides = array<i32>} : memref<1x16x64xf32, #tpu.memory_space<vmem>>, vector<1x16x64xf32>,
    return
  }
  func.func @transform_0(%arg0: i32) -> (i32, i32, i32) {
    %c0_i32 = arith.constant 0 : i32
    %c0_i32_0 = arith.constant 0 : i32
    %c0_i32_1 = arith.constant 0 : i32
    return %arg0, %c0_i32, %c0_i32_0 : i32, i32, i32
  }
  func.func @transform_1(%arg0: i32) -> (i32, i32) {
    %c0_i32 = arith.constant 0 : i32
    %c0_i32_0 = arith.constant 0 : i32
    %c0_i32_1 = arith.constant 0 : i32
    return %c0_i32, %c0_i32_0 : i32, i32
  }
  func.func @transform_2(%arg0: i32) -> (i32, i32) {
    %c0_i32 = arith.constant 0 : i32
    %c0_i32_0 = arith.constant 0 : i32
    %c0_i32_1 = arith.constant 0 : i32
    return %c0_i32, %c0_i32_0 : i32, i32
  }
  func.func @transform_3(%arg0: i32) -> (i32, i32) {
    %c0_i32 = arith.constant 0 : i32
    %c0_i32_0 = arith.constant 0 : i32
    %c0_i32_1 = arith.constant 0 : i32
    return %c0_i32, %c0_i32_0 : i32, i32
  }
  func.func @transform_4(%arg0: i32) -> (i32, i32) {
    %c0_i32 = arith.constant 0 : i32
    %c0_i32_0 = arith.constant 0 : i32
    %c0_i32_1 = arith.constant 0 : i32
    return %c0_i32, %c0_i32_0 : i32, i32
  }
  func.func @transform_5(%arg0: i32) -> (i32, i32) {
    %c0_i32 = arith.constant 0 : i32
    %c0_i32_0 = arith.constant 0 : i32
    %c0_i32_1 = arith.constant 0 : i32
    return %c0_i32, %c0_i32_0 : i32, i32
  }
  func.func @transform_6(%arg0: i32) -> (i32, i32) {
    %c0_i32 = arith.constant 0 : i32
    %c0_i32_0 = arith.constant 0 : i32
    %c0_i32_1 = arith.constant 0 : i32
    return %c0_i32, %c0_i32_0 : i32, i32
  }
  func.func @transform_7(%arg0: i32) -> (i32, i32) {
    %c0_i32 = arith.constant 0 : i32
    %c0_i32_0 = arith.constant 0 : i32
    %c0_i32_1 = arith.constant 0 : i32
    return %c0_i32, %c0_i32_0 : i32, i32
  }
  func.func @transform_8(%arg0: i32) -> (i32, i32) {
    %c0_i32 = arith.constant 0 : i32
    %c0_i32_0 = arith.constant 0 : i32
    %c0_i32_1 = arith.constant 0 : i32
    return %c0_i32, %c0_i32_0 : i32, i32
  }
  func.func @transform_9(%arg0: i32) -> (i32, i32) {
    %c0_i32 = arith.constant 0 : i32
    %c0_i32_0 = arith.constant 0 : i32
    %c0_i32_1 = arith.constant 0 : i32
    return %c0_i32, %c0_i32_0 : i32, i32
  }
  func.func @transform_10(%arg0: i32) -> (i32, i32) {
    %c0_i32 = arith.constant 0 : i32
    %c0_i32_0 = arith.constant 0 : i32
    %c0_i32_1 = arith.constant 0 : i32
    return %c0_i32, %c0_i32_0 : i32, i32
  }
  func.func @transform_11(%arg0: i32) -> (i32, i32) {
    %c0_i32 = arith.constant 0 : i32
    %c0_i32_0 = arith.constant 0 : i32
    %c0_i32_1 = arith.constant 0 : i32
    return %c0_i32, %c0_i32_0 : i32, i32
  }
  func.func @transform_12(%arg0: i32) -> (i32, i32) {
    %c0_i32 = arith.constant 0 : i32
    %c0_i32_0 = arith.constant 0 : i32
    %c0_i32_1 = arith.constant 0 : i32
    return %c0_i32, %c0_i32_0 : i32, i32
  }
  func.func @transform_13(%arg0: i32) -> (i32, i32) {
    %c0_i32 = arith.constant 0 : i32
    %c0_i32_0 = arith.constant 0 : i32
    %c0_i32_1 = arith.constant 0 : i32
    return %c0_i32, %c0_i32_0 : i32, i32
  }
  func.func @transform_14(%arg0: i32) -> (i32, i32) {
    %c0_i32 = arith.constant 0 : i32
    %c0_i32_0 = arith.constant 0 : i32
    %c0_i32_1 = arith.constant 0 : i32
    return %c0_i32, %c0_i32_0 : i32, i32
  }
  func.func @transform_15(%arg0: i32) -> (i32, i32) {
    %c0_i32 = arith.constant 0 : i32
    %c0_i32_0 = arith.constant 0 : i32
    %c0_i32_1 = arith.constant 0 : i32
    return %c0_i32, %c0_i32_0 : i32, i32
  }
  func.func @transform_16(%arg0: i32) -> (i32, i32) {
    %c0_i32 = arith.constant 0 : i32
    %c0_i32_0 = arith.constant 0 : i32
    %c0_i32_1 = arith.constant 0 : i32
    return %c0_i32, %c0_i32_0 : i32, i32
  }
  func.func @transform_17(%arg0: i32) -> (i32, i32) {
    %c0_i32 = arith.constant 0 : i32
    %c0_i32_0 = arith.constant 0 : i32
    %c0_i32_1 = arith.constant 0 : i32
    return %c0_i32, %c0_i32_0 : i32, i32
  }
  func.func @transform_18(%arg0: i32) -> (i32, i32) {
    %c0_i32 = arith.constant 0 : i32
    %c0_i32_0 = arith.constant 0 : i32
    %c0_i32_1 = arith.constant 0 : i32
    return %c0_i32, %c0_i32_0 : i32, i32
  }
  func.func @transform_19(%arg0: i32) -> (i32, i32) {
    %c0_i32 = arith.constant 0 : i32
    %c0_i32_0 = arith.constant 0 : i32
    %c0_i32_1 = arith.constant 0 : i32
    return %c0_i32, %c0_i32_0 : i32, i32
  }
  func.func @transform_20(%arg0: i32) -> (i32, i32) {
    %c0_i32 = arith.constant 0 : i32
    %c0_i32_0 = arith.constant 0 : i32
    %c0_i32_1 = arith.constant 0 : i32
    return %c0_i32, %c0_i32_0 : i32, i32
  }
  func.func @transform_21(%arg0: i32) -> (i32, i32) {
    %c0_i32 = arith.constant 0 : i32
    %c0_i32_0 = arith.constant 0 : i32
    %c0_i32_1 = arith.constant 0 : i32
    return %c0_i32, %c0_i32_0 : i32, i32
  }
  func.func @transform_22(%arg0: i32) -> (i32, i32) {
    %c0_i32 = arith.constant 0 : i32
    %c0_i32_0 = arith.constant 0 : i32
    %c0_i32_1 = arith.constant 0 : i32
    return %c0_i32, %c0_i32_0 : i32, i32
  }
  func.func @transform_23(%arg0: i32) -> (i32, i32) {
    %c0_i32 = arith.constant 0 : i32
    %c0_i32_0 = arith.constant 0 : i32
    %c0_i32_1 = arith.constant 0 : i32
    return %c0_i32, %c0_i32_0 : i32, i32
  }
  func.func @transform_24(%arg0: i32) -> (i32, i32) {
    %c0_i32 = arith.constant 0 : i32
    %c0_i32_0 = arith.constant 0 : i32
    %c0_i32_1 = arith.constant 0 : i32
    return %c0_i32, %c0_i32_0 : i32, i32
  }
  func.func @transform_25(%arg0: i32) -> (i32, i32) {
    %c0_i32 = arith.constant 0 : i32
    %c0_i32_0 = arith.constant 0 : i32
    %c0_i32_1 = arith.constant 0 : i32
    return %c0_i32, %c0_i32_0 : i32, i32
  }
  func.func @transform_26(%arg0: i32) -> (i32, i32) {
    %c0_i32 = arith.constant 0 : i32
    %c0_i32_0 = arith.constant 0 : i32
    %c0_i32_1 = arith.constant 0 : i32
    return %c0_i32, %c0_i32_0 : i32, i32
  }
  func.func @transform_27(%arg0: i32) -> (i32, i32) {
    %c0_i32 = arith.constant 0 : i32
    %c0_i32_0 = arith.constant 0 : i32
    %c0_i32_1 = arith.constant 0 : i32
    return %c0_i32, %c0_i32_0 : i32, i32
  }
  func.func @transform_28(%arg0: i32) -> (i32, i32) {
    %c0_i32 = arith.constant 0 : i32
    %c0_i32_0 = arith.constant 0 : i32
    %c0_i32_1 = arith.constant 0 : i32
    return %c0_i32, %c0_i32_0 : i32, i32
  }
  func.func @transform_29(%arg0: i32) -> (i32, i32) {
    %c0_i32 = arith.constant 0 : i32
    %c0_i32_0 = arith.constant 0 : i32
    %c0_i32_1 = arith.constant 0 : i32
    return %c0_i32, %c0_i32_0 : i32, i32
  }
  func.func @transform_30(%arg0: i32) -> (i32, i32) {
    %c0_i32 = arith.constant 0 : i32
    %c0_i32_0 = arith.constant 0 : i32
    %c0_i32_1 = arith.constant 0 : i32
    return %c0_i32, %c0_i32_0 : i32, i32
  }
  func.func @transform_31(%arg0: i32) -> (i32, i32) {
    %c0_i32 = arith.constant 0 : i32
    %c0_i32_0 = arith.constant 0 : i32
    %c0_i32_1 = arith.constant 0 : i32
    return %c0_i32, %c0_i32_0 : i32, i32
  }
  func.func @transform_32(%arg0: i32) -> (i32, i32) {
    %c0_i32 = arith.constant 0 : i32
    %c0_i32_0 = arith.constant 0 : i32
    %c0_i32_1 = arith.constant 0 : i32
    return %c0_i32, %c0_i32_0 : i32, i32
  }
  func.func @transform_33(%arg0: i32) -> (i32, i32) {
    %c0_i32 = arith.constant 0 : i32
    %c0_i32_0 = arith.constant 0 : i32
    %c0_i32_1 = arith.constant 0 : i32
    return %c0_i32, %c0_i32_0 : i32, i32
  }
  func.func @transform_34(%arg0: i32) -> (i32, i32) {
    %c0_i32 = arith.constant 0 : i32
    %c0_i32_0 = arith.constant 0 : i32
    %c0_i32_1 = arith.constant 0 : i32
    return %c0_i32, %c0_i32_0 : i32, i32
  }
  func.func @transform_35(%arg0: i32) -> (i32, i32) {
    %c0_i32 = arith.constant 0 : i32
    %c0_i32_0 = arith.constant 0 : i32
    %c0_i32_1 = arith.constant 0 : i32
    return %c0_i32, %c0_i32_0 : i32, i32
  }
  func.func @transform_36(%arg0: i32) -> (i32, i32) {
    %c0_i32 = arith.constant 0 : i32
    %c0_i32_0 = arith.constant 0 : i32
    %c0_i32_1 = arith.constant 0 : i32
    return %c0_i32, %c0_i32_0 : i32, i32
  }
  func.func @transform_37(%arg0: i32) -> (i32, i32) {
    %c0_i32 = arith.constant 0 : i32
    %c0_i32_0 = arith.constant 0 : i32
    %c0_i32_1 = arith.constant 0 : i32
    return %c0_i32, %c0_i32_0 : i32, i32
  }
  func.func @transform_38(%arg0: i32) -> (i32, i32) {
    %c0_i32 = arith.constant 0 : i32
    %c0_i32_0 = arith.constant 0 : i32
    %c0_i32_1 = arith.constant 0 : i32
    return %c0_i32, %c0_i32_0 : i32, i32
  }
  func.func @transform_39(%arg0: i32) -> (i32, i32) {
    %c0_i32 = arith.constant 0 : i32
    %c0_i32_0 = arith.constant 0 : i32
    %c0_i32_1 = arith.constant 0 : i32
    return %c0_i32, %c0_i32_0 : i32, i32
  }
  func.func @transform_40(%arg0: i32) -> (i32, i32) {
    %c0_i32 = arith.constant 0 : i32
    %c0_i32_0 = arith.constant 0 : i32
    %c0_i32_1 = arith.constant 0 : i32
    return %c0_i32, %c0_i32_0 : i32, i32
  }
  func.func @transform_41(%arg0: i32) -> (i32, i32, i32) {
    %c0_i32 = arith.constant 0 : i32
    %c0_i32_0 = arith.constant 0 : i32
    %c0_i32_1 = arith.constant 0 : i32
    return %arg0, %c0_i32, %c0_i32_0 : i32, i32, i32
  }
}

module attributes {stable_mosaic.version = 11 : i64} {
  func.func @_stage_kernel(%arg0: i32, %arg1: memref<1x64x48xf32, #tpu.memory_space<vmem>>, %arg2: memref<48x32xf32, #tpu.memory_space<vmem>>, %arg3: memref<1x32xf32, #tpu.memory_space<vmem>>, %arg4: memref<1x32xf32, #tpu.memory_space<vmem>>, %arg5: memref<1x32xf32, #tpu.memory_space<vmem>>, %arg6: memref<1x32xf32, #tpu.memory_space<vmem>>, %arg7: memref<1x32xf32, #tpu.memory_space<vmem>>, %arg8: memref<32x96xf32, #tpu.memory_space<vmem>>, %arg9: memref<1x96xf32, #tpu.memory_space<vmem>>, %arg10: memref<32x32xf32, #tpu.memory_space<vmem>>, %arg11: memref<1x32xf32, #tpu.memory_space<vmem>>, %arg12: memref<1x32xf32, #tpu.memory_space<vmem>>, %arg13: memref<1x32xf32, #tpu.memory_space<vmem>>, %arg14: memref<32x128xf32, #tpu.memory_space<vmem>>, %arg15: memref<1x128xf32, #tpu.memory_space<vmem>>, %arg16: memref<128x32xf32, #tpu.memory_space<vmem>>, %arg17: memref<1x32xf32, #tpu.memory_space<vmem>>, %arg18: memref<64x64xf32, #tpu.memory_space<vmem>>, %arg19: memref<576x64xbf16, #tpu.memory_space<vmem>>, %arg20: memref<9x32xf32, #tpu.memory_space<vmem>>, %arg21: memref<1x32xf32, #tpu.memory_space<vmem>>, %arg22: memref<1x32xf32, #tpu.memory_space<vmem>>, %arg23: memref<1x32xf32, #tpu.memory_space<vmem>>, %arg24: memref<32x32xf32, #tpu.memory_space<vmem>>, %arg25: memref<1x32xf32, #tpu.memory_space<vmem>>, %arg26: memref<64x64xbf16, #tpu.memory_space<vmem>>, %arg27: memref<512x32xf32, #tpu.memory_space<vmem>>, %arg28: memref<1x32xf32, #tpu.memory_space<vmem>>, %arg29: memref<1x32xf32, #tpu.memory_space<vmem>>, %arg30: memref<1x32xf32, #tpu.memory_space<vmem>>, %arg31: memref<32x64xf32, #tpu.memory_space<vmem>>, %arg32: memref<1x64xf32, #tpu.memory_space<vmem>>, %arg33: memref<32x32xf32, #tpu.memory_space<vmem>>, %arg34: memref<1x32xf32, #tpu.memory_space<vmem>>, %arg35: memref<1x32xf32, #tpu.memory_space<vmem>>, %arg36: memref<1x32xf32, #tpu.memory_space<vmem>>, %arg37: memref<32x128xf32, #tpu.memory_space<vmem>>, %arg38: memref<1x128xf32, #tpu.memory_space<vmem>>, %arg39: memref<128x32xf32, #tpu.memory_space<vmem>>, %arg40: memref<1x32xf32, #tpu.memory_space<vmem>>, %arg41: memref<64x64xbf16, #tpu.memory_space<vmem>>, %arg42: memref<1x16x128xbf16, #tpu.memory_space<vmem>>) attributes {dimension_semantics = [#tpu.dimension_semantics<parallel>], iteration_bounds = array<i64: 2>, scalar_prefetch = 0 : i64, scratch_operands = 0 : i64, tpu.core_type = #tpu.core_type<tc>, window_params = [{transform_indices = @transform_0, window_bounds = array<i64: 1, 64, 48>}, {pipeline_mode = #tpu.pipeline_mode<synchronous>, transform_indices = @transform_1, window_bounds = array<i64: 48, 32>}, {pipeline_mode = #tpu.pipeline_mode<synchronous>, transform_indices = @transform_2, window_bounds = array<i64: 1, 32>}, {pipeline_mode = #tpu.pipeline_mode<synchronous>, transform_indices = @transform_3, window_bounds = array<i64: 1, 32>}, {pipeline_mode = #tpu.pipeline_mode<synchronous>, transform_indices = @transform_4, window_bounds = array<i64: 1, 32>}, {pipeline_mode = #tpu.pipeline_mode<synchronous>, transform_indices = @transform_5, window_bounds = array<i64: 1, 32>}, {pipeline_mode = #tpu.pipeline_mode<synchronous>, transform_indices = @transform_6, window_bounds = array<i64: 1, 32>}, {pipeline_mode = #tpu.pipeline_mode<synchronous>, transform_indices = @transform_7, window_bounds = array<i64: 32, 96>}, {pipeline_mode = #tpu.pipeline_mode<synchronous>, transform_indices = @transform_8, window_bounds = array<i64: 1, 96>}, {pipeline_mode = #tpu.pipeline_mode<synchronous>, transform_indices = @transform_9, window_bounds = array<i64: 32, 32>}, {pipeline_mode = #tpu.pipeline_mode<synchronous>, transform_indices = @transform_10, window_bounds = array<i64: 1, 32>}, {pipeline_mode = #tpu.pipeline_mode<synchronous>, transform_indices = @transform_11, window_bounds = array<i64: 1, 32>}, {pipeline_mode = #tpu.pipeline_mode<synchronous>, transform_indices = @transform_12, window_bounds = array<i64: 1, 32>}, {pipeline_mode = #tpu.pipeline_mode<synchronous>, transform_indices = @transform_13, window_bounds = array<i64: 32, 128>}, {pipeline_mode = #tpu.pipeline_mode<synchronous>, transform_indices = @transform_14, window_bounds = array<i64: 1, 128>}, {pipeline_mode = #tpu.pipeline_mode<synchronous>, transform_indices = @transform_15, window_bounds = array<i64: 128, 32>}, {pipeline_mode = #tpu.pipeline_mode<synchronous>, transform_indices = @transform_16, window_bounds = array<i64: 1, 32>}, {pipeline_mode = #tpu.pipeline_mode<synchronous>, transform_indices = @transform_17, window_bounds = array<i64: 64, 64>}, {pipeline_mode = #tpu.pipeline_mode<synchronous>, transform_indices = @transform_18, window_bounds = array<i64: 576, 64>}, {pipeline_mode = #tpu.pipeline_mode<synchronous>, transform_indices = @transform_19, window_bounds = array<i64: 9, 32>}, {pipeline_mode = #tpu.pipeline_mode<synchronous>, transform_indices = @transform_20, window_bounds = array<i64: 1, 32>}, {pipeline_mode = #tpu.pipeline_mode<synchronous>, transform_indices = @transform_21, window_bounds = array<i64: 1, 32>}, {pipeline_mode = #tpu.pipeline_mode<synchronous>, transform_indices = @transform_22, window_bounds = array<i64: 1, 32>}, {pipeline_mode = #tpu.pipeline_mode<synchronous>, transform_indices = @transform_23, window_bounds = array<i64: 32, 32>}, {pipeline_mode = #tpu.pipeline_mode<synchronous>, transform_indices = @transform_24, window_bounds = array<i64: 1, 32>}, {pipeline_mode = #tpu.pipeline_mode<synchronous>, transform_indices = @transform_25, window_bounds = array<i64: 64, 64>}, {pipeline_mode = #tpu.pipeline_mode<synchronous>, transform_indices = @transform_26, window_bounds = array<i64: 512, 32>}, {pipeline_mode = #tpu.pipeline_mode<synchronous>, transform_indices = @transform_27, window_bounds = array<i64: 1, 32>}, {pipeline_mode = #tpu.pipeline_mode<synchronous>, transform_indices = @transform_28, window_bounds = array<i64: 1, 32>}, {pipeline_mode = #tpu.pipeline_mode<synchronous>, transform_indices = @transform_29, window_bounds = array<i64: 1, 32>}, {pipeline_mode = #tpu.pipeline_mode<synchronous>, transform_indices = @transform_30, window_bounds = array<i64: 32, 64>}, {pipeline_mode = #tpu.pipeline_mode<synchronous>, transform_indices = @transform_31, window_bounds = array<i64: 1, 64>}, {pipeline_mode = #tpu.pipeline_mode<synchronous>, transform_indices = @transform_32, window_bounds = array<i64: 32, 32>}, {pipeline_mode = #tpu.pipeline_mode<synchronous>, transform_indices = @transform_33, window_bounds = array<i64: 1, 32>}, {pipeline_mode = #tpu.pipeline_mode<synchronous>, transform_indices = @transform_34, window_bounds = array<i64: 1, 32>}, {pipeline_mode = #tpu.pipeline_mode<synchronous>, transform_indices = @transform_35, window_bounds = array<i64: 1, 32>}, {pipeline_mode = #tpu.pipeline_mode<synchronous>, transform_indices = @transform_36, window_bounds = array<i64: 32, 128>}, {pipeline_mode = #tpu.pipeline_mode<synchronous>, transform_indices = @transform_37, window_bounds = array<i64: 1, 128>}, {pipeline_mode = #tpu.pipeline_mode<synchronous>, transform_indices = @transform_38, window_bounds = array<i64: 128, 32>}, {pipeline_mode = #tpu.pipeline_mode<synchronous>, transform_indices = @transform_39, window_bounds = array<i64: 1, 32>}, {pipeline_mode = #tpu.pipeline_mode<synchronous>, transform_indices = @transform_40, window_bounds = array<i64: 64, 64>}, {transform_indices = @transform_41, window_bounds = array<i64: 1, 16, 128>}]} {
    %c0 = arith.constant 0 : index
    %c0_0 = arith.constant 0 : index
    %c0_1 = arith.constant 0 : index
    %0 = vector.load %arg1[%c0, %c0_0, %c0_1] : memref<1x64x48xf32, #tpu.memory_space<vmem>>, vector<1x64x48xf32>
    %1 = vector.shape_cast %0 : vector<1x64x48xf32> to vector<64x48xf32>
    %c0_2 = arith.constant 0 : index
    %c0_3 = arith.constant 0 : index
    %2 = vector.load %arg2[%c0_2, %c0_3] : memref<48x32xf32, #tpu.memory_space<vmem>>, vector<48x32xf32>
    %3 = arith.truncf %1 : vector<64x48xf32> to vector<64x48xbf16>
    %4 = arith.truncf %2 : vector<48x32xf32> to vector<48x32xbf16>
    %cst = arith.constant dense<0.000000e+00> : vector<64x32xf32>
    %5 = tpu.matmul %3, %4, %cst {dimension_numbers = #tpu.dot_dimension_numbers<[1], [0], [0], [1], [0, 0, 1, 1], [], []>} : vector<64x48xbf16>, vector<48x32xbf16>, vector<64x32xf32> -> vector<64x32xf32>
    %c0_4 = arith.constant 0 : index
    %c0_5 = arith.constant 0 : index
    %6 = vector.load %arg3[%c0_4, %c0_5] : memref<1x32xf32, #tpu.memory_space<vmem>>, vector<1x32xf32>
    %7 = vector.broadcast %6 : vector<1x32xf32> to vector<64x32xf32>
    %8 = arith.addf %5, %7 : vector<64x32xf32>
    %c0_6 = arith.constant 0 : index
    %c0_7 = arith.constant 0 : index
    %9 = vector.load %arg4[%c0_6, %c0_7] : memref<1x32xf32, #tpu.memory_space<vmem>>, vector<1x32xf32>
    %c0_8 = arith.constant 0 : index
    %c0_9 = arith.constant 0 : index
    %10 = vector.load %arg5[%c0_8, %c0_9] : memref<1x32xf32, #tpu.memory_space<vmem>>, vector<1x32xf32>
    %cst_10 = arith.constant dense<0.000000e+00> : vector<64xf32>
    %11 = vector.multi_reduction <add>, %8, %cst_10 [1] : vector<64x32xf32> to vector<64xf32>
    %12 = vector.shape_cast %11 : vector<64xf32> to vector<64x1xf32>
    %cst_11 = arith.constant 3.200000e+01 : f32
    %13 = vector.broadcast %cst_11 : f32 to vector<64x1xf32>
    %14 = arith.divf %12, %13 : vector<64x1xf32>
    %15 = vector.broadcast %14 : vector<64x1xf32> to vector<64x32xf32>
    %16 = arith.subf %8, %15 : vector<64x32xf32>
    %17 = arith.mulf %16, %16 : vector<64x32xf32>
    %cst_12 = arith.constant dense<0.000000e+00> : vector<64xf32>
    %18 = vector.multi_reduction <add>, %17, %cst_12 [1] : vector<64x32xf32> to vector<64xf32>
    %19 = vector.shape_cast %18 : vector<64xf32> to vector<64x1xf32>
    %cst_13 = arith.constant 3.200000e+01 : f32
    %20 = vector.broadcast %cst_13 : f32 to vector<64x1xf32>
    %21 = arith.divf %19, %20 : vector<64x1xf32>
    %cst_14 = arith.constant 9.99999974E-6 : f32
    %22 = vector.broadcast %cst_14 : f32 to vector<64x1xf32>
    %23 = arith.addf %21, %22 : vector<64x1xf32>
    %24 = math.rsqrt %23 : vector<64x1xf32>
    %25 = vector.broadcast %24 : vector<64x1xf32> to vector<64x32xf32>
    %26 = arith.mulf %16, %25 : vector<64x32xf32>
    %27 = vector.broadcast %9 : vector<1x32xf32> to vector<64x32xf32>
    %28 = arith.mulf %26, %27 : vector<64x32xf32>
    %29 = vector.broadcast %10 : vector<1x32xf32> to vector<64x32xf32>
    %30 = arith.addf %28, %29 : vector<64x32xf32>
    %c0_15 = arith.constant 0 : index
    %c0_16 = arith.constant 0 : index
    %31 = vector.load %arg6[%c0_15, %c0_16] : memref<1x32xf32, #tpu.memory_space<vmem>>, vector<1x32xf32>
    %c0_17 = arith.constant 0 : index
    %c0_18 = arith.constant 0 : index
    %32 = vector.load %arg7[%c0_17, %c0_18] : memref<1x32xf32, #tpu.memory_space<vmem>>, vector<1x32xf32>
    %cst_19 = arith.constant dense<0.000000e+00> : vector<64xf32>
    %33 = vector.multi_reduction <add>, %30, %cst_19 [1] : vector<64x32xf32> to vector<64xf32>
    %34 = vector.shape_cast %33 : vector<64xf32> to vector<64x1xf32>
    %cst_20 = arith.constant 3.200000e+01 : f32
    %35 = vector.broadcast %cst_20 : f32 to vector<64x1xf32>
    %36 = arith.divf %34, %35 : vector<64x1xf32>
    %37 = vector.broadcast %36 : vector<64x1xf32> to vector<64x32xf32>
    %38 = arith.subf %30, %37 : vector<64x32xf32>
    %39 = arith.mulf %38, %38 : vector<64x32xf32>
    %cst_21 = arith.constant dense<0.000000e+00> : vector<64xf32>
    %40 = vector.multi_reduction <add>, %39, %cst_21 [1] : vector<64x32xf32> to vector<64xf32>
    %41 = vector.shape_cast %40 : vector<64xf32> to vector<64x1xf32>
    %cst_22 = arith.constant 3.200000e+01 : f32
    %42 = vector.broadcast %cst_22 : f32 to vector<64x1xf32>
    %43 = arith.divf %41, %42 : vector<64x1xf32>
    %cst_23 = arith.constant 9.99999997E-7 : f32
    %44 = vector.broadcast %cst_23 : f32 to vector<64x1xf32>
    %45 = arith.addf %43, %44 : vector<64x1xf32>
    %46 = math.rsqrt %45 : vector<64x1xf32>
    %47 = vector.broadcast %46 : vector<64x1xf32> to vector<64x32xf32>
    %48 = arith.mulf %38, %47 : vector<64x32xf32>
    %49 = vector.broadcast %31 : vector<1x32xf32> to vector<64x32xf32>
    %50 = arith.mulf %48, %49 : vector<64x32xf32>
    %51 = vector.broadcast %32 : vector<1x32xf32> to vector<64x32xf32>
    %52 = arith.addf %50, %51 : vector<64x32xf32>
    %c0_24 = arith.constant 0 : index
    %c0_25 = arith.constant 0 : index
    %53 = vector.load %arg8[%c0_24, %c0_25] : memref<32x96xf32, #tpu.memory_space<vmem>>, vector<32x96xf32>
    %54 = arith.truncf %52 : vector<64x32xf32> to vector<64x32xbf16>
    %55 = arith.truncf %53 : vector<32x96xf32> to vector<32x96xbf16>
    %cst_26 = arith.constant dense<0.000000e+00> : vector<64x96xf32>
    %56 = tpu.matmul %54, %55, %cst_26 {dimension_numbers = #tpu.dot_dimension_numbers<[1], [0], [0], [1], [0, 0, 1, 1], [], []>} : vector<64x32xbf16>, vector<32x96xbf16>, vector<64x96xf32> -> vector<64x96xf32>
    %c0_27 = arith.constant 0 : index
    %c0_28 = arith.constant 0 : index
    %57 = vector.load %arg9[%c0_27, %c0_28] : memref<1x96xf32, #tpu.memory_space<vmem>>, vector<1x96xf32>
    %58 = vector.broadcast %57 : vector<1x96xf32> to vector<64x96xf32>
    %59 = arith.addf %56, %58 : vector<64x96xf32>
    %60 = vector.extract_strided_slice %59 {offsets = [0, 0], sizes = [64, 16], strides = [1, 1]} : vector<64x96xf32> to vector<64x16xf32>
    %61 = vector.extract_strided_slice %59 {offsets = [0, 16], sizes = [64, 16], strides = [1, 1]} : vector<64x96xf32> to vector<64x16xf32>
    %62 = vector.shape_cast %60 : vector<64x16xf32> to vector<1x64x16xf32>
    %63 = vector.shape_cast %61 : vector<64x16xf32> to vector<1x64x16xf32>
    %64 = tpu.concatenate %62, %63 in 0 : vector<1x64x16xf32>, vector<1x64x16xf32> -> vector<2x64x16xf32>
    %65 = vector.extract_strided_slice %59 {offsets = [0, 32], sizes = [64, 16], strides = [1, 1]} : vector<64x96xf32> to vector<64x16xf32>
    %66 = vector.extract_strided_slice %59 {offsets = [0, 48], sizes = [64, 16], strides = [1, 1]} : vector<64x96xf32> to vector<64x16xf32>
    %67 = vector.shape_cast %65 : vector<64x16xf32> to vector<1x64x16xf32>
    %68 = vector.shape_cast %66 : vector<64x16xf32> to vector<1x64x16xf32>
    %69 = tpu.concatenate %67, %68 in 0 : vector<1x64x16xf32>, vector<1x64x16xf32> -> vector<2x64x16xf32>
    %70 = vector.extract_strided_slice %59 {offsets = [0, 64], sizes = [64, 16], strides = [1, 1]} : vector<64x96xf32> to vector<64x16xf32>
    %71 = vector.extract_strided_slice %59 {offsets = [0, 80], sizes = [64, 16], strides = [1, 1]} : vector<64x96xf32> to vector<64x16xf32>
    %72 = vector.shape_cast %70 : vector<64x16xf32> to vector<1x64x16xf32>
    %73 = vector.shape_cast %71 : vector<64x16xf32> to vector<1x64x16xf32>
    %74 = tpu.concatenate %72, %73 in 0 : vector<1x64x16xf32>, vector<1x64x16xf32> -> vector<2x64x16xf32>
    %75 = arith.truncf %64 : vector<2x64x16xf32> to vector<2x64x16xbf16>
    %76 = arith.truncf %69 : vector<2x64x16xf32> to vector<2x64x16xbf16>
    %cst_29 = arith.constant dense<0.000000e+00> : vector<2x64x64xf32>
    %77 = tpu.matmul %75, %76, %cst_29 {dimension_numbers = #tpu.dot_dimension_numbers<[2], [2], [1], [1], [0, 0, 0, 1, 1, 1], [0], [0]>} : vector<2x64x16xbf16>, vector<2x64x16xbf16>, vector<2x64x64xf32> -> vector<2x64x64xf32>
    %c0_30 = arith.constant 0 : index
    %c0_31 = arith.constant 0 : index
    %78 = vector.load %arg18[%c0_30, %c0_31] : memref<64x64xf32, #tpu.memory_space<vmem>>, vector<64x64xf32>
    %79 = vector.shape_cast %78 : vector<64x64xf32> to vector<1x64x64xf32>
    %80 = vector.broadcast %79 : vector<1x64x64xf32> to vector<2x64x64xf32>
    %81 = arith.addf %77, %80 : vector<2x64x64xf32>
    %cst_32 = arith.constant dense<0xFF800000> : vector<2x64xf32>
    %82 = vector.multi_reduction <maximumf>, %81, %cst_32 [2] : vector<2x64x64xf32> to vector<2x64xf32>
    %83 = vector.shape_cast %82 : vector<2x64xf32> to vector<2x64x1xf32>
    %84 = vector.broadcast %83 : vector<2x64x1xf32> to vector<2x64x64xf32>
    %85 = arith.subf %81, %84 : vector<2x64x64xf32>
    %86 = math.exp %85 : vector<2x64x64xf32>
    %cst_33 = arith.constant dense<0.000000e+00> : vector<2x64xf32>
    %87 = vector.multi_reduction <add>, %86, %cst_33 [2] : vector<2x64x64xf32> to vector<2x64xf32>
    %88 = vector.shape_cast %87 : vector<2x64xf32> to vector<2x64x1xf32>
    %89 = tpu.reciprocal %88 {approx = true} : vector<2x64x1xf32> -> vector<2x64x1xf32>
    %90 = vector.broadcast %89 : vector<2x64x1xf32> to vector<2x64x64xf32>
    %91 = arith.mulf %86, %90 : vector<2x64x64xf32>
    %92 = arith.truncf %91 : vector<2x64x64xf32> to vector<2x64x64xbf16>
    %93 = arith.truncf %74 : vector<2x64x16xf32> to vector<2x64x16xbf16>
    %cst_34 = arith.constant dense<0.000000e+00> : vector<2x64x16xf32>
    %94 = tpu.matmul %92, %93, %cst_34 {dimension_numbers = #tpu.dot_dimension_numbers<[2], [1], [1], [2], [0, 0, 0, 1, 1, 2], [0], [0]>} : vector<2x64x64xbf16>, vector<2x64x16xbf16>, vector<2x64x16xf32> -> vector<2x64x16xf32>
    %95 = vector.extract_strided_slice %94 {offsets = [0, 0, 0], sizes = [1, 64, 16], strides = [1, 1, 1]} : vector<2x64x16xf32> to vector<1x64x16xf32>
    %96 = vector.shape_cast %95 : vector<1x64x16xf32> to vector<64x16xf32>
    %97 = vector.extract_strided_slice %94 {offsets = [1, 0, 0], sizes = [1, 64, 16], strides = [1, 1, 1]} : vector<2x64x16xf32> to vector<1x64x16xf32>
    %98 = vector.shape_cast %97 : vector<1x64x16xf32> to vector<64x16xf32>
    %99 = tpu.concatenate %96, %98 in 1 : vector<64x16xf32>, vector<64x16xf32> -> vector<64x32xf32>
    %c0_35 = arith.constant 0 : index
    %c0_36 = arith.constant 0 : index
    %100 = vector.load %arg10[%c0_35, %c0_36] : memref<32x32xf32, #tpu.memory_space<vmem>>, vector<32x32xf32>
    %101 = arith.truncf %99 : vector<64x32xf32> to vector<64x32xbf16>
    %102 = arith.truncf %100 : vector<32x32xf32> to vector<32x32xbf16>
    %cst_37 = arith.constant dense<0.000000e+00> : vector<64x32xf32>
    %103 = tpu.matmul %101, %102, %cst_37 {dimension_numbers = #tpu.dot_dimension_numbers<[1], [0], [0], [1], [0, 0, 1, 1], [], []>} : vector<64x32xbf16>, vector<32x32xbf16>, vector<64x32xf32> -> vector<64x32xf32>
    %104 = arith.addf %30, %103 : vector<64x32xf32>
    %c0_38 = arith.constant 0 : index
    %c0_39 = arith.constant 0 : index
    %105 = vector.load %arg11[%c0_38, %c0_39] : memref<1x32xf32, #tpu.memory_space<vmem>>, vector<1x32xf32>
    %106 = vector.broadcast %105 : vector<1x32xf32> to vector<64x32xf32>
    %107 = arith.addf %104, %106 : vector<64x32xf32>
    %c0_40 = arith.constant 0 : index
    %c0_41 = arith.constant 0 : index
    %108 = vector.load %arg12[%c0_40, %c0_41] : memref<1x32xf32, #tpu.memory_space<vmem>>, vector<1x32xf32>
    %c0_42 = arith.constant 0 : index
    %c0_43 = arith.constant 0 : index
    %109 = vector.load %arg13[%c0_42, %c0_43] : memref<1x32xf32, #tpu.memory_space<vmem>>, vector<1x32xf32>
    %cst_44 = arith.constant dense<0.000000e+00> : vector<64xf32>
    %110 = vector.multi_reduction <add>, %107, %cst_44 [1] : vector<64x32xf32> to vector<64xf32>
    %111 = vector.shape_cast %110 : vector<64xf32> to vector<64x1xf32>
    %cst_45 = arith.constant 3.200000e+01 : f32
    %112 = vector.broadcast %cst_45 : f32 to vector<64x1xf32>
    %113 = arith.divf %111, %112 : vector<64x1xf32>
    %114 = vector.broadcast %113 : vector<64x1xf32> to vector<64x32xf32>
    %115 = arith.subf %107, %114 : vector<64x32xf32>
    %116 = arith.mulf %115, %115 : vector<64x32xf32>
    %cst_46 = arith.constant dense<0.000000e+00> : vector<64xf32>
    %117 = vector.multi_reduction <add>, %116, %cst_46 [1] : vector<64x32xf32> to vector<64xf32>
    %118 = vector.shape_cast %117 : vector<64xf32> to vector<64x1xf32>
    %cst_47 = arith.constant 3.200000e+01 : f32
    %119 = vector.broadcast %cst_47 : f32 to vector<64x1xf32>
    %120 = arith.divf %118, %119 : vector<64x1xf32>
    %cst_48 = arith.constant 9.99999997E-7 : f32
    %121 = vector.broadcast %cst_48 : f32 to vector<64x1xf32>
    %122 = arith.addf %120, %121 : vector<64x1xf32>
    %123 = math.rsqrt %122 : vector<64x1xf32>
    %124 = vector.broadcast %123 : vector<64x1xf32> to vector<64x32xf32>
    %125 = arith.mulf %115, %124 : vector<64x32xf32>
    %126 = vector.broadcast %108 : vector<1x32xf32> to vector<64x32xf32>
    %127 = arith.mulf %125, %126 : vector<64x32xf32>
    %128 = vector.broadcast %109 : vector<1x32xf32> to vector<64x32xf32>
    %129 = arith.addf %127, %128 : vector<64x32xf32>
    %c0_49 = arith.constant 0 : index
    %c0_50 = arith.constant 0 : index
    %130 = vector.load %arg14[%c0_49, %c0_50] : memref<32x128xf32, #tpu.memory_space<vmem>>, vector<32x128xf32>
    %131 = arith.truncf %129 : vector<64x32xf32> to vector<64x32xbf16>
    %132 = arith.truncf %130 : vector<32x128xf32> to vector<32x128xbf16>
    %cst_51 = arith.constant dense<0.000000e+00> : vector<64x128xf32>
    %133 = tpu.matmul %131, %132, %cst_51 {dimension_numbers = #tpu.dot_dimension_numbers<[1], [0], [0], [1], [0, 0, 1, 1], [], []>} : vector<64x32xbf16>, vector<32x128xbf16>, vector<64x128xf32> -> vector<64x128xf32>
    %c0_52 = arith.constant 0 : index
    %c0_53 = arith.constant 0 : index
    %134 = vector.load %arg15[%c0_52, %c0_53] : memref<1x128xf32, #tpu.memory_space<vmem>>, vector<1x128xf32>
    %135 = vector.broadcast %134 : vector<1x128xf32> to vector<64x128xf32>
    %136 = arith.addf %133, %135 : vector<64x128xf32>
    %cst_54 = arith.constant 0.707106769 : f32
    %137 = vector.broadcast %cst_54 : f32 to vector<64x128xf32>
    %138 = arith.mulf %136, %137 : vector<64x128xf32>
    %139 = math.absf %138 : vector<64x128xf32>
    %cst_55 = arith.constant 0.327591091 : f32
    %140 = vector.broadcast %cst_55 : f32 to vector<64x128xf32>
    %141 = arith.mulf %140, %139 : vector<64x128xf32>
    %cst_56 = arith.constant 1.000000e+00 : f32
    %142 = vector.broadcast %cst_56 : f32 to vector<64x128xf32>
    %143 = arith.addf %142, %141 : vector<64x128xf32>
    %cst_57 = arith.constant 1.000000e+00 : f32
    %144 = vector.broadcast %cst_57 : f32 to vector<64x128xf32>
    %145 = arith.divf %144, %143 : vector<64x128xf32>
    %cst_58 = arith.constant 1.06140542 : f32
    %146 = vector.broadcast %cst_58 : f32 to vector<64x128xf32>
    %147 = arith.mulf %145, %146 : vector<64x128xf32>
    %cst_59 = arith.constant -1.45315206 : f32
    %148 = vector.broadcast %cst_59 : f32 to vector<64x128xf32>
    %149 = arith.addf %148, %147 : vector<64x128xf32>
    %150 = arith.mulf %145, %149 : vector<64x128xf32>
    %cst_60 = arith.constant 1.42141378 : f32
    %151 = vector.broadcast %cst_60 : f32 to vector<64x128xf32>
    %152 = arith.addf %151, %150 : vector<64x128xf32>
    %153 = arith.mulf %145, %152 : vector<64x128xf32>
    %cst_61 = arith.constant -0.284496725 : f32
    %154 = vector.broadcast %cst_61 : f32 to vector<64x128xf32>
    %155 = arith.addf %154, %153 : vector<64x128xf32>
    %156 = arith.mulf %145, %155 : vector<64x128xf32>
    %cst_62 = arith.constant 0.254829586 : f32
    %157 = vector.broadcast %cst_62 : f32 to vector<64x128xf32>
    %158 = arith.addf %157, %156 : vector<64x128xf32>
    %159 = arith.mulf %145, %158 : vector<64x128xf32>
    %cst_63 = arith.constant 0.000000e+00 : f32
    %160 = vector.broadcast %cst_63 : f32 to vector<64x128xf32>
    %161 = arith.subf %160, %139 : vector<64x128xf32>
    %162 = arith.mulf %161, %139 : vector<64x128xf32>
    %163 = math.exp %162 : vector<64x128xf32>
    %164 = arith.mulf %159, %163 : vector<64x128xf32>
    %cst_64 = arith.constant 1.000000e+00 : f32
    %165 = vector.broadcast %cst_64 : f32 to vector<64x128xf32>
    %166 = arith.subf %165, %164 : vector<64x128xf32>
    %cst_65 = arith.constant 0.000000e+00 : f32
    %167 = vector.broadcast %cst_65 : f32 to vector<64x128xf32>
    %168 = arith.cmpf oge, %138, %167 : vector<64x128xf32>
    %cst_66 = arith.constant 0.000000e+00 : f32
    %169 = vector.broadcast %cst_66 : f32 to vector<64x128xf32>
    %170 = arith.subf %169, %166 : vector<64x128xf32>
    %171 = arith.select %168, %166, %170 : vector<64x128xi1>, vector<64x128xf32>
    %cst_67 = arith.constant 5.000000e-01 : f32
    %172 = vector.broadcast %cst_67 : f32 to vector<64x128xf32>
    %173 = arith.mulf %172, %136 : vector<64x128xf32>
    %cst_68 = arith.constant 1.000000e+00 : f32
    %174 = vector.broadcast %cst_68 : f32 to vector<64x128xf32>
    %175 = arith.addf %174, %171 : vector<64x128xf32>
    %176 = arith.mulf %173, %175 : vector<64x128xf32>
    %c0_69 = arith.constant 0 : index
    %c0_70 = arith.constant 0 : index
    %177 = vector.load %arg16[%c0_69, %c0_70] : memref<128x32xf32, #tpu.memory_space<vmem>>, vector<128x32xf32>
    %178 = arith.truncf %176 : vector<64x128xf32> to vector<64x128xbf16>
    %179 = arith.truncf %177 : vector<128x32xf32> to vector<128x32xbf16>
    %cst_71 = arith.constant dense<0.000000e+00> : vector<64x32xf32>
    %180 = tpu.matmul %178, %179, %cst_71 {dimension_numbers = #tpu.dot_dimension_numbers<[1], [0], [0], [1], [0, 0, 1, 1], [], []>} : vector<64x128xbf16>, vector<128x32xbf16>, vector<64x32xf32> -> vector<64x32xf32>
    %181 = arith.addf %107, %180 : vector<64x32xf32>
    %c0_72 = arith.constant 0 : index
    %c0_73 = arith.constant 0 : index
    %182 = vector.load %arg17[%c0_72, %c0_73] : memref<1x32xf32, #tpu.memory_space<vmem>>, vector<1x32xf32>
    %183 = vector.broadcast %182 : vector<1x32xf32> to vector<64x32xf32>
    %184 = arith.addf %181, %183 : vector<64x32xf32>
    %c0_74 = arith.constant 0 : index
    %c0_75 = arith.constant 0 : index
    %185 = vector.load %arg19[%c0_74, %c0_75] : memref<576x64xbf16, #tpu.memory_space<vmem>>, vector<576x64xbf16>
    %186 = arith.truncf %184 : vector<64x32xf32> to vector<64x32xbf16>
    %cst_76 = arith.constant dense<0.000000e+00> : vector<576x32xf32>
    %187 = tpu.matmul %185, %186, %cst_76 {dimension_numbers = #tpu.dot_dimension_numbers<[1], [0], [0], [1], [0, 0, 1, 1], [], []>} : vector<576x64xbf16>, vector<64x32xbf16>, vector<576x32xf32> -> vector<576x32xf32>
    %188 = vector.shape_cast %187 : vector<576x32xf32> to vector<9x64x32xf32>
    %189 = vector.extract_strided_slice %188 {offsets = [0, 0, 0], sizes = [1, 64, 32], strides = [1, 1, 1]} : vector<9x64x32xf32> to vector<1x64x32xf32>
    %190 = vector.shape_cast %189 : vector<1x64x32xf32> to vector<64x32xf32>
    %c0_77 = arith.constant 0 : index
    %c0_78 = arith.constant 0 : index
    %191 = vector.load %arg20[%c0_77, %c0_78] : memref<9x32xf32, #tpu.memory_space<vmem>>, vector<1x32xf32>
    %192 = vector.broadcast %191 : vector<1x32xf32> to vector<64x32xf32>
    %193 = arith.mulf %190, %192 : vector<64x32xf32>
    %194 = vector.extract_strided_slice %188 {offsets = [1, 0, 0], sizes = [1, 64, 32], strides = [1, 1, 1]} : vector<9x64x32xf32> to vector<1x64x32xf32>
    %195 = vector.shape_cast %194 : vector<1x64x32xf32> to vector<64x32xf32>
    %c1 = arith.constant 1 : index
    %c0_79 = arith.constant 0 : index
    %196 = vector.load %arg20[%c1, %c0_79] : memref<9x32xf32, #tpu.memory_space<vmem>>, vector<1x32xf32>
    %197 = vector.broadcast %196 : vector<1x32xf32> to vector<64x32xf32>
    %198 = arith.mulf %195, %197 : vector<64x32xf32>
    %199 = arith.addf %193, %198 : vector<64x32xf32>
    %200 = vector.extract_strided_slice %188 {offsets = [2, 0, 0], sizes = [1, 64, 32], strides = [1, 1, 1]} : vector<9x64x32xf32> to vector<1x64x32xf32>
    %201 = vector.shape_cast %200 : vector<1x64x32xf32> to vector<64x32xf32>
    %c2 = arith.constant 2 : index
    %c0_80 = arith.constant 0 : index
    %202 = vector.load %arg20[%c2, %c0_80] : memref<9x32xf32, #tpu.memory_space<vmem>>, vector<1x32xf32>
    %203 = vector.broadcast %202 : vector<1x32xf32> to vector<64x32xf32>
    %204 = arith.mulf %201, %203 : vector<64x32xf32>
    %205 = arith.addf %199, %204 : vector<64x32xf32>
    %206 = vector.extract_strided_slice %188 {offsets = [3, 0, 0], sizes = [1, 64, 32], strides = [1, 1, 1]} : vector<9x64x32xf32> to vector<1x64x32xf32>
    %207 = vector.shape_cast %206 : vector<1x64x32xf32> to vector<64x32xf32>
    %c3 = arith.constant 3 : index
    %c0_81 = arith.constant 0 : index
    %208 = vector.load %arg20[%c3, %c0_81] : memref<9x32xf32, #tpu.memory_space<vmem>>, vector<1x32xf32>
    %209 = vector.broadcast %208 : vector<1x32xf32> to vector<64x32xf32>
    %210 = arith.mulf %207, %209 : vector<64x32xf32>
    %211 = arith.addf %205, %210 : vector<64x32xf32>
    %212 = vector.extract_strided_slice %188 {offsets = [4, 0, 0], sizes = [1, 64, 32], strides = [1, 1, 1]} : vector<9x64x32xf32> to vector<1x64x32xf32>
    %213 = vector.shape_cast %212 : vector<1x64x32xf32> to vector<64x32xf32>
    %c4 = arith.constant 4 : index
    %c0_82 = arith.constant 0 : index
    %214 = vector.load %arg20[%c4, %c0_82] : memref<9x32xf32, #tpu.memory_space<vmem>>, vector<1x32xf32>
    %215 = vector.broadcast %214 : vector<1x32xf32> to vector<64x32xf32>
    %216 = arith.mulf %213, %215 : vector<64x32xf32>
    %217 = arith.addf %211, %216 : vector<64x32xf32>
    %218 = vector.extract_strided_slice %188 {offsets = [5, 0, 0], sizes = [1, 64, 32], strides = [1, 1, 1]} : vector<9x64x32xf32> to vector<1x64x32xf32>
    %219 = vector.shape_cast %218 : vector<1x64x32xf32> to vector<64x32xf32>
    %c5 = arith.constant 5 : index
    %c0_83 = arith.constant 0 : index
    %220 = vector.load %arg20[%c5, %c0_83] : memref<9x32xf32, #tpu.memory_space<vmem>>, vector<1x32xf32>
    %221 = vector.broadcast %220 : vector<1x32xf32> to vector<64x32xf32>
    %222 = arith.mulf %219, %221 : vector<64x32xf32>
    %223 = arith.addf %217, %222 : vector<64x32xf32>
    %224 = vector.extract_strided_slice %188 {offsets = [6, 0, 0], sizes = [1, 64, 32], strides = [1, 1, 1]} : vector<9x64x32xf32> to vector<1x64x32xf32>
    %225 = vector.shape_cast %224 : vector<1x64x32xf32> to vector<64x32xf32>
    %c6 = arith.constant 6 : index
    %c0_84 = arith.constant 0 : index
    %226 = vector.load %arg20[%c6, %c0_84] : memref<9x32xf32, #tpu.memory_space<vmem>>, vector<1x32xf32>
    %227 = vector.broadcast %226 : vector<1x32xf32> to vector<64x32xf32>
    %228 = arith.mulf %225, %227 : vector<64x32xf32>
    %229 = arith.addf %223, %228 : vector<64x32xf32>
    %230 = vector.extract_strided_slice %188 {offsets = [7, 0, 0], sizes = [1, 64, 32], strides = [1, 1, 1]} : vector<9x64x32xf32> to vector<1x64x32xf32>
    %231 = vector.shape_cast %230 : vector<1x64x32xf32> to vector<64x32xf32>
    %c7 = arith.constant 7 : index
    %c0_85 = arith.constant 0 : index
    %232 = vector.load %arg20[%c7, %c0_85] : memref<9x32xf32, #tpu.memory_space<vmem>>, vector<1x32xf32>
    %233 = vector.broadcast %232 : vector<1x32xf32> to vector<64x32xf32>
    %234 = arith.mulf %231, %233 : vector<64x32xf32>
    %235 = arith.addf %229, %234 : vector<64x32xf32>
    %236 = vector.extract_strided_slice %188 {offsets = [8, 0, 0], sizes = [1, 64, 32], strides = [1, 1, 1]} : vector<9x64x32xf32> to vector<1x64x32xf32>
    %237 = vector.shape_cast %236 : vector<1x64x32xf32> to vector<64x32xf32>
    %c8 = arith.constant 8 : index
    %c0_86 = arith.constant 0 : index
    %238 = vector.load %arg20[%c8, %c0_86] : memref<9x32xf32, #tpu.memory_space<vmem>>, vector<1x32xf32>
    %239 = vector.broadcast %238 : vector<1x32xf32> to vector<64x32xf32>
    %240 = arith.mulf %237, %239 : vector<64x32xf32>
    %241 = arith.addf %235, %240 : vector<64x32xf32>
    %242 = arith.addf %184, %241 : vector<64x32xf32>
    %c0_87 = arith.constant 0 : index
    %c0_88 = arith.constant 0 : index
    %243 = vector.load %arg21[%c0_87, %c0_88] : memref<1x32xf32, #tpu.memory_space<vmem>>, vector<1x32xf32>
    %244 = vector.broadcast %243 : vector<1x32xf32> to vector<64x32xf32>
    %245 = arith.addf %242, %244 : vector<64x32xf32>
    %c0_89 = arith.constant 0 : index
    %c0_90 = arith.constant 0 : index
    %246 = vector.load %arg22[%c0_89, %c0_90] : memref<1x32xf32, #tpu.memory_space<vmem>>, vector<1x32xf32>
    %c0_91 = arith.constant 0 : index
    %c0_92 = arith.constant 0 : index
    %247 = vector.load %arg23[%c0_91, %c0_92] : memref<1x32xf32, #tpu.memory_space<vmem>>, vector<1x32xf32>
    %cst_93 = arith.constant dense<0.000000e+00> : vector<64xf32>
    %248 = vector.multi_reduction <add>, %245, %cst_93 [1] : vector<64x32xf32> to vector<64xf32>
    %249 = vector.shape_cast %248 : vector<64xf32> to vector<64x1xf32>
    %cst_94 = arith.constant 3.200000e+01 : f32
    %250 = vector.broadcast %cst_94 : f32 to vector<64x1xf32>
    %251 = arith.divf %249, %250 : vector<64x1xf32>
    %252 = vector.broadcast %251 : vector<64x1xf32> to vector<64x32xf32>
    %253 = arith.subf %245, %252 : vector<64x32xf32>
    %254 = arith.mulf %253, %253 : vector<64x32xf32>
    %cst_95 = arith.constant dense<0.000000e+00> : vector<64xf32>
    %255 = vector.multi_reduction <add>, %254, %cst_95 [1] : vector<64x32xf32> to vector<64xf32>
    %256 = vector.shape_cast %255 : vector<64xf32> to vector<64x1xf32>
    %cst_96 = arith.constant 3.200000e+01 : f32
    %257 = vector.broadcast %cst_96 : f32 to vector<64x1xf32>
    %258 = arith.divf %256, %257 : vector<64x1xf32>
    %cst_97 = arith.constant 9.99999997E-7 : f32
    %259 = vector.broadcast %cst_97 : f32 to vector<64x1xf32>
    %260 = arith.addf %258, %259 : vector<64x1xf32>
    %261 = math.rsqrt %260 : vector<64x1xf32>
    %262 = vector.broadcast %261 : vector<64x1xf32> to vector<64x32xf32>
    %263 = arith.mulf %253, %262 : vector<64x32xf32>
    %264 = vector.broadcast %246 : vector<1x32xf32> to vector<64x32xf32>
    %265 = arith.mulf %263, %264 : vector<64x32xf32>
    %266 = vector.broadcast %247 : vector<1x32xf32> to vector<64x32xf32>
    %267 = arith.addf %265, %266 : vector<64x32xf32>
    %c0_98 = arith.constant 0 : index
    %c0_99 = arith.constant 0 : index
    %268 = vector.load %arg24[%c0_98, %c0_99] : memref<32x32xf32, #tpu.memory_space<vmem>>, vector<32x32xf32>
    %269 = arith.truncf %267 : vector<64x32xf32> to vector<64x32xbf16>
    %270 = arith.truncf %268 : vector<32x32xf32> to vector<32x32xbf16>
    %cst_100 = arith.constant dense<0.000000e+00> : vector<64x32xf32>
    %271 = tpu.matmul %269, %270, %cst_100 {dimension_numbers = #tpu.dot_dimension_numbers<[1], [0], [0], [1], [0, 0, 1, 1], [], []>} : vector<64x32xbf16>, vector<32x32xbf16>, vector<64x32xf32> -> vector<64x32xf32>
    %c0_101 = arith.constant 0 : index
    %c0_102 = arith.constant 0 : index
    %272 = vector.load %arg25[%c0_101, %c0_102] : memref<1x32xf32, #tpu.memory_space<vmem>>, vector<1x32xf32>
    %273 = vector.broadcast %272 : vector<1x32xf32> to vector<64x32xf32>
    %274 = arith.addf %271, %273 : vector<64x32xf32>
    %c0_103 = arith.constant 0 : index
    %c0_104 = arith.constant 0 : index
    %275 = vector.load %arg26[%c0_103, %c0_104] : memref<64x64xbf16, #tpu.memory_space<vmem>>, vector<64x64xbf16>
    %276 = arith.truncf %267 : vector<64x32xf32> to vector<64x32xbf16>
    %cst_105 = arith.constant dense<0.000000e+00> : vector<64x32xf32>
    %277 = tpu.matmul %275, %276, %cst_105 {dimension_numbers = #tpu.dot_dimension_numbers<[1], [0], [0], [1], [0, 0, 1, 1], [], []>} : vector<64x64xbf16>, vector<64x32xbf16>, vector<64x32xf32> -> vector<64x32xf32>
    %278 = vector.shape_cast %277 : vector<64x32xf32> to vector<16x4x32xf32>
    %279 = vector.extract_strided_slice %278 {offsets = [0, 0, 0], sizes = [1, 4, 32], strides = [1, 1, 1]} : vector<16x4x32xf32> to vector<1x4x32xf32>
    %280 = vector.shape_cast %279 : vector<1x4x32xf32> to vector<4x32xf32>
    %281 = vector.extract_strided_slice %278 {offsets = [1, 0, 0], sizes = [1, 4, 32], strides = [1, 1, 1]} : vector<16x4x32xf32> to vector<1x4x32xf32>
    %282 = vector.shape_cast %281 : vector<1x4x32xf32> to vector<4x32xf32>
    %283 = vector.extract_strided_slice %278 {offsets = [2, 0, 0], sizes = [1, 4, 32], strides = [1, 1, 1]} : vector<16x4x32xf32> to vector<1x4x32xf32>
    %284 = vector.shape_cast %283 : vector<1x4x32xf32> to vector<4x32xf32>
    %285 = vector.extract_strided_slice %278 {offsets = [3, 0, 0], sizes = [1, 4, 32], strides = [1, 1, 1]} : vector<16x4x32xf32> to vector<1x4x32xf32>
    %286 = vector.shape_cast %285 : vector<1x4x32xf32> to vector<4x32xf32>
    %287 = vector.extract_strided_slice %278 {offsets = [4, 0, 0], sizes = [1, 4, 32], strides = [1, 1, 1]} : vector<16x4x32xf32> to vector<1x4x32xf32>
    %288 = vector.shape_cast %287 : vector<1x4x32xf32> to vector<4x32xf32>
    %289 = vector.extract_strided_slice %278 {offsets = [5, 0, 0], sizes = [1, 4, 32], strides = [1, 1, 1]} : vector<16x4x32xf32> to vector<1x4x32xf32>
    %290 = vector.shape_cast %289 : vector<1x4x32xf32> to vector<4x32xf32>
    %291 = vector.extract_strided_slice %278 {offsets = [6, 0, 0], sizes = [1, 4, 32], strides = [1, 1, 1]} : vector<16x4x32xf32> to vector<1x4x32xf32>
    %292 = vector.shape_cast %291 : vector<1x4x32xf32> to vector<4x32xf32>
    %293 = vector.extract_strided_slice %278 {offsets = [7, 0, 0], sizes = [1, 4, 32], strides = [1, 1, 1]} : vector<16x4x32xf32> to vector<1x4x32xf32>
    %294 = vector.shape_cast %293 : vector<1x4x32xf32> to vector<4x32xf32>
    %295 = vector.extract_strided_slice %278 {offsets = [8, 0, 0], sizes = [1, 4, 32], strides = [1, 1, 1]} : vector<16x4x32xf32> to vector<1x4x32xf32>
    %296 = vector.shape_cast %295 : vector<1x4x32xf32> to vector<4x32xf32>
    %297 = vector.extract_strided_slice %278 {offsets = [9, 0, 0], sizes = [1, 4, 32], strides = [1, 1, 1]} : vector<16x4x32xf32> to vector<1x4x32xf32>
    %298 = vector.shape_cast %297 : vector<1x4x32xf32> to vector<4x32xf32>
    %299 = vector.extract_strided_slice %278 {offsets = [10, 0, 0], sizes = [1, 4, 32], strides = [1, 1, 1]} : vector<16x4x32xf32> to vector<1x4x32xf32>
    %300 = vector.shape_cast %299 : vector<1x4x32xf32> to vector<4x32xf32>
    %301 = vector.extract_strided_slice %278 {offsets = [11, 0, 0], sizes = [1, 4, 32], strides = [1, 1, 1]} : vector<16x4x32xf32> to vector<1x4x32xf32>
    %302 = vector.shape_cast %301 : vector<1x4x32xf32> to vector<4x32xf32>
    %303 = vector.extract_strided_slice %278 {offsets = [12, 0, 0], sizes = [1, 4, 32], strides = [1, 1, 1]} : vector<16x4x32xf32> to vector<1x4x32xf32>
    %304 = vector.shape_cast %303 : vector<1x4x32xf32> to vector<4x32xf32>
    %305 = vector.extract_strided_slice %278 {offsets = [13, 0, 0], sizes = [1, 4, 32], strides = [1, 1, 1]} : vector<16x4x32xf32> to vector<1x4x32xf32>
    %306 = vector.shape_cast %305 : vector<1x4x32xf32> to vector<4x32xf32>
    %307 = vector.extract_strided_slice %278 {offsets = [14, 0, 0], sizes = [1, 4, 32], strides = [1, 1, 1]} : vector<16x4x32xf32> to vector<1x4x32xf32>
    %308 = vector.shape_cast %307 : vector<1x4x32xf32> to vector<4x32xf32>
    %309 = vector.extract_strided_slice %278 {offsets = [15, 0, 0], sizes = [1, 4, 32], strides = [1, 1, 1]} : vector<16x4x32xf32> to vector<1x4x32xf32>
    %310 = vector.shape_cast %309 : vector<1x4x32xf32> to vector<4x32xf32>
    %311 = tpu.concatenate %280, %282, %284, %286, %288, %290, %292, %294, %296, %298, %300, %302, %304, %306, %308, %310 in 1 : vector<4x32xf32>, vector<4x32xf32>, vector<4x32xf32>, vector<4x32xf32>, vector<4x32xf32>, vector<4x32xf32>, vector<4x32xf32>, vector<4x32xf32>, vector<4x32xf32>, vector<4x32xf32>, vector<4x32xf32>, vector<4x32xf32>, vector<4x32xf32>, vector<4x32xf32>, vector<4x32xf32>, vector<4x32xf32> -> vector<4x512xf32>
    %c0_106 = arith.constant 0 : index
    %c0_107 = arith.constant 0 : index
    %312 = vector.load %arg27[%c0_106, %c0_107] : memref<512x32xf32, #tpu.memory_space<vmem>>, vector<512x32xf32>
    %313 = arith.truncf %311 : vector<4x512xf32> to vector<4x512xbf16>
    %314 = arith.truncf %312 : vector<512x32xf32> to vector<512x32xbf16>
    %cst_108 = arith.constant dense<0.000000e+00> : vector<4x32xf32>
    %315 = tpu.matmul %313, %314, %cst_108 {dimension_numbers = #tpu.dot_dimension_numbers<[1], [0], [0], [1], [0, 0, 1, 1], [], []>} : vector<4x512xbf16>, vector<512x32xbf16>, vector<4x32xf32> -> vector<4x32xf32>
    %c0_109 = arith.constant 0 : index
    %c0_110 = arith.constant 0 : index
    %316 = vector.load %arg28[%c0_109, %c0_110] : memref<1x32xf32, #tpu.memory_space<vmem>>, vector<1x32xf32>
    %317 = vector.broadcast %316 : vector<1x32xf32> to vector<4x32xf32>
    %318 = arith.addf %315, %317 : vector<4x32xf32>
    %c0_111 = arith.constant 0 : index
    %c0_112 = arith.constant 0 : index
    %319 = vector.load %arg29[%c0_111, %c0_112] : memref<1x32xf32, #tpu.memory_space<vmem>>, vector<1x32xf32>
    %c0_113 = arith.constant 0 : index
    %c0_114 = arith.constant 0 : index
    %320 = vector.load %arg30[%c0_113, %c0_114] : memref<1x32xf32, #tpu.memory_space<vmem>>, vector<1x32xf32>
    %cst_115 = arith.constant dense<0.000000e+00> : vector<4xf32>
    %321 = vector.multi_reduction <add>, %318, %cst_115 [1] : vector<4x32xf32> to vector<4xf32>
    %322 = vector.shape_cast %321 : vector<4xf32> to vector<4x1xf32>
    %cst_116 = arith.constant 3.200000e+01 : f32
    %323 = vector.broadcast %cst_116 : f32 to vector<4x1xf32>
    %324 = arith.divf %322, %323 : vector<4x1xf32>
    %325 = vector.broadcast %324 : vector<4x1xf32> to vector<4x32xf32>
    %326 = arith.subf %318, %325 : vector<4x32xf32>
    %327 = arith.mulf %326, %326 : vector<4x32xf32>
    %cst_117 = arith.constant dense<0.000000e+00> : vector<4xf32>
    %328 = vector.multi_reduction <add>, %327, %cst_117 [1] : vector<4x32xf32> to vector<4xf32>
    %329 = vector.shape_cast %328 : vector<4xf32> to vector<4x1xf32>
    %cst_118 = arith.constant 3.200000e+01 : f32
    %330 = vector.broadcast %cst_118 : f32 to vector<4x1xf32>
    %331 = arith.divf %329, %330 : vector<4x1xf32>
    %cst_119 = arith.constant 9.99999974E-6 : f32
    %332 = vector.broadcast %cst_119 : f32 to vector<4x1xf32>
    %333 = arith.addf %331, %332 : vector<4x1xf32>
    %334 = math.rsqrt %333 : vector<4x1xf32>
    %335 = vector.broadcast %334 : vector<4x1xf32> to vector<4x32xf32>
    %336 = arith.mulf %326, %335 : vector<4x32xf32>
    %337 = vector.broadcast %319 : vector<1x32xf32> to vector<4x32xf32>
    %338 = arith.mulf %336, %337 : vector<4x32xf32>
    %339 = vector.broadcast %320 : vector<1x32xf32> to vector<4x32xf32>
    %340 = arith.addf %338, %339 : vector<4x32xf32>
    %c0_120 = arith.constant 0 : index
    %c0_121 = arith.constant 0 : index
    %341 = vector.load %arg31[%c0_120, %c0_121] : memref<32x64xf32, #tpu.memory_space<vmem>>, vector<32x64xf32>
    %342 = arith.truncf %340 : vector<4x32xf32> to vector<4x32xbf16>
    %343 = arith.truncf %341 : vector<32x64xf32> to vector<32x64xbf16>
    %cst_122 = arith.constant dense<0.000000e+00> : vector<4x64xf32>
    %344 = tpu.matmul %342, %343, %cst_122 {dimension_numbers = #tpu.dot_dimension_numbers<[1], [0], [0], [1], [0, 0, 1, 1], [], []>} : vector<4x32xbf16>, vector<32x64xbf16>, vector<4x64xf32> -> vector<4x64xf32>
    %c0_123 = arith.constant 0 : index
    %c0_124 = arith.constant 0 : index
    %345 = vector.load %arg32[%c0_123, %c0_124] : memref<1x64xf32, #tpu.memory_space<vmem>>, vector<1x64xf32>
    %346 = vector.broadcast %345 : vector<1x64xf32> to vector<4x64xf32>
    %347 = arith.addf %344, %346 : vector<4x64xf32>
    %348 = vector.extract_strided_slice %274 {offsets = [0, 0], sizes = [64, 16], strides = [1, 1]} : vector<64x32xf32> to vector<64x16xf32>
    %349 = vector.extract_strided_slice %274 {offsets = [0, 16], sizes = [64, 16], strides = [1, 1]} : vector<64x32xf32> to vector<64x16xf32>
    %350 = vector.shape_cast %348 : vector<64x16xf32> to vector<1x64x16xf32>
    %351 = vector.shape_cast %349 : vector<64x16xf32> to vector<1x64x16xf32>
    %352 = tpu.concatenate %350, %351 in 0 : vector<1x64x16xf32>, vector<1x64x16xf32> -> vector<2x64x16xf32>
    %353 = vector.extract_strided_slice %347 {offsets = [0, 0], sizes = [4, 16], strides = [1, 1]} : vector<4x64xf32> to vector<4x16xf32>
    %354 = vector.extract_strided_slice %347 {offsets = [0, 16], sizes = [4, 16], strides = [1, 1]} : vector<4x64xf32> to vector<4x16xf32>
    %355 = vector.shape_cast %353 : vector<4x16xf32> to vector<1x4x16xf32>
    %356 = vector.shape_cast %354 : vector<4x16xf32> to vector<1x4x16xf32>
    %357 = tpu.concatenate %355, %356 in 0 : vector<1x4x16xf32>, vector<1x4x16xf32> -> vector<2x4x16xf32>
    %358 = vector.extract_strided_slice %347 {offsets = [0, 32], sizes = [4, 16], strides = [1, 1]} : vector<4x64xf32> to vector<4x16xf32>
    %359 = vector.extract_strided_slice %347 {offsets = [0, 48], sizes = [4, 16], strides = [1, 1]} : vector<4x64xf32> to vector<4x16xf32>
    %360 = vector.shape_cast %358 : vector<4x16xf32> to vector<1x4x16xf32>
    %361 = vector.shape_cast %359 : vector<4x16xf32> to vector<1x4x16xf32>
    %362 = tpu.concatenate %360, %361 in 0 : vector<1x4x16xf32>, vector<1x4x16xf32> -> vector<2x4x16xf32>
    %363 = arith.truncf %352 : vector<2x64x16xf32> to vector<2x64x16xbf16>
    %364 = arith.truncf %357 : vector<2x4x16xf32> to vector<2x4x16xbf16>
    %cst_125 = arith.constant dense<0.000000e+00> : vector<2x64x4xf32>
    %365 = tpu.matmul %363, %364, %cst_125 {dimension_numbers = #tpu.dot_dimension_numbers<[2], [2], [1], [1], [0, 0, 0, 1, 1, 1], [0], [0]>} : vector<2x64x16xbf16>, vector<2x4x16xbf16>, vector<2x64x4xf32> -> vector<2x64x4xf32>
    %cst_126 = arith.constant dense<0xFF800000> : vector<2x64xf32>
    %366 = vector.multi_reduction <maximumf>, %365, %cst_126 [2] : vector<2x64x4xf32> to vector<2x64xf32>
    %367 = vector.shape_cast %366 : vector<2x64xf32> to vector<2x64x1xf32>
    %368 = vector.broadcast %367 : vector<2x64x1xf32> to vector<2x64x4xf32>
    %369 = arith.subf %365, %368 : vector<2x64x4xf32>
    %370 = math.exp %369 : vector<2x64x4xf32>
    %cst_127 = arith.constant dense<0.000000e+00> : vector<2x64xf32>
    %371 = vector.multi_reduction <add>, %370, %cst_127 [2] : vector<2x64x4xf32> to vector<2x64xf32>
    %372 = vector.shape_cast %371 : vector<2x64xf32> to vector<2x64x1xf32>
    %373 = tpu.reciprocal %372 {approx = true} : vector<2x64x1xf32> -> vector<2x64x1xf32>
    %374 = vector.broadcast %373 : vector<2x64x1xf32> to vector<2x64x4xf32>
    %375 = arith.mulf %370, %374 : vector<2x64x4xf32>
    %376 = arith.truncf %375 : vector<2x64x4xf32> to vector<2x64x4xbf16>
    %377 = arith.truncf %362 : vector<2x4x16xf32> to vector<2x4x16xbf16>
    %cst_128 = arith.constant dense<0.000000e+00> : vector<2x64x16xf32>
    %378 = tpu.matmul %376, %377, %cst_128 {dimension_numbers = #tpu.dot_dimension_numbers<[2], [1], [1], [2], [0, 0, 0, 1, 1, 2], [0], [0]>} : vector<2x64x4xbf16>, vector<2x4x16xbf16>, vector<2x64x16xf32> -> vector<2x64x16xf32>
    %379 = vector.extract_strided_slice %378 {offsets = [0, 0, 0], sizes = [1, 64, 16], strides = [1, 1, 1]} : vector<2x64x16xf32> to vector<1x64x16xf32>
    %380 = vector.shape_cast %379 : vector<1x64x16xf32> to vector<64x16xf32>
    %381 = vector.extract_strided_slice %378 {offsets = [1, 0, 0], sizes = [1, 64, 16], strides = [1, 1, 1]} : vector<2x64x16xf32> to vector<1x64x16xf32>
    %382 = vector.shape_cast %381 : vector<1x64x16xf32> to vector<64x16xf32>
    %383 = tpu.concatenate %380, %382 in 1 : vector<64x16xf32>, vector<64x16xf32> -> vector<64x32xf32>
    %c0_129 = arith.constant 0 : index
    %c0_130 = arith.constant 0 : index
    %384 = vector.load %arg33[%c0_129, %c0_130] : memref<32x32xf32, #tpu.memory_space<vmem>>, vector<32x32xf32>
    %385 = arith.truncf %383 : vector<64x32xf32> to vector<64x32xbf16>
    %386 = arith.truncf %384 : vector<32x32xf32> to vector<32x32xbf16>
    %cst_131 = arith.constant dense<0.000000e+00> : vector<64x32xf32>
    %387 = tpu.matmul %385, %386, %cst_131 {dimension_numbers = #tpu.dot_dimension_numbers<[1], [0], [0], [1], [0, 0, 1, 1], [], []>} : vector<64x32xbf16>, vector<32x32xbf16>, vector<64x32xf32> -> vector<64x32xf32>
    %388 = arith.addf %245, %387 : vector<64x32xf32>
    %c0_132 = arith.constant 0 : index
    %c0_133 = arith.constant 0 : index
    %389 = vector.load %arg34[%c0_132, %c0_133] : memref<1x32xf32, #tpu.memory_space<vmem>>, vector<1x32xf32>
    %390 = vector.broadcast %389 : vector<1x32xf32> to vector<64x32xf32>
    %391 = arith.addf %388, %390 : vector<64x32xf32>
    %c0_134 = arith.constant 0 : index
    %c0_135 = arith.constant 0 : index
    %392 = vector.load %arg35[%c0_134, %c0_135] : memref<1x32xf32, #tpu.memory_space<vmem>>, vector<1x32xf32>
    %c0_136 = arith.constant 0 : index
    %c0_137 = arith.constant 0 : index
    %393 = vector.load %arg36[%c0_136, %c0_137] : memref<1x32xf32, #tpu.memory_space<vmem>>, vector<1x32xf32>
    %cst_138 = arith.constant dense<0.000000e+00> : vector<64xf32>
    %394 = vector.multi_reduction <add>, %391, %cst_138 [1] : vector<64x32xf32> to vector<64xf32>
    %395 = vector.shape_cast %394 : vector<64xf32> to vector<64x1xf32>
    %cst_139 = arith.constant 3.200000e+01 : f32
    %396 = vector.broadcast %cst_139 : f32 to vector<64x1xf32>
    %397 = arith.divf %395, %396 : vector<64x1xf32>
    %398 = vector.broadcast %397 : vector<64x1xf32> to vector<64x32xf32>
    %399 = arith.subf %391, %398 : vector<64x32xf32>
    %400 = arith.mulf %399, %399 : vector<64x32xf32>
    %cst_140 = arith.constant dense<0.000000e+00> : vector<64xf32>
    %401 = vector.multi_reduction <add>, %400, %cst_140 [1] : vector<64x32xf32> to vector<64xf32>
    %402 = vector.shape_cast %401 : vector<64xf32> to vector<64x1xf32>
    %cst_141 = arith.constant 3.200000e+01 : f32
    %403 = vector.broadcast %cst_141 : f32 to vector<64x1xf32>
    %404 = arith.divf %402, %403 : vector<64x1xf32>
    %cst_142 = arith.constant 9.99999997E-7 : f32
    %405 = vector.broadcast %cst_142 : f32 to vector<64x1xf32>
    %406 = arith.addf %404, %405 : vector<64x1xf32>
    %407 = math.rsqrt %406 : vector<64x1xf32>
    %408 = vector.broadcast %407 : vector<64x1xf32> to vector<64x32xf32>
    %409 = arith.mulf %399, %408 : vector<64x32xf32>
    %410 = vector.broadcast %392 : vector<1x32xf32> to vector<64x32xf32>
    %411 = arith.mulf %409, %410 : vector<64x32xf32>
    %412 = vector.broadcast %393 : vector<1x32xf32> to vector<64x32xf32>
    %413 = arith.addf %411, %412 : vector<64x32xf32>
    %c0_143 = arith.constant 0 : index
    %c0_144 = arith.constant 0 : index
    %414 = vector.load %arg37[%c0_143, %c0_144] : memref<32x128xf32, #tpu.memory_space<vmem>>, vector<32x128xf32>
    %415 = arith.truncf %413 : vector<64x32xf32> to vector<64x32xbf16>
    %416 = arith.truncf %414 : vector<32x128xf32> to vector<32x128xbf16>
    %cst_145 = arith.constant dense<0.000000e+00> : vector<64x128xf32>
    %417 = tpu.matmul %415, %416, %cst_145 {dimension_numbers = #tpu.dot_dimension_numbers<[1], [0], [0], [1], [0, 0, 1, 1], [], []>} : vector<64x32xbf16>, vector<32x128xbf16>, vector<64x128xf32> -> vector<64x128xf32>
    %c0_146 = arith.constant 0 : index
    %c0_147 = arith.constant 0 : index
    %418 = vector.load %arg38[%c0_146, %c0_147] : memref<1x128xf32, #tpu.memory_space<vmem>>, vector<1x128xf32>
    %419 = vector.broadcast %418 : vector<1x128xf32> to vector<64x128xf32>
    %420 = arith.addf %417, %419 : vector<64x128xf32>
    %cst_148 = arith.constant 0.707106769 : f32
    %421 = vector.broadcast %cst_148 : f32 to vector<64x128xf32>
    %422 = arith.mulf %420, %421 : vector<64x128xf32>
    %423 = math.absf %422 : vector<64x128xf32>
    %cst_149 = arith.constant 0.327591091 : f32
    %424 = vector.broadcast %cst_149 : f32 to vector<64x128xf32>
    %425 = arith.mulf %424, %423 : vector<64x128xf32>
    %cst_150 = arith.constant 1.000000e+00 : f32
    %426 = vector.broadcast %cst_150 : f32 to vector<64x128xf32>
    %427 = arith.addf %426, %425 : vector<64x128xf32>
    %cst_151 = arith.constant 1.000000e+00 : f32
    %428 = vector.broadcast %cst_151 : f32 to vector<64x128xf32>
    %429 = arith.divf %428, %427 : vector<64x128xf32>
    %cst_152 = arith.constant 1.06140542 : f32
    %430 = vector.broadcast %cst_152 : f32 to vector<64x128xf32>
    %431 = arith.mulf %429, %430 : vector<64x128xf32>
    %cst_153 = arith.constant -1.45315206 : f32
    %432 = vector.broadcast %cst_153 : f32 to vector<64x128xf32>
    %433 = arith.addf %432, %431 : vector<64x128xf32>
    %434 = arith.mulf %429, %433 : vector<64x128xf32>
    %cst_154 = arith.constant 1.42141378 : f32
    %435 = vector.broadcast %cst_154 : f32 to vector<64x128xf32>
    %436 = arith.addf %435, %434 : vector<64x128xf32>
    %437 = arith.mulf %429, %436 : vector<64x128xf32>
    %cst_155 = arith.constant -0.284496725 : f32
    %438 = vector.broadcast %cst_155 : f32 to vector<64x128xf32>
    %439 = arith.addf %438, %437 : vector<64x128xf32>
    %440 = arith.mulf %429, %439 : vector<64x128xf32>
    %cst_156 = arith.constant 0.254829586 : f32
    %441 = vector.broadcast %cst_156 : f32 to vector<64x128xf32>
    %442 = arith.addf %441, %440 : vector<64x128xf32>
    %443 = arith.mulf %429, %442 : vector<64x128xf32>
    %cst_157 = arith.constant 0.000000e+00 : f32
    %444 = vector.broadcast %cst_157 : f32 to vector<64x128xf32>
    %445 = arith.subf %444, %423 : vector<64x128xf32>
    %446 = arith.mulf %445, %423 : vector<64x128xf32>
    %447 = math.exp %446 : vector<64x128xf32>
    %448 = arith.mulf %443, %447 : vector<64x128xf32>
    %cst_158 = arith.constant 1.000000e+00 : f32
    %449 = vector.broadcast %cst_158 : f32 to vector<64x128xf32>
    %450 = arith.subf %449, %448 : vector<64x128xf32>
    %cst_159 = arith.constant 0.000000e+00 : f32
    %451 = vector.broadcast %cst_159 : f32 to vector<64x128xf32>
    %452 = arith.cmpf oge, %422, %451 : vector<64x128xf32>
    %cst_160 = arith.constant 0.000000e+00 : f32
    %453 = vector.broadcast %cst_160 : f32 to vector<64x128xf32>
    %454 = arith.subf %453, %450 : vector<64x128xf32>
    %455 = arith.select %452, %450, %454 : vector<64x128xi1>, vector<64x128xf32>
    %cst_161 = arith.constant 5.000000e-01 : f32
    %456 = vector.broadcast %cst_161 : f32 to vector<64x128xf32>
    %457 = arith.mulf %456, %420 : vector<64x128xf32>
    %cst_162 = arith.constant 1.000000e+00 : f32
    %458 = vector.broadcast %cst_162 : f32 to vector<64x128xf32>
    %459 = arith.addf %458, %455 : vector<64x128xf32>
    %460 = arith.mulf %457, %459 : vector<64x128xf32>
    %c0_163 = arith.constant 0 : index
    %c0_164 = arith.constant 0 : index
    %461 = vector.load %arg39[%c0_163, %c0_164] : memref<128x32xf32, #tpu.memory_space<vmem>>, vector<128x32xf32>
    %462 = arith.truncf %460 : vector<64x128xf32> to vector<64x128xbf16>
    %463 = arith.truncf %461 : vector<128x32xf32> to vector<128x32xbf16>
    %cst_165 = arith.constant dense<0.000000e+00> : vector<64x32xf32>
    %464 = tpu.matmul %462, %463, %cst_165 {dimension_numbers = #tpu.dot_dimension_numbers<[1], [0], [0], [1], [0, 0, 1, 1], [], []>} : vector<64x128xbf16>, vector<128x32xbf16>, vector<64x32xf32> -> vector<64x32xf32>
    %465 = arith.addf %391, %464 : vector<64x32xf32>
    %c0_166 = arith.constant 0 : index
    %c0_167 = arith.constant 0 : index
    %466 = vector.load %arg40[%c0_166, %c0_167] : memref<1x32xf32, #tpu.memory_space<vmem>>, vector<1x32xf32>
    %467 = vector.broadcast %466 : vector<1x32xf32> to vector<64x32xf32>
    %468 = arith.addf %465, %467 : vector<64x32xf32>
    %c0_168 = arith.constant 0 : index
    %c0_169 = arith.constant 0 : index
    %469 = vector.load %arg41[%c0_168, %c0_169] : memref<64x64xbf16, #tpu.memory_space<vmem>>, vector<64x64xbf16>
    %470 = arith.truncf %468 : vector<64x32xf32> to vector<64x32xbf16>
    %cst_170 = arith.constant dense<0.000000e+00> : vector<64x32xf32>
    %471 = tpu.matmul %469, %470, %cst_170 {dimension_numbers = #tpu.dot_dimension_numbers<[1], [0], [0], [1], [0, 0, 1, 1], [], []>} : vector<64x64xbf16>, vector<64x32xbf16>, vector<64x32xf32> -> vector<64x32xf32>
    %472 = vector.shape_cast %471 : vector<64x32xf32> to vector<4x16x32xf32>
    %473 = vector.extract_strided_slice %472 {offsets = [0, 0, 0], sizes = [1, 16, 32], strides = [1, 1, 1]} : vector<4x16x32xf32> to vector<1x16x32xf32>
    %474 = vector.shape_cast %473 : vector<1x16x32xf32> to vector<16x32xf32>
    %475 = vector.extract_strided_slice %472 {offsets = [1, 0, 0], sizes = [1, 16, 32], strides = [1, 1, 1]} : vector<4x16x32xf32> to vector<1x16x32xf32>
    %476 = vector.shape_cast %475 : vector<1x16x32xf32> to vector<16x32xf32>
    %477 = vector.extract_strided_slice %472 {offsets = [2, 0, 0], sizes = [1, 16, 32], strides = [1, 1, 1]} : vector<4x16x32xf32> to vector<1x16x32xf32>
    %478 = vector.shape_cast %477 : vector<1x16x32xf32> to vector<16x32xf32>
    %479 = vector.extract_strided_slice %472 {offsets = [3, 0, 0], sizes = [1, 16, 32], strides = [1, 1, 1]} : vector<4x16x32xf32> to vector<1x16x32xf32>
    %480 = vector.shape_cast %479 : vector<1x16x32xf32> to vector<16x32xf32>
    %481 = tpu.concatenate %474, %476, %478, %480 in 1 : vector<16x32xf32>, vector<16x32xf32>, vector<16x32xf32>, vector<16x32xf32> -> vector<16x128xf32>
    %482 = arith.truncf %481 : vector<16x128xf32> to vector<16x128xbf16>
    %c0_171 = arith.constant 0 : index
    %c0_172 = arith.constant 0 : index
    %c0_173 = arith.constant 0 : index
    %483 = vector.load %arg42[%c0_171, %c0_172, %c0_173] : memref<1x16x128xbf16, #tpu.memory_space<vmem>>, vector<1x16x128xbf16>
    %484 = vector.shape_cast %483 : vector<1x16x128xbf16> to vector<16x128xbf16>
    %485 = vector.shape_cast %482 : vector<16x128xbf16> to vector<1x16x128xbf16>
    tpu.vector_store %arg42[%c0_171, %c0_172, %c0_173], %485 {strides = array<i32>} : memref<1x16x128xbf16, #tpu.memory_space<vmem>>, vector<1x16x128xbf16>,
    return
  }
  func.func @transform_0(%arg0: i32) -> (i32, i32, i32) {
    %c0_i32 = arith.constant 0 : i32
    %c0_i32_0 = arith.constant 0 : i32
    %c0_i32_1 = arith.constant 0 : i32
    return %arg0, %c0_i32, %c0_i32_0 : i32, i32, i32
  }
  func.func @transform_1(%arg0: i32) -> (i32, i32) {
    %c0_i32 = arith.constant 0 : i32
    %c0_i32_0 = arith.constant 0 : i32
    %c0_i32_1 = arith.constant 0 : i32
    return %c0_i32, %c0_i32_0 : i32, i32
  }
  func.func @transform_2(%arg0: i32) -> (i32, i32) {
    %c0_i32 = arith.constant 0 : i32
    %c0_i32_0 = arith.constant 0 : i32
    %c0_i32_1 = arith.constant 0 : i32
    return %c0_i32, %c0_i32_0 : i32, i32
  }
  func.func @transform_3(%arg0: i32) -> (i32, i32) {
    %c0_i32 = arith.constant 0 : i32
    %c0_i32_0 = arith.constant 0 : i32
    %c0_i32_1 = arith.constant 0 : i32
    return %c0_i32, %c0_i32_0 : i32, i32
  }
  func.func @transform_4(%arg0: i32) -> (i32, i32) {
    %c0_i32 = arith.constant 0 : i32
    %c0_i32_0 = arith.constant 0 : i32
    %c0_i32_1 = arith.constant 0 : i32
    return %c0_i32, %c0_i32_0 : i32, i32
  }
  func.func @transform_5(%arg0: i32) -> (i32, i32) {
    %c0_i32 = arith.constant 0 : i32
    %c0_i32_0 = arith.constant 0 : i32
    %c0_i32_1 = arith.constant 0 : i32
    return %c0_i32, %c0_i32_0 : i32, i32
  }
  func.func @transform_6(%arg0: i32) -> (i32, i32) {
    %c0_i32 = arith.constant 0 : i32
    %c0_i32_0 = arith.constant 0 : i32
    %c0_i32_1 = arith.constant 0 : i32
    return %c0_i32, %c0_i32_0 : i32, i32
  }
  func.func @transform_7(%arg0: i32) -> (i32, i32) {
    %c0_i32 = arith.constant 0 : i32
    %c0_i32_0 = arith.constant 0 : i32
    %c0_i32_1 = arith.constant 0 : i32
    return %c0_i32, %c0_i32_0 : i32, i32
  }
  func.func @transform_8(%arg0: i32) -> (i32, i32) {
    %c0_i32 = arith.constant 0 : i32
    %c0_i32_0 = arith.constant 0 : i32
    %c0_i32_1 = arith.constant 0 : i32
    return %c0_i32, %c0_i32_0 : i32, i32
  }
  func.func @transform_9(%arg0: i32) -> (i32, i32) {
    %c0_i32 = arith.constant 0 : i32
    %c0_i32_0 = arith.constant 0 : i32
    %c0_i32_1 = arith.constant 0 : i32
    return %c0_i32, %c0_i32_0 : i32, i32
  }
  func.func @transform_10(%arg0: i32) -> (i32, i32) {
    %c0_i32 = arith.constant 0 : i32
    %c0_i32_0 = arith.constant 0 : i32
    %c0_i32_1 = arith.constant 0 : i32
    return %c0_i32, %c0_i32_0 : i32, i32
  }
  func.func @transform_11(%arg0: i32) -> (i32, i32) {
    %c0_i32 = arith.constant 0 : i32
    %c0_i32_0 = arith.constant 0 : i32
    %c0_i32_1 = arith.constant 0 : i32
    return %c0_i32, %c0_i32_0 : i32, i32
  }
  func.func @transform_12(%arg0: i32) -> (i32, i32) {
    %c0_i32 = arith.constant 0 : i32
    %c0_i32_0 = arith.constant 0 : i32
    %c0_i32_1 = arith.constant 0 : i32
    return %c0_i32, %c0_i32_0 : i32, i32
  }
  func.func @transform_13(%arg0: i32) -> (i32, i32) {
    %c0_i32 = arith.constant 0 : i32
    %c0_i32_0 = arith.constant 0 : i32
    %c0_i32_1 = arith.constant 0 : i32
    return %c0_i32, %c0_i32_0 : i32, i32
  }
  func.func @transform_14(%arg0: i32) -> (i32, i32) {
    %c0_i32 = arith.constant 0 : i32
    %c0_i32_0 = arith.constant 0 : i32
    %c0_i32_1 = arith.constant 0 : i32
    return %c0_i32, %c0_i32_0 : i32, i32
  }
  func.func @transform_15(%arg0: i32) -> (i32, i32) {
    %c0_i32 = arith.constant 0 : i32
    %c0_i32_0 = arith.constant 0 : i32
    %c0_i32_1 = arith.constant 0 : i32
    return %c0_i32, %c0_i32_0 : i32, i32
  }
  func.func @transform_16(%arg0: i32) -> (i32, i32) {
    %c0_i32 = arith.constant 0 : i32
    %c0_i32_0 = arith.constant 0 : i32
    %c0_i32_1 = arith.constant 0 : i32
    return %c0_i32, %c0_i32_0 : i32, i32
  }
  func.func @transform_17(%arg0: i32) -> (i32, i32) {
    %c0_i32 = arith.constant 0 : i32
    %c0_i32_0 = arith.constant 0 : i32
    %c0_i32_1 = arith.constant 0 : i32
    return %c0_i32, %c0_i32_0 : i32, i32
  }
  func.func @transform_18(%arg0: i32) -> (i32, i32) {
    %c0_i32 = arith.constant 0 : i32
    %c0_i32_0 = arith.constant 0 : i32
    %c0_i32_1 = arith.constant 0 : i32
    return %c0_i32, %c0_i32_0 : i32, i32
  }
  func.func @transform_19(%arg0: i32) -> (i32, i32) {
    %c0_i32 = arith.constant 0 : i32
    %c0_i32_0 = arith.constant 0 : i32
    %c0_i32_1 = arith.constant 0 : i32
    return %c0_i32, %c0_i32_0 : i32, i32
  }
  func.func @transform_20(%arg0: i32) -> (i32, i32) {
    %c0_i32 = arith.constant 0 : i32
    %c0_i32_0 = arith.constant 0 : i32
    %c0_i32_1 = arith.constant 0 : i32
    return %c0_i32, %c0_i32_0 : i32, i32
  }
  func.func @transform_21(%arg0: i32) -> (i32, i32) {
    %c0_i32 = arith.constant 0 : i32
    %c0_i32_0 = arith.constant 0 : i32
    %c0_i32_1 = arith.constant 0 : i32
    return %c0_i32, %c0_i32_0 : i32, i32
  }
  func.func @transform_22(%arg0: i32) -> (i32, i32) {
    %c0_i32 = arith.constant 0 : i32
    %c0_i32_0 = arith.constant 0 : i32
    %c0_i32_1 = arith.constant 0 : i32
    return %c0_i32, %c0_i32_0 : i32, i32
  }
  func.func @transform_23(%arg0: i32) -> (i32, i32) {
    %c0_i32 = arith.constant 0 : i32
    %c0_i32_0 = arith.constant 0 : i32
    %c0_i32_1 = arith.constant 0 : i32
    return %c0_i32, %c0_i32_0 : i32, i32
  }
  func.func @transform_24(%arg0: i32) -> (i32, i32) {
    %c0_i32 = arith.constant 0 : i32
    %c0_i32_0 = arith.constant 0 : i32
    %c0_i32_1 = arith.constant 0 : i32
    return %c0_i32, %c0_i32_0 : i32, i32
  }
  func.func @transform_25(%arg0: i32) -> (i32, i32) {
    %c0_i32 = arith.constant 0 : i32
    %c0_i32_0 = arith.constant 0 : i32
    %c0_i32_1 = arith.constant 0 : i32
    return %c0_i32, %c0_i32_0 : i32, i32
  }
  func.func @transform_26(%arg0: i32) -> (i32, i32) {
    %c0_i32 = arith.constant 0 : i32
    %c0_i32_0 = arith.constant 0 : i32
    %c0_i32_1 = arith.constant 0 : i32
    return %c0_i32, %c0_i32_0 : i32, i32
  }
  func.func @transform_27(%arg0: i32) -> (i32, i32) {
    %c0_i32 = arith.constant 0 : i32
    %c0_i32_0 = arith.constant 0 : i32
    %c0_i32_1 = arith.constant 0 : i32
    return %c0_i32, %c0_i32_0 : i32, i32
  }
  func.func @transform_28(%arg0: i32) -> (i32, i32) {
    %c0_i32 = arith.constant 0 : i32
    %c0_i32_0 = arith.constant 0 : i32
    %c0_i32_1 = arith.constant 0 : i32
    return %c0_i32, %c0_i32_0 : i32, i32
  }
  func.func @transform_29(%arg0: i32) -> (i32, i32) {
    %c0_i32 = arith.constant 0 : i32
    %c0_i32_0 = arith.constant 0 : i32
    %c0_i32_1 = arith.constant 0 : i32
    return %c0_i32, %c0_i32_0 : i32, i32
  }
  func.func @transform_30(%arg0: i32) -> (i32, i32) {
    %c0_i32 = arith.constant 0 : i32
    %c0_i32_0 = arith.constant 0 : i32
    %c0_i32_1 = arith.constant 0 : i32
    return %c0_i32, %c0_i32_0 : i32, i32
  }
  func.func @transform_31(%arg0: i32) -> (i32, i32) {
    %c0_i32 = arith.constant 0 : i32
    %c0_i32_0 = arith.constant 0 : i32
    %c0_i32_1 = arith.constant 0 : i32
    return %c0_i32, %c0_i32_0 : i32, i32
  }
  func.func @transform_32(%arg0: i32) -> (i32, i32) {
    %c0_i32 = arith.constant 0 : i32
    %c0_i32_0 = arith.constant 0 : i32
    %c0_i32_1 = arith.constant 0 : i32
    return %c0_i32, %c0_i32_0 : i32, i32
  }
  func.func @transform_33(%arg0: i32) -> (i32, i32) {
    %c0_i32 = arith.constant 0 : i32
    %c0_i32_0 = arith.constant 0 : i32
    %c0_i32_1 = arith.constant 0 : i32
    return %c0_i32, %c0_i32_0 : i32, i32
  }
  func.func @transform_34(%arg0: i32) -> (i32, i32) {
    %c0_i32 = arith.constant 0 : i32
    %c0_i32_0 = arith.constant 0 : i32
    %c0_i32_1 = arith.constant 0 : i32
    return %c0_i32, %c0_i32_0 : i32, i32
  }
  func.func @transform_35(%arg0: i32) -> (i32, i32) {
    %c0_i32 = arith.constant 0 : i32
    %c0_i32_0 = arith.constant 0 : i32
    %c0_i32_1 = arith.constant 0 : i32
    return %c0_i32, %c0_i32_0 : i32, i32
  }
  func.func @transform_36(%arg0: i32) -> (i32, i32) {
    %c0_i32 = arith.constant 0 : i32
    %c0_i32_0 = arith.constant 0 : i32
    %c0_i32_1 = arith.constant 0 : i32
    return %c0_i32, %c0_i32_0 : i32, i32
  }
  func.func @transform_37(%arg0: i32) -> (i32, i32) {
    %c0_i32 = arith.constant 0 : i32
    %c0_i32_0 = arith.constant 0 : i32
    %c0_i32_1 = arith.constant 0 : i32
    return %c0_i32, %c0_i32_0 : i32, i32
  }
  func.func @transform_38(%arg0: i32) -> (i32, i32) {
    %c0_i32 = arith.constant 0 : i32
    %c0_i32_0 = arith.constant 0 : i32
    %c0_i32_1 = arith.constant 0 : i32
    return %c0_i32, %c0_i32_0 : i32, i32
  }
  func.func @transform_39(%arg0: i32) -> (i32, i32) {
    %c0_i32 = arith.constant 0 : i32
    %c0_i32_0 = arith.constant 0 : i32
    %c0_i32_1 = arith.constant 0 : i32
    return %c0_i32, %c0_i32_0 : i32, i32
  }
  func.func @transform_40(%arg0: i32) -> (i32, i32) {
    %c0_i32 = arith.constant 0 : i32
    %c0_i32_0 = arith.constant 0 : i32
    %c0_i32_1 = arith.constant 0 : i32
    return %c0_i32, %c0_i32_0 : i32, i32
  }
  func.func @transform_41(%arg0: i32) -> (i32, i32, i32) {
    %c0_i32 = arith.constant 0 : i32
    %c0_i32_0 = arith.constant 0 : i32
    %c0_i32_1 = arith.constant 0 : i32
    return %arg0, %c0_i32, %c0_i32_0 : i32, i32, i32
  }
}

</mosaic_0001>

<bundles_post_ra>
// kernel: twins_forward.3
= control target key start
LH: loop header
LB: loop body
LE: loop exit
PB: predicated region body
PF: predicated region fallthrough
CT: control target
= control target key end

     0   :  { %s4966_s6 = smov 1   ;;  %s4967_s10 = smov 2   ;;  %s5987_s0 = inlined_call_operand.smem [shape: u32[42], index: -1, kind: input, shape index: {}] }
   0x1   :  { %s5027_s5 = sld [smem:[%s5987_s0]]   ;;  %s4968_s14 = smov 3  }
   0x2   :  { %s5032_s9 = sld [smem:[%s5987_s0 + %s4966_s6]]   ;;  %s4969_s18 = smov 4  }
   0x3   :  { %s5037_s13 = sld [smem:[%s5987_s0 + %s4967_s10]]   ;;  %s4970_s22 = smov 5  }
   0x4   :  { %s5042_s17 = sld [smem:[%s5987_s0 + %s4968_s14]]   ;;  %s4971_s26 = smov 6  }
   0x5   :  { %s5047_s21 = sld [smem:[%s5987_s0 + %s4969_s18]]   ;;  %s4972_s30 = smov 7  }
   0x6   :  { %s5052_s25 = sld [smem:[%s5987_s0 + %s4970_s22]]   ;;  %s4973_s4 = smov 8  }
   0x7   :  { %6017 = sst [smem:[#allocation5_spill]] %s5027_s5  ;;  %s4974_s10 = smov 9  }
   0x8   :  { %6018 = sst [smem:[#allocation6_spill]] %s5032_s9  ;;  %s4975_s15 = smov 10  }
   0x9   :  { %s5057_s29 = sld [smem:[%s5987_s0 + %s4971_s26]]   ;;  %s4976_s20 = smov 11  }
   0xa   :  { %s5062_s3 = sld [smem:[%s5987_s0 + %s4972_s30]]   ;;  %s4977_s26 = smov 12  }
   0xb   :  { %s5067_s8 = sld [smem:[%s5987_s0 + %s4973_s4]]   ;;  %s4978_s1 = smov 13  }
   0xc   :  { %s5072_s14 = sld [smem:[%s5987_s0 + %s4974_s10]]   ;;  %s4979_s7 = smov 14  }
   0xd   :  { %s5077_s19 = sld [smem:[%s5987_s0 + %s4975_s15]]   ;;  %s4980_s15 = smov 15  }
   0xe   :  { %s5082_s24 = sld [smem:[%s5987_s0 + %s4976_s20]]   ;;  %s4981_s22 = smov 16  }
   0xf   :  { %s5087_s30 = sld [smem:[%s5987_s0 + %s4977_s26]]   ;;  %s4982_s28 = smov 17  }
  0x10   :  { %6019 = sst [smem:[#allocation7_spill]] %s5062_s3 }
  0x11   :  { %6020 = sst [smem:[#allocation8_spill]] %s5067_s8 }
  0x12   :  { %s5092_s6 = sld [smem:[%s5987_s0 + %s4978_s1]]  }
  0x13   :  { %s5097_s12 = sld [smem:[%s5987_s0 + %s4979_s7]]   ;;  %s4983_s7 = smov 18  }
  0x14   :  { %s5102_s20 = sld [smem:[%s5987_s0 + %s4980_s15]]   ;;  %s4984_s15 = smov 19  }
  0x15   :  { %6021 = sst [smem:[#allocation9_spill]] %s5087_s30 }
  0x16   :  { %s5107_s27 = sld [smem:[%s5987_s0 + %s4981_s22]]   ;;  %s4985_s22 = smov 20  }
  0x17   :  { %s5112_s4 = sld [smem:[%s5987_s0 + %s4982_s28]]   ;;  %s4986_s28 = smov 21  }
  0x18   :  { %6022 = sst [smem:[#allocation10_spill]] %s5092_s6 }
  0x19   :  { %6023 = sst [smem:[#allocation11_spill]] %s5097_s12 }
  0x1a   :  { %6024 = sst [smem:[#allocation12_spill]] %s5102_s20 }
  0x1b   :  { %s5117_s12 = sld [smem:[%s5987_s0 + %s4983_s7]]   ;;  %s4987_s7 = smov 22  }
  0x1c   :  { %6025 = sst [smem:[#allocation13_spill]] %s5107_s27 }
  0x1d   :  { %6026 = sst [smem:[#allocation14_spill]] %s5112_s4 }
  0x1e   :  { %s5122_s20 = sld [smem:[%s5987_s0 + %s4984_s15]]   ;;  %s4988_s15 = smov 23  }
  0x1f   :  { %s5127_s27 = sld [smem:[%s5987_s0 + %s4985_s22]]   ;;  %s4989_s22 = smov 24  }
  0x20   :  { %s5132_s30 = sld [smem:[%s5987_s0 + %s4986_s28]]   ;;  %s4990_s28 = smov 25  }
  0x21   :  { %6027 = sst [smem:[#allocation15_spill]] %s5117_s12 }
  0x22   :  { %s5137_s12 = sld [smem:[%s5987_s0 + %s4987_s7]]   ;;  %s4991_s7 = smov 26  }
  0x24   :  { %6028 = sst [smem:[#allocation16_spill]] %s5122_s20 }
  0x25   :  { %6029 = sst [smem:[#allocation17_spill]] %s5127_s27 }
  0x26   :  { %6030 = sst [smem:[#allocation18_spill]] %s5132_s30 }
  0x27   :  { %s5142_s20 = sld [smem:[%s5987_s0 + %s4988_s15]]   ;;  %s4992_s15 = smov 27  }
  0x28   :  { %6031 = sst [smem:[#allocation19_spill]] %s5137_s12 }
  0x29   :  { %s5147_s27 = sld [smem:[%s5987_s0 + %s4989_s22]]   ;;  %s4993_s22 = smov 28  }
  0x2a   :  { %s5152_s30 = sld [smem:[%s5987_s0 + %s4990_s28]]   ;;  %s4994_s28 = smov 29  }
  0x2b   :  { %s5157_s12 = sld [smem:[%s5987_s0 + %s4991_s7]]   ;;  %s4995_s7 = smov 30  }
  0x2d   :  { %6032 = sst [smem:[#allocation20_spill]] %s5142_s20 }
  0x2e   :  { %s5162_s20 = sld [smem:[%s5987_s0 + %s4992_s15]]   ;;  %s4996_s15 = smov 31  }
  0x2f   :  { %6033 = sst [smem:[#allocation21_spill]] %s5147_s27 }
  0x30   :  { %6034 = sst [smem:[#allocation22_spill]] %s5152_s30 }
  0x31   :  { %6035 = sst [smem:[#allocation23_spill]] %s5157_s12 }
  0x32   :  { %s5167_s27 = sld [smem:[%s5987_s0 + %s4993_s22]]   ;;  %s4997_s22 = smov 32  }
  0x33   :  { %s5172_s30 = sld [smem:[%s5987_s0 + %s4994_s28]]   ;;  %s4998_s28 = smov 33  }
  0x34   :  { %6036 = sst [smem:[#allocation24_spill]] %s5162_s20 }
  0x35   :  { %s5177_s12 = sld [smem:[%s5987_s0 + %s4995_s7]]   ;;  %s4999_s7 = smov 34  }
  0x36   :  { %s5182_s20 = sld [smem:[%s5987_s0 + %s4996_s15]]   ;;  %s5000_s15 = smov 35  }
  0x38   :  { %6037 = sst [smem:[#allocation25_spill]] %s5167_s27 }
  0x39   :  { %6038 = sst [smem:[#allocation26_spill]] %s5172_s30 }
  0x3a   :  { %s5187_s27 = sld [smem:[%s5987_s0 + %s4997_s22]]   ;;  %s5001_s22 = smov 36  }
  0x3b   :  { %6039 = sst [smem:[#allocation27_spill]] %s5177_s12 }
  0x3c   :  { %6040 = sst [smem:[#allocation28_spill]] %s5182_s20 }
  0x3d   :  { %s5192_s30 = sld [smem:[%s5987_s0 + %s4998_s28]]   ;;  %s5002_s28 = smov 37  }
  0x3e   :  { %s5197_s12 = sld [smem:[%s5987_s0 + %s4999_s7]]   ;;  %s5003_s7 = smov 38  }
  0x3f   :  { %s5202_s20 = sld [smem:[%s5987_s0 + %s5000_s15]]   ;;  %s5004_s15 = smov 39  }
  0x40   :  { %6041 = sst [smem:[#allocation29_spill]] %s5187_s27 }
  0x41   :  { %s5207_s27 = sld [smem:[%s5987_s0 + %s5001_s22]]   ;;  %s5005_s22 = smov 41  }
  0x43   :  { %6042 = sst [smem:[#allocation30_spill]] %s5192_s30 }
  0x44   :  { %6043 = sst [smem:[#allocation31_spill]] %s5197_s12 }
  0x45   :  { %6044 = sst [smem:[#allocation32_spill]] %s5202_s20 }
  0x46   :  { %s5212_s30 = sld [smem:[%s5987_s0 + %s5002_s28]]  }
  0x47   :  { %6045 = sst [smem:[#allocation33_spill]] %s5207_s27 }
  0x48   :  { %s5217_s12 = sld [smem:[%s5987_s0 + %s5003_s7]]  }
  0x49   :  { %s5222_s20 = sld [smem:[%s5987_s0 + %s5004_s15]]  }
  0x4a   :  { %s5227_s27 = sld [smem:[%s5987_s0 + %s5005_s22]]  }
  0x4b   :  { %88 = vsyncpa [#allocation3], 0 }
  0x4c   :  { %90 = vsyncpa [#allocation3 + $0x1], 0  ;;  %s5229_s28 = smov 0   ;;  %s5231_s1 = smov 0  }
  0x4d   :  { %s5233_s2 = smov 0   ;;  %s5235_s7 = smov 0  }
  0x4e LB: > { %s6046_s9 = sld [smem:[#allocation6_spill]]  ;;  %s5250_s0 = sadd.s32 4294967295, %s4964_s7   ;;  %s4964_s7 = sphi %s5235_s7, %s6087_s7   ;;  %s4960_s2 = sphi %s5233_s2, %s6086_s2   ;;  %s4956_s1 = sphi %s5231_s1, %s6085_s1   ;;  %s4952_s28 = sphi %s5229_s28, %s6084_s28  }
  0x4f   : > { %s6047_s6 = sld [smem:[#allocation10_spill]]  ;;  %s4167_s10 = sadd.s32 4294967294, %s4964_s7  }
  0x50   : > { %s6048_s4 = sld [smem:[#allocation14_spill]]  ;;  %s5254_s11 = sadd.s32 1, %s4964_s7  }
  0x51   : > { %s6049_s3 = sld [smem:[#allocation7_spill]]  ;;  %s969_s15 = sadd.s32 1, %s4960_s2 }
  0x52   : > { %s966_s16 = ssub.s32 %s4964_s7, %s5254_s11  ;;  %p979_p0 = scmp.ne.s32.totalorder %s4960_s2, %s4956_s1 }
  0x53   : > { %p967_p1 = scmp.eq.s32.totalorder %s966_s16, 0  ;;  %p980_p2 = scmp.eq.s32.totalorder %s5250_s0, 1 }
  0x54   : > { %p985_p3 = scmp.ne.s32.totalorder %s4956_s1, %s4952_s28  ;;  %p986_p4 = scmp.eq.s32.totalorder %s4167_s10, 1 }
  0x55   : > { %s5265_s18 = scalar_select %p967_p1, %s4960_s2, %s969_s15  }
  0x56   : > { %p5267_p5 = por %p980_p2, %p979_p0  ;;  %p5271_p6 = por %p986_p4, %p985_p3 }
  0x57   : > { %p4170_p7 = scmp.ge.s32.totalorder %s4964_s7, 1  ;;  %p1132_p8 = scmp.lt.s32.totalorder %s4964_s7, 3 }
  0x59   : > { %p1133_p9 = pnand %p4170_p7, %p1132_p8 }
  0x5a   : > { %s6052_s5 = sld [smem:[#allocation5_spill]] (!%p1133_p9)  ;;  %p1232_p10 = scmp.lt.s32.totalorder (!%p1133_p9), %s5250_s0, 1 }
  0x5b   : > { %1136 = sbr.rel (%p1133_p9) target bundleno = 6807 (0x1a97), region = 184  ;;  %s6053_s8 = sld [smem:[#allocation8_spill]] (!%p1133_p9) }
  0x5c   : > { %s5998_s16 = smov (!%p1133_p9), 96  }
  0x60   : > { %v1254_v0 = vld [vmem:[%s6046_s9 + $0x70] sm:$0xff]  ;;  %v1255_v1 = vld [vmem:[%s6046_s9 + $0x78] sm:$0xff]  ;;  %v1252_v2 = vld [vmem:[%s6046_s9 + $0x60] sm:$0xff]  ;;  %v5006_v3 = vmov 0.0   ;;  %vm5007_vm0 = vmmov 0   ;;  %s1233_s26 = scalar_select %p1232_p10, %s5250_s0, 1 }
  0x61   : > { %4394 = vmatprep.subr.bf16.mxu0 %v5006_v3  ;;  %v1263_v4 = vpack.c.bf16 %v1255_v1, %v1254_v0  ;;  %v1253_v5 = vld [vmem:[%s6046_s9 + $0x68] sm:$0xff]  ;;  %4410 = vmatprep.mubr.msk.bf16.mxu0 %vm5007_vm0, %v5006_v3  ;;  %v1250_v7 = vld [vmem:[%s6046_s9 + $0x50] sm:$0xff]  ;;  %v1251_v8 = vld [vmem:[%s6046_s9 + $0x58] sm:$0xff]  ;;  %vm1320_vm1 = vcmask 523264   ;;  %vm1540_vm2 = vcmask 130048   ;;  %vm2036_vm3 = vcmask 261120  }
  0x62   : > { %v1262_v6 = vpack.c.bf16 %v1253_v5, %v1252_v2  ;;  %s4253_s10 = sshll.u32 %s1233_s26, 3  ;;  %v1248_v9 = vld [vmem:[%s6046_s9 + $0x40] sm:$0xff]  ;;  %v1249_v10 = vld [vmem:[%s6046_s9 + $0x48] sm:$0xff]  ;;  %v1261_v11 = vpack.c.bf16 %v1251_v8, %v1250_v7  ;;  %v1246_v12 = vld [vmem:[%s6046_s9 + $0x30] sm:$0xff]  ;;  %s6000_s26 = smov 112   ;;  %vm2039_vm4 = vcmask 392192  }
  0x63   : > { %4395 = vmatpush3.bf16.msra.mxu0 %v1263_v4  ;;  %s1236_s15 = scalar_lea.vmem %s6052_s5, %s4253_s10  ;;  %v1247_v13 = vld [vmem:[%s6046_s9 + $0x38] sm:$0xff]  ;;  %v1260_v14 = vpack.c.bf16 %v1249_v10, %v1248_v9  ;;  %v1244_v16 = vld [vmem:[%s6046_s9 + $0x20] sm:$0xff]  ;;  %v1245_v17 = vld [vmem:[%s6046_s9 + $0x28] sm:$0xff]  ;;  %s5996_s10 = smov 80   ;;  %vm3003_vm9 = vcmask 519168   ;;  %vm3320_vm10 = vcmask 31744  }
  0x64   : > { %4396 = vmatprep.subr.bf16.mxu0 %v5006_v3  ;;  %v1259_v15 = vpack.c.bf16 %v1247_v13, %v1246_v12  ;;  %v1258_v18 = vpack.c.bf16 %v1245_v17, %v1244_v16  ;;  %v1242_v19 = vld [vmem:[%s6046_s9 + $0x10] sm:$0xff]  ;;  %v1243_v20 = vld [vmem:[%s6046_s9 + $0x18] sm:$0xff]  ;;  %v1240_v22 = vld [vmem:[%s6046_s9] sm:$0xff]  ;;  %v5008_v17 = vmov 0   ;;  %s6064_s5 = sld [smem:[#allocation22_spill]]  ;;  %vm3419_vm11 = vcmask 1041408  }
  0x65   : > { %v1257_v21 = vpack.c.bf16 %v1243_v20, %v1242_v19  ;;  %v1241_v23 = vld [vmem:[%s6046_s9 + $0x8] sm:$0xff]  ;;  %v4775_v25 = vld [vmem:[%s1236_s15] sm:$0xff]   ;;  %v1419_v16 = vld [vmem:[%s6049_s3 + $0x58] sm:$0xff]  ;;  %1480 = vmatprep.mubr.bf16.mxu1 %v5008_v17  ;;  %s6005_s15 = smov 64  }
  0x66   : > { %v1256_v24 = vpack.c.bf16 %v1241_v23, %v1240_v22  ;;  %v4174_v26 = vld [vmem:[%s5037_s13] ss:$0 sm:$0xff]  ;;  %v1421_v10 = vld [vmem:[%s6049_s3 + $0x68] sm:$0xff]  ;;  %v1415_v23 = vld [vmem:[%s6049_s3 + $0x38] sm:$0xff] }
  0x67   : > { %4397 = vmatpush3.bf16.msra.mxu0 %v1262_v6  ;;  %v4176_v52 = vld [vmem:[%s5042_s17] ss:$0 sm:$0xff]  ;;  %v1413_v22 = vld [vmem:[%s6049_s3 + $0x28] sm:$0xff] }
  0x68   : > { %4398 = vmatprep.subr.bf16.mxu0 %v5006_v3  ;;  %v4177_v54 = vld [vmem:[%s5047_s21] ss:$0 sm:$0xff] }
  0x69   : > { %v1420_v12 = vld [vmem:[%s6049_s3 + $0x60] sm:$0xff] }
  0x6a   : > { %v1416_v20 = vld [vmem:[%s6049_s3 + $0x40] sm:$0xff] }
  0x6b   : > { %4399 = vmatpush3.bf16.msra.mxu0 %v1261_v11  ;;  %v1423_v11 = vld [vmem:[%s6049_s3 + $0x78] sm:$0xff] }
  0x6c   : > { %4400 = vmatprep.subr.bf16.mxu0 %v5006_v3  ;;  %v1432_v13 = vpack.c.bf16 %v1423_v11, %v1421_v10 }
  0x6e   : > { %1456 = vmatprep.subr.bf16.mxu1 %v1432_v13 }
  0x6f   : > { %4401 = vmatpush3.bf16.msra.mxu0 %v1260_v14  ;;  %v1422_v14 = vld [vmem:[%s6049_s3 + $0x70] sm:$0xff] }
  0x70   : > { %4402 = vmatprep.subr.bf16.mxu0 %v5006_v3 }
  0x73   : > { %4403 = vmatpush3.bf16.msra.mxu0 %v1259_v15  ;;  %v1417_v15 = vld [vmem:[%s6049_s3 + $0x48] sm:$0xff] }
  0x74   : > { %4404 = vmatprep.subr.bf16.mxu0 %v5006_v3  ;;  %v1430_v19 = vpack.c.bf16 %v1419_v16, %v1417_v15 }
  0x77   : > { %4405 = vmatpush3.bf16.msra.mxu0 %v1258_v18  ;;  %v1431_v18 = vpack.c.bf16 %v1422_v14, %v1420_v12 }
  0x78   : > { %4406 = vmatprep.subr.bf16.mxu0 %v5006_v3 }
  0x79   : > { %1457 = vmatpush1.bf16.msra.mxu1 %v1431_v18 }
  0x7a   : > { %1458 = vmatprep.subr.bf16.mxu1 %v1430_v19 }
  0x7b   : > { %4407 = vmatpush3.bf16.msra.mxu0 %v1257_v21  ;;  %v1418_v21 = vld [vmem:[%s6049_s3 + $0x50] sm:$0xff] }
  0x7c   : > { %4408 = vmatprep.subr.bf16.mxu0 %v5006_v3 }
  0x7f   : > { %4409 = vmatpush3.bf16.msra.mxu0 %v1256_v24  ;;  %v1429_v24 = vpack.c.bf16 %v1418_v21, %v1416_v20 }
  0x80   : > { %4426 = vmatprep.subr.bf16.mxu0 %v5006_v3 }
  0x81   : > { %1459 = vmatpush1.bf16.msra.mxu1 %v1429_v24 }
  0x82   : > { %4411 = vmatmul.mubr.bf16.vlgmr.msra.gmra.mxu0 %v4775_v25  ;;  %v1428_v25 = vpack.c.bf16 %v1415_v23, %v1413_v22 }
  0x83   : > { %4428 = vmatprep.mubr.msk.bf16.mxu0 %vm5007_vm0, %v5006_v3 }
  0x84   : > { %1460 = vmatprep.subr.bf16.mxu1 %v1428_v25 }
 0x142   : > { %v1311_v27 = vpop.f32.mrf.mxu0 }
 0x143   : > { %v1312_v28 = vadd.f32 %v4174_v26, %v1311_v27  ;;  %v1414_v27 = vld [vmem:[%s6049_s3 + $0x30] sm:$0xff] }
 0x144   : > { %v4412_v29 = vpop.f32.mrf.mxu0 }
 0x145   : > { %v1321_v30 = vsel %vm1320_vm1, %v1312_v28, 0.0  ;;  %v1411_v29 = vld [vmem:[%s6049_s3 + $0x18] sm:$0xff] }
 0x146   : > { %1322 = vadd.xlane.f32.xlu0 %v1321_v30  ;;  %v1314_v31 = vpop.f32.mrf.mxu0 }
 0x147   : > { %v1315_v32 = vadd.f32 %v4174_v26, %v1314_v31  ;;  %v1412_v26 = vld [vmem:[%s6049_s3 + $0x20] sm:$0xff] }
 0x148   : > { %v4413_v33 = vpop.f32.mrf.mxu0  ;;  %v1427_v30 = vpack.c.bf16 %v1414_v27, %v1412_v26 }
 0x149   : > { %v1324_v34 = vsel %vm1320_vm1, %v1315_v32, 0.0  ;;  %v1410_v33 = vld [vmem:[%s6049_s3 + $0x10] sm:$0xff] }
 0x14a   : > { %1325 = vadd.xlane.f32.xlu0 %v1324_v34  ;;  %1461 = vmatpush1.bf16.msra.mxu1 %v1427_v30 }
 0x1cf   : > { %v1323_v35 = vpop.xlane.xlu0 %1322 }
 0x1d0   : > { %v1328_v36 = vmul.f32 0.015625, %v1323_v35 }
 0x1d2   : > { %v1330_v37 = vsub.f32 %v1312_v28, %v1328_v36  ;;  %v1409_v28 = vld [vmem:[%s6049_s3 + $0x8] sm:$0xff] }
 0x1d3   : > { %v1326_v38 = vpop.xlane.xlu0 %1325  ;;  %v1426_v31 = vpack.c.bf16 %v1411_v29, %v1409_v28 }
 0x1d4   : > { %v1329_v39 = vmul.f32 0.015625, %v1326_v38  ;;  %v1332_v40 = vmul.f32 %v1330_v37, %v1330_v37 }
 0x1d5   : > { %1462 = vmatprep.subr.bf16.mxu1 %v1426_v31  ;;  %v1535_v31 = vld [vmem:[%s6048_s4] sm:$0xff] }
 0x1d6   : > { %v1331_v41 = vsub.f32 %v1315_v32, %v1329_v39  ;;  %v1334_v42 = vsel %vm1320_vm1, %v1332_v40, 0.0  ;;  %v1408_v32 = vld [vmem:[%s6049_s3] sm:$0xff]  ;;  %s6061_s3 = sld [smem:[#allocation20_spill]] }
 0x1d7   : > { %1335 = vadd.xlane.f32.xlu1 %v1334_v42  ;;  %v1425_v34 = vpack.c.bf16 %v1410_v33, %v1408_v32 }
 0x1d8   : > { %v1333_v43 = vmul.f32 %v1331_v41, %v1331_v41 }
 0x1d9   : > { %1463 = vmatpush1.bf16.msra.mxu1 %v1425_v34 }
 0x1da   : > { %v1337_v44 = vsel %vm1320_vm1, %v1333_v43, 0.0  ;;  %4414 = vmatprep.subr.bf16.mxu1 %v5006_v3  ;;  %v4178_v43 = vld [vmem:[%s5052_s25] ss:$0 sm:$0xff] }
 0x1db   : > { %1338 = vadd.xlane.f32.xlu1 %v1337_v44 }
 0x260   : > { %v1336_v45 = vpop.xlane.xlu1 %1335 }
 0x261   : > { %v1340_v46 = vmul.f32 0.015625, %v1336_v45 }
 0x263   : > { %v1342_v47 = vadd.f32 1e-05, %v1340_v46 }
 0x264   : > { %v1339_v48 = vpop.xlane.xlu1 %1338 }
 0x265   : > { %4786 = vrsqrt.f32 %v1342_v47  ;;  %v1341_v49 = vmul.f32 0.015625, %v1339_v48  ;;  %v4179_v47 = vld [vmem:[%s5057_s29] ss:$0 sm:$0xff] }
 0x267   : > { %v1343_v50 = vadd.f32 1e-05, %v1341_v49 }
 0x269   : > { %4788 = vrsqrt.f32 %v1343_v50 }
 0x272   : > { %v4787_v51 = vpop.eup %4786 }
 0x273   : > { %v1346_v53 = vmul.f32 %v4787_v51, %v1330_v37 }
 0x275   : > { %v1354_v55 = vmul.f32 %v4176_v52, %v1346_v53 }
 0x276   : > { %v4789_v56 = vpop.eup %4788 }
 0x277   : > { %v5316_v57 = vadd.f32 %v4177_v54, %v1354_v55  ;;  %v1347_v58 = vmul.f32 %v4789_v56, %v1331_v41  ;;  %v1433_v55 = vld [vmem:[%s6053_s8] sm:$0x3]  ;;  %s6073_s8 = sld [smem:[#allocation28_spill]] }
 0x279   : > { %v1366_v59 = vsel %vm1320_vm1, %v5316_v57, 0.0  ;;  %v1355_v60 = vmul.f32 %v4176_v52, %v1347_v58  ;;  %v1435_v52 = vlaneseq }
 0x27a   : > { %1367 = vadd.xlane.f32.xlu0 %v1366_v59 }
 0x27b   : > { %v5320_v61 = vadd.f32 %v4177_v54, %v1355_v60  ;;  %v1436_v53 = vshrl.u32 %v1435_v52, 7 }
 0x27d   : > { %v1369_v62 = vsel %vm1320_vm1, %v5320_v61, 0.0  ;;  %v5351_v54 = vsub.s32 0, %v1436_v53  ;;  %v5354_v56 = vsub.s32 1, %v1436_v53 }
 0x27e   : > { %1370 = vadd.xlane.f32.xlu1 %v1369_v62 }
 0x27f   : > { %v1438_v59 = vrot.slane %v1433_v55, %v5351_v54  ;;  %v1442_v62 = vrot.slane %v1433_v55, %v5354_v56 }
 0x303   : > { %v1368_v63 = vpop.xlane.xlu0 %1367 }
 0x304   : > { %v1372_v0 = vmul.f32 0.015625, %v1368_v63 }
 0x306   : > { %v1374_v1 = vsub.f32 %v5316_v57, %v1372_v0 }
 0x307   : > { %v1371_v2 = vpop.xlane.xlu1 %1370 }
 0x308   : > { %v1373_v4 = vmul.f32 0.015625, %v1371_v2  ;;  %v1376_v5 = vmul.f32 %v1374_v1, %v1374_v1 }
 0x30a   : > { %v1375_v6 = vsub.f32 %v5320_v61, %v1373_v4  ;;  %v1378_v7 = vsel %vm1320_vm1, %v1376_v5, 0.0 }
 0x30b   : > { %1379 = vadd.xlane.f32.xlu0 %v1378_v7 }
 0x30c   : > { %v1377_v8 = vmul.f32 %v1375_v6, %v1375_v6 }
 0x30e   : > { %v1381_v9 = vsel %vm1320_vm1, %v1377_v8, 0.0 }
 0x30f   : > { %1382 = vadd.xlane.f32.xlu1 %v1381_v9 }
 0x394   : > { %v1380_v35 = vpop.xlane.xlu0 %1379 }
 0x395   : > { %v1384_v36 = vmul.f32 0.015625, %v1380_v35  ;;  %v1536_v35 = vld [vmem:[%s6048_s4 + $0x8] sm:$0xff]  ;;  %s6063_s4 = sld [smem:[#allocation19_spill]] }
 0x397   : > { %v1386_v37 = vadd.f32 1e-06, %v1384_v36 }
 0x398   : > { %v1383_v38 = vpop.xlane.xlu1 %1382 }
 0x399   : > { %4790 = vrsqrt.f32 %v1386_v37  ;;  %v1385_v39 = vmul.f32 0.015625, %v1383_v38 }
 0x39b   : > { %v1387_v40 = vadd.f32 1e-06, %v1385_v39 }
 0x39d   : > { %4792 = vrsqrt.f32 %v1387_v40 }
 0x3a6   : > { %v4791_v41 = vpop.eup %4790 }
 0x3a7   : > { %v1390_v42 = vmul.f32 %v4791_v41, %v1374_v1 }
 0x3a9   : > { %v1398_v46 = vmul.f32 %v4178_v43, %v1390_v42 }
 0x3aa   : > { %v4793_v44 = vpop.eup %4792 }
 0x3ab   : > { %v1391_v45 = vmul.f32 %v4793_v44, %v1375_v6  ;;  %v1406_v49 = vadd.f32 %v4179_v47, %v1398_v46 }
 0x3ad   : > { %v1399_v48 = vmul.f32 %v4178_v43, %v1391_v45 }
 0x3af   : > { %v1407_v50 = vadd.f32 %v4179_v47, %v1399_v48 }
 0x3b1   : > { %v1424_v51 = vpack.c.bf16 %v1407_v50, %v1406_v49 }
 0x3b3   : > { %4180 = vmatmul.mubr.msk.bf16.vlgmr.msra.gmra.mxu1 %vm1320_vm1, %v1424_v51 }
 0x3b4   : > { %4416 = vmatprep.mubr.msk.bf16.mxu1 %vm5007_vm0, %v5006_v3 }
 0x473   : > { %v1482_v58 = vpop.f32.mrf.mxu1 }
 0x474   : > { %v1483_v0 = vadd.f32 %v1482_v58, %v1438_v59 }
 0x475   : > { %v1484_v60 = vpop.f32.mrf.mxu1 }
 0x476   : > { %v1485_v4 = vadd.f32 %v1484_v60, %v1442_v62 }
 0x477   : > { %v1486_v63 = vpop.f32.mrf.mxu1 }
 0x478   : > { %v1487_v1 = vadd.f32 %v1486_v63, %v1438_v59 }
 0x479   : > { %v1488_v2 = vpop.f32.mrf.mxu1 }
 0x47a   : > { %v1489_v5 = vadd.f32 %v1488_v2, %v1442_v62  ;;  %v4700_v6 = vpack.i.bf16 %v1487_v1, %v1483_v0  ;;  %v1531_v8 = vpack.c.bf16 %v1487_v1, %v1483_v0 }
 0x47c   : > { %4701 = vrot.lane.b32.xlu1 %v4700_v6, %s5998_s16  ;;  %4696 = vrot.lane.b32.xlu0 %v4700_v6, %s6000_s26  ;;  %v5360_v7 = vpack.i.bf16 %v1489_v5, %v1485_v4  ;;  %v1830_v29 = vpack.c.bf16 %v1489_v5, %v1485_v4 }
 0x480   : > { %4706 = vrot.lane.b32.xlu1 %v4700_v6, %s5996_s10 }
 0x484   : > { %1538 = vrot.lane.b32.xlu1 %v1531_v8, %s6005_s15 }
 0x4ee   : > { %v4702_v9 = vpop.permute.xlu1 %4701  ;;  %v4697_v10 = vpop.permute.xlu0 %4696 }
 0x4ef   : > { %v4704_v11 = vunpack.i.h.bf16 %v4702_v9  ;;  %v4703_v12 = vunpack.i.l.bf16 %v4702_v9  ;;  %v4699_v13 = vunpack.i.h.bf16 %v4697_v10  ;;  %v4698_v14 = vunpack.i.l.bf16 %v4697_v10 }
 0x4f1   : > { %v1533_v15 = vpack.c.bf16 %v4704_v11, %v4703_v12  ;;  %v1532_v16 = vpack.c.bf16 %v4699_v13, %v4698_v14 }
 0x4f2   : > { %v4707_v18 = vpop.permute.xlu1 %4706 }
 0x4f3   : > { %v4709_v19 = vunpack.i.h.bf16 %v4707_v18  ;;  %v4708_v20 = vunpack.i.l.bf16 %v4707_v18  ;;  %1589 = vrot.lane.b32.xlu0 %v1532_v16, %s6005_s15  ;;  %1639 = vrot.lane.b32.xlu1 %v1533_v15, %s6005_s15 }
 0x4f5   : > { %v1534_v21 = vpack.c.bf16 %v4709_v19, %v4708_v20 }
 0x4f6   : > { %v1539_v22 = vpop.permute.xlu1 %1538 }
 0x4f7   : > { %v1545_v23 = vsel %vm1540_vm2, %v1539_v22, 0  ;;  %1689 = vrot.lane.b32.xlu0 %v1534_v21, %s6005_s15  ;;  %s6060_s15 = sld [smem:[#allocation17_spill]] }
 0x4f8   : > { %4415 = vmatpush3.bf16.xpose.msra.mxu1 %v1545_v23 }
 0x4f9   : > { %4420 = vmatprep.subr.bf16.mxu1 %v5006_v3 }
 0x4ff   : > { %4417 = vmatmul.mubr.msk.bf16.vlgmr.msra.gmra.mxu1 %vm1540_vm2, %v1531_v8 }
 0x500   : > { %4422 = vmatprep.mubr.msk.bf16.mxu1 %vm5007_vm0, %v5006_v3 }
 0x565   : > { %v1590_v24 = vpop.permute.xlu0 %1589  ;;  %v1640_v25 = vpop.permute.xlu1 %1639 }
 0x566   : > { %v1595_v26 = vsel %vm1540_vm2, %v1590_v24, 0  ;;  %v1645_v27 = vsel %vm1540_vm2, %v1640_v25, 0 }
 0x567   : > { %4421 = vmatpush3.bf16.xpose.msra.mxu1 %v1595_v26  ;;  %4427 = vmatpush3.bf16.xpose.msra.mxu0 %v1645_v27 }
 0x568   : > { %4432 = vmatprep.subr.bf16.mxu1 %v5006_v3  ;;  %4438 = vmatprep.subr.bf16.mxu0 %v5006_v3 }
 0x569   : > { %v1690_v28 = vpop.permute.xlu0 %1689 }
 0x56a   : > { %v1695_v30 = vsel %vm1540_vm2, %v1690_v28, 0 }
 0x56e   : > { %4423 = vmatmul.mubr.msk.bf16.vlgmr.msra.gmra.mxu1 %vm1540_vm2, %v1532_v16  ;;  %4429 = vmatmul.mubr.msk.bf16.vlgmr.msra.gmra.mxu0 %vm1540_vm2, %v1533_v15 }
 0x56f   : > { %4433 = vmatpush3.bf16.xpose.msra.mxu1 %v1695_v30  ;;  %4439 = vmatpush3.bf16.msra.mxu0 %v1830_v29 }
 0x570   : > { %4434 = vmatprep.mubr.msk.bf16.mxu1 %vm5007_vm0, %v5006_v3  ;;  %4444 = vmatprep.subr.bf16.mxu1 %v5006_v3 }
 0x571   : > { %4440 = vmatprep.mubr.msk.bf16.mxu0 %vm5007_vm0, %v5006_v3  ;;  %4450 = vmatprep.subr.bf16.mxu0 %v5006_v3 }
 0x576   : > { %4435 = vmatmul.mubr.msk.bf16.vlgmr.msra.gmra.mxu1 %vm1540_vm2, %v1534_v21 }
 0x577   : > { %4446 = vmatprep.mubr.msk.bf16.mxu1 %vm5007_vm0, %v5006_v3 }
 0x5bf   : > { %v1581_v32 = vpop.f32.mrf.mxu1 }
 0x5c0   : > { %v1582_v33 = vadd.f32 %v1581_v32, %v1535_v31 }
 0x5c1   : > { %v4418_v34 = vpop.f32.mrf.mxu1 }
 0x5c2   : > { %v1738_v36 = vsel %vm1540_vm2, %v1582_v33, -inf }
 0x5c3   : > { %1739 = vmax.xlane.f32.xlu1 %v1738_v36  ;;  %v1584_v37 = vpop.f32.mrf.mxu1 }
 0x5c4   : > { %v1585_v38 = vadd.f32 %v1584_v37, %v1536_v35 }
 0x5c5   : > { %v4419_v39 = vpop.f32.mrf.mxu1 }
 0x5c6   : > { %v1741_v40 = vsel %vm1540_vm2, %v1585_v38, -inf }
 0x5c7   : > { %1742 = vmax.xlane.f32.xlu0 %v1741_v40 }
 0x62e   : > { %v1631_v41 = vpop.f32.mrf.mxu1  ;;  %v1681_v42 = vpop.f32.mrf.mxu0 }
 0x62f   : > { %v1632_v43 = vadd.f32 %v1631_v41, %v1535_v31  ;;  %v1682_v44 = vadd.f32 %v1681_v42, %v1535_v31 }
 0x630   : > { %v4424_v45 = vpop.f32.mrf.mxu1  ;;  %v4430_v46 = vpop.f32.mrf.mxu0 }
 0x631   : > { %v1744_v47 = vsel %vm1540_vm2, %v1632_v43, -inf  ;;  %v1750_v48 = vsel %vm1540_vm2, %v1682_v44, -inf }
 0x632   : > { %1745 = vmax.xlane.f32.xlu0 %v1744_v47  ;;  %v1634_v49 = vpop.f32.mrf.mxu1  ;;  %1751 = vmax.xlane.f32.xlu1 %v1750_v48  ;;  %v1684_v50 = vpop.f32.mrf.mxu0 }
 0x633   : > { %v1635_v51 = vadd.f32 %v1634_v49, %v1536_v35  ;;  %v1685_v55 = vadd.f32 %v1684_v50, %v1536_v35 }
 0x634   : > { %v4425_v52 = vpop.f32.mrf.mxu1  ;;  %v4431_v53 = vpop.f32.mrf.mxu0 }
 0x635   : > { %v1747_v58 = vsel %vm1540_vm2, %v1635_v51, -inf  ;;  %v1753_v0 = vsel %vm1540_vm2, %v1685_v55, -inf }
 0x636   : > { %1748 = vmax.xlane.f32.xlu0 %v1747_v58  ;;  %v1731_v59 = vpop.f32.mrf.mxu1 }
 0x637   : > { %v1732_v60 = vadd.f32 %v1731_v59, %v1535_v31 }
 0x638   : > { %v4436_v62 = vpop.f32.mrf.mxu1 }
 0x639   : > { %v1756_v63 = vsel %vm1540_vm2, %v1732_v60, -inf }
 0x63a   : > { %v1734_v1 = vpop.f32.mrf.mxu1  ;;  %1757 = vmax.xlane.f32.xlu1 %v1756_v63  ;;  %1754 = vmax.xlane.f32.xlu0 %v1753_v0 }
 0x63b   : > { %v1735_v2 = vadd.f32 %v1734_v1, %v1536_v35 }
 0x63c   : > { %v4437_v4 = vpop.f32.mrf.mxu1 }
 0x63d   : > { %v1759_v5 = vsel %vm1540_vm2, %v1735_v2, -inf }
 0x63e   : > { %1760 = vmax.xlane.f32.xlu0 %v1759_v5 }
 0x64b   : > { %4711 = vrot.lane.b32.xlu1 %v5360_v7, %s6000_s26  ;;  %s6002_s26 = smov 48  }
 0x64c   : > { %v1740_v9 = vpop.xlane.xlu1 %1739 }
 0x64d   : > { %v1762_v11 = vsub.f32 %v1582_v33, %v1740_v9 }
 0x64f   : > { %v1770_v12 = vmul.f32 1.442695, %v1762_v11 }
 0x650   : > { %v1743_v6 = vpop.xlane.xlu0 %1742 }
 0x651   : > { %v1763_v8 = vsub.f32 %v1585_v38, %v1743_v6 }
 0x653   : > { %v1772_v10 = vmul.f32 1.442695, %v1763_v8 }
 0x655   : > { %4794 = vpow2.f32 %v1772_v10 }
 0x656   : > { %4796 = vpow2.f32 %v1770_v12 }
 0x662   : > { %v5400_v13 = vpop.eup %4794 }
 0x663   : > { %v1789_v14 = vsel %vm1540_vm2, %v5400_v13, 0.0  ;;  %v4797_v15 = vpop.eup %4796 }
 0x664   : > { %1790 = vadd.xlane.f32.xlu0 %v1789_v14  ;;  %v1786_v16 = vsel %vm1540_vm2, %v4797_v15, 0.0 }
 0x66f   : > { %1787 = vadd.xlane.f32.xlu1 %v1786_v16 }
 0x6bb   : > { %v1746_v18 = vpop.xlane.xlu0 %1745  ;;  %v1752_v19 = vpop.xlane.xlu1 %1751 }
 0x6bc   : > { %v1764_v20 = vsub.f32 %v1632_v43, %v1746_v18  ;;  %v1766_v21 = vsub.f32 %v1682_v44, %v1752_v19 }
 0x6be   : > { %v1774_v22 = vmul.f32 1.442695, %v1764_v20  ;;  %v1778_v23 = vmul.f32 1.442695, %v1766_v21 }
 0x6bf   : > { %v1749_v24 = vpop.xlane.xlu0 %1748 }
 0x6c0   : > { %4798 = vpow2.f32 %v1774_v22  ;;  %v1765_v25 = vsub.f32 %v1635_v51, %v1749_v24 }
 0x6c1   : > { %4800 = vpow2.f32 %v1778_v23 }
 0x6c2   : > { %v1776_v26 = vmul.f32 1.442695, %v1765_v25 }
 0x6c3   : > { %v1758_v27 = vpop.xlane.xlu1 %1757  ;;  %v1755_v28 = vpop.xlane.xlu0 %1754 }
 0x6c4   : > { %4802 = vpow2.f32 %v1776_v26  ;;  %v1768_v29 = vsub.f32 %v1732_v60, %v1758_v27  ;;  %v1767_v30 = vsub.f32 %v1685_v55, %v1755_v28 }
 0x6c6   : > { %v1782_v31 = vmul.f32 1.442695, %v1768_v29  ;;  %v1780_v32 = vmul.f32 1.442695, %v1767_v30  ;;  %v2048_v30 = vld [vmem:[%s5072_s14 + $0x30] sm:$0xff] }
 0x6c7   : > { %v4712_v33 = vpop.permute.xlu1 %4711  ;;  %v1761_v34 = vpop.xlane.xlu0 %1760 }
 0x6c8   : > { %4804 = vpow2.f32 %v1782_v31  ;;  %v4714_v35 = vunpack.i.h.bf16 %v4712_v33  ;;  %v4713_v36 = vunpack.i.l.bf16 %v4712_v33  ;;  %v1769_v37 = vsub.f32 %v1735_v2, %v1761_v34  ;;  %v2049_v31 = vld [vmem:[%s5072_s14 + $0x38] sm:$0xff] }
 0x6c9   : > { %4806 = vpow2.f32 %v1780_v32  ;;  %v2054_v32 = vpack.c.bf16 %v2049_v31, %v2048_v30 }
 0x6ca   : > { %v1831_v38 = vpack.c.bf16 %v4714_v35, %v4713_v36  ;;  %v1784_v39 = vmul.f32 1.442695, %v1769_v37  ;;  %v2046_v37 = vld [vmem:[%s5072_s14 + $0x20] sm:$0xff] }
 0x6cc   : > { %4808 = vpow2.f32 %v1784_v39  ;;  %4445 = vmatpush3.bf16.msra.mxu1 %v1831_v38  ;;  %v2047_v38 = vld [vmem:[%s5072_s14 + $0x28] sm:$0xff] }
 0x6cd   : > { %v4799_v40 = vpop.eup %4798  ;;  %4456 = vmatprep.subr.bf16.mxu1 %v5006_v3  ;;  %v2053_v39 = vpack.c.bf16 %v2047_v38, %v2046_v37  ;;  %v2167_v38 = vld [vmem:[%s6047_s6 + $0x68] sm:$0xff] }
 0x6ce   : > { %v1792_v41 = vsel %vm1540_vm2, %v4799_v40, 0.0  ;;  %v4801_v42 = vpop.eup %4800 }
 0x6cf   : > { %1793 = vadd.xlane.f32.xlu1 %v1792_v41  ;;  %v1798_v44 = vsel %vm1540_vm2, %v4801_v42, 0.0  ;;  %v2045_v41 = vld [vmem:[%s5072_s14 + $0x18] sm:$0xff] }
 0x6d1   : > { %v4803_v43 = vpop.eup %4802 }
 0x6d2   : > { %v1795_v45 = vsel %vm1540_vm2, %v4803_v43, 0.0 }
 0x6d3   : > { %1799 = vadd.xlane.f32.xlu1 %v1798_v44  ;;  %1796 = vadd.xlane.f32.xlu0 %v1795_v45  ;;  %v2042_v45 = vld [vmem:[%s5072_s14] sm:$0xff] }
 0x6d5   : > { %v4805_v46 = vpop.eup %4804 }
 0x6d6   : > { %v4807_v47 = vpop.eup %4806  ;;  %v1804_v48 = vsel %vm1540_vm2, %v4805_v46, 0.0 }
 0x6d7   : > { %1805 = vadd.xlane.f32.xlu1 %v1804_v48  ;;  %v1801_v49 = vsel %vm1540_vm2, %v4807_v47, 0.0 }
 0x6d8   : > { %1802 = vadd.xlane.f32.xlu0 %v1801_v49 }
 0x6d9   : > { %v4809_v50 = vpop.eup %4808 }
 0x6da   : > { %v1807_v51 = vsel %vm1540_vm2, %v4809_v50, 0.0 }
 0x6dc   : > { %1808 = vadd.xlane.f32.xlu0 %v1807_v51 }
 0x6e8   : > { %4721 = vrot.lane.b32.xlu1 %v5360_v7, %s5996_s10  ;;  %s6004_s10 = smov 16  }
 0x6ed   : > { %v1791_v52 = vpop.xlane.xlu0 %1790 }
 0x6ee   : > { %4810 = vrcp.f32 %v1791_v52 }
 0x6f2   : > { %4716 = vrot.lane.b32.xlu0 %v5360_v7, %s5998_s16  ;;  %s6003_s16 = smov 32  }
 0x6f8   : > { %v1788_v53 = vpop.xlane.xlu1 %1787 }
 0x6f9   : > { %4812 = vrcp.f32 %v1788_v53 }
 0x6fb   : > { %v4811_v55 = vpop.eup %4810 }
 0x6fc   : > { %v1819_v60 = vmul.f32 %v4811_v55, %v5400_v13 }
 0x706   : > { %v4813_v58 = vpop.eup %4812 }
 0x707   : > { %v1818_v59 = vmul.f32 %v4813_v58, %v4797_v15 }
 0x709   : > { %v1826_v62 = vpack.c.bf16 %v1819_v60, %v1818_v59 }
 0x70b   : > { %4441 = vmatmul.mubr.msk.bf16.vlgmr.msra.gmra.mxu0 %vm1540_vm2, %v1826_v62 }
 0x70c   : > { %4452 = vmatprep.mubr.msk.bf16.mxu0 %vm5007_vm0, %v5006_v3 }
 0x758   : > { %v1794_v63 = vpop.xlane.xlu1 %1793 }
 0x759   : > { %4814 = vrcp.f32 %v1794_v63 }
 0x75c   : > { %v1800_v0 = vpop.xlane.xlu1 %1799  ;;  %v1797_v1 = vpop.xlane.xlu0 %1796 }
 0x75d   : > { %4816 = vrcp.f32 %v1797_v1 }
 0x75e   : > { %4818 = vrcp.f32 %v1800_v0 }
 0x760   : > { %v1806_v7 = vpop.xlane.xlu1 %1805 }
 0x761   : > { %v1803_v2 = vpop.xlane.xlu0 %1802 }
 0x762   : > { %4820 = vrcp.f32 %v1803_v2 }
 0x763   : > { %4822 = vrcp.f32 %v1806_v7 }
 0x764   : > { %v4722_v5 = vpop.permute.xlu1 %4721 }
 0x765   : > { %v1809_v4 = vpop.xlane.xlu0 %1808  ;;  %v4724_v12 = vunpack.i.h.bf16 %v4722_v5  ;;  %v4723_v13 = vunpack.i.l.bf16 %v4722_v5 }
 0x766   : > { %4824 = vrcp.f32 %v1809_v4  ;;  %v4815_v6 = vpop.eup %4814 }
 0x767   : > { %v1820_v15 = vmul.f32 %v4815_v6, %v4799_v40  ;;  %v1833_v21 = vpack.c.bf16 %v4724_v12, %v4723_v13  ;;  %v2044_v40 = vld [vmem:[%s5072_s14 + $0x10] sm:$0xff] }
 0x769   : > { %v4717_v8 = vpop.permute.xlu0 %4716 }
 0x76a   : > { %v4719_v9 = vunpack.i.h.bf16 %v4717_v8  ;;  %v4718_v10 = vunpack.i.l.bf16 %v4717_v8  ;;  %v4817_v11 = vpop.eup %4816 }
 0x76b   : > { %v1821_v16 = vmul.f32 %v4817_v11, %v4803_v43  ;;  %v4819_v18 = vpop.eup %4818 }
 0x76c   : > { %v1832_v14 = vpack.c.bf16 %v4719_v9, %v4718_v10  ;;  %v1822_v22 = vmul.f32 %v4819_v18, %v4801_v42  ;;  %v2052_v42 = vpack.c.bf16 %v2045_v41, %v2044_v40  ;;  %v2166_v41 = vld [vmem:[%s6047_s6 + $0x60] sm:$0xff] }
 0x76d   : > { %v1827_v19 = vpack.c.bf16 %v1821_v16, %v1820_v15 }
 0x76e   : > { %4451 = vmatpush3.bf16.msra.mxu0 %v1832_v14 }
 0x76f   : > { %v4821_v20 = vpop.eup %4820  ;;  %4462 = vmatprep.subr.bf16.mxu0 %v5006_v3  ;;  %4447 = vmatmul.mubr.msk.bf16.vlgmr.msra.gmra.mxu1 %vm1540_vm2, %v1827_v19 }
 0x770   : > { %v1823_v23 = vmul.f32 %v4821_v20, %v4807_v47  ;;  %v4823_v24 = vpop.eup %4822  ;;  %4457 = vmatpush3.bf16.msra.mxu1 %v1833_v21  ;;  %4458 = vmatprep.mubr.msk.bf16.mxu1 %vm5007_vm0, %v5006_v3  ;;  %v4190_v20 = vld [vmem:[%s5077_s19] ss:$0 sm:$0xff] }
 0x771   : > { %v1824_v27 = vmul.f32 %v4823_v24, %v4805_v46  ;;  %v2043_v46 = vld [vmem:[%s5072_s14 + $0x8] sm:$0xff] }
 0x772   : > { %v1828_v25 = vpack.c.bf16 %v1823_v23, %v1822_v22  ;;  %v2051_v47 = vpack.c.bf16 %v2043_v46, %v2042_v45  ;;  %v2165_v45 = vld [vmem:[%s6047_s6 + $0x58] sm:$0xff] }
 0x773   : > { %v4825_v26 = vpop.eup %4824 }
 0x774   : > { %4453 = vmatmul.mubr.msk.bf16.vlgmr.msra.gmra.mxu0 %vm1540_vm2, %v1828_v25  ;;  %v1825_v28 = vmul.f32 %v4825_v26, %v4809_v50 }
 0x775   : > { %4470 = vmatprep.mubr.msk.bf16.mxu0 %vm5007_vm0, %v5006_v3  ;;  %4463 = vmatpush3.bf16.msra.mxu0 %v2054_v32 }
 0x776   : > { %v1829_v29 = vpack.c.bf16 %v1825_v28, %v1824_v27  ;;  %4464 = vmatprep.subr.bf16.mxu0 %v5006_v3 }
 0x778   : > { %4459 = vmatmul.mubr.msk.bf16.vlgmr.msra.gmra.mxu1 %vm1540_vm2, %v1829_v29 }
 0x779   : > { %2226 = vmatprep.mubr.bf16.mxu1 %v5008_v17  ;;  %4465 = vmatpush3.bf16.msra.mxu0 %v2053_v39  ;;  %v2169_v39 = vld [vmem:[%s6047_s6 + $0x78] sm:$0xff] }
 0x77a   : > { %4466 = vmatprep.subr.bf16.mxu0 %v5006_v3  ;;  %v2178_v40 = vpack.c.bf16 %v2169_v39, %v2167_v38 }
 0x77c   : > { %2202 = vmatprep.subr.bf16.mxu1 %v2178_v40 }
 0x77d   : > { %4467 = vmatpush3.bf16.msra.mxu0 %v2052_v42  ;;  %v2168_v42 = vld [vmem:[%s6047_s6 + $0x70] sm:$0xff] }
 0x77e   : > { %4468 = vmatprep.subr.bf16.mxu0 %v5006_v3 }
 0x781   : > { %4469 = vmatpush3.bf16.msra.mxu0 %v2051_v47  ;;  %v2162_v47 = vld [vmem:[%s6047_s6 + $0x40] sm:$0xff] }
 0x7cb   : > { %v1871_v33 = vpop.f32.mrf.mxu0 }
 0x7cd   : > { %v4442_v34 = vpop.f32.mrf.mxu0 }
 0x7cf   : > { %v1874_v35 = vpop.f32.mrf.mxu0 }
 0x7d1   : > { %v4443_v36 = vpop.f32.mrf.mxu0 }
 0x82f   : > { %v1915_v43 = vpop.f32.mrf.mxu1 }
 0x831   : > { %v4448_v44 = vpop.f32.mrf.mxu1 }
 0x832   : > { %v2163_v44 = vld [vmem:[%s6047_s6 + $0x48] sm:$0xff] }
 0x833   : > { %v1918_v48 = vpop.f32.mrf.mxu1  ;;  %v2176_v46 = vpack.c.bf16 %v2165_v45, %v2163_v44 }
 0x834   : > { %v1959_v49 = vpop.f32.mrf.mxu0  ;;  %v4725_v50 = vpack.i.bf16 %v1918_v48, %v1915_v43  ;;  %v2177_v43 = vpack.c.bf16 %v2168_v42, %v2166_v41  ;;  %v2164_v48 = vld [vmem:[%s6047_s6 + $0x50] sm:$0xff] }
 0x835   : > { %v4449_v51 = vpop.f32.mrf.mxu1 }
 0x836   : > { %v4454_v52 = vpop.f32.mrf.mxu0  ;;  %4726 = vrot.lane.b32.xlu1 %v4725_v50, %s6004_s10  ;;  %2203 = vmatpush1.bf16.msra.mxu1 %v2177_v43  ;;  %v2159_v50 = vld [vmem:[%s6047_s6 + $0x28] sm:$0xff]  ;;  %v2161_v51 = vld [vmem:[%s6047_s6 + $0x38] sm:$0xff]  ;;  %s6058_s10 = sld [smem:[#allocation15_spill]] }
 0x837   : > { %2204 = vmatprep.subr.bf16.mxu1 %v2176_v46  ;;  %v2174_v52 = vpack.c.bf16 %v2161_v51, %v2159_v50 }
 0x838   : > { %v1962_v53 = vpop.f32.mrf.mxu0  ;;  %v2003_v55 = vpop.f32.mrf.mxu1 }
 0x839   : > { %v4730_v58 = vpack.i.bf16 %v1962_v53, %v1959_v49  ;;  %v2175_v49 = vpack.c.bf16 %v2164_v48, %v2162_v47  ;;  %v2158_v53 = vld [vmem:[%s6047_s6 + $0x20] sm:$0xff] }
 0x83a   : > { %v4455_v59 = vpop.f32.mrf.mxu0  ;;  %v4460_v60 = vpop.f32.mrf.mxu1 }
 0x83b   : > { %4731 = vrot.lane.b32.xlu1 %v4730_v58, %s6003_s16  ;;  %2205 = vmatpush1.bf16.msra.mxu1 %v2175_v49  ;;  %v2155_v59 = vld [vmem:[%s6047_s6 + $0x8] sm:$0xff]  ;;  %v2157_v60 = vld [vmem:[%s6047_s6 + $0x18] sm:$0xff]  ;;  %s6055_s16 = sld [smem:[#allocation12_spill]] }
 0x83c   : > { %v2006_v62 = vpop.f32.mrf.mxu1  ;;  %2206 = vmatprep.subr.bf16.mxu1 %v2174_v52 }
 0x83d   : > { %v4735_v63 = vpack.i.bf16 %v2006_v62, %v2003_v55  ;;  %v2160_v55 = vld [vmem:[%s6047_s6 + $0x30] sm:$0xff]  ;;  %v2154_v62 = vld [vmem:[%s6047_s6] sm:$0xff] }
 0x83e   : > { %v4461_v0 = vpop.f32.mrf.mxu1  ;;  %v2173_v58 = vpack.c.bf16 %v2160_v55, %v2158_v53 }
 0x83f   : > { %4736 = vrot.lane.b32.xlu0 %v4735_v63, %s6002_s26  ;;  %v2172_v63 = vpack.c.bf16 %v2157_v60, %v2155_v59  ;;  %v2156_v0 = vld [vmem:[%s6047_s6 + $0x10] sm:$0xff]  ;;  %s6054_s26 = sld [smem:[#allocation9_spill]] }
 0x840   : > { %2207 = vmatpush1.bf16.msra.mxu1 %v2173_v58  ;;  %s6065_s6 = sld [smem:[#allocation23_spill]] }
 0x841   : > { %2208 = vmatprep.subr.bf16.mxu1 %v2172_v63  ;;  %v2369_v39 = vld [vmem:[%s6055_s16 + $0xc0] sm:$0xff]  ;;  %v2370_v40 = vld [vmem:[%s6055_s16 + $0xc8] sm:$0xff]  ;;  %v2367_v45 = vld [vmem:[%s6055_s16 + $0xb0] sm:$0xff] }
 0x842   : > { %v2391_v41 = vpack.c.bf16 %v2370_v40, %v2369_v39  ;;  %v2353_v42 = vld [vmem:[%s6055_s16 + $0x40] sm:$0xff]  ;;  %v2354_v43 = vld [vmem:[%s6055_s16 + $0x48] sm:$0xff]  ;;  %v2368_v46 = vld [vmem:[%s6055_s16 + $0xb8] sm:$0xff] }
 0x843   : > { %v2383_v44 = vpack.c.bf16 %v2354_v43, %v2353_v42  ;;  %v2390_v47 = vpack.c.bf16 %v2368_v46, %v2367_v45  ;;  %v2351_v48 = vld [vmem:[%s6055_s16 + $0x30] sm:$0xff]  ;;  %v2352_v49 = vld [vmem:[%s6055_s16 + $0x38] sm:$0xff]  ;;  %v2365_v51 = vld [vmem:[%s6055_s16 + $0xa0] sm:$0xff] }
 0x844   : > { %v2382_v50 = vpack.c.bf16 %v2352_v49, %v2351_v48  ;;  %v2366_v52 = vld [vmem:[%s6055_s16 + $0xa8] sm:$0xff]  ;;  %v2349_v55 = vld [vmem:[%s6055_s16 + $0x20] sm:$0xff]  ;;  %v2363_v60 = vld [vmem:[%s6055_s16 + $0x90] sm:$0xff] }
 0x845   : > { %v2389_v53 = vpack.c.bf16 %v2366_v52, %v2365_v51  ;;  %v2350_v58 = vld [vmem:[%s6055_s16 + $0x28] sm:$0xff] }
 0x846   : > { %v2381_v59 = vpack.c.bf16 %v2350_v58, %v2349_v55 }
 0x8a8   : > { %v4727_v1 = vpop.permute.xlu1 %4726 }
 0x8a9   : > { %v4729_v2 = vunpack.i.h.bf16 %v4727_v1  ;;  %v4728_v4 = vunpack.i.l.bf16 %v4727_v1  ;;  %v2171_v1 = vpack.c.bf16 %v2156_v0, %v2154_v62  ;;  %v2364_v62 = vld [vmem:[%s6055_s16 + $0x98] sm:$0xff]  ;;  %v2347_v0 = vld [vmem:[%s6055_s16 + $0x10] sm:$0xff] }
 0x8aa   : > { %v2388_v63 = vpack.c.bf16 %v2364_v62, %v2363_v60 }
 0x8ab   : > { %v2034_v9 = vsel %vm1540_vm2, %v1871_v33, %v4728_v4  ;;  %v2035_v10 = vsel %vm1540_vm2, %v1874_v35, %v4729_v2  ;;  %2209 = vmatpush1.bf16.msra.mxu1 %v2171_v1  ;;  %v2348_v1 = vld [vmem:[%s6055_s16 + $0x18] sm:$0xff] }
 0x8ac   : > { %4602 = vmatprep.subr.bf16.mxu1 %v5006_v3 }
 0x8ad   : > { %v4732_v7 = vpop.permute.xlu1 %4731 }
 0x8ae   : > { %v4734_v5 = vunpack.i.h.bf16 %v4732_v7  ;;  %v4733_v6 = vunpack.i.l.bf16 %v4732_v7 }
 0x8b0   : > { %v2038_v13 = vsel %vm2036_vm3, %v2035_v10, %v4734_v5  ;;  %v2037_v14 = vsel %vm2036_vm3, %v2034_v9, %v4733_v6 }
 0x8b1   : > { %v4737_v8 = vpop.permute.xlu0 %4736 }
 0x8b2   : > { %v4739_v11 = vunpack.i.h.bf16 %v4737_v8  ;;  %v4738_v12 = vunpack.i.l.bf16 %v4737_v8 }
 0x8b4   : > { %v2040_v15 = vsel %vm2039_vm4, %v2037_v14, %v4738_v12  ;;  %v2041_v16 = vsel %vm2039_vm4, %v2038_v13, %v4739_v11  ;;  %v4191_v11 = vld [vmem:[%s5082_s24] ss:$0 sm:$0xff] }
 0x8b5   : > { %v2050_v18 = vpack.c.bf16 %v2041_v16, %v2040_v15  ;;  %v4192_v15 = vld [vmem:[%s6054_s26] ss:$0 sm:$0xff]  ;;  %s6056_s26 = sld [smem:[#allocation11_spill]] }
 0x8b7   : > { %4471 = vmatmul.mubr.msk.bf16.vlgmr.msra.gmra.mxu0 %vm1320_vm1, %v2050_v18 }
 0x977   : > { %v2092_v19 = vpop.f32.mrf.mxu0 }
 0x978   : > { %v2099_v21 = vadd.f32 %v2092_v19, %v5316_v57 }
 0x979   : > { %v4472_v22 = vpop.f32.mrf.mxu0 }
 0x97a   : > { %v5452_v23 = vadd.f32 %v4190_v20, %v2099_v21  ;;  %v2375_v21 = vld [vmem:[%s6055_s16 + $0xf0] sm:$0xff]  ;;  %v2376_v22 = vld [vmem:[%s6055_s16 + $0xf8] sm:$0xff] }
 0x97b   : > { %v2095_v24 = vpop.f32.mrf.mxu0 }
 0x97c   : > { %v2100_v25 = vadd.f32 %v2095_v24, %v5320_v61  ;;  %v2112_v26 = vsel %vm1320_vm1, %v5452_v23, 0.0  ;;  %v2394_v24 = vpack.c.bf16 %v2376_v22, %v2375_v21 }
 0x97d   : > { %2113 = vadd.xlane.f32.xlu1 %v2112_v26  ;;  %v4473_v27 = vpop.f32.mrf.mxu0  ;;  %v2360_v26 = vld [vmem:[%s6055_s16 + $0x78] sm:$0xff] }
 0x97e   : > { %v5457_v28 = vadd.f32 %v4190_v20, %v2100_v25  ;;  %v2359_v25 = vld [vmem:[%s6055_s16 + $0x70] sm:$0xff]  ;;  %4285 = vmatprep.subr.bf16.mxu0 %v2394_v24 }
 0x97f   : > { %v2386_v27 = vpack.c.bf16 %v2360_v26, %v2359_v25 }
 0x980   : > { %v2115_v29 = vsel %vm1320_vm1, %v5457_v28, 0.0 }
 0x981   : > { %2116 = vadd.xlane.f32.xlu0 %v2115_v29  ;;  %4286 = vmatpush3.bf16.msra.mxu0 %v2386_v27  ;;  %v2373_v29 = vld [vmem:[%s6055_s16 + $0xe0] sm:$0xff] }
 0xa06   : > { %v2114_v57 = vpop.xlane.xlu1 %2113 }
 0xa07   : > { %v2118_v30 = vmul.f32 0.015625, %v2114_v57  ;;  %v2374_v57 = vld [vmem:[%s6055_s16 + $0xe8] sm:$0xff] }
 0xa09   : > { %v2120_v31 = vsub.f32 %v5452_v23, %v2118_v30  ;;  %v2393_v30 = vpack.c.bf16 %v2374_v57, %v2373_v29 }
 0xa0a   : > { %v2117_v61 = vpop.xlane.xlu0 %2116 }
 0xa0b   : > { %v2119_v32 = vmul.f32 0.015625, %v2117_v61  ;;  %v2122_v33 = vmul.f32 %v2120_v31, %v2120_v31  ;;  %v2358_v61 = vld [vmem:[%s6055_s16 + $0x68] sm:$0xff]  ;;  %4287 = vmatprep.subr.bf16.mxu0 %v2393_v30 }
 0xa0d   : > { %v2121_v34 = vsub.f32 %v5457_v28, %v2119_v32  ;;  %v2124_v35 = vsel %vm1320_vm1, %v2122_v33, 0.0  ;;  %v2371_v33 = vld [vmem:[%s6055_s16 + $0xd0] sm:$0xff] }
 0xa0e   : > { %2125 = vadd.xlane.f32.xlu0 %v2124_v35 }
 0xa0f   : > { %v2123_v36 = vmul.f32 %v2121_v34, %v2121_v34 }
 0xa11   : > { %v2127_v37 = vsel %vm1320_vm1, %v2123_v36, 0.0  ;;  %v2355_v36 = vld [vmem:[%s6055_s16 + $0x50] sm:$0xff] }
 0xa12   : > { %2128 = vadd.xlane.f32.xlu0 %v2127_v37  ;;  %v2356_v37 = vld [vmem:[%s6055_s16 + $0x58] sm:$0xff] }
 0xa13   : > { %v2384_v38 = vpack.c.bf16 %v2356_v37, %v2355_v36 }
 0xa97   : > { %v2126_v7 = vpop.xlane.xlu0 %2125 }
 0xa98   : > { %v2130_v2 = vmul.f32 0.015625, %v2126_v7  ;;  %v2380_v7 = vpack.c.bf16 %v2348_v1, %v2347_v0 }
 0xa9a   : > { %v2132_v4 = vadd.f32 1e-06, %v2130_v2  ;;  %v2361_v2 = vld [vmem:[%s6055_s16 + $0x80] sm:$0xff] }
 0xa9b   : > { %v2129_v5 = vpop.xlane.xlu0 %2128 }
 0xa9c   : > { %4826 = vrsqrt.f32 %v2132_v4  ;;  %v2131_v6 = vmul.f32 0.015625, %v2129_v5  ;;  %v2362_v4 = vld [vmem:[%s6055_s16 + $0x88] sm:$0xff] }
 0xa9d   : > { %v2387_v5 = vpack.c.bf16 %v2362_v4, %v2361_v2 }
 0xa9e   : > { %v2133_v8 = vadd.f32 1e-06, %v2131_v6  ;;  %v2345_v6 = vld [vmem:[%s6055_s16] sm:$0xff] }
 0xaa0   : > { %4828 = vrsqrt.f32 %v2133_v8  ;;  %v2346_v8 = vld [vmem:[%s6055_s16 + $0x8] sm:$0xff] }
 0xaa9   : > { %v4827_v9 = vpop.eup %4826 }
 0xaaa   : > { %v2136_v10 = vmul.f32 %v4827_v9, %v2120_v31  ;;  %v2357_v31 = vld [vmem:[%s6055_s16 + $0x60] sm:$0xff]  ;;  %v2379_v9 = vpack.c.bf16 %v2346_v8, %v2345_v6 }
 0xaab   : > { %v2385_v32 = vpack.c.bf16 %v2358_v61, %v2357_v31 }
 0xaac   : > { %v2144_v14 = vmul.f32 %v4191_v11, %v2136_v10  ;;  %v2179_v10 = vld [vmem:[%s6056_s26] sm:$0x3]  ;;  %s6057_s26 = sld [smem:[#allocation13_spill]] }
 0xaad   : > { %v4829_v12 = vpop.eup %4828  ;;  %4288 = vmatpush3.bf16.msra.mxu0 %v2385_v32 }
 0xaae   : > { %v2137_v13 = vmul.f32 %v4829_v12, %v2121_v34  ;;  %v2152_v18 = vadd.f32 %v4192_v15, %v2144_v14  ;;  %v2372_v34 = vld [vmem:[%s6055_s16 + $0xd8] sm:$0xff]  ;;  %v2188_v12 = vrot.slane %v2179_v10, %v5354_v56 }
 0xaaf   : > { %v2392_v35 = vpack.c.bf16 %v2372_v34, %v2371_v33 }
 0xab0   : > { %v2145_v16 = vmul.f32 %v4191_v11, %v2137_v13  ;;  %v2184_v11 = vrot.slane %v2179_v10, %v5351_v54 }
 0xab1   : > { %4289 = vmatprep.subr.bf16.mxu0 %v2392_v35 }
 0xab2   : > { %v2153_v19 = vadd.f32 %v4192_v15, %v2145_v16  ;;  %4290 = vmatpush3.bf16.msra.mxu0 %v2384_v38 }
 0xab3   : > { %4291 = vmatprep.subr.bf16.mxu0 %v2391_v41 }
 0xab4   : > { %v2170_v20 = vpack.c.bf16 %v2153_v19, %v2152_v18 }
 0xab6   : > { %4193 = vmatmul.mubr.msk.bf16.vlgmr.msra.gmra.mxu1 %vm1320_vm1, %v2170_v20  ;;  %4292 = vmatpush3.bf16.msra.mxu0 %v2383_v44 }
 0xab7   : > { %4484 = vmatprep.mubr.msk.bf16.mxu1 %vm5007_vm0, %v5006_v3  ;;  %4293 = vmatprep.subr.bf16.mxu0 %v2390_v47 }
 0xaba   : > { %4294 = vmatpush3.bf16.msra.mxu0 %v2382_v50 }
 0xabb   : > { %4295 = vmatprep.subr.bf16.mxu0 %v2389_v53 }
 0xabe   : > { %4296 = vmatpush3.bf16.msra.mxu0 %v2381_v59 }
 0xabf   : > { %4297 = vmatprep.subr.bf16.mxu0 %v2388_v63 }
 0xac2   : > { %4298 = vmatpush3.bf16.msra.mxu0 %v2380_v7 }
 0xac3   : > { %4299 = vmatprep.subr.bf16.mxu0 %v2387_v5 }
 0xac6   : > { %4300 = vmatpush3.bf16.msra.mxu0 %v2379_v9 }
 0xac7   : > { %4474 = vmatprep.subr.bf16.mxu0 %v5006_v3 }
 0xb76   : > { %v2228_v13 = vpop.f32.mrf.mxu1 }
 0xb77   : > { %v5523_v14 = vadd.f32 %v2228_v13, %v2184_v11 }
 0xb78   : > { %v2230_v15 = vpop.f32.mrf.mxu1 }
 0xb79   : > { %v5526_v16 = vmul.f32 0.70710677, %v5523_v14  ;;  %v5528_v18 = vadd.f32 %v2230_v15, %v2188_v12 }
 0xb7a   : > { %v2232_v19 = vpop.f32.mrf.mxu1 }
 0xb7b   : > { %v2241_v20 = vand.u32 2147483647, %v5526_v16  ;;  %v5532_v21 = vmul.f32 0.70710677, %v5528_v18  ;;  %v5534_v22 = vadd.f32 %v2232_v19, %v2184_v11  ;;  %vm2321_vm6 = vcmp.ge.f32.partialorder %v5526_v16, 0.0 }
 0xb7c   : > { %v2234_v24 = vpop.f32.mrf.mxu1 }
 0xb7d   : > { %v2245_v25 = vmul.f32 0.3275911, %v2241_v20  ;;  %v2242_v26 = vand.u32 2147483647, %v5532_v21  ;;  %v5538_v27 = vmul.f32 0.70710677, %v5534_v22  ;;  %v5540_v29 = vadd.f32 %v2234_v24, %v2188_v12 }
 0xb7e   : > { %v2297_v38 = vsub.f32 0.0, %v2241_v20  ;;  %vm2322_vm5 = vcmp.ge.f32.partialorder %v5532_v21, 0.0  ;;  %v2334_v21 = vmul.f32 0.5, %v5528_v18 }
 0xb7f   : > { %v2249_v57 = vadd.f32 1.0, %v2245_v25  ;;  %v2246_v30 = vmul.f32 0.3275911, %v2242_v26  ;;  %v2243_v31 = vand.u32 2147483647, %v5538_v27  ;;  %v2298_v39 = vsub.f32 0.0, %v2242_v26 }
 0xb80   : > { %v5544_v61 = vmul.f32 0.70710677, %v5540_v29  ;;  %v2301_v40 = vmul.f32 %v2297_v38, %v2241_v20  ;;  %vm2323_vm7 = vcmp.ge.f32.partialorder %v5538_v27, 0.0 }
 0xb81   : > { %4830 = vrcp.f32 %v2249_v57  ;;  %v2250_v32 = vadd.f32 1.0, %v2246_v30  ;;  %v2247_v33 = vmul.f32 0.3275911, %v2243_v31  ;;  %v2299_v41 = vsub.f32 0.0, %v2243_v31 }
 0xb82   : > { %v2244_v34 = vand.u32 2147483647, %v5544_v61  ;;  %v2302_v43 = vmul.f32 %v2298_v39, %v2242_v26  ;;  %v2305_v45 = vmul.f32 1.442695, %v2301_v40  ;;  %vm2324_vm8 = vcmp.ge.f32.partialorder %v5544_v61, 0.0 }
 0xb83   : > { %4832 = vrcp.f32 %v2250_v32  ;;  %v2251_v35 = vadd.f32 1.0, %v2247_v33  ;;  %v2303_v47 = vmul.f32 %v2299_v41, %v2243_v31 }
 0xb84   : > { %v2248_v36 = vmul.f32 0.3275911, %v2244_v34  ;;  %v2300_v46 = vsub.f32 0.0, %v2244_v34  ;;  %v2307_v51 = vmul.f32 1.442695, %v2302_v43 }
 0xb85   : > { %4834 = vrcp.f32 %v2251_v35  ;;  %v2309_v60 = vmul.f32 1.442695, %v2303_v47 }
 0xb86   : > { %v2252_v37 = vadd.f32 1.0, %v2248_v36  ;;  %v2304_v55 = vmul.f32 %v2300_v46, %v2244_v34 }
 0xb88   : > { %4836 = vrcp.f32 %v2252_v37  ;;  %v2311_v4 = vmul.f32 1.442695, %v2304_v55 }
 0xb89   : > { %4838 = vpow2.f32 %v2305_v45 }
 0xb8a   : > { %4840 = vpow2.f32 %v2307_v51 }
 0xb8b   : > { %4842 = vpow2.f32 %v2309_v60 }
 0xb8c   : > { %4844 = vpow2.f32 %v2311_v4  ;;  %v2336_v4 = vmul.f32 0.5, %v5540_v29 }
 0xb8e   : > { %v4831_v42 = vpop.eup %4830 }
 0xb8f   : > { %v2261_v44 = vmul.f32 1.0614054, %v4831_v42 }
 0xb90   : > { %v4833_v48 = vpop.eup %4832 }
 0xb91   : > { %v2265_v49 = vadd.f32 -1.4531521, %v2261_v44  ;;  %v2262_v50 = vmul.f32 1.0614054, %v4833_v48 }
 0xb92   : > { %v4835_v52 = vpop.eup %4834 }
 0xb93   : > { %v2269_v53 = vmul.f32 %v4831_v42, %v2265_v49  ;;  %v2266_v58 = vadd.f32 -1.4531521, %v2262_v50  ;;  %v2263_v59 = vmul.f32 1.0614054, %v4835_v52 }
 0xb95   : > { %v2273_v62 = vadd.f32 1.4214138, %v2269_v53  ;;  %v4837_v63 = vpop.eup %4836  ;;  %v2270_v0 = vmul.f32 %v4833_v48, %v2266_v58  ;;  %v2267_v1 = vadd.f32 -1.4531521, %v2263_v59 }
 0xb96   : > { %v2264_v2 = vmul.f32 1.0614054, %v4837_v63  ;;  %v4839_v31 = vpop.eup %4838 }
 0xb97   : > { %v2277_v7 = vmul.f32 %v4831_v42, %v2273_v62  ;;  %v2274_v5 = vadd.f32 1.4214138, %v2270_v0  ;;  %v2271_v6 = vmul.f32 %v4835_v52, %v2267_v1  ;;  %v4841_v38 = vpop.eup %4840 }
 0xb98   : > { %v2268_v9 = vadd.f32 -1.4531521, %v2264_v2  ;;  %v4843_v44 = vpop.eup %4842 }
 0xb99   : > { %v2281_v8 = vadd.f32 -0.28449672, %v2277_v7  ;;  %v2278_v10 = vmul.f32 %v4833_v48, %v2274_v5  ;;  %v2275_v11 = vadd.f32 1.4214138, %v2271_v6  ;;  %v4845_v50 = vpop.eup %4844  ;;  %v2335_v7 = vmul.f32 0.5, %v5534_v22 }
 0xb9a   : > { %v2272_v13 = vmul.f32 %v4837_v63, %v2268_v9  ;;  %v2333_v5 = vmul.f32 0.5, %v5523_v14 }
 0xb9b   : > { %v2285_v12 = vmul.f32 %v4831_v42, %v2281_v8  ;;  %v2282_v15 = vadd.f32 -0.28449672, %v2278_v10  ;;  %v2279_v19 = vmul.f32 %v4835_v52, %v2275_v11 }
 0xb9c   : > { %v2276_v24 = vadd.f32 1.4214138, %v2272_v13 }
 0xb9d   : > { %v2289_v20 = vadd.f32 0.2548296, %v2285_v12  ;;  %v2286_v25 = vmul.f32 %v4833_v48, %v2282_v15  ;;  %v2283_v26 = vadd.f32 -0.28449672, %v2279_v19  ;;  %v4194_v15 = vld [vmem:[%s6057_s26] ss:$0 sm:$0xff] }
 0xb9e   : > { %v2280_v30 = vmul.f32 %v4837_v63, %v2276_v24  ;;  %s6059_s26 = sld [smem:[#allocation16_spill]] }
 0xb9f   : > { %v2293_v57 = vmul.f32 %v4831_v42, %v2289_v20  ;;  %v2290_v32 = vadd.f32 0.2548296, %v2286_v25  ;;  %v2287_v33 = vmul.f32 %v4835_v52, %v2283_v26  ;;  %v4776_v26 = vld [vmem:[%s6058_s10] sm:$0xff]  }
 0xba0   : > { %v2284_v35 = vadd.f32 -0.28449672, %v2280_v30  ;;  %v4780_v30 = vld [vmem:[%s6058_s10 + $0x20] sm:$0xff]  }
 0xba1   : > { %v2313_v34 = vmul.f32 %v4839_v31, %v2293_v57  ;;  %v2294_v36 = vmul.f32 %v4833_v48, %v2290_v32  ;;  %v2291_v37 = vadd.f32 0.2548296, %v2287_v33  ;;  %v4777_v57 = vld [vmem:[%s6058_s10 + $0x10] sm:$0xff]   ;;  %v4781_v31 = vld [vmem:[%s6058_s10 + $0x28] sm:$0xff]   ;;  %v4783_v33 = vld [vmem:[%s6058_s10 + $0x38] sm:$0xff]  }
 0xba2   : > { %v2288_v39 = vmul.f32 %v4837_v63, %v2284_v35  ;;  %v4782_v32 = vld [vmem:[%s6058_s10 + $0x30] sm:$0xff]  }
 0xba3   : > { %v2317_v40 = vsub.f32 1.0, %v2313_v34  ;;  %v2314_v41 = vmul.f32 %v4841_v38, %v2294_v36  ;;  %v2295_v43 = vmul.f32 %v4835_v52, %v2291_v37  ;;  %v4784_v34 = vld [vmem:[%s6058_s10 + $0x40] sm:$0xff]  }
 0xba4   : > { %v2292_v45 = vadd.f32 0.2548296, %v2288_v39 }
 0xba5   : > { %v2318_v46 = vsub.f32 1.0, %v2314_v41  ;;  %v2315_v47 = vmul.f32 %v4843_v44, %v2295_v43  ;;  %v2325_v42 = vsub.f32 0.0, %v2317_v40 }
 0xba6   : > { %v2296_v49 = vmul.f32 %v4837_v63, %v2292_v45 }
 0xba7   : > { %v2326_v51 = vsub.f32 0.0, %v2318_v46  ;;  %v2319_v53 = vsub.f32 1.0, %v2315_v47  ;;  %v2329_v52 = vsel %vm2321_vm6, %v2317_v40, %v2325_v42 }
 0xba8   : > { %v2316_v55 = vmul.f32 %v4845_v50, %v2296_v49  ;;  %v2337_v63 = vadd.f32 1.0, %v2329_v52  ;;  %v4213_v52 = vld [vmem:[%s6059_s26] ss:$0 sm:$0xff] }
 0xba9   : > { %v2327_v58 = vsub.f32 0.0, %v2319_v53  ;;  %v2330_v48 = vsel %vm2322_vm5, %v2318_v46, %v2326_v51 }
 0xbaa   : > { %v2320_v59 = vsub.f32 1.0, %v2316_v55  ;;  %v2338_v1 = vadd.f32 1.0, %v2330_v48  ;;  %v2341_v9 = vmul.f32 %v2337_v63, %v2333_v5 }
 0xbab   : > { %v2331_v60 = vsel %vm2323_vm7, %v2319_v53, %v2327_v58 }
 0xbac   : > { %v2339_v62 = vadd.f32 1.0, %v2331_v60  ;;  %v2328_v0 = vsub.f32 0.0, %v2320_v59  ;;  %v2342_v6 = vmul.f32 %v2338_v1, %v2334_v21  ;;  %v4214_v60 = vld [vmem:[%s6059_s26 + $0x1] ss:$0 sm:$0xff] }
 0xbae   : > { %v2332_v2 = vsel %vm2324_vm8, %v2320_v59, %v2328_v0  ;;  %v2343_v27 = vmul.f32 %v2339_v62, %v2335_v7 }
 0xbaf   : > { %v2340_v16 = vadd.f32 1.0, %v2332_v2  ;;  %v4215_v2 = vld [vmem:[%s6059_s26 + $0x2] ss:$0 sm:$0xff] }
 0xbb0   : > { %v2377_v11 = vpack.c.bf16 %v2343_v27, %v2341_v9  ;;  %v4217_v9 = vld [vmem:[%s6059_s26 + $0x4] ss:$0 sm:$0xff] }
 0xbb1   : > { %v2344_v8 = vmul.f32 %v2340_v16, %v2336_v4 }
 0xbb3   : > { %v2378_v10 = vpack.c.bf16 %v2344_v8, %v2342_v6  ;;  %v4216_v8 = vld [vmem:[%s6059_s26 + $0x3] ss:$0 sm:$0xff] }
 0xbb5   : > { %2427 = vmatprep.mubr.bf16.mxu0 %v2378_v10 }
 0xbb6   : > { %2428 = vmatmul.mubr.bf16.vlgmr.msra.gmra.mxu0 %v2377_v11 }
 0xbb7   : > { %4476 = vmatprep.mubr.msk.bf16.mxu0 %vm5007_vm0, %v5006_v3 }
 0xc76   : > { %v4301_v18 = vpop.f32.mrf.mxu0 }
 0xc78   : > { %v4302_v22 = vpop.f32.mrf.mxu0 }
 0xc79   : > { %v4303_v29 = vadd.f32 %v4302_v22, %v4301_v18  ;;  %v4218_v22 = vld [vmem:[%s6059_s26 + $0x5] ss:$0 sm:$0xff] }
 0xc7a   : > { %v4304_v61 = vpop.f32.mrf.mxu0 }
 0xc7b   : > { %v2436_v14 = vadd.f32 %v4303_v29, %v5452_v23  ;;  %v4778_v23 = vld [vmem:[%s6058_s10 + $0x8] sm:$0xff]  }
 0xc7c   : > { %v4305_v12 = vpop.f32.mrf.mxu0 }
 0xc7d   : > { %v4306_v13 = vadd.f32 %v4305_v12, %v4304_v61  ;;  %v5560_v20 = vadd.f32 %v4194_v15, %v2436_v14 }
 0xc7f   : > { %v2437_v19 = vadd.f32 %v4306_v13, %v5457_v28  ;;  %v4779_v28 = vld [vmem:[%s6058_s10 + $0x18] sm:$0xff]   ;;  %v4219_v13 = vld [vmem:[%s6059_s26 + $0x6] ss:$0 sm:$0xff] }
 0xc81   : > { %v5562_v24 = vadd.f32 %v4194_v15, %v2437_v19 }
 0xc83   : > { %v2465_v25 = vpack.c.bf16 %v5562_v24, %v5560_v20 }
 0xc85   : > { %4475 = vmatpush3.bf16.msra.mxu0 %v2465_v25  ;;  %4603 = vmatpush3.bf16.msra.mxu1 %v2465_v25 }
 0xc86   : > { %4512 = vmatprep.subr.bf16.mxu0 %v5006_v3 }
 0xc88   : > { %4477 = vmatmul.mubr.msk.bf16.vlgmr.msra.gmra.mxu0 %vm1540_vm2, %v4776_v26  ;;  %4485 = vmatmul.mubr.msk.bf16.vlgmr.msra.gmra.mxu1 %vm1540_vm2, %v4777_v57  ;;  %v4220_v57 = vld [vmem:[%s6059_s26 + $0x7] ss:$0 sm:$0xff] }
 0xc89   : > { %4480 = vmatprep.mubr.msk.bf16.mxu0 %vm5007_vm0, %v5006_v3  ;;  %4488 = vmatprep.mubr.msk.bf16.mxu1 %vm5007_vm0, %v5006_v3 }
 0xc90   : > { %4481 = vmatmul.mubr.msk.bf16.gmra.mxu0 %vm1540_vm2, %v4778_v23  ;;  %4489 = vmatmul.mubr.msk.bf16.gmra.mxu1 %vm1540_vm2, %v4779_v28 }
 0xc91   : > { %4492 = vmatprep.mubr.msk.bf16.mxu1 %vm5007_vm0, %v5006_v3  ;;  %4520 = vmatprep.mubr.msk.bf16.mxu0 %vm5007_vm0, %v5006_v3 }
 0xc98   : > { %4493 = vmatmul.mubr.msk.bf16.gmra.mxu1 %vm1540_vm2, %v4780_v30 }
 0xc99   : > { %4496 = vmatprep.mubr.msk.bf16.mxu1 %vm5007_vm0, %v5006_v3 }
 0xca0   : > { %4497 = vmatmul.mubr.msk.bf16.gmra.mxu1 %vm1540_vm2, %v4781_v31 }
 0xca1   : > { %4500 = vmatprep.mubr.msk.bf16.mxu1 %vm5007_vm0, %v5006_v3 }
 0xca8   : > { %4501 = vmatmul.mubr.msk.bf16.gmra.mxu1 %vm1540_vm2, %v4782_v32 }
 0xca9   : > { %4504 = vmatprep.mubr.msk.bf16.mxu1 %vm5007_vm0, %v5006_v3 }
 0xcb0   : > { %4505 = vmatmul.mubr.msk.bf16.gmra.mxu1 %vm1540_vm2, %v4783_v33 }
 0xcb1   : > { %4508 = vmatprep.mubr.msk.bf16.mxu1 %vm5007_vm0, %v5006_v3 }
 0xcb8   : > { %4509 = vmatmul.mubr.msk.bf16.gmra.mxu1 %vm1540_vm2, %v4784_v34 }
 0xd48   : > { %v2572_v35 = vpop.f32.mrf.mxu0  ;;  %v2588_v36 = vpop.f32.mrf.mxu1 }
 0xd49   : > { %v2648_v1 = vmul.f32 %v4213_v52, %v2572_v35  ;;  %v2664_v6 = vmul.f32 %v4215_v2, %v2588_v36 }
 0xd4a   : > { %v4478_v37 = vpop.f32.mrf.mxu0  ;;  %v4486_v38 = vpop.f32.mrf.mxu1 }
 0xd4c   : > { %v2575_v39 = vpop.f32.mrf.mxu0  ;;  %v2591_v40 = vpop.f32.mrf.mxu1 }
 0xd4d   : > { %v2649_v4 = vmul.f32 %v4213_v52, %v2575_v39  ;;  %v2665_v61 = vmul.f32 %v4215_v2, %v2591_v40  ;;  %v4221_v39 = vld [vmem:[%s6059_s26 + $0x8] ss:$0 sm:$0xff] }
 0xd4e   : > { %v4479_v41 = vpop.f32.mrf.mxu0  ;;  %v4487_v43 = vpop.f32.mrf.mxu1 }
 0xd50   : > { %v2580_v44 = vpop.f32.mrf.mxu0  ;;  %v2596_v45 = vpop.f32.mrf.mxu1 }
 0xd51   : > { %v2655_v63 = vmul.f32 %v4214_v60, %v2580_v44  ;;  %v2673_v12 = vmul.f32 %v4216_v8, %v2596_v45 }
 0xd52   : > { %v4482_v46 = vpop.f32.mrf.mxu0  ;;  %v4490_v47 = vpop.f32.mrf.mxu1 }
 0xd53   : > { %v2657_v16 = vadd.f32 %v2655_v63, %v2648_v1 }
 0xd54   : > { %v2583_v49 = vpop.f32.mrf.mxu0  ;;  %v2599_v50 = vpop.f32.mrf.mxu1 }
 0xd55   : > { %v2656_v5 = vmul.f32 %v4214_v60, %v2583_v49  ;;  %v2666_v11 = vadd.f32 %v2664_v6, %v2657_v16  ;;  %v2674_v28 = vmul.f32 %v4216_v8, %v2599_v50 }
 0xd56   : > { %v4491_v42 = vpop.f32.mrf.mxu1  ;;  %v4483_v51 = vpop.f32.mrf.mxu0 }
 0xd57   : > { %v2658_v18 = vadd.f32 %v2656_v5, %v2649_v4  ;;  %v2675_v19 = vadd.f32 %v2673_v12, %v2666_v11  ;;  %v2780_v12 = vld [vmem:[%s6061_s3 + $0x18] sm:$0xff] }
 0xd58   : > { %v2604_v53 = vpop.f32.mrf.mxu1 }
 0xd59   : > { %v2682_v14 = vmul.f32 %v4217_v9, %v2604_v53  ;;  %v2667_v25 = vadd.f32 %v2665_v61, %v2658_v18  ;;  %v2781_v18 = vld [vmem:[%s6061_s3 + $0x20] sm:$0xff]  ;;  %v2779_v61 = vld [vmem:[%s6061_s3 + $0x10] sm:$0xff] }
 0xd5a   : > { %v4494_v55 = vpop.f32.mrf.mxu1 }
 0xd5b   : > { %v2684_v30 = vadd.f32 %v2682_v14, %v2675_v19  ;;  %v2676_v34 = vadd.f32 %v2674_v28, %v2667_v25  ;;  %v4222_v55 = vld [vmem:[%s6060_s15] ss:$0 sm:$0xff]  ;;  %v2787_v14 = vpack.c.bf16 %v2780_v12, %v2779_v61  ;;  %s6062_s15 = sld [smem:[#allocation18_spill]]  ;;  %v2909_v61 = vld [vmem:[%s6065_s6 + $0x28] sm:$0xff]  ;;  %v2922_v12 = vld [vmem:[%s6065_s6 + $0x90] sm:$0xff] }
 0xd5c   : > { %v2607_v58 = vpop.f32.mrf.mxu1 }
 0xd5d   : > { %v2683_v31 = vmul.f32 %v4217_v9, %v2607_v58  ;;  %v2783_v9 = vld [vmem:[%s6061_s3 + $0x30] sm:$0xff] }
 0xd5e   : > { %v4495_v48 = vpop.f32.mrf.mxu1 }
 0xd5f   : > { %v2685_v40 = vadd.f32 %v2683_v31, %v2676_v34 }
 0xd60   : > { %v2612_v59 = vpop.f32.mrf.mxu1 }
 0xd61   : > { %v2691_v26 = vmul.f32 %v4218_v22, %v2612_v59 }
 0xd62   : > { %v4498_v62 = vpop.f32.mrf.mxu1 }
 0xd63   : > { %v2693_v35 = vadd.f32 %v2691_v26, %v2684_v30 }
 0xd64   : > { %v2615_v0 = vpop.f32.mrf.mxu1 }
 0xd65   : > { %v2692_v36 = vmul.f32 %v4218_v22, %v2615_v0  ;;  %v2782_v22 = vld [vmem:[%s6061_s3 + $0x28] sm:$0xff] }
 0xd66   : > { %v4499_v7 = vpop.f32.mrf.mxu1 }
 0xd67   : > { %v2694_v45 = vadd.f32 %v2692_v36, %v2685_v40 }
 0xd68   : > { %v2620_v21 = vpop.f32.mrf.mxu1 }
 0xd69   : > { %v2700_v32 = vmul.f32 %v4219_v13, %v2620_v21 }
 0xd6a   : > { %v4502_v27 = vpop.f32.mrf.mxu1 }
 0xd6b   : > { %v2702_v41 = vadd.f32 %v2700_v32, %v2693_v35 }
 0xd6c   : > { %v2623_v10 = vpop.f32.mrf.mxu1 }
 0xd6d   : > { %v2701_v43 = vmul.f32 %v4219_v13, %v2623_v10  ;;  %v2784_v10 = vld [vmem:[%s6061_s3 + $0x38] sm:$0xff]  ;;  %v2777_v13 = vld [vmem:[%s6061_s3] sm:$0xff] }
 0xd6e   : > { %v4503_v29 = vpop.f32.mrf.mxu1  ;;  %v2789_v11 = vpack.c.bf16 %v2784_v10, %v2783_v9  ;;  %v2911_v9 = vld [vmem:[%s6065_s6 + $0x38] sm:$0xff]  ;;  %v2924_v10 = vld [vmem:[%s6065_s6 + $0xa0] sm:$0xff] }
 0xd6f   : > { %v2703_v42 = vadd.f32 %v2701_v43, %v2694_v45  ;;  %v2788_v29 = vpack.c.bf16 %v2782_v22, %v2781_v18  ;;  %v4785_v43 = vld [vmem:[%s6064_s5] sm:$0xff]   ;;  %v2935_v45 = vld [vmem:[%s6065_s6 + $0xf8] sm:$0xff]  ;;  %s6066_s5 = sld [smem:[#allocation21_spill]] }
 0xd70   : > { %v2628_v15 = vpop.f32.mrf.mxu1  ;;  %4513 = vmatpush3.bf16.msra.mxu0 %v2789_v11  ;;  %v2925_v11 = vld [vmem:[%s6065_s6 + $0xa8] sm:$0xff] }
 0xd71   : > { %v2709_v37 = vmul.f32 %v4220_v57, %v2628_v15  ;;  %4514 = vmatprep.subr.bf16.mxu0 %v5006_v3  ;;  %v2778_v15 = vld [vmem:[%s6061_s3 + $0x8] sm:$0xff]  ;;  %v2948_v22 = vpack.c.bf16 %v2925_v11, %v2924_v10  ;;  %s6070_s3 = sld [smem:[#allocation27_spill]] }
 0xd72   : > { %v4506_v23 = vpop.f32.mrf.mxu1  ;;  %v2786_v19 = vpack.c.bf16 %v2778_v15, %v2777_v13 }
 0xd73   : > { %v2711_v46 = vadd.f32 %v2709_v37, %v2702_v41  ;;  %v4224_v37 = vld [vmem:[%s6063_s4] ss:$0 sm:$0xff]  ;;  %s6067_s4 = sld [smem:[#allocation24_spill]] }
 0xd74   : > { %v2631_v33 = vpop.f32.mrf.mxu1  ;;  %4515 = vmatpush3.bf16.msra.mxu0 %v2788_v29  ;;  %v2908_v29 = vld [vmem:[%s6065_s6 + $0x20] sm:$0xff] }
 0xd75   : > { %v2710_v47 = vmul.f32 %v4220_v57, %v2631_v33  ;;  %4516 = vmatprep.subr.bf16.mxu0 %v5006_v3  ;;  %v4223_v33 = vld [vmem:[%s6062_s15] ss:$0 sm:$0xff]  ;;  %v2940_v13 = vpack.c.bf16 %v2909_v61, %v2908_v29  ;;  %s6068_s15 = smov 64  }
 0xd76   : > { %v4507_v38 = vpop.f32.mrf.mxu1 }
 0xd77   : > { %v2712_v58 = vadd.f32 %v2710_v47, %v2703_v42  ;;  %v2933_v42 = vld [vmem:[%s6065_s6 + $0xe8] sm:$0xff]  ;;  %v3035_v10 = vld [vmem:[%s6070_s3 + $0x20] sm:$0xff]  ;;  %v3034_v29 = vld [vmem:[%s6070_s3 + $0x18] sm:$0xff] }
 0xd78   : > { %v2636_v44 = vpop.f32.mrf.mxu1  ;;  %4517 = vmatpush3.bf16.msra.mxu0 %v2787_v14  ;;  %v2923_v14 = vld [vmem:[%s6065_s6 + $0x98] sm:$0xff]  ;;  %v3036_v11 = vld [vmem:[%s6070_s3 + $0x28] sm:$0xff] }
 0xd79   : > { %v2718_v49 = vmul.f32 %v4221_v39, %v2636_v44  ;;  %4518 = vmatprep.subr.bf16.mxu0 %v5006_v3  ;;  %v2934_v44 = vld [vmem:[%s6065_s6 + $0xf0] sm:$0xff]  ;;  %v2947_v15 = vpack.c.bf16 %v2923_v14, %v2922_v12  ;;  %v3031_v12 = vld [vmem:[%s6070_s3] sm:$0xff]  ;;  %v3032_v14 = vld [vmem:[%s6070_s3 + $0x8] sm:$0xff] }
 0xd7a   : > { %v4510_v50 = vpop.f32.mrf.mxu1  ;;  %v2953_v47 = vpack.c.bf16 %v2935_v45, %v2934_v44 }
 0xd7b   : > { %v2720_v51 = vadd.f32 %v2718_v49, %v2711_v46  ;;  %v2918_v46 = vld [vmem:[%s6065_s6 + $0x70] sm:$0xff]  ;;  %v2919_v49 = vld [vmem:[%s6065_s6 + $0x78] sm:$0xff]  ;;  %v2932_v50 = vld [vmem:[%s6065_s6 + $0xe0] sm:$0xff] }
 0xd7c   : > { %v2639_v53 = vpop.f32.mrf.mxu1  ;;  %4519 = vmatpush3.bf16.msra.mxu0 %v2786_v19  ;;  %4324 = vmatprep.subr.bf16.mxu1 %v2953_v47  ;;  %v2906_v19 = vld [vmem:[%s6065_s6 + $0x10] sm:$0xff] }
 0xd7d   : > { %v2722_v48 = vadd.f32 %v2720_v51, %v5560_v20  ;;  %v2719_v59 = vmul.f32 %v4221_v39, %v2639_v53  ;;  %4524 = vmatprep.subr.bf16.mxu0 %v5006_v3  ;;  %v2945_v51 = vpack.c.bf16 %v2919_v49, %v2918_v46  ;;  %v2952_v53 = vpack.c.bf16 %v2933_v42, %v2932_v50 }
 0xd7e   : > { %v4511_v52 = vpop.f32.mrf.mxu1 }
 0xd7f   : > { %v2721_v60 = vadd.f32 %v2719_v59, %v2712_v58  ;;  %v5612_v62 = vadd.f32 %v4222_v55, %v2722_v48  ;;  %v2917_v58 = vld [vmem:[%s6065_s6 + $0x68] sm:$0xff]  ;;  %v2930_v48 = vld [vmem:[%s6065_s6 + $0xd0] sm:$0xff]  ;;  %v2931_v59 = vld [vmem:[%s6065_s6 + $0xd8] sm:$0xff]  ;;  %4325 = vmatpush3.bf16.msra.mxu1 %v2945_v51 }
 0xd80   : > { %4326 = vmatprep.subr.bf16.mxu1 %v2952_v53 }
 0xd81   : > { %v2723_v0 = vadd.f32 %v2721_v60, %v5562_v24  ;;  %v2735_v1 = vsel %vm1320_vm1, %v5612_v62, 0.0  ;;  %v2951_v60 = vpack.c.bf16 %v2931_v59, %v2930_v48 }
 0xd82   : > { %2736 = vadd.xlane.f32.xlu1 %v2735_v1  ;;  %v2915_v1 = vld [vmem:[%s6065_s6 + $0x58] sm:$0xff] }
 0xd83   : > { %v5617_v63 = vadd.f32 %v4222_v55, %v2723_v0  ;;  %v2916_v55 = vld [vmem:[%s6065_s6 + $0x60] sm:$0xff]  ;;  %v2914_v0 = vld [vmem:[%s6065_s6 + $0x50] sm:$0xff] }
 0xd84   : > { %v2944_v52 = vpack.c.bf16 %v2917_v58, %v2916_v55 }
 0xd85   : > { %v2738_v7 = vsel %vm1320_vm1, %v5617_v63, 0.0 }
 0xd86   : > { %2739 = vadd.xlane.f32.xlu0 %v2738_v7  ;;  %v2928_v7 = vld [vmem:[%s6065_s6 + $0xc0] sm:$0xff]  ;;  %4327 = vmatpush3.bf16.msra.mxu1 %v2944_v52 }
 0xd87   : > { %4328 = vmatprep.subr.bf16.mxu1 %v2951_v60 }
 0xe0b   : > { %v2737_v20 = vpop.xlane.xlu1 %2736 }
 0xe0c   : > { %v2741_v2 = vmul.f32 0.015625, %v2737_v20  ;;  %v2929_v20 = vld [vmem:[%s6065_s6 + $0xc8] sm:$0xff] }
 0xe0e   : > { %v2743_v21 = vsub.f32 %v5612_v62, %v2741_v2  ;;  %v2943_v2 = vpack.c.bf16 %v2915_v1, %v2914_v0  ;;  %v4229_v0 = vld [vmem:[%s6067_s4] ss:$0 sm:$0xff]  ;;  %s6071_s4 = sld [smem:[#allocation25_spill]] }
 0xe0f   : > { %v2740_v4 = vpop.xlane.xlu0 %2739 }
 0xe10   : > { %v2742_v24 = vmul.f32 0.015625, %v2740_v4  ;;  %v2745_v16 = vmul.f32 %v2743_v21, %v2743_v21  ;;  %v2912_v4 = vld [vmem:[%s6065_s6 + $0x40] sm:$0xff]  ;;  %4329 = vmatpush3.bf16.msra.mxu1 %v2943_v2 }
 0xe12   : > { %v2744_v5 = vsub.f32 %v5617_v63, %v2742_v24  ;;  %v2747_v27 = vsel %vm1320_vm1, %v2745_v16, 0.0  ;;  %v2913_v24 = vld [vmem:[%s6065_s6 + $0x48] sm:$0xff]  ;;  %v2926_v16 = vld [vmem:[%s6065_s6 + $0xb0] sm:$0xff] }
 0xe13   : > { %2748 = vadd.xlane.f32.xlu1 %v2747_v27  ;;  %v2942_v27 = vpack.c.bf16 %v2913_v24, %v2912_v4 }
 0xe14   : > { %v2746_v6 = vmul.f32 %v2744_v5, %v2744_v5 }
 0xe16   : > { %v2750_v8 = vsel %vm1320_vm1, %v2746_v6, 0.0 }
 0xe17   : > { %2751 = vadd.xlane.f32.xlu0 %v2750_v8  ;;  %v2910_v8 = vld [vmem:[%s6065_s6 + $0x30] sm:$0xff] }
 0xe18   : > { %v2941_v18 = vpack.c.bf16 %v2911_v9, %v2910_v8  ;;  %v3038_v8 = vld [vmem:[%s6070_s3 + $0x38] sm:$0xff] }
 0xe9c   : > { %v2749_v25 = vpop.xlane.xlu1 %2748 }
 0xe9d   : > { %v2753_v26 = vmul.f32 0.015625, %v2749_v25  ;;  %v2907_v25 = vld [vmem:[%s6065_s6 + $0x18] sm:$0xff] }
 0xe9f   : > { %v2755_v57 = vadd.f32 1e-06, %v2753_v26  ;;  %v2939_v26 = vpack.c.bf16 %v2907_v25, %v2906_v19 }
 0xea0   : > { %v2752_v23 = vpop.xlane.xlu0 %2751 }
 0xea1   : > { %4846 = vrsqrt.f32 %v2755_v57  ;;  %v2754_v28 = vmul.f32 0.015625, %v2752_v23  ;;  %v4225_v23 = vld [vmem:[%s6066_s5] ss:$0 sm:$0xff]  ;;  %s6069_s5 = smov 112  }
 0xea3   : > { %v2756_v30 = vadd.f32 1e-06, %v2754_v28 }
 0xea5   : > { %4848 = vrsqrt.f32 %v2756_v30 }
 0xeae   : > { %v4847_v31 = vpop.eup %4846 }
 0xeaf   : > { %v2759_v32 = vmul.f32 %v4847_v31, %v2743_v21  ;;  %v2950_v21 = vpack.c.bf16 %v2929_v20, %v2928_v7  ;;  %v2920_v31 = vld [vmem:[%s6065_s6 + $0x80] sm:$0xff] }
 0xeb1   : > { %v2767_v35 = vmul.f32 %v4223_v33, %v2759_v32  ;;  %4330 = vmatprep.subr.bf16.mxu1 %v2950_v21  ;;  %v2921_v32 = vld [vmem:[%s6065_s6 + $0x88] sm:$0xff] }
 0xeb2   : > { %v4849_v34 = vpop.eup %4848  ;;  %4331 = vmatpush3.bf16.msra.mxu1 %v2942_v27 }
 0xeb3   : > { %v2760_v36 = vmul.f32 %v4849_v34, %v2744_v5  ;;  %v2775_v39 = vadd.f32 %v4224_v37, %v2767_v35  ;;  %v2927_v5 = vld [vmem:[%s6065_s6 + $0xb8] sm:$0xff]  ;;  %v2946_v35 = vpack.c.bf16 %v2921_v32, %v2920_v31 }
 0xeb4   : > { %v2949_v6 = vpack.c.bf16 %v2927_v5, %v2926_v16 }
 0xeb5   : > { %v2768_v38 = vmul.f32 %v4223_v33, %v2760_v36  ;;  %v2904_v36 = vld [vmem:[%s6065_s6] sm:$0xff] }
 0xeb6   : > { %4332 = vmatprep.subr.bf16.mxu1 %v2949_v6  ;;  %v3037_v6 = vld [vmem:[%s6070_s3 + $0x30] sm:$0xff] }
 0xeb7   : > { %v2776_v40 = vadd.f32 %v4224_v37, %v2768_v38  ;;  %4333 = vmatpush3.bf16.msra.mxu1 %v2941_v18  ;;  %v2905_v37 = vld [vmem:[%s6065_s6 + $0x8] sm:$0xff]  ;;  %v3043_v9 = vpack.c.bf16 %v3038_v8, %v3037_v6  ;;  %v3042_v18 = vpack.c.bf16 %v3036_v11, %v3035_v10  ;;  %s6072_s6 = sld [smem:[#allocation26_spill]] }
 0xeb8   : > { %4334 = vmatprep.subr.bf16.mxu1 %v2948_v22  ;;  %v3033_v22 = vld [vmem:[%s6070_s3 + $0x10] sm:$0xff]  ;;  %s6074_s3 = smov 96  }
 0xeb9   : > { %v2785_v41 = vpack.c.bf16 %v2776_v40, %v2775_v39  ;;  %v2938_v39 = vpack.c.bf16 %v2905_v37, %v2904_v36  ;;  %v3041_v61 = vpack.c.bf16 %v3034_v29, %v3033_v22 }
 0xebb   : > { %4521 = vmatmul.mubr.msk.bf16.vlgmr.msra.gmra.mxu0 %vm1320_vm1, %v2785_v41  ;;  %4335 = vmatpush3.bf16.msra.mxu1 %v2940_v13  ;;  %v3040_v13 = vpack.c.bf16 %v3032_v14, %v3031_v12 }
 0xebc   : > { %4525 = vmatpush3.bf16.msra.mxu0 %v2785_v41  ;;  %4526 = vmatprep.mubr.msk.bf16.mxu0 %vm5007_vm0, %v5006_v3 }
 0xebd   : > { %4530 = vmatprep.subr.bf16.mxu0 %v5006_v3  ;;  %4336 = vmatprep.subr.bf16.mxu1 %v2947_v15 }
 0xebf   : > { %4337 = vmatpush3.bf16.msra.mxu1 %v2939_v26 }
 0xec0   : > { %4338 = vmatprep.subr.bf16.mxu1 %v2946_v35  ;;  %v4232_v35 = vld [vmem:[%s6073_s8] ss:$0 sm:$0xff]  ;;  %s6077_s8 = smov 16  }
 0xec3   : > { %4527 = vmatmul.mubr.msk.bf16.vlgmr.msra.gmra.mxu0 %vm1540_vm2, %v4785_v43  ;;  %4339 = vmatpush3.bf16.msra.mxu1 %v2938_v39 }
 0xec4   : > { %4538 = vmatprep.mubr.msk.bf16.mxu0 %vm5007_vm0, %v5006_v3  ;;  %4554 = vmatprep.subr.bf16.mxu1 %v5006_v3 }
 0xec5   : > { %4531 = vmatpush3.bf16.msra.mxu0 %v3043_v9 }
 0xec6   : > { %4532 = vmatprep.subr.bf16.mxu0 %v5006_v3 }
 0xec9   : > { %4533 = vmatpush3.bf16.msra.mxu0 %v3042_v18 }
 0xeca   : > { %4534 = vmatprep.subr.bf16.mxu0 %v5006_v3 }
 0xecd   : > { %4535 = vmatpush3.bf16.msra.mxu0 %v3041_v61 }
 0xece   : > { %4536 = vmatprep.subr.bf16.mxu0 %v5006_v3 }
 0xed1   : > { %4537 = vmatpush3.bf16.msra.mxu0 %v3040_v13 }
 0xed2   : > { %4542 = vmatprep.subr.bf16.mxu0 %v5006_v3 }
 0xf7b   : > { %v2834_v57 = vpop.f32.mrf.mxu0 }
 0xf7c   : > { %v5678_v33 = vadd.f32 %v4225_v23, %v2834_v57  ;;  %v4230_v57 = vld [vmem:[%s6071_s4] ss:$0 sm:$0xff]  ;;  %s6080_s4 = sld [smem:[#allocation30_spill]] }
 0xf7d   : > { %v4522_v28 = vpop.f32.mrf.mxu0 }
 0xf7e   : > { %v4231_v28 = vld [vmem:[%s6072_s6] ss:$0 sm:$0xff]  ;;  %s6075_s6 = smov 80  }
 0xf7f   : > { %v2837_v30 = vpop.f32.mrf.mxu0 }
 0xf80   : > { %v5680_v34 = vadd.f32 %v4225_v23, %v2837_v30 }
 0xf81   : > { %v4523_v38 = vpop.f32.mrf.mxu0 }
 0xf82   : > { %v3124_v40 = vpack.c.bf16 %v5680_v34, %v5678_v33  ;;  %v5688_v41 = vpack.i.bf16 %v5680_v34, %v5678_v33 }
 0xf83   : > { %v2885_v43 = vpop.f32.mrf.mxu0 }
 0xf84   : > { %v2894_v46 = vcombine.high %v2885_v43, %v2885_v43 }
 0xf85   : > { %v4528_v44 = vpop.f32.mrf.mxu0 }
 0xf87   : > { %v2888_v45 = vpop.f32.mrf.mxu0 }
 0xf88   : > { %v2895_v47 = vcombine.high %v2888_v45, %v2888_v45 }
 0xf89   : > { %v4529_v49 = vpop.f32.mrf.mxu0 }
 0xf8a   : > { %v4740_v50 = vpack.i.bf16 %v2894_v46, %v2895_v47 }
 0xf8c   : > { %4741 = vrot.lane.b32.xlu1 %v4740_v50, %s6068_s15 }
 0xf90   : > { %4746 = vrot.lane.b32.xlu1 %v5688_v41, %s6069_s5 }
 0xffe   : > { %v4742_v42 = vpop.permute.xlu1 %4741 }
 0xfff   : > { %v4744_v51 = vunpack.i.h.bf16 %v4742_v42  ;;  %v4743_v53 = vunpack.i.l.bf16 %v4742_v42 }
0x1001   : > { %v2902_v55 = vsel %vm1320_vm1, %v2885_v43, %v4744_v51  ;;  %v2903_v58 = vsel %vm1320_vm1, %v2888_v45, %v4743_v53 }
0x1002   : > { %v2936_v48 = vpack.c.bf16 %v2902_v55, %v2902_v55  ;;  %v2937_v59 = vpack.c.bf16 %v2903_v58, %v2903_v58  ;;  %v4747_v46 = vpop.permute.xlu1 %4746 }
0x1003   : > { %v4748_v53 = vunpack.i.l.bf16 %v4747_v46 }
0x1004   : > { %2993 = vmatprep.mubr.bf16.mxu1 %v2937_v59 }
0x1005   : > { %2994 = vmatmul.mubr.bf16.vlgmr.msra.gmra.mxu1 %v2936_v48 }
0x1006   : > { %4556 = vmatprep.mubr.msk.bf16.mxu1 %vm5007_vm0, %v5006_v3 }
0x10c5   : > { %v4340_v52 = vpop.f32.mrf.mxu1 }
0x10c7   : > { %v4341_v60 = vpop.f32.mrf.mxu1 }
0x10c8   : > { %v4342_v1 = vadd.f32 %v4341_v60, %v4340_v52 }
0x10c9   : > { %v4343_v7 = vpop.f32.mrf.mxu1 }
0x10ca   : > { %v2996_v20 = vadd.f32 %v4342_v1, %v4229_v0 }
0x10cb   : > { %v4344_v2 = vpop.f32.mrf.mxu1 }
0x10cc   : > { %v3004_v21 = vsel %vm3003_vm9, %v2996_v20, 0.0 }
0x10cd   : > { %3005 = vadd.xlane.f32.xlu0 %v3004_v21 }
0x1156   : > { %v3006_v4 = vpop.xlane.xlu0 %3005 }
0x1157   : > { %v3007_v24 = vmul.f32 0.015625, %v3006_v4 }
0x1159   : > { %v3008_v16 = vsub.f32 %v2996_v20, %v3007_v24 }
0x115b   : > { %v3009_v5 = vmul.f32 %v3008_v16, %v3008_v16 }
0x115d   : > { %v3010_v27 = vsel %vm3003_vm9, %v3009_v5, 0.0 }
0x115e   : > { %3011 = vadd.xlane.f32.xlu0 %v3010_v27 }
0x11e7   : > { %v3012_v15 = vpop.xlane.xlu0 %3011 }
0x11e8   : > { %v3013_v19 = vmul.f32 0.015625, %v3012_v15 }
0x11ea   : > { %v3014_v25 = vadd.f32 1e-05, %v3013_v19 }
0x11ec   : > { %4850 = vrsqrt.f32 %v3014_v25 }
0x11f9   : > { %v4851_v26 = vpop.eup %4850 }
0x11fa   : > { %v3016_v23 = vmul.f32 %v4851_v26, %v3008_v16 }
0x11fc   : > { %v3023_v30 = vmul.f32 %v4230_v57, %v3016_v23 }
0x11fe   : > { %v3030_v31 = vadd.f32 %v4231_v28, %v3023_v30 }
0x1200   : > { %v3039_v32 = vpack.c.bf16 %v3030_v31, %v3030_v31 }
0x1202   : > { %4539 = vmatmul.mubr.msk.bf16.vlgmr.msra.gmra.mxu0 %vm1320_vm1, %v3039_v32 }
0x1203   : > { %4544 = vmatprep.mubr.msk.bf16.mxu0 %vm5007_vm0, %v5006_v3 }
0x12c2   : > { %v3088_v36 = vpop.f32.mrf.mxu0 }
0x12c3   : > { %v3089_v37 = vadd.f32 %v4232_v35, %v3088_v36 }
0x12c4   : > { %v4540_v38 = vpop.f32.mrf.mxu0 }
0x12c5   : > { %3118 = vrot.lane.b32.xlu1 %v3089_v37, %s6074_s3  ;;  %3115 = vrot.lane.b32.xlu0 %v3089_v37, %s6069_s5  ;;  %v5719_v39 = vpack.c.bf16 %v3089_v37, %v3089_v37  ;;  %s6079_s5 = smov 48  }
0x12c6   : > { %v3091_v43 = vpop.f32.mrf.mxu0 }
0x12c7   : > { %v3136_v44 = vsel %vm1540_vm2, %v5719_v39, 0 }
0x12c8   : > { %v4541_v45 = vpop.f32.mrf.mxu0  ;;  %4543 = vmatpush3.bf16.xpose.msra.mxu0 %v3136_v44 }
0x12c9   : > { %3121 = vrot.lane.b32.xlu1 %v3089_v37, %s6075_s6  ;;  %4548 = vmatprep.subr.bf16.mxu0 %v5006_v3 }
0x12cd   : > { %4751 = vrot.lane.b32.xlu1 %v5688_v41, %s6074_s3  ;;  %s6076_s3 = sld [smem:[#allocation29_spill]] }
0x12cf   : > { %4545 = vmatmul.mubr.msk.bf16.vlgmr.msra.gmra.mxu0 %vm1540_vm2, %v3124_v40  ;;  %v4749_v40 = vunpack.i.h.bf16 %v4747_v46 }
0x12d0   : > { %4550 = vmatprep.mubr.msk.bf16.mxu0 %vm5007_vm0, %v5006_v3 }
0x12d1   : > { %4756 = vrot.lane.b32.xlu1 %v5688_v41, %s6075_s6  ;;  %v3125_v58 = vpack.c.bf16 %v4749_v40, %v4748_v53  ;;  %s6081_s6 = sld [smem:[#allocation33_spill]] }
0x1337   : > { %v3119_v47 = vpop.permute.xlu1 %3118  ;;  %v3116_v49 = vpop.permute.xlu0 %3115 }
0x1338   : > { %v5735_v50 = vpack.c.bf16 %v3119_v47, %v3119_v47  ;;  %v5737_v42 = vpack.c.bf16 %v3116_v49, %v3116_v49 }
0x133a   : > { %v3230_v51 = vsel %vm1540_vm2, %v5735_v50, 0  ;;  %v3183_v33 = vsel %vm1540_vm2, %v5737_v42, 0 }
0x133b   : > { %4555 = vmatpush3.bf16.xpose.msra.mxu1 %v3230_v51  ;;  %v3122_v34 = vpop.permute.xlu1 %3121  ;;  %4549 = vmatpush3.bf16.xpose.msra.mxu0 %v3183_v33 }
0x133c   : > { %4560 = vmatprep.subr.bf16.mxu0 %v5006_v3  ;;  %4566 = vmatprep.subr.bf16.mxu1 %v5006_v3  ;;  %v5745_v41 = vpack.c.bf16 %v3122_v34, %v3122_v34 }
0x133e   : > { %v3277_v52 = vsel %vm1540_vm2, %v5745_v41, 0 }
0x133f   : > { %v4752_v55 = vpop.permute.xlu1 %4751 }
0x1340   : > { %v4754_v48 = vunpack.i.h.bf16 %v4752_v55  ;;  %v4753_v59 = vunpack.i.l.bf16 %v4752_v55 }
0x1342   : > { %v3126_v60 = vpack.c.bf16 %v4754_v48, %v4753_v59  ;;  %4551 = vmatmul.mubr.msk.bf16.vlgmr.msra.gmra.mxu0 %vm1540_vm2, %v3125_v58 }
0x1343   : > { %v4757_v0 = vpop.permute.xlu1 %4756  ;;  %4561 = vmatpush3.bf16.xpose.msra.mxu0 %v3277_v52  ;;  %4562 = vmatprep.mubr.msk.bf16.mxu0 %vm5007_vm0, %v5006_v3 }
0x1344   : > { %v4759_v1 = vunpack.i.h.bf16 %v4757_v0  ;;  %v4758_v7 = vunpack.i.l.bf16 %v4757_v0  ;;  %4557 = vmatmul.mubr.msk.bf16.vlgmr.msra.gmra.mxu1 %vm1540_vm2, %v3126_v60  ;;  %4572 = vmatprep.subr.bf16.mxu0 %v5006_v3 }
0x1345   : > { %4568 = vmatprep.mubr.msk.bf16.mxu1 %vm5007_vm0, %v5006_v3 }
0x1346   : > { %v3127_v20 = vpack.c.bf16 %v4759_v1, %v4758_v7 }
0x134a   : > { %4563 = vmatmul.mubr.msk.bf16.vlgmr.msra.gmra.mxu0 %vm1540_vm2, %v3127_v20 }
0x134b   : > { %4574 = vmatprep.mubr.msk.bf16.mxu0 %vm5007_vm0, %v5006_v3 }
0x138f   : > { %v3172_v2 = vpop.f32.mrf.mxu0 }
0x1390   : > { %v3321_v21 = vsel %vm3320_vm10, %v3172_v2, -inf }
0x1391   : > { %3322 = vmax.xlane.f32.xlu0 %v3321_v21  ;;  %v4546_v4 = vpop.f32.mrf.mxu0 }
0x1393   : > { %v3175_v24 = vpop.f32.mrf.mxu0 }
0x1394   : > { %v3324_v16 = vsel %vm3320_vm10, %v3175_v24, -inf }
0x1395   : > { %3325 = vmax.xlane.f32.xlu1 %v3324_v16  ;;  %v4547_v5 = vpop.f32.mrf.mxu0 }
0x1402   : > { %v3219_v27 = vpop.f32.mrf.mxu0 }
0x1403   : > { %v3327_v6 = vsel %vm3320_vm10, %v3219_v27, -inf }
0x1404   : > { %v3266_v8 = vpop.f32.mrf.mxu1  ;;  %3328 = vmax.xlane.f32.xlu0 %v3327_v6  ;;  %v4552_v9 = vpop.f32.mrf.mxu0 }
0x1405   : > { %v3333_v13 = vsel %vm3320_vm10, %v3266_v8, -inf }
0x1406   : > { %v3222_v10 = vpop.f32.mrf.mxu0  ;;  %v4558_v11 = vpop.f32.mrf.mxu1 }
0x1407   : > { %v3330_v18 = vsel %vm3320_vm10, %v3222_v10, -inf }
0x1408   : > { %v3269_v22 = vpop.f32.mrf.mxu1  ;;  %3331 = vmax.xlane.f32.xlu0 %v3330_v18  ;;  %v4553_v29 = vpop.f32.mrf.mxu0 }
0x1409   : > { %v3336_v61 = vsel %vm3320_vm10, %v3269_v22, -inf }
0x140a   : > { %v4559_v12 = vpop.f32.mrf.mxu1  ;;  %3337 = vmax.xlane.f32.xlu1 %v3336_v61  ;;  %v3313_v14 = vpop.f32.mrf.mxu0 }
0x140b   : > { %v3339_v25 = vsel %vm3320_vm10, %v3313_v14, -inf }
0x140c   : > { %3334 = vmax.xlane.f32.xlu0 %v3333_v13  ;;  %v4564_v15 = vpop.f32.mrf.mxu0 }
0x140e   : > { %v3316_v19 = vpop.f32.mrf.mxu0 }
0x140f   : > { %v3342_v26 = vsel %vm3320_vm10, %v3316_v19, -inf }
0x1410   : > { %3340 = vmax.xlane.f32.xlu0 %v3339_v25  ;;  %3343 = vmax.xlane.f32.xlu1 %v3342_v26  ;;  %v4565_v57 = vpop.f32.mrf.mxu0 }
0x141a   : > { %v3323_v23 = vpop.xlane.xlu0 %3322 }
0x141b   : > { %v3345_v28 = vsub.f32 %v3172_v2, %v3323_v23 }
0x141d   : > { %v3353_v30 = vmul.f32 1.442695, %v3345_v28 }
0x141e   : > { %v3326_v31 = vpop.xlane.xlu1 %3325 }
0x141f   : > { %4852 = vpow2.f32 %v3353_v30  ;;  %v3346_v32 = vsub.f32 %v3175_v24, %v3326_v31 }
0x1421   : > { %v3355_v35 = vmul.f32 1.442695, %v3346_v32 }
0x1423   : > { %4854 = vpow2.f32 %v3355_v35 }
0x142c   : > { %v5767_v36 = vpop.eup %4852 }
0x142d   : > { %v3369_v37 = vsel %vm3320_vm10, %v5767_v36, 0.0 }
0x142e   : > { %3370 = vadd.xlane.f32.xlu0 %v3369_v37 }
0x1430   : > { %v5771_v38 = vpop.eup %4854 }
0x1431   : > { %v3372_v43 = vsel %vm3320_vm10, %v5771_v38, 0.0 }
0x1432   : > { %3373 = vadd.xlane.f32.xlu1 %v3372_v43 }
0x148d   : > { %v3329_v44 = vpop.xlane.xlu0 %3328 }
0x148e   : > { %v3347_v45 = vsub.f32 %v3219_v27, %v3329_v44 }
0x1490   : > { %v3357_v46 = vmul.f32 1.442695, %v3347_v45 }
0x1491   : > { %v3332_v47 = vpop.xlane.xlu0 %3331 }
0x1492   : > { %4856 = vpow2.f32 %v3357_v46  ;;  %v3348_v49 = vsub.f32 %v3222_v10, %v3332_v47 }
0x1493   : > { %v3338_v51 = vpop.xlane.xlu1 %3337 }
0x1494   : > { %v3359_v33 = vmul.f32 1.442695, %v3348_v49  ;;  %v3350_v34 = vsub.f32 %v3269_v22, %v3338_v51 }
0x1495   : > { %v3335_v40 = vpop.xlane.xlu0 %3334 }
0x1496   : > { %4858 = vpow2.f32 %v3359_v33  ;;  %v3363_v53 = vmul.f32 1.442695, %v3350_v34  ;;  %v3349_v55 = vsub.f32 %v3266_v8, %v3335_v40 }
0x1498   : > { %4860 = vpow2.f32 %v3363_v53  ;;  %v3361_v58 = vmul.f32 1.442695, %v3349_v55 }
0x1499   : > { %v3341_v48 = vpop.xlane.xlu0 %3340  ;;  %v3344_v5 = vpop.xlane.xlu1 %3343 }
0x149a   : > { %4862 = vpow2.f32 %v3361_v58  ;;  %v3351_v59 = vsub.f32 %v3313_v14, %v3341_v48  ;;  %v3352_v27 = vsub.f32 %v3316_v19, %v3344_v5 }
0x149c   : > { %v3365_v52 = vmul.f32 1.442695, %v3351_v59  ;;  %v3367_v6 = vmul.f32 1.442695, %v3352_v27  ;;  %v3650_v59 = vld [vmem:[%s6076_s3 + $0x30] sm:$0xff] }
0x149e   : > { %4864 = vpow2.f32 %v3365_v52  ;;  %v3651_v52 = vld [vmem:[%s6076_s3 + $0x38] sm:$0xff] }
0x149f   : > { %v4857_v60 = vpop.eup %4856  ;;  %4866 = vpow2.f32 %v3367_v6 }
0x14a0   : > { %v3375_v0 = vsel %vm3320_vm10, %v4857_v60, 0.0 }
0x14a1   : > { %3376 = vadd.xlane.f32.xlu0 %v3375_v0  ;;  %v3656_v0 = vpack.c.bf16 %v3651_v52, %v3650_v59  ;;  %v3769_v52 = vld [vmem:[%s6081_s6 + $0x68] sm:$0xff] }
0x14a3   : > { %v4859_v1 = vpop.eup %4858 }
0x14a4   : > { %v3378_v7 = vsel %vm3320_vm10, %v4859_v1, 0.0 }
0x14a5   : > { %v5777_v20 = vpop.eup %4860  ;;  %3379 = vadd.xlane.f32.xlu1 %v3378_v7 }
0x14a6   : > { %v3384_v4 = vsel %vm3320_vm10, %v5777_v20, 0.0 }
0x14a7   : > { %v4863_v2 = vpop.eup %4862 }
0x14a8   : > { %v3381_v21 = vsel %vm3320_vm10, %v4863_v2, 0.0 }
0x14a9   : > { %3382 = vadd.xlane.f32.xlu0 %v3381_v21  ;;  %3385 = vadd.xlane.f32.xlu1 %v3384_v4 }
0x14ab   : > { %v5782_v24 = vpop.eup %4864 }
0x14ac   : > { %v3387_v16 = vsel %vm3320_vm10, %v5782_v24, 0.0  ;;  %v4867_v8 = vpop.eup %4866 }
0x14ad   : > { %3388 = vadd.xlane.f32.xlu0 %v3387_v16  ;;  %v3390_v9 = vsel %vm3320_vm10, %v4867_v8, 0.0  ;;  %v3647_v16 = vld [vmem:[%s6076_s3 + $0x18] sm:$0xff] }
0x14b7   : > { %v3371_v10 = vpop.xlane.xlu0 %3370 }
0x14ba   : > { %3465 = vrot.lane.b32.xlu1 %v5737_v42, %s6068_s15 }
0x14bb   : > { %v3374_v11 = vpop.xlane.xlu1 %3373 }
0x14bc   : > { %4868 = vrcp.f32 %v3374_v11  ;;  %v3645_v11 = vld [vmem:[%s6076_s3 + $0x8] sm:$0xff] }
0x14bd   : > { %4870 = vrcp.f32 %v3371_v10  ;;  %v3644_v10 = vld [vmem:[%s6076_s3] sm:$0xff] }
0x14be   : > { %3515 = vrot.lane.b32.xlu1 %v5735_v50, %s6068_s15 }
0x14c3   : > { %3414 = vrot.lane.b32.xlu0 %v5719_v39, %s6068_s15 }
0x14c9   : > { %v4869_v22 = vpop.eup %4868 }
0x14ca   : > { %v4871_v14 = vpop.eup %4870 }
0x14cb   : > { %v3401_v25 = vmul.f32 %v4871_v14, %v5767_v36 }
0x14e2   : > { %3391 = vadd.xlane.f32.xlu1 %v3390_v9 }
0x14f3   : > { %3565 = vrot.lane.b32.xlu1 %v5745_v41, %s6068_s15  ;;  %v3402_v41 = vmul.f32 %v4869_v22, %v5771_v38  ;;  %s6078_s15 = smov 32  }
0x14f5   : > { %v3409_v23 = vpack.c.bf16 %v3402_v41, %v3401_v25 }
0x152a   : > { %v3377_v42 = vpop.xlane.xlu0 %3376 }
0x152b   : > { %4872 = vrcp.f32 %v3377_v42  ;;  %v3653_v42 = vpack.c.bf16 %v3645_v11, %v3644_v10  ;;  %v3757_v11 = vld [vmem:[%s6081_s6 + $0x8] sm:$0xff] }
0x152e   : > { %v3380_v50 = vpop.xlane.xlu1 %3379 }
0x152f   : > { %4874 = vrcp.f32 %v3380_v50 }
0x1532   : > { %v3383_v39 = vpop.xlane.xlu0 %3382  ;;  %v3386_v18 = vpop.xlane.xlu1 %3385 }
0x1533   : > { %4876 = vrcp.f32 %v3383_v39 }
0x1534   : > { %4878 = vrcp.f32 %v3386_v18 }
0x1536   : > { %v3389_v29 = vpop.xlane.xlu0 %3388  ;;  %v3466_v61 = vpop.permute.xlu1 %3465 }
0x1537   : > { %v3471_v12 = vsel %vm3419_vm11, %v3466_v61, 0  ;;  %4880 = vrcp.f32 %v3389_v29 }
0x1538   : > { %4573 = vmatpush3.bf16.msra.mxu0 %v3471_v12  ;;  %v4873_v13 = vpop.eup %4872 }
0x1539   : > { %4584 = vmatprep.subr.bf16.mxu0 %v5006_v3  ;;  %v3403_v28 = vmul.f32 %v4873_v13, %v4857_v60  ;;  %v3648_v60 = vld [vmem:[%s6076_s3 + $0x20] sm:$0xff] }
0x153a   : > { %v3415_v15 = vpop.permute.xlu0 %3414  ;;  %v3516_v57 = vpop.permute.xlu1 %3515 }
0x153b   : > { %v3421_v19 = vsel %vm3419_vm11, %v3415_v15, 0  ;;  %v3521_v31 = vsel %vm3419_vm11, %v3516_v57, 0 }
0x153c   : > { %v4875_v26 = vpop.eup %4874  ;;  %4567 = vmatpush3.bf16.msra.mxu1 %v3421_v19 }
0x153d   : > { %4578 = vmatprep.subr.bf16.mxu1 %v5006_v3  ;;  %v3404_v30 = vmul.f32 %v4875_v26, %v4859_v1  ;;  %v3649_v1 = vld [vmem:[%s6076_s3 + $0x28] sm:$0xff] }
0x153e   : > { %v3655_v21 = vpack.c.bf16 %v3649_v1, %v3648_v60  ;;  %v3771_v60 = vld [vmem:[%s6081_s6 + $0x78] sm:$0xff]  ;;  %v3768_v1 = vld [vmem:[%s6081_s6 + $0x60] sm:$0xff] }
0x153f   : > { %4569 = vmatmul.mubr.msk.bf16.vlgmr.msra.gmra.mxu1 %vm3320_vm10, %v3409_v23  ;;  %v3410_v32 = vpack.c.bf16 %v3404_v30, %v3403_v28 }
0x1540   : > { %v4877_v35 = vpop.eup %4876  ;;  %4579 = vmatpush3.bf16.msra.mxu1 %v3521_v31  ;;  %4580 = vmatprep.mubr.msk.bf16.mxu1 %vm5007_vm0, %v5006_v3 }
0x1541   : > { %v4879_v37 = vpop.eup %4878  ;;  %4575 = vmatmul.mubr.msk.bf16.vlgmr.msra.gmra.mxu0 %vm3320_vm10, %v3410_v32  ;;  %v3405_v36 = vmul.f32 %v4877_v35, %v4863_v2  ;;  %4590 = vmatprep.subr.bf16.mxu1 %v5006_v3 }
0x1542   : > { %v3406_v38 = vmul.f32 %v4879_v37, %v5777_v20  ;;  %4586 = vmatprep.mubr.msk.bf16.mxu0 %vm5007_vm0, %v5006_v3  ;;  %v4243_v37 = vld [vmem:[%s6080_s4] ss:$0 sm:$0xff] }
0x1544   : > { %v3411_v43 = vpack.c.bf16 %v3406_v38, %v3405_v36  ;;  %v4881_v47 = vpop.eup %4880 }
0x1545   : > { %v3407_v51 = vmul.f32 %v4881_v47, %v5782_v24  ;;  %v3646_v24 = vld [vmem:[%s6076_s3 + $0x10] sm:$0xff] }
0x1546   : > { %v3654_v27 = vpack.c.bf16 %v3647_v16, %v3646_v24  ;;  %v3766_v24 = vld [vmem:[%s6081_s6 + $0x50] sm:$0xff] }
0x1547   : > { %4581 = vmatmul.mubr.msk.bf16.vlgmr.msra.gmra.mxu1 %vm3320_vm10, %v3411_v43 }
0x1548   : > { %4598 = vmatprep.mubr.msk.bf16.mxu1 %vm5007_vm0, %v5006_v3  ;;  %4591 = vmatpush3.bf16.msra.mxu1 %v3656_v0  ;;  %v3780_v0 = vpack.c.bf16 %v3771_v60, %v3769_v52  ;;  %v3972_v52 = vld [vmem:[%s5217_s12 + $0xc8] sm:$0xff] }
0x1549   : > { %4592 = vmatprep.subr.bf16.mxu1 %v5006_v3 }
0x154c   : > { %4593 = vmatpush3.bf16.msra.mxu1 %v3655_v21  ;;  %v3767_v21 = vld [vmem:[%s6081_s6 + $0x58] sm:$0xff] }
0x154d   : > { %4594 = vmatprep.subr.bf16.mxu1 %v5006_v3 }
0x1550   : > { %4595 = vmatpush3.bf16.msra.mxu1 %v3654_v27  ;;  %v3763_v27 = vld [vmem:[%s6081_s6 + $0x38] sm:$0xff] }
0x1551   : > { %4596 = vmatprep.subr.bf16.mxu1 %v5006_v3 }
0x1554   : > { %4597 = vmatpush3.bf16.msra.mxu1 %v3653_v42  ;;  %v3759_v42 = vld [vmem:[%s6081_s6 + $0x18] sm:$0xff] }
0x156b   : > { %v3392_v44 = vpop.xlane.xlu1 %3391 }
0x156c   : > { %4882 = vrcp.f32 %v3392_v44 }
0x156f   : > { %v3566_v45 = vpop.permute.xlu1 %3565 }
0x1570   : > { %v3571_v46 = vsel %vm3419_vm11, %v3566_v45, 0 }
0x1571   : > { %4585 = vmatpush3.bf16.msra.mxu0 %v3571_v46 }
0x1572   : > { %3804 = vmatprep.subr.bf16.mxu0 %v3780_v0  ;;  %v3955_v0 = vld [vmem:[%s5217_s12 + $0x40] sm:$0xff] }
0x1579   : > { %v4883_v49 = vpop.eup %4882 }
0x157a   : > { %v3408_v33 = vmul.f32 %v4883_v49, %v4867_v8 }
0x157c   : > { %v3412_v34 = vpack.c.bf16 %v3408_v33, %v3407_v51 }
0x157e   : > { %4587 = vmatmul.mubr.msk.bf16.vlgmr.msra.gmra.mxu0 %vm3320_vm10, %v3412_v34 }
0x157f   : > { %3828 = vmatprep.mubr.bf16.mxu0 %v5008_v17 }
0x15ff   : > { %v3457_v40 = vpop.f32.mrf.mxu1 }
0x1601   : > { %v4570_v53 = vpop.f32.mrf.mxu1  ;;  %v3507_v55 = vpop.f32.mrf.mxu0 }
0x1603   : > { %v3460_v58 = vpop.f32.mrf.mxu1  ;;  %v4576_v48 = vpop.f32.mrf.mxu0 }
0x1605   : > { %v4571_v7 = vpop.f32.mrf.mxu1  ;;  %v3510_v20 = vpop.f32.mrf.mxu0 }
0x1606   : > { %v4760_v2 = vpack.i.bf16 %v3510_v20, %v3507_v55  ;;  %v3770_v7 = vld [vmem:[%s6081_s6 + $0x70] sm:$0xff] }
0x1607   : > { %v4577_v4 = vpop.f32.mrf.mxu0  ;;  %v3557_v17 = vpop.f32.mrf.mxu1  ;;  %v3779_v20 = vpack.c.bf16 %v3770_v7, %v3768_v1  ;;  %v3956_v1 = vld [vmem:[%s5217_s12 + $0x48] sm:$0xff] }
0x1608   : > { %4761 = vrot.lane.b32.xlu0 %v4760_v2, %s6077_s8  ;;  %v3765_v2 = vld [vmem:[%s6081_s6 + $0x48] sm:$0xff]  ;;  %s6082_s8 = sld [smem:[#allocation31_spill]]  ;;  %v3985_v7 = vpack.c.bf16 %v3956_v1, %v3955_v0 }
0x1609   : > { %v4582_v5 = vpop.f32.mrf.mxu1  ;;  %3805 = vmatpush1.bf16.msra.mxu0 %v3779_v20  ;;  %v3778_v4 = vpack.c.bf16 %v3767_v21, %v3765_v2  ;;  %v3969_v20 = vld [vmem:[%s5217_s12 + $0xb0] sm:$0xff]  ;;  %v3970_v2 = vld [vmem:[%s5217_s12 + $0xb8] sm:$0xff] }
0x160a   : > { %v3761_v5 = vld [vmem:[%s6081_s6 + $0x28] sm:$0xff]  ;;  %v3992_v21 = vpack.c.bf16 %v3970_v2, %v3969_v20 }
0x160b   : > { %v3560_v6 = vpop.f32.mrf.mxu1  ;;  %3806 = vmatprep.subr.bf16.mxu0 %v3778_v4  ;;  %v3953_v4 = vld [vmem:[%s5217_s12 + $0x30] sm:$0xff] }
0x160c   : > { %v4765_v8 = vpack.i.bf16 %v3560_v6, %v3557_v17  ;;  %v3764_v17 = vld [vmem:[%s6081_s6 + $0x40] sm:$0xff]  ;;  %v3776_v6 = vpack.c.bf16 %v3763_v27, %v3761_v5  ;;  %v3968_v5 = vld [vmem:[%s5217_s12 + $0xa8] sm:$0xff] }
0x160d   : > { %v4583_v9 = vpop.f32.mrf.mxu1  ;;  %v3777_v16 = vpack.c.bf16 %v3766_v24, %v3764_v17  ;;  %v3954_v17 = vld [vmem:[%s5217_s12 + $0x38] sm:$0xff] }
0x160e   : > { %4766 = vrot.lane.b32.xlu1 %v4765_v8, %s6078_s15  ;;  %v3760_v8 = vld [vmem:[%s6081_s6 + $0x20] sm:$0xff]  ;;  %v3762_v9 = vld [vmem:[%s6081_s6 + $0x30] sm:$0xff]  ;;  %s6083_s15 = sld [smem:[#allocation32_spill]]  ;;  %v3984_v24 = vpack.c.bf16 %v3954_v17, %v3953_v4 }
0x160f   : > { %3807 = vmatpush1.bf16.msra.mxu0 %v3777_v16  ;;  %v3775_v10 = vpack.c.bf16 %v3762_v9, %v3760_v8  ;;  %v3967_v16 = vld [vmem:[%s5217_s12 + $0xa0] sm:$0xff]  ;;  %v3952_v8 = vld [vmem:[%s5217_s12 + $0x28] sm:$0xff] }
0x1610   : > { %3808 = vmatprep.subr.bf16.mxu0 %v3776_v6  ;;  %v3991_v27 = vpack.c.bf16 %v3968_v5, %v3967_v16  ;;  %v3951_v6 = vld [vmem:[%s5217_s12 + $0x20] sm:$0xff] }
0x1611   : > { %v3983_v9 = vpack.c.bf16 %v3952_v8, %v3951_v6 }
0x1613   : > { %3809 = vmatpush1.bf16.msra.mxu0 %v3775_v10  ;;  %v3965_v10 = vld [vmem:[%s5217_s12 + $0x90] sm:$0xff] }
0x163e   : > { %v3607_v50 = vpop.f32.mrf.mxu0 }
0x1640   : > { %v4588_v39 = vpop.f32.mrf.mxu0 }
0x1641   : > { %v3774_v39 = vpack.c.bf16 %v3759_v42, %v3757_v11  ;;  %v3966_v11 = vld [vmem:[%s5217_s12 + $0x98] sm:$0xff] }
0x1642   : > { %v3610_v18 = vpop.f32.mrf.mxu0  ;;  %v3990_v42 = vpack.c.bf16 %v3966_v11, %v3965_v10 }
0x1643   : > { %v4770_v22 = vpack.i.bf16 %v3610_v18, %v3607_v50  ;;  %v3756_v50 = vld [vmem:[%s6081_s6] sm:$0xff]  ;;  %v3758_v18 = vld [vmem:[%s6081_s6 + $0x10] sm:$0xff]  ;;  %3810 = vmatprep.subr.bf16.mxu0 %v3774_v39  ;;  %v3950_v39 = vld [vmem:[%s5217_s12 + $0x18] sm:$0xff] }
0x1644   : > { %v4589_v29 = vpop.f32.mrf.mxu0 }
0x1645   : > { %4771 = vrot.lane.b32.xlu0 %v4770_v22, %s6079_s5  ;;  %v3773_v22 = vpack.c.bf16 %v3758_v18, %v3756_v50  ;;  %v3949_v50 = vld [vmem:[%s5217_s12 + $0x10] sm:$0xff]  ;;  %s1229_s5 = sand.u32 1, %s4956_s1  }
0x1646   : > { %v3982_v18 = vpack.c.bf16 %v3950_v39, %v3949_v50  ;;  %s4171_s4 = sshll.u32 %s1229_s5, 4  ;;  %s5951_s9 = scalar_lea.sflag [#allocation3], %s1229_s5 }
0x1647   : > { %3811 = vmatpush1.bf16.msra.mxu0 %v3773_v22  ;;  %v3963_v22 = vld [vmem:[%s5217_s12 + $0x80] sm:$0xff] }
0x167a   : > { %v4762_v61 = vpop.permute.xlu0 %4761 }
0x167b   : > { %v4764_v14 = vunpack.i.h.bf16 %v4762_v61  ;;  %v4763_v41 = vunpack.i.l.bf16 %v4762_v61 }
0x167d   : > { %v3639_v3 = vsel %vm1540_vm2, %v3460_v58, %v4764_v14  ;;  %v3638_v25 = vsel %vm1540_vm2, %v3457_v40, %v4763_v41 }
0x1680   : > { %v4767_v12 = vpop.permute.xlu1 %4766 }
0x1681   : > { %v4769_v13 = vunpack.i.h.bf16 %v4767_v12  ;;  %v4768_v15 = vunpack.i.l.bf16 %v4767_v12 }
0x1683   : > { %v3640_v23 = vsel %vm2036_vm3, %v3638_v25, %v4768_v15  ;;  %v3641_v28 = vsel %vm2036_vm3, %v3639_v3, %v4769_v13  ;;  %v4244_v3 = vld [vmem:[%s6082_s8] ss:$0 sm:$0xff]  ;;  %s4254_s8 = sshll.u32 %s5250_s0, 8  ;;  %s5016_s0 = smov [#allocation2]  }
0x1684   : > { %s5946_s6 = scalar_lea.hbm %s5227_s27, %s4254_s8 }
0x16b7   : > { %v4772_v19 = vpop.permute.xlu0 %4771 }
0x16b8   : > { %v4774_v26 = vunpack.i.h.bf16 %v4772_v19  ;;  %v4773_v57 = vunpack.i.l.bf16 %v4772_v19 }
0x16ba   : > { %v3643_v30 = vsel %vm2039_vm4, %v3641_v28, %v4774_v26  ;;  %v3642_v31 = vsel %vm2039_vm4, %v3640_v23, %v4773_v57  ;;  %v4245_v23 = vld [vmem:[%s6083_s15] ss:$0 sm:$0xff]  ;;  %s1231_s15 = scalar_lea.vmem [#allocation2], %s4171_s4  ;;  %s4908_s4 = sshll.u32 %s5016_s0, 4  ;;  %s4909_s4 = int_to_ptr.vmem [resolvable:$false] %s4908_s4 }
0x16bb   : > { %v3652_v32 = vpack.c.bf16 %v3643_v30, %v3642_v31  ;;  %s4065_s3 = sshll.u32 %s1231_s15, 4  ;;  %s4910_s8 = scalar_lea.vmem %s4909_s4, 512  ;;  %s5948_s3 = int_to_ptr.vmem [resolvable:$true] %s4065_s3 }
0x16bc   : > { %s4904_s10 = scalar_lea.vmem %s5948_s3, 256  ;;  %p4911_p0 = scmp.lt.s32.totalorder %s5948_s3, %s4909_s4 }
0x16bd   : > { %4599 = vmatmul.mubr.msk.bf16.vlgmr.msra.gmra.mxu1 %vm1320_vm1, %v3652_v32  ;;  %p4905_p11 = scmp.ne.s32.totalorder %s5948_s3, %s4904_s10  ;;  %p4912_p1 = scmp.lt.s32.totalorder %s4910_s8, %s4904_s10 }
0x16bf   : > { %p4906_p12 = pnand %p4905_p11, %p5267_p5  ;;  %p4913_p2 = por %p4912_p1, %p4911_p0 }
0x16c1   : > { %p4907_p13 = pneg %p4906_p12 }
0x16c3   : > { %p4914_p3 = pnand %p4913_p2, %p4907_p13 }
0x177d   : > { %v3694_v35 = vpop.f32.mrf.mxu1 }
0x177e   : > { %v3701_v36 = vadd.f32 %v3694_v35, %v5612_v62  ;;  %v3977_v35 = vld [vmem:[%s5217_s12 + $0xf0] sm:$0xff] }
0x177f   : > { %v4600_v38 = vpop.f32.mrf.mxu1 }
0x1780   : > { %v5840_v43 = vadd.f32 %v4243_v37, %v3701_v36  ;;  %v3961_v38 = vld [vmem:[%s5217_s12 + $0x70] sm:$0xff] }
0x1781   : > { %v3697_v44 = vpop.f32.mrf.mxu1 }
0x1782   : > { %v3702_v45 = vadd.f32 %v3697_v44, %v5617_v63  ;;  %v3714_v46 = vsel %vm1320_vm1, %v5840_v43, 0.0  ;;  %v3962_v44 = vld [vmem:[%s5217_s12 + $0x78] sm:$0xff] }
0x1783   : > { %3715 = vadd.xlane.f32.xlu1 %v3714_v46  ;;  %v4601_v47 = vpop.f32.mrf.mxu1  ;;  %v3975_v46 = vld [vmem:[%s5217_s12 + $0xe0] sm:$0xff] }
0x1784   : > { %v5845_v49 = vadd.f32 %v4243_v37, %v3702_v45  ;;  %v3978_v37 = vld [vmem:[%s5217_s12 + $0xf8] sm:$0xff]  ;;  %v3988_v45 = vpack.c.bf16 %v3962_v44, %v3961_v38  ;;  %v3976_v47 = vld [vmem:[%s5217_s12 + $0xe8] sm:$0xff] }
0x1785   : > { %v3996_v36 = vpack.c.bf16 %v3978_v37, %v3977_v35 }
0x1786   : > { %v3717_v51 = vsel %vm1320_vm1, %v5845_v49, 0.0 }
0x1787   : > { %3718 = vadd.xlane.f32.xlu0 %v3717_v51  ;;  %4372 = vmatprep.subr.bf16.mxu1 %v3996_v36  ;;  %v3995_v51 = vpack.c.bf16 %v3976_v47, %v3975_v46 }
0x1788   : > { %4373 = vmatpush3.bf16.msra.mxu1 %v3988_v45 }
0x1789   : > { %4374 = vmatprep.subr.bf16.mxu1 %v3995_v51 }
0x180c   : > { %v3716_v62 = vpop.xlane.xlu1 %3715 }
0x180d   : > { %v3720_v33 = vmul.f32 0.015625, %v3716_v62  ;;  %v3959_v62 = vld [vmem:[%s5217_s12 + $0x60] sm:$0xff] }
0x180f   : > { %v3722_v34 = vsub.f32 %v5840_v43, %v3720_v33  ;;  %v3960_v33 = vld [vmem:[%s5217_s12 + $0x68] sm:$0xff] }
0x1810   : > { %v3719_v63 = vpop.xlane.xlu0 %3718 }
0x1811   : > { %v3721_v40 = vmul.f32 0.015625, %v3719_v63  ;;  %v3724_v53 = vmul.f32 %v3722_v34, %v3722_v34  ;;  %v3973_v63 = vld [vmem:[%s5217_s12 + $0xd0] sm:$0xff] }
0x1813   : > { %v3723_v55 = vsub.f32 %v5845_v49, %v3721_v40  ;;  %v3726_v58 = vsel %vm1320_vm1, %v3724_v53, 0.0  ;;  %v3974_v40 = vld [vmem:[%s5217_s12 + $0xd8] sm:$0xff] }
0x1814   : > { %3727 = vadd.xlane.f32.xlu0 %v3726_v58  ;;  %v3994_v53 = vpack.c.bf16 %v3974_v40, %v3973_v63  ;;  %v3958_v58 = vld [vmem:[%s5217_s12 + $0x58] sm:$0xff] }
0x1815   : > { %v3725_v48 = vmul.f32 %v3723_v55, %v3723_v55 }
0x1817   : > { %v3729_v59 = vsel %vm1320_vm1, %v3725_v48, 0.0 }
0x1818   : > { %3730 = vadd.xlane.f32.xlu0 %v3729_v59  ;;  %v3971_v59 = vld [vmem:[%s5217_s12 + $0xc0] sm:$0xff] }
0x1819   : > { %v3993_v60 = vpack.c.bf16 %v3972_v52, %v3971_v59 }
0x189d   : > { %v3728_v29 = vpop.xlane.xlu0 %3727 }
0x189e   : > { %v3732_v61 = vmul.f32 0.015625, %v3728_v29  ;;  %v3964_v29 = vld [vmem:[%s5217_s12 + $0x88] sm:$0xff] }
0x18a0   : > { %v3734_v12 = vadd.f32 1e-06, %v3732_v61  ;;  %v3989_v61 = vpack.c.bf16 %v3964_v29, %v3963_v22 }
0x18a1   : > { %v3731_v14 = vpop.xlane.xlu0 %3730 }
0x18a2   : > { %4884 = vrsqrt.f32 %v3734_v12  ;;  %v3733_v41 = vmul.f32 0.015625, %v3731_v14  ;;  %v3947_v12 = vld [vmem:[%s5217_s12] sm:$0xff]  ;;  %v3948_v14 = vld [vmem:[%s5217_s12 + $0x8] sm:$0xff] }
0x18a4   : > { %v3735_v13 = vadd.f32 1e-06, %v3733_v41  ;;  %v3981_v41 = vpack.c.bf16 %v3948_v14, %v3947_v12 }
0x18a6   : > { %4886 = vrsqrt.f32 %v3735_v13  ;;  %v3781_v13 = vld [vmem:[%s5212_s30] sm:$0x3] }
0x18af   : > { %v4885_v15 = vpop.eup %4884 }
0x18b0   : > { %v3738_v19 = vmul.f32 %v4885_v15, %v3722_v34  ;;  %v3987_v34 = vpack.c.bf16 %v3960_v33, %v3959_v62  ;;  %v3786_v15 = vrot.slane %v3781_v13, %v5351_v54 }
0x18b2   : > { %v3746_v57 = vmul.f32 %v4244_v3, %v3738_v19  ;;  %4375 = vmatpush3.bf16.msra.mxu1 %v3987_v34  ;;  %v3790_v19 = vrot.slane %v3781_v13, %v5354_v56 }
0x18b3   : > { %v4887_v25 = vpop.eup %4886  ;;  %4376 = vmatprep.subr.bf16.mxu1 %v3994_v53 }
0x18b4   : > { %v3739_v26 = vmul.f32 %v4887_v25, %v3723_v55  ;;  %v3754_v30 = vadd.f32 %v4245_v23, %v3746_v57  ;;  %v3957_v55 = vld [vmem:[%s5217_s12 + $0x50] sm:$0xff] }
0x18b5   : > { %v3986_v48 = vpack.c.bf16 %v3958_v58, %v3957_v55 }
0x18b6   : > { %v3747_v28 = vmul.f32 %v4244_v3, %v3739_v26 }
0x18b7   : > { %4377 = vmatpush3.bf16.msra.mxu1 %v3986_v48 }
0x18b8   : > { %v3755_v31 = vadd.f32 %v4245_v23, %v3747_v28  ;;  %4378 = vmatprep.subr.bf16.mxu1 %v3993_v60 }
0x18ba   : > { %v3772_v32 = vpack.c.bf16 %v3755_v31, %v3754_v30 }
0x18bb   : > { %4379 = vmatpush3.bf16.msra.mxu1 %v3985_v7 }
0x18bc   : > { %4246 = vmatmul.mubr.msk.bf16.vlgmr.msra.gmra.mxu0 %vm1320_vm1, %v3772_v32  ;;  %4380 = vmatprep.subr.bf16.mxu1 %v3992_v21 }
0x18bf   : > { %4381 = vmatpush3.bf16.msra.mxu1 %v3984_v24 }
0x18c0   : > { %4382 = vmatprep.subr.bf16.mxu1 %v3991_v27 }
0x18c3   : > { %4383 = vmatpush3.bf16.msra.mxu1 %v3983_v9 }
0x18c4   : > { %4384 = vmatprep.subr.bf16.mxu1 %v3990_v42 }
0x18c7   : > { %4385 = vmatpush3.bf16.msra.mxu1 %v3982_v18 }
0x18c8   : > { %4386 = vmatprep.subr.bf16.mxu1 %v3989_v61 }
0x18cb   : > { %4387 = vmatpush3.bf16.msra.mxu1 %v3981_v41 }
0x197c   : > { %v3830_v3 = vpop.f32.mrf.mxu0 }
0x197d   : > { %v5907_v25 = vadd.f32 %v3830_v3, %v3786_v15 }
0x197e   : > { %v3832_v26 = vpop.f32.mrf.mxu0 }
0x197f   : > { %v5910_v57 = vmul.f32 0.70710677, %v5907_v25  ;;  %v5912_v23 = vadd.f32 %v3832_v26, %v3790_v19 }
0x1980   : > { %v3834_v28 = vpop.f32.mrf.mxu0 }
0x1981   : > { %v3843_v30 = vand.u32 2147483647, %v5910_v57  ;;  %v5916_v31 = vmul.f32 0.70710677, %v5912_v23  ;;  %v5918_v32 = vadd.f32 %v3834_v28, %v3786_v15  ;;  %vm3923_vm13 = vcmp.ge.f32.partialorder %v5910_v57, 0.0 }
0x1982   : > { %v3836_v54 = vpop.f32.mrf.mxu0 }
0x1983   : > { %v3847_v35 = vmul.f32 0.3275911, %v3843_v30  ;;  %v3844_v56 = vand.u32 2147483647, %v5916_v31  ;;  %v5922_v37 = vmul.f32 0.70710677, %v5918_v32  ;;  %v5924_v36 = vadd.f32 %v3836_v54, %v3790_v19 }
0x1984   : > { %v3899_v40 = vsub.f32 0.0, %v3843_v30  ;;  %vm3924_vm12 = vcmp.ge.f32.partialorder %v5916_v31, 0.0  ;;  %v3936_v31 = vmul.f32 0.5, %v5912_v23 }
0x1985   : > { %v3851_v38 = vadd.f32 1.0, %v3847_v35  ;;  %v3848_v44 = vmul.f32 0.3275911, %v3844_v56  ;;  %v3845_v45 = vand.u32 2147483647, %v5922_v37  ;;  %v3900_v53 = vsub.f32 0.0, %v3844_v56 }
0x1986   : > { %v5928_v46 = vmul.f32 0.70710677, %v5924_v36  ;;  %v3903_v55 = vmul.f32 %v3899_v40, %v3843_v30  ;;  %vm3925_vm14 = vcmp.ge.f32.partialorder %v5922_v37, 0.0  ;;  %v3938_v57 = vmul.f32 0.5, %v5924_v36  ;;  %v4247_v36 = vld [vmem:[%s5222_s20] ss:$0 sm:$0xff] }
0x1987   : > { %4888 = vrcp.f32 %v3851_v38  ;;  %v3852_v47 = vadd.f32 1.0, %v3848_v44  ;;  %v3849_v51 = vmul.f32 0.3275911, %v3845_v45  ;;  %v3901_v58 = vsub.f32 0.0, %v3845_v45 }
0x1988   : > { %v3846_v62 = vand.u32 2147483647, %v5928_v46  ;;  %v3904_v59 = vmul.f32 %v3900_v53, %v3844_v56  ;;  %v3907_v60 = vmul.f32 1.442695, %v3903_v55  ;;  %vm3926_vm15 = vcmp.ge.f32.partialorder %v5928_v46, 0.0 }
0x1989   : > { %4890 = vrcp.f32 %v3852_v47  ;;  %v3853_v33 = vadd.f32 1.0, %v3849_v51  ;;  %v3905_v1 = vmul.f32 %v3901_v58, %v3845_v45  ;;  %v3935_v37 = vmul.f32 0.5, %v5907_v25 }
0x198a   : > { %v3850_v34 = vmul.f32 0.3275911, %v3846_v62  ;;  %v3902_v0 = vsub.f32 0.0, %v3846_v62  ;;  %v3909_v21 = vmul.f32 1.442695, %v3904_v59 }
0x198b   : > { %4892 = vrcp.f32 %v3853_v33  ;;  %v3911_v27 = vmul.f32 1.442695, %v3905_v1 }
0x198c   : > { %v3854_v63 = vadd.f32 1.0, %v3850_v34  ;;  %v3906_v24 = vmul.f32 %v3902_v0, %v3846_v62 }
0x198e   : > { %4894 = vrcp.f32 %v3854_v63  ;;  %v3913_v50 = vmul.f32 1.442695, %v3906_v24 }
0x198f   : > { %4896 = vpow2.f32 %v3907_v60 }
0x1990   : > { %4898 = vpow2.f32 %v3909_v21 }
0x1991   : > { %4900 = vpow2.f32 %v3911_v27 }
0x1992   : > { %4902 = vpow2.f32 %v3913_v50 }
0x1994   : > { %v4889_v48 = vpop.eup %4888 }
0x1995   : > { %v3863_v52 = vmul.f32 1.0614054, %v4889_v48 }
0x1996   : > { %v4891_v7 = vpop.eup %4890 }
0x1997   : > { %v3867_v20 = vadd.f32 -1.4531521, %v3863_v52  ;;  %v3864_v2 = vmul.f32 1.0614054, %v4891_v7 }
0x1998   : > { %v4893_v4 = vpop.eup %4892 }
0x1999   : > { %v3871_v17 = vmul.f32 %v4889_v48, %v3867_v20  ;;  %v3868_v16 = vadd.f32 -1.4531521, %v3864_v2  ;;  %v3865_v5 = vmul.f32 1.0614054, %v4893_v4 }
0x199b   : > { %v3875_v6 = vadd.f32 1.4214138, %v3871_v17  ;;  %v4895_v8 = vpop.eup %4894  ;;  %v3872_v9 = vmul.f32 %v4891_v7, %v3868_v16  ;;  %v3869_v10 = vadd.f32 -1.4531521, %v3865_v5 }
0x199c   : > { %v3866_v42 = vmul.f32 1.0614054, %v4895_v8  ;;  %v4897_v35 = vpop.eup %4896 }
0x199d   : > { %v3879_v11 = vmul.f32 %v4889_v48, %v3875_v6  ;;  %v3876_v39 = vadd.f32 1.4214138, %v3872_v9  ;;  %v3873_v18 = vmul.f32 %v4893_v4, %v3869_v10  ;;  %v4899_v62 = vpop.eup %4898  ;;  %v3937_v6 = vmul.f32 0.5, %v5918_v32 }
0x199e   : > { %v3870_v29 = vadd.f32 -1.4531521, %v3866_v42  ;;  %v4901_v53 = vpop.eup %4900 }
0x199f   : > { %v3883_v22 = vadd.f32 -0.28449672, %v3879_v11  ;;  %v3880_v61 = vmul.f32 %v4891_v7, %v3876_v39  ;;  %v3877_v12 = vadd.f32 1.4214138, %v3873_v18  ;;  %v4903_v60 = vpop.eup %4902 }
0x19a0   : > { %v3874_v41 = vmul.f32 %v4895_v8, %v3870_v29 }
0x19a1   : > { %v3887_v14 = vmul.f32 %v4889_v48, %v3883_v22  ;;  %v3884_v13 = vadd.f32 -0.28449672, %v3880_v61  ;;  %v3881_v15 = vmul.f32 %v4893_v4, %v3877_v12 }
0x19a2   : > { %v3878_v3 = vadd.f32 1.4214138, %v3874_v41 }
0x19a3   : > { %v3891_v19 = vadd.f32 0.2548296, %v3887_v14  ;;  %v3888_v26 = vmul.f32 %v4891_v7, %v3884_v13  ;;  %v3885_v28 = vadd.f32 -0.28449672, %v3881_v15 }
0x19a4   : > { %v3882_v54 = vmul.f32 %v4895_v8, %v3878_v3 }
0x19a5   : > { %v3895_v30 = vmul.f32 %v4889_v48, %v3891_v19  ;;  %v3892_v56 = vadd.f32 0.2548296, %v3888_v26  ;;  %v3889_v38 = vmul.f32 %v4893_v4, %v3885_v28 }
0x19a6   : > { %v3886_v45 = vadd.f32 -0.28449672, %v3882_v54 }
0x19a7   : > { %v3915_v44 = vmul.f32 %v4897_v35, %v3895_v30  ;;  %v3896_v47 = vmul.f32 %v4891_v7, %v3892_v56  ;;  %v3893_v51 = vadd.f32 0.2548296, %v3889_v38 }
0x19a8   : > { %v3890_v33 = vmul.f32 %v4895_v8, %v3886_v45 }
0x19a9   : > { %v3919_v34 = vsub.f32 1.0, %v3915_v44  ;;  %v3916_v63 = vmul.f32 %v4899_v62, %v3896_v47  ;;  %v3897_v40 = vmul.f32 %v4893_v4, %v3893_v51 }
0x19aa   : > { %v3894_v55 = vadd.f32 0.2548296, %v3890_v33 }
0x19ab   : > { %v3920_v58 = vsub.f32 1.0, %v3916_v63  ;;  %v3917_v59 = vmul.f32 %v4901_v53, %v3897_v40  ;;  %v3927_v48 = vsub.f32 0.0, %v3919_v34 }
0x19ac   : > { %v3898_v52 = vmul.f32 %v4895_v8, %v3894_v55 }
0x19ad   : > { %v3928_v0 = vsub.f32 0.0, %v3920_v58  ;;  %v3921_v1 = vsub.f32 1.0, %v3917_v59  ;;  %v3931_v4 = vsel %vm3923_vm13, %v3919_v34, %v3927_v48 }
0x19ae   : > { %v3918_v20 = vmul.f32 %v4903_v60, %v3898_v52  ;;  %v3939_v27 = vadd.f32 1.0, %v3931_v4 }
0x19af   : > { %v3929_v2 = vsub.f32 0.0, %v3921_v1  ;;  %v3932_v7 = vsel %vm3924_vm12, %v3920_v58, %v3928_v0 }
0x19b0   : > { %v3922_v21 = vsub.f32 1.0, %v3918_v20  ;;  %v3940_v5 = vadd.f32 1.0, %v3932_v7  ;;  %v3943_v50 = vmul.f32 %v3939_v27, %v3935_v37 }
0x19b1   : > { %v3933_v17 = vsel %vm3925_vm14, %v3921_v1, %v3929_v2 }
0x19b2   : > { %v3941_v24 = vadd.f32 1.0, %v3933_v17  ;;  %v3930_v16 = vsub.f32 0.0, %v3922_v21  ;;  %v3944_v11 = vmul.f32 %v3940_v5, %v3936_v31 }
0x19b4   : > { %v3934_v8 = vsel %vm3926_vm15, %v3922_v21, %v3930_v16  ;;  %v3945_v10 = vmul.f32 %v3941_v24, %v3937_v6 }
0x19b5   : > { %v3942_v9 = vadd.f32 1.0, %v3934_v8 }
0x19b6   : > { %v3979_v46 = vpack.c.bf16 %v3945_v10, %v3943_v50 }
0x19b7   : > { %v3946_v42 = vmul.f32 %v3942_v9, %v3938_v57 }
0x19b9   : > { %v3980_v39 = vpack.c.bf16 %v3946_v42, %v3944_v11 }
0x19bb   : > { %4029 = vmatprep.mubr.bf16.mxu1 %v3980_v39 }
0x19bc   : > { %4030 = vmatmul.mubr.bf16.vlgmr.msra.gmra.mxu1 %v3979_v46 }
0x1a7c   : > { %v4388_v18 = vpop.f32.mrf.mxu1 }
0x1a7e   : > { %v4389_v32 = vpop.f32.mrf.mxu1 }
0x1a7f   : > { %v4390_v23 = vadd.f32 %v4389_v32, %v4388_v18 }
0x1a80   : > { %v4391_v22 = vpop.f32.mrf.mxu1 }
0x1a81   : > { %v4038_v29 = vadd.f32 %v4390_v23, %v5840_v43 }
0x1a82   : > { %v4392_v25 = vpop.f32.mrf.mxu1 }
0x1a83   : > { %v4047_v61 = vadd.f32 %v4247_v36, %v4038_v29  ;;  %v4393_v12 = vadd.f32 %v4392_v25, %v4391_v22 }
0x1a85   : > { %4049 = vst.msk [vmem:[%s1231_s15] sm:$0xff] %vm1320_vm1, %v4047_v61  ;;  %v4039_v14 = vadd.f32 %v4393_v12, %v5845_v49 }
0x1a87   : > { %v4048_v41 = vadd.f32 %v4247_v36, %v4039_v14 }
0x1a89   : > { %4050 = vst.msk [vmem:[%s1231_s15 + $0x8] sm:$0xff] %vm1320_vm1, %v4048_v41 }
0x1a8a   : > { %4917 = shalt.err (!%p4914_p3)
}
0x1a8b   : > { %s4918_s5 = scalar_lea.hbm %s5946_s6, 256  ;;  %s4922_s15 = scalar_lea.hbm %s5227_s27, 512 }
0x1a8c   : > { %p4919_p4 = scmp.ne.s32.totalorder %s5946_s6, %s4918_s5  ;;  %p4923_p9 = scmp.lt.s32.totalorder %s5946_s6, %s5227_s27 }
0x1a8d   : > { %p4924_p10 = scmp.lt.s32.totalorder %s4922_s15, %s4918_s5 }
0x1a8e   : > { %p4920_p7 = pnand %p4919_p4, %p5267_p5 }
0x1a8f   : > { %p4925_p11 = por %p4924_p10, %p4923_p9 }
0x1a90   : > { %p4921_p8 = pneg %p4920_p7 }
0x1a92   : > { %p4926_p12 = pnand %p4925_p11, %p4921_p8 }
0x1a94   : > { %4929 = shalt.err (!%p4926_p12)
}
0x1a95   : > { %s5017_s10 = smov 128   ;;  %s5018_s0 = smov 8  }
0x1a96   : > { %4604 = dma.vmem_to_hbm [thread:$0]  (%p5267_p5), %s5948_s3, 256, %s5946_s6, %s5951_s9, %s5017_s10, %s5017_s10, %s5018_s0  }
0x1a97 PF: > { %p4610_p13 = scmp.ge.s32.totalorder %s4964_s7, 2  ;;  %s4080_s4 = sand.u32 1, %s4952_s28  }
0x1a98   : > { %s4081_s8 = scalar_lea.sflag [#allocation3], %s4080_s4 }
0x1a99   : > { %p4607_p0 = pnand %p4610_p13, %p5271_p6 }
0x1a9b   : > { %p4608_p1 = pneg %p4607_p0 }
0x1a9d   : > { %4947 = dma.done.wait (%p4608_p1), %s4081_s8, 256  }
0x1a9e   : > { %4949 = vsyncadd (%p4608_p1), %s4081_s8, 4294967040  ;;  %p93_p2 = scmp.ge.s32.totalorder %s5254_s11, 4   ;;  %s6084_s28 = smov %s4956_s1 }
0x1a9f   : > { %s6085_s1 = smov %s4960_s2  ;;  %s6086_s2 = smov %s5265_s18 }
0x1aa0   : > { %s6087_s7 = smov %s5254_s11  ;;  %95 = sbr.rel (!%p93_p2) target bundleno = 78 (0x4e), region = 260 }
0x1aa5   :  { %4086 = vsyncpa [#allocation3], 1 }
0x1aa6   :  { %4088 = vsyncpa [#allocation3 + $0x1], 1 }

// kernel: twins_forward.2
= control target key start
LH: loop header
LB: loop body
LE: loop exit
PB: predicated region body
PF: predicated region fallthrough
CT: control target
= control target key end

     0   :  { %s7479_s6 = smov 1   ;;  %s7480_s10 = smov 2   ;;  %s9372_s0 = inlined_call_operand.smem [shape: u32[42], index: -1, kind: input, shape index: {}] }
   0x1   :  { %s7536_s5 = sld [smem:[%s9372_s0]]   ;;  %s7481_s14 = smov 3  }
   0x2   :  { %s7541_s9 = sld [smem:[%s9372_s0 + %s7479_s6]]   ;;  %s7482_s18 = smov 4  }
   0x3   :  { %s7546_s13 = sld [smem:[%s9372_s0 + %s7480_s10]]   ;;  %s7483_s22 = smov 5  }
   0x4   :  { %s7551_s17 = sld [smem:[%s9372_s0 + %s7481_s14]]   ;;  %s7484_s26 = smov 6  }
   0x5   :  { %s7556_s21 = sld [smem:[%s9372_s0 + %s7482_s18]]   ;;  %s7485_s30 = smov 7  }
   0x6   :  { %s7561_s25 = sld [smem:[%s9372_s0 + %s7483_s22]]   ;;  %s7486_s4 = smov 8  }
   0x7   :  { %s7566_s29 = sld [smem:[%s9372_s0 + %s7484_s26]]   ;;  %s7487_s10 = smov 9  }
   0x8   :  { %s7571_s3 = sld [smem:[%s9372_s0 + %s7485_s30]]   ;;  %s7488_s15 = smov 10  }
   0x9   :  { %s7576_s8 = sld [smem:[%s9372_s0 + %s7486_s4]]   ;;  %s7489_s20 = smov 11  }
   0xa   :  { %s7581_s14 = sld [smem:[%s9372_s0 + %s7487_s10]]   ;;  %s7490_s26 = smov 12  }
   0xb   :  { %s7586_s19 = sld [smem:[%s9372_s0 + %s7488_s15]]   ;;  %s7491_s1 = smov 13  }
   0xc   :  { %s7591_s24 = sld [smem:[%s9372_s0 + %s7489_s20]]   ;;  %s7492_s7 = smov 14  }
   0xd   :  { %s7596_s30 = sld [smem:[%s9372_s0 + %s7490_s26]]   ;;  %s7493_s15 = smov 15  }
   0xe   :  { %s7601_s6 = sld [smem:[%s9372_s0 + %s7491_s1]]   ;;  %s7494_s22 = smov 16  }
   0xf   :  { %s7606_s12 = sld [smem:[%s9372_s0 + %s7492_s7]]   ;;  %s7495_s28 = smov 17  }
  0x10   :  { %s7611_s20 = sld [smem:[%s9372_s0 + %s7493_s15]]   ;;  %s7496_s7 = smov 18  }
  0x11   :  { %s7616_s27 = sld [smem:[%s9372_s0 + %s7494_s22]]   ;;  %s7497_s15 = smov 19  }
  0x12   :  { %s7621_s4 = sld [smem:[%s9372_s0 + %s7495_s28]]   ;;  %s7498_s22 = smov 20  }
  0x13   :  { %9391 = sst [smem:[#allocation5_spill]] %s7596_s30  ;;  %s7499_s28 = smov 21  }
  0x14   :  { %s7641_s30 = sld [smem:[%s9372_s0 + %s7499_s28]]   ;;  %s7503_s28 = smov 25  }
  0x15   :  { %9392 = sst [smem:[#allocation6_spill]] %s7606_s12 }
  0x16   :  { %9393 = sst [smem:[#allocation7_spill]] %s7611_s20 }
  0x17   :  { %9394 = sst [smem:[#allocation8_spill]] %s7616_s27 }
  0x18   :  { %s7626_s12 = sld [smem:[%s9372_s0 + %s7496_s7]]   ;;  %s7500_s7 = smov 22  }
  0x19   :  { %s7631_s20 = sld [smem:[%s9372_s0 + %s7497_s15]]   ;;  %s7501_s15 = smov 23  }
  0x1a   :  { %s7636_s27 = sld [smem:[%s9372_s0 + %s7498_s22]]   ;;  %s7502_s22 = smov 24  }
  0x1b   :  { %9398 = sst [smem:[#allocation12_spill]] %s7641_s30 }
  0x1c   :  { %s7661_s30 = sld [smem:[%s9372_s0 + %s7503_s28]]   ;;  %s7507_s28 = smov 29  }
  0x1e   :  { %9395 = sst [smem:[#allocation9_spill]] %s7626_s12 }
  0x1f   :  { %9396 = sst [smem:[#allocation10_spill]] %s7631_s20 }
  0x20   :  { %9397 = sst [smem:[#allocation11_spill]] %s7636_s27 }
  0x21   :  { %s7646_s12 = sld [smem:[%s9372_s0 + %s7500_s7]]   ;;  %s7504_s7 = smov 26  }
  0x22   :  { %s7651_s20 = sld [smem:[%s9372_s0 + %s7501_s15]]   ;;  %s7505_s15 = smov 27  }
  0x23   :  { %s7656_s27 = sld [smem:[%s9372_s0 + %s7502_s22]]   ;;  %s7506_s22 = smov 28  }
  0x24   :  { %9402 = sst [smem:[#allocation16_spill]] %s7661_s30 }
  0x25   :  { %s7681_s30 = sld [smem:[%s9372_s0 + %s7507_s28]]   ;;  %s7511_s28 = smov 33  }
  0x27   :  { %9399 = sst [smem:[#allocation13_spill]] %s7646_s12 }
  0x28   :  { %9400 = sst [smem:[#allocation14_spill]] %s7651_s20 }
  0x29   :  { %9401 = sst [smem:[#allocation15_spill]] %s7656_s27 }
  0x2a   :  { %s7666_s12 = sld [smem:[%s9372_s0 + %s7504_s7]]   ;;  %s7508_s7 = smov 30  }
  0x2b   :  { %s7671_s20 = sld [smem:[%s9372_s0 + %s7505_s15]]   ;;  %s7509_s15 = smov 31  }
  0x2c   :  { %s7676_s27 = sld [smem:[%s9372_s0 + %s7506_s22]]   ;;  %s7510_s22 = smov 32  }
  0x2d   :  { %9406 = sst [smem:[#allocation20_spill]] %s7681_s30 }
  0x2e   :  { %s7701_s30 = sld [smem:[%s9372_s0 + %s7511_s28]]   ;;  %s7515_s28 = smov 37  }
  0x30   :  { %9403 = sst [smem:[#allocation17_spill]] %s7666_s12 }
  0x31   :  { %9404 = sst [smem:[#allocation18_spill]] %s7671_s20 }
  0x32   :  { %9405 = sst [smem:[#allocation19_spill]] %s7676_s27 }
  0x33   :  { %s7686_s12 = sld [smem:[%s9372_s0 + %s7508_s7]]   ;;  %s7512_s7 = smov 34  }
  0x34   :  { %s7691_s20 = sld [smem:[%s9372_s0 + %s7509_s15]]   ;;  %s7513_s15 = smov 35  }
  0x35   :  { %s7696_s27 = sld [smem:[%s9372_s0 + %s7510_s22]]   ;;  %s7514_s22 = smov 36  }
  0x36   :  { %9410 = sst [smem:[#allocation24_spill]] %s7701_s30 }
  0x37   :  { %s7721_s30 = sld [smem:[%s9372_s0 + %s7515_s28]]   ;;  %s7519_s28 = smov 41  }
  0x39   :  { %9407 = sst [smem:[#allocation21_spill]] %s7686_s12 }
  0x3a   :  { %9408 = sst [smem:[#allocation22_spill]] %s7691_s20 }
  0x3b   :  { %9409 = sst [smem:[#allocation23_spill]] %s7696_s27 }
  0x3c   :  { %s7706_s12 = sld [smem:[%s9372_s0 + %s7512_s7]]   ;;  %s7516_s7 = smov 38  }
  0x3d   :  { %s7711_s20 = sld [smem:[%s9372_s0 + %s7513_s15]]   ;;  %s7517_s15 = smov 39  }
  0x3e   :  { %s7716_s27 = sld [smem:[%s9372_s0 + %s7514_s22]]   ;;  %s7518_s22 = smov 40  }
  0x3f   :  { %9414 = sst [smem:[#allocation28_spill]] %s7721_s30 }
  0x40   :  { %s7741_s30 = sld [smem:[%s9372_s0 + %s7519_s28]]  }
  0x42   :  { %9411 = sst [smem:[#allocation25_spill]] %s7706_s12 }
  0x43   :  { %9412 = sst [smem:[#allocation26_spill]] %s7711_s20 }
  0x44   :  { %9413 = sst [smem:[#allocation27_spill]] %s7716_s27 }
  0x45   :  { %s7726_s12 = sld [smem:[%s9372_s0 + %s7516_s7]]  }
  0x46   :  { %s7731_s20 = sld [smem:[%s9372_s0 + %s7517_s15]]  }
  0x47   :  { %s7736_s27 = sld [smem:[%s9372_s0 + %s7518_s22]]  }
  0x48   :  { %88 = vsyncpa [#allocation3], 0  ;;  %s7743_s7 = smov 0  }
  0x49 LB: > { %s6133_s10 = sadd.s32 4294967295, %s7477_s7   ;;  %p6135_p0 = scmp.ge.s32.totalorder %s7477_s7, 1  ;;  %s7477_s7 = sphi %s7743_s7, %s94_s7  }
  0x4a   : > { %p991_p1 = scmp.lt.s32.totalorder %s7477_s7, 3  ;;  %p6939_p3 = scmp.eq.s32.totalorder %s6133_s10, 0 }
  0x4b   : > { %s7520_s0 = smov [#allocation2]  }
  0x4c   : > { %p7751_p2 = pnand %p6135_p0, %p991_p1  ;;  %s1118_s15 = sshll.u32 %s7520_s0, 4  ;;  %s1119_s15 = int_to_ptr.vmem [resolvable:$true] %s1118_s15 }
  0x4d   : > { %s7452_s16 = scalar_lea.vmem %s1119_s15, 16  ;;  %s7459_s18 = scalar_lea.vmem %s1119_s15, 32 }
  0x4e   : > { %p6935_p4 = pneg %p7751_p2  ;;  %p7453_p7 = scmp.ne.s32.totalorder %s1119_s15, %s7452_s16 }
  0x4f   : > { %p7460_p10 = scmp.lt.s32.totalorder %s1119_s15, %s1119_s15  ;;  %p7461_p11 = scmp.lt.s32.totalorder %s7459_s18, %s7452_s16 }
  0x50   : > { %p6936_p5 = pnand %p6939_p3, %p6935_p4 }
  0x51   : > { %p7462_p12 = por %p7461_p11, %p7460_p10 }
  0x52   : > { %p7443_p6 = pneg %p6936_p5 }
  0x54   : > { %p7455_p8 = pnand %p7453_p7, %p7443_p6 }
  0x56   : > { %p7456_p9 = pneg %p7455_p8 }
  0x58   : > { %p7463_p13 = pnand %p7462_p12, %p7456_p9 }
  0x5a   : > { %7466 = shalt.err (!%p7463_p13)
}
  0x5b   : > { %6938 = dma.hbm_to_vmem [thread:$0]  (!%p6936_p5), %s7731_s20, 16, %s1119_s15, [#allocation3]  }
  0x5c   : > { %1142 = sbr.rel (%p7751_p2) target bundleno = 7344 (0x1cb0), region = 184 }
  0x61   : > { %7472 = dma.done.wait (%p6939_p3), [#allocation3], 16  }
  0x62   : > { %7474 = vsyncadd (%p6939_p3), [#allocation3], 4294967280  ;;  %p1242_p0 = scmp.lt.s32.totalorder %s6133_s10, 1  ;;  %v1265_v0 = vld [vmem:[%s7541_s9 + $0x20] sm:$0xff]  ;;  %v1266_v1 = vld [vmem:[%s7541_s9 + $0x28] sm:$0xff]  ;;  %vm1281_vm0 = vcmask 392192  }
  0x63   : > { %v1263_v2 = vld [vmem:[%s7541_s9 + $0x10] sm:$0xff]  ;;  %v1273_v3 = vpack.c.bf16 %v1266_v1, %v1265_v0  ;;  %v1264_v4 = vld [vmem:[%s7541_s9 + $0x18] sm:$0xff]  ;;  %v1261_v5 = vld [vmem:[%s7541_s9] sm:$0xff]  ;;  %vm1361_vm1 = vcmask 261120   ;;  %vm1783_vm2 = vcmask 130048   ;;  %s7521_s26 = smov 112  }
  0x64   : > { %s9447_s10 = smov (!%p1242_p0, %s6133_s10), 1  ;;  %v1272_v6 = vpack.c.bf16 %v1264_v4, %v1263_v2  ;;  %v1262_v7 = vld [vmem:[%s7541_s9 + $0x8] sm:$0xff]  ;;  %v6144_v21 = vld [vmem:[%s7546_s13] ss:$0 sm:$0xff]  ;;  %s9387_s28 = smov 96   ;;  %vm1974_vm3 = vcmask 523264  }
  0x65   : > { %s6330_s22 = sshll.u32 %s9447_s10, 6  ;;  %6561 = vmatprep.subr.bf16.mxu0 %v1273_v3  ;;  %v1271_v11 = vpack.c.bf16 %v1262_v7, %v1261_v5  ;;  %s9383_s1 = smov 64   ;;  %vm4323_vm12 = vcmask 785408   ;;  %vm4523_vm13 = vcmask 257024   ;;  %vm7527_vm14 = vmmov 0  }
  0x66   : > { %s1246_s23 = scalar_lea.vmem %s7536_s5, %s6330_s22  ;;  %6562 = vmatpush3.bf16.msra.mxu0 %v1273_v3  ;;  %s9385_s2 = smov 16   ;;  %vm4814_vm15 = vcmask 31744  }
  0x67   : > { %v1253_v8 = vld [vmem:[%s1246_s23] sm:$0xff]  ;;  %v1254_v9 = vld [vmem:[%s1246_s23 + $0x8] sm:$0xff]  ;;  %6563 = vmatprep.subr.bf16.mxu0 %v1272_v6  ;;  %v1255_v12 = vld [vmem:[%s1246_s23 + $0x10] sm:$0xff]  ;;  %s9416_s11 = sld [smem:[#allocation5_spill]] }
  0x68   : > { %v1267_v10 = vpack.c.bf16 %v1254_v9, %v1253_v8  ;;  %v1256_v13 = vld [vmem:[%s1246_s23 + $0x18] sm:$0xff]  ;;  %v1257_v14 = vld [vmem:[%s1246_s23 + $0x20] sm:$0xff]  ;;  %v1258_v15 = vld [vmem:[%s1246_s23 + $0x28] sm:$0xff]  ;;  %s9417_s0 = sld [smem:[#allocation7_spill]] }
  0x69   : > { %v1268_v16 = vpack.c.bf16 %v1256_v13, %v1255_v12  ;;  %v1269_v17 = vpack.c.bf16 %v1258_v15, %v1257_v14  ;;  %v1259_v18 = vld [vmem:[%s1246_s23 + $0x30] sm:$0xff]  ;;  %v1260_v19 = vld [vmem:[%s1246_s23 + $0x38] sm:$0xff]  ;;  %s9418_s15 = sld [smem:[#allocation6_spill]] }
  0x6a   : > { %6567 = vmatprep.mubr.msk.bf16.mxu0 %vm1281_vm0, %v1267_v10  ;;  %6564 = vmatpush3.bf16.msra.mxu0 %v1272_v6  ;;  %v1270_v20 = vpack.c.bf16 %v1260_v19, %v1259_v18  ;;  %s9419_s16 = sld [smem:[#allocation9_spill]] }
  0x6b   : > { %6565 = vmatprep.subr.bf16.mxu0 %v1271_v11  ;;  %s9420_s18 = sld [smem:[#allocation8_spill]] }
  0x6c   : > { %s9422_s22 = sld [smem:[#allocation10_spill]] }
  0x6d   : > { %s9423_s23 = sld [smem:[#allocation11_spill]] }
  0x6e   : > { %6566 = vmatpush3.bf16.msra.mxu0 %v1271_v11 }
  0x71   : > { %6568 = vmatmul.mubr.msk.bf16.vlgmr.msra.gmra.mxu0 %vm1281_vm0, %v1268_v16 }
  0x72   : > { %6571 = vmatprep.mubr.msk.bf16.mxu0 %vm1281_vm0, %v1269_v17 }
  0x79   : > { %6572 = vmatmul.mubr.msk.bf16.gmra.mxu0 %vm1281_vm0, %v1270_v20  ;;  %vm5014_vm0 = vcmask 1041408  }
 0x131   : > { %v6569_v22 = vpop.f32.mrf.mxu0 }
 0x132   : > { %v1337_v23 = vadd.f32 %v6569_v22, %v6144_v21 }
 0x133   : > { %v1328_v24 = vpop.f32.mrf.mxu0 }
 0x134   : > { %v1329_v25 = vadd.f32 %v6144_v21, %v1328_v24  ;;  %v1368_v26 = vsel %vm1361_vm1, %v1337_v23, 0.0 }
 0x135   : > { %1369 = vadd.xlane.f32.xlu1 %v1368_v26  ;;  %v6570_v27 = vpop.f32.mrf.mxu0 }
 0x136   : > { %v1340_v28 = vadd.f32 %v6570_v27, %v6144_v21  ;;  %v1362_v29 = vsel %vm1361_vm1, %v1329_v25, 0.0 }
 0x137   : > { %v1331_v30 = vpop.f32.mrf.mxu0  ;;  %1363 = vadd.xlane.f32.xlu0 %v1362_v29 }
 0x138   : > { %v1332_v31 = vadd.f32 %v6144_v21, %v1331_v30  ;;  %v1371_v32 = vsel %vm1361_vm1, %v1340_v28, 0.0 }
 0x139   : > { %1372 = vadd.xlane.f32.xlu1 %v1371_v32  ;;  %v6573_v33 = vpop.f32.mrf.mxu0 }
 0x13a   : > { %v1365_v34 = vsel %vm1361_vm1, %v1332_v31, 0.0  ;;  %v1353_v38 = vadd.f32 %v6573_v33, %v6144_v21 }
 0x13b   : > { %v1344_v35 = vpop.f32.mrf.mxu0  ;;  %1366 = vadd.xlane.f32.xlu0 %v1365_v34 }
 0x13c   : > { %v1345_v36 = vadd.f32 %v6144_v21, %v1344_v35  ;;  %v1380_v44 = vsel %vm1361_vm1, %v1353_v38, 0.0 }
 0x13d   : > { %v6574_v37 = vpop.f32.mrf.mxu0 }
 0x13e   : > { %v1374_v39 = vsel %vm1361_vm1, %v1345_v36, 0.0  ;;  %v1356_v42 = vadd.f32 %v6574_v37, %v6144_v21 }
 0x13f   : > { %v1347_v40 = vpop.f32.mrf.mxu0  ;;  %1375 = vadd.xlane.f32.xlu0 %v1374_v39 }
 0x140   : > { %v1348_v41 = vadd.f32 %v6144_v21, %v1347_v40  ;;  %v1383_v45 = vsel %vm1361_vm1, %v1356_v42, 0.0 }
 0x142   : > { %v1377_v43 = vsel %vm1361_vm1, %v1348_v41, 0.0 }
 0x143   : > { %1378 = vadd.xlane.f32.xlu1 %v1377_v43  ;;  %1381 = vadd.xlane.f32.xlu0 %v1380_v44 }
 0x147   : > { %1384 = vadd.xlane.f32.xlu1 %v1383_v45 }
 0x1be   : > { %v1370_v46 = vpop.xlane.xlu1 %1369 }
 0x1bf   : > { %v1389_v47 = vmul.f32 0.03125, %v1370_v46  ;;  %v6149_v46 = vld [vmem:[%s7551_s17] ss:$0 sm:$0xff] }
 0x1c0   : > { %v1364_v48 = vpop.xlane.xlu0 %1363 }
 0x1c1   : > { %v1387_v49 = vmul.f32 0.03125, %v1364_v48  ;;  %v7786_v51 = vsub.f32 %v1337_v23, %v1389_v47 }
 0x1c2   : > { %v1373_v50 = vpop.xlane.xlu1 %1372 }
 0x1c3   : > { %v7788_v52 = vsub.f32 %v1329_v25, %v1387_v49  ;;  %v1390_v53 = vmul.f32 0.03125, %v1373_v50  ;;  %v1405_v60 = vmul.f32 %v7786_v51, %v7786_v51  ;;  %v6150_v49 = vld [vmem:[%s7556_s21] ss:$0 sm:$0xff] }
 0x1c4   : > { %v1367_v54 = vpop.xlane.xlu0 %1366 }
 0x1c5   : > { %v1388_v55 = vmul.f32 0.03125, %v1367_v54  ;;  %v1403_v56 = vmul.f32 %v7788_v52, %v7788_v52  ;;  %v7792_v57 = vsub.f32 %v1340_v28, %v1390_v53  ;;  %v1417_v1 = vsel %vm1361_vm1, %v1405_v60, 0.0 }
 0x1c7   : > { %v7794_v58 = vsub.f32 %v1332_v31, %v1388_v55  ;;  %v1411_v59 = vsel %vm1361_vm1, %v1403_v56, 0.0  ;;  %v1406_v3 = vmul.f32 %v7792_v57, %v7792_v57 }
 0x1c8   : > { %1412 = vadd.xlane.f32.xlu0 %v1411_v59  ;;  %v1376_v61 = vpop.xlane.xlu0 %1375 }
 0x1c9   : > { %v1391_v62 = vmul.f32 0.03125, %v1376_v61  ;;  %v1404_v63 = vmul.f32 %v7794_v58, %v7794_v58  ;;  %v1420_v11 = vsel %vm1361_vm1, %v1406_v3, 0.0 }
 0x1cb   : > { %v7801_v0 = vsub.f32 %v1345_v36, %v1391_v62  ;;  %v1414_v2 = vsel %vm1361_vm1, %v1404_v63, 0.0 }
 0x1cc   : > { %v1379_v4 = vpop.xlane.xlu1 %1378  ;;  %1418 = vadd.xlane.f32.xlu0 %v1417_v1  ;;  %1415 = vadd.xlane.f32.xlu1 %v1414_v2  ;;  %v1382_v5 = vpop.xlane.xlu0 %1381 }
 0x1cd   : > { %v1392_v6 = vmul.f32 0.03125, %v1379_v4  ;;  %v1393_v7 = vmul.f32 0.03125, %v1382_v5  ;;  %v1407_v8 = vmul.f32 %v7801_v0, %v7801_v0 }
 0x1cf   : > { %v7809_v9 = vsub.f32 %v1348_v41, %v1392_v6  ;;  %v7811_v10 = vsub.f32 %v1353_v38, %v1393_v7  ;;  %v1423_v12 = vsel %vm1361_vm1, %v1407_v8, 0.0 }
 0x1d0   : > { %v1385_v13 = vpop.xlane.xlu1 %1384  ;;  %1421 = vadd.xlane.f32.xlu1 %v1420_v11  ;;  %1424 = vadd.xlane.f32.xlu0 %v1423_v12 }
 0x1d1   : > { %v1394_v14 = vmul.f32 0.03125, %v1385_v13  ;;  %v1408_v15 = vmul.f32 %v7809_v9, %v7809_v9  ;;  %v1409_v16 = vmul.f32 %v7811_v10, %v7811_v10 }
 0x1d3   : > { %v7819_v17 = vsub.f32 %v1356_v42, %v1394_v14  ;;  %v1426_v18 = vsel %vm1361_vm1, %v1408_v15, 0.0  ;;  %v1429_v19 = vsel %vm1361_vm1, %v1409_v16, 0.0 }
 0x1d4   : > { %1427 = vadd.xlane.f32.xlu1 %v1426_v18  ;;  %1430 = vadd.xlane.f32.xlu0 %v1429_v19 }
 0x1d5   : > { %v1410_v20 = vmul.f32 %v7819_v17, %v7819_v17 }
 0x1d7   : > { %v1432_v21 = vsel %vm1361_vm1, %v1410_v20, 0.0 }
 0x1d8   : > { %1433 = vadd.xlane.f32.xlu1 %v1432_v21 }
 0x251   : > { %v1413_v22 = vpop.xlane.xlu0 %1412 }
 0x252   : > { %v1435_v23 = vmul.f32 0.03125, %v1413_v22 }
 0x254   : > { %v1443_v24 = vadd.f32 1e-05, %v1435_v23 }
 0x255   : > { %v1416_v25 = vpop.xlane.xlu1 %1415  ;;  %v1419_v26 = vpop.xlane.xlu0 %1418 }
 0x256   : > { %7167 = vrsqrt.f32 %v1443_v24  ;;  %v1436_v27 = vmul.f32 0.03125, %v1416_v25  ;;  %v1437_v28 = vmul.f32 0.03125, %v1419_v26 }
 0x258   : > { %v1444_v29 = vadd.f32 1e-05, %v1436_v27  ;;  %v1445_v30 = vadd.f32 1e-05, %v1437_v28 }
 0x259   : > { %v1422_v31 = vpop.xlane.xlu1 %1421  ;;  %v1425_v32 = vpop.xlane.xlu0 %1424 }
 0x25a   : > { %7169 = vrsqrt.f32 %v1444_v29  ;;  %v1438_v33 = vmul.f32 0.03125, %v1422_v31  ;;  %v1439_v34 = vmul.f32 0.03125, %v1425_v32 }
 0x25b   : > { %7171 = vrsqrt.f32 %v1445_v30 }
 0x25c   : > { %v1446_v35 = vadd.f32 1e-05, %v1438_v33  ;;  %v1447_v36 = vadd.f32 1e-05, %v1439_v34 }
 0x25d   : > { %v1428_v37 = vpop.xlane.xlu1 %1427  ;;  %v1431_v38 = vpop.xlane.xlu0 %1430 }
 0x25e   : > { %7173 = vrsqrt.f32 %v1446_v35  ;;  %v1440_v39 = vmul.f32 0.03125, %v1428_v37  ;;  %v1441_v40 = vmul.f32 0.03125, %v1431_v38 }
 0x25f   : > { %7175 = vrsqrt.f32 %v1447_v36 }
 0x260   : > { %v1448_v41 = vadd.f32 1e-05, %v1440_v39  ;;  %v1449_v42 = vadd.f32 1e-05, %v1441_v40 }
 0x261   : > { %v1434_v43 = vpop.xlane.xlu1 %1433 }
 0x262   : > { %7177 = vrsqrt.f32 %v1448_v41  ;;  %v1442_v44 = vmul.f32 0.03125, %v1434_v43 }
 0x263   : > { %v7168_v45 = vpop.eup %7167  ;;  %7179 = vrsqrt.f32 %v1449_v42 }
 0x264   : > { %v1450_v47 = vadd.f32 1e-05, %v1442_v44  ;;  %v1459_v48 = vmul.f32 %v7168_v45, %v7788_v52 }
 0x266   : > { %7181 = vrsqrt.f32 %v1450_v47  ;;  %v1473_v50 = vmul.f32 %v6149_v46, %v1459_v48 }
 0x267   : > { %v7170_v53 = vpop.eup %7169 }
 0x268   : > { %v7172_v54 = vpop.eup %7171  ;;  %v7829_v55 = vadd.f32 %v6150_v49, %v1473_v50  ;;  %v1460_v56 = vmul.f32 %v7170_v53, %v7794_v58 }
 0x269   : > { %v1461_v59 = vmul.f32 %v7172_v54, %v7786_v51 }
 0x26a   : > { %v1497_v60 = vsel %vm1361_vm1, %v7829_v55, 0.0  ;;  %v1474_v61 = vmul.f32 %v6149_v46, %v1460_v56 }
 0x26b   : > { %v7174_v62 = vpop.eup %7173  ;;  %1498 = vadd.xlane.f32.xlu0 %v1497_v60  ;;  %v1475_v63 = vmul.f32 %v6149_v46, %v1461_v59 }
 0x26c   : > { %v7176_v1 = vpop.eup %7175  ;;  %v7835_v52 = vadd.f32 %v6150_v49, %v1474_v61  ;;  %v1462_v2 = vmul.f32 %v7174_v62, %v7792_v57 }
 0x26d   : > { %v7838_v3 = vadd.f32 %v6150_v49, %v1475_v63  ;;  %v1463_v4 = vmul.f32 %v7176_v1, %v7801_v0 }
 0x26e   : > { %v1500_v58 = vsel %vm1361_vm1, %v7835_v52, 0.0  ;;  %v1476_v51 = vmul.f32 %v6149_v46, %v1462_v2 }
 0x26f   : > { %v7178_v5 = vpop.eup %7177  ;;  %1501 = vadd.xlane.f32.xlu1 %v1500_v58  ;;  %v1503_v6 = vsel %vm1361_vm1, %v7838_v3, 0.0  ;;  %v1477_v7 = vmul.f32 %v6149_v46, %v1463_v4 }
 0x270   : > { %v7180_v8 = vpop.eup %7179  ;;  %1504 = vadd.xlane.f32.xlu0 %v1503_v6  ;;  %v7845_v11 = vadd.f32 %v6150_v49, %v1476_v51  ;;  %v1464_v57 = vmul.f32 %v7178_v5, %v7809_v9  ;;  %v1631_v5 = vld [vmem:[%s7571_s3 + $0x10] sm:$0xff]  ;;  %v1632_v6 = vld [vmem:[%s7571_s3 + $0x18] sm:$0xff] }
 0x271   : > { %v7848_v12 = vadd.f32 %v6150_v49, %v1477_v7  ;;  %v1465_v0 = vmul.f32 %v7180_v8, %v7811_v10  ;;  %v1629_v7 = vld [vmem:[%s7571_s3] sm:$0xff]  ;;  %v1638_v8 = vpack.c.bf16 %v1632_v6, %v1631_v5 }
 0x272   : > { %v1506_v13 = vsel %vm1361_vm1, %v7845_v11, 0.0  ;;  %v1478_v14 = vmul.f32 %v6149_v46, %v1464_v57  ;;  %v1630_v57 = vld [vmem:[%s7571_s3 + $0x8] sm:$0xff] }
 0x273   : > { %v7182_v15 = vpop.eup %7181  ;;  %1507 = vadd.xlane.f32.xlu1 %v1506_v13  ;;  %v1509_v16 = vsel %vm1361_vm1, %v7848_v12, 0.0  ;;  %v1479_v18 = vmul.f32 %v6149_v46, %v1465_v0  ;;  %v1637_v0 = vpack.c.bf16 %v1630_v57, %v1629_v7  ;;  %6575 = vmatprep.subr.bf16.mxu1 %v1638_v8 }
 0x274   : > { %1510 = vadd.xlane.f32.xlu0 %v1509_v16  ;;  %v7855_v19 = vadd.f32 %v6150_v49, %v1478_v14  ;;  %v1466_v20 = vmul.f32 %v7182_v15, %v7819_v17  ;;  %6576 = vmatpush3.bf16.msra.mxu1 %v1638_v8 }
 0x275   : > { %v7858_v9 = vadd.f32 %v6150_v49, %v1479_v18  ;;  %6577 = vmatprep.subr.bf16.mxu1 %v1637_v0 }
 0x276   : > { %v1512_v10 = vsel %vm1361_vm1, %v7855_v19, 0.0  ;;  %v1480_v21 = vmul.f32 %v6149_v46, %v1466_v20 }
 0x277   : > { %1513 = vadd.xlane.f32.xlu1 %v1512_v10  ;;  %v1515_v22 = vsel %vm1361_vm1, %v7858_v9, 0.0 }
 0x278   : > { %1516 = vadd.xlane.f32.xlu0 %v1515_v22  ;;  %v7864_v23 = vadd.f32 %v6150_v49, %v1480_v21  ;;  %6578 = vmatpush3.bf16.msra.mxu1 %v1637_v0 }
 0x27a   : > { %v1518_v24 = vsel %vm1361_vm1, %v7864_v23, 0.0 }
 0x27b   : > { %1519 = vadd.xlane.f32.xlu1 %v1518_v24 }
 0x2f4   : > { %v1499_v25 = vpop.xlane.xlu0 %1498 }
 0x2f5   : > { %v1521_v26 = vmul.f32 0.03125, %v1499_v25 }
 0x2f7   : > { %v7869_v17 = vsub.f32 %v7829_v55, %v1521_v26 }
 0x2f8   : > { %v1502_v27 = vpop.xlane.xlu1 %1501 }
 0x2f9   : > { %v1522_v28 = vmul.f32 0.03125, %v1502_v27  ;;  %v1505_v29 = vpop.xlane.xlu0 %1504  ;;  %v1537_v30 = vmul.f32 %v7869_v17, %v7869_v17 }
 0x2fa   : > { %v1523_v31 = vmul.f32 0.03125, %v1505_v29 }
 0x2fb   : > { %v7874_v32 = vsub.f32 %v7835_v52, %v1522_v28  ;;  %v1545_v33 = vsel %vm1361_vm1, %v1537_v30, 0.0 }
 0x2fc   : > { %v7878_v34 = vsub.f32 %v7838_v3, %v1523_v31  ;;  %v1508_v35 = vpop.xlane.xlu1 %1507  ;;  %1546 = vadd.xlane.f32.xlu0 %v1545_v33 }
 0x2fd   : > { %v1524_v36 = vmul.f32 0.03125, %v1508_v35  ;;  %v1511_v37 = vpop.xlane.xlu0 %1510  ;;  %v1538_v38 = vmul.f32 %v7874_v32, %v7874_v32 }
 0x2fe   : > { %v1525_v39 = vmul.f32 0.03125, %v1511_v37  ;;  %v1539_v40 = vmul.f32 %v7878_v34, %v7878_v34 }
 0x2ff   : > { %v7885_v41 = vsub.f32 %v7845_v11, %v1524_v36  ;;  %v1548_v42 = vsel %vm1361_vm1, %v1538_v38, 0.0 }
 0x300   : > { %v7889_v43 = vsub.f32 %v7848_v12, %v1525_v39  ;;  %1549 = vadd.xlane.f32.xlu1 %v1548_v42  ;;  %v1514_v44 = vpop.xlane.xlu1 %1513  ;;  %v1551_v45 = vsel %vm1361_vm1, %v1539_v40, 0.0 }
 0x301   : > { %v1526_v46 = vmul.f32 0.03125, %v1514_v44  ;;  %1552 = vadd.xlane.f32.xlu0 %v1551_v45  ;;  %v1517_v47 = vpop.xlane.xlu0 %1516  ;;  %v1540_v48 = vmul.f32 %v7885_v41, %v7885_v41  ;;  %v6151_v45 = vld [vmem:[%s7561_s25] ss:$0 sm:$0xff] }
 0x302   : > { %v1527_v49 = vmul.f32 0.03125, %v1517_v47  ;;  %v1541_v50 = vmul.f32 %v7889_v43, %v7889_v43 }
 0x303   : > { %v7897_v53 = vsub.f32 %v7855_v19, %v1526_v46  ;;  %v1554_v54 = vsel %vm1361_vm1, %v1540_v48, 0.0 }
 0x304   : > { %v7901_v56 = vsub.f32 %v7858_v9, %v1527_v49  ;;  %1555 = vadd.xlane.f32.xlu1 %v1554_v54  ;;  %v1520_v59 = vpop.xlane.xlu1 %1519  ;;  %v1557_v60 = vsel %vm1361_vm1, %v1541_v50, 0.0  ;;  %v6152_v50 = vld [vmem:[%s7566_s29] ss:$0 sm:$0xff] }
 0x305   : > { %v1528_v61 = vmul.f32 0.03125, %v1520_v59  ;;  %1558 = vadd.xlane.f32.xlu0 %v1557_v60  ;;  %v1542_v62 = vmul.f32 %v7897_v53, %v7897_v53 }
 0x306   : > { %v1543_v63 = vmul.f32 %v7901_v56, %v7901_v56 }
 0x307   : > { %v7909_v1 = vsub.f32 %v7864_v23, %v1528_v61  ;;  %v1560_v2 = vsel %vm1361_vm1, %v1542_v62, 0.0 }
 0x308   : > { %1561 = vadd.xlane.f32.xlu1 %v1560_v2  ;;  %v1563_v4 = vsel %vm1361_vm1, %v1543_v63, 0.0 }
 0x309   : > { %1564 = vadd.xlane.f32.xlu0 %v1563_v4  ;;  %v1544_v58 = vmul.f32 %v7909_v1, %v7909_v1 }
 0x30b   : > { %v1566_v51 = vsel %vm1361_vm1, %v1544_v58, 0.0 }
 0x30c   : > { %1567 = vadd.xlane.f32.xlu1 %v1566_v51 }
 0x385   : > { %v1547_v13 = vpop.xlane.xlu0 %1546 }
 0x386   : > { %v1569_v14 = vmul.f32 0.03125, %v1547_v13 }
 0x388   : > { %v1577_v15 = vadd.f32 1e-06, %v1569_v14 }
 0x389   : > { %v1550_v16 = vpop.xlane.xlu1 %1549 }
 0x38a   : > { %7183 = vrsqrt.f32 %v1577_v15  ;;  %v1570_v18 = vmul.f32 0.03125, %v1550_v16  ;;  %v1553_v20 = vpop.xlane.xlu0 %1552 }
 0x38b   : > { %v1571_v10 = vmul.f32 0.03125, %v1553_v20 }
 0x38c   : > { %v1578_v21 = vadd.f32 1e-06, %v1570_v18 }
 0x38d   : > { %v1579_v22 = vadd.f32 1e-06, %v1571_v10  ;;  %v1556_v24 = vpop.xlane.xlu1 %1555 }
 0x38e   : > { %7185 = vrsqrt.f32 %v1578_v21  ;;  %v1572_v25 = vmul.f32 0.03125, %v1556_v24  ;;  %v1559_v26 = vpop.xlane.xlu0 %1558 }
 0x38f   : > { %7187 = vrsqrt.f32 %v1579_v22  ;;  %v1573_v27 = vmul.f32 0.03125, %v1559_v26  ;;  %v6153_v22 = vld [vmem:[%s7576_s8] ss:$0 sm:$0xff] }
 0x390   : > { %v1580_v28 = vadd.f32 1e-06, %v1572_v25 }
 0x391   : > { %v1581_v29 = vadd.f32 1e-06, %v1573_v27  ;;  %v1562_v30 = vpop.xlane.xlu1 %1561 }
 0x392   : > { %7189 = vrsqrt.f32 %v1580_v28  ;;  %v1574_v31 = vmul.f32 0.03125, %v1562_v30  ;;  %v1565_v33 = vpop.xlane.xlu0 %1564 }
 0x393   : > { %7191 = vrsqrt.f32 %v1581_v29  ;;  %v1575_v35 = vmul.f32 0.03125, %v1565_v33 }
 0x394   : > { %v1582_v36 = vadd.f32 1e-06, %v1574_v31 }
 0x395   : > { %v1583_v37 = vadd.f32 1e-06, %v1575_v35  ;;  %v1568_v38 = vpop.xlane.xlu1 %1567 }
 0x396   : > { %7193 = vrsqrt.f32 %v1582_v36  ;;  %v1576_v39 = vmul.f32 0.03125, %v1568_v38 }
 0x397   : > { %v7184_v40 = vpop.eup %7183  ;;  %7195 = vrsqrt.f32 %v1583_v37 }
 0x398   : > { %v1584_v42 = vadd.f32 1e-06, %v1576_v39  ;;  %v1593_v44 = vmul.f32 %v7184_v40, %v7869_v17 }
 0x39a   : > { %7197 = vrsqrt.f32 %v1584_v42  ;;  %v1607_v49 = vmul.f32 %v6151_v45, %v1593_v44 }
 0x39b   : > { %v7186_v46 = vpop.eup %7185 }
 0x39c   : > { %v7188_v47 = vpop.eup %7187  ;;  %v1594_v48 = vmul.f32 %v7186_v46, %v7874_v32  ;;  %v1621_v62 = vadd.f32 %v6152_v50, %v1607_v49 }
 0x39d   : > { %v1595_v54 = vmul.f32 %v7188_v47, %v7878_v34 }
 0x39e   : > { %v1608_v59 = vmul.f32 %v6151_v45, %v1594_v48 }
 0x39f   : > { %v7190_v60 = vpop.eup %7189  ;;  %v1609_v4 = vmul.f32 %v6151_v45, %v1595_v54 }
 0x3a0   : > { %v7192_v61 = vpop.eup %7191  ;;  %v1622_v63 = vadd.f32 %v6152_v50, %v1608_v59  ;;  %v1596_v2 = vmul.f32 %v7190_v60, %v7885_v41 }
 0x3a1   : > { %v1597_v17 = vmul.f32 %v7192_v61, %v7889_v43  ;;  %v1623_v32 = vadd.f32 %v6152_v50, %v1609_v4 }
 0x3a2   : > { %v1633_v58 = vpack.c.bf16 %v1622_v63, %v1621_v62  ;;  %v1610_v51 = vmul.f32 %v6151_v45, %v1596_v2 }
 0x3a3   : > { %v7194_v5 = vpop.eup %7193  ;;  %v1611_v8 = vmul.f32 %v6151_v45, %v1597_v17 }
 0x3a4   : > { %v7196_v6 = vpop.eup %7195  ;;  %6579 = vmatprep.mubr.msk.bf16.mxu1 %vm1361_vm1, %v1633_v58  ;;  %v1624_v7 = vadd.f32 %v6152_v50, %v1610_v51  ;;  %v1598_v34 = vmul.f32 %v7194_v5, %v7897_v53 }
 0x3a5   : > { %v1599_v57 = vmul.f32 %v7196_v6, %v7901_v56  ;;  %v1625_v43 = vadd.f32 %v6152_v50, %v1611_v8 }
 0x3a6   : > { %v1634_v0 = vpack.c.bf16 %v1624_v7, %v1623_v32  ;;  %v1612_v13 = vmul.f32 %v6151_v45, %v1598_v34 }
 0x3a7   : > { %v7198_v41 = vpop.eup %7197  ;;  %v1613_v16 = vmul.f32 %v6151_v45, %v1599_v57 }
 0x3a8   : > { %6580 = vmatmul.mubr.msk.bf16.vlgmr.msra.gmra.mxu1 %vm1361_vm1, %v1634_v0  ;;  %v1626_v14 = vadd.f32 %v6152_v50, %v1612_v13  ;;  %v1600_v15 = vmul.f32 %v7198_v41, %v7909_v1 }
 0x3a9   : > { %v1627_v10 = vadd.f32 %v6152_v50, %v1613_v16 }
 0x3aa   : > { %v1635_v18 = vpack.c.bf16 %v1626_v14, %v1625_v43  ;;  %v1614_v20 = vmul.f32 %v6151_v45, %v1600_v15 }
 0x3ac   : > { %6583 = vmatprep.mubr.msk.bf16.mxu1 %vm1361_vm1, %v1635_v18  ;;  %v1628_v53 = vadd.f32 %v6152_v50, %v1614_v20 }
 0x3ae   : > { %v1636_v21 = vpack.c.bf16 %v1628_v53, %v1627_v10 }
 0x3b0   : > { %6584 = vmatmul.mubr.msk.bf16.gmra.mxu1 %vm1361_vm1, %v1636_v21 }
 0x468   : > { %v6581_v56 = vpop.f32.mrf.mxu1 }
 0x469   : > { %v1701_v26 = vadd.f32 %v6581_v56, %v6153_v22 }
 0x46a   : > { %v1692_v24 = vpop.f32.mrf.mxu1 }
 0x46b   : > { %v1693_v29 = vadd.f32 %v6153_v22, %v1692_v24 }
 0x46c   : > { %v6582_v25 = vpop.f32.mrf.mxu1 }
 0x46d   : > { %v1704_v27 = vadd.f32 %v6582_v25, %v6153_v22  ;;  %v1763_v25 = vld [vmem:[%s7621_s4] sm:$0xff] }
 0x46e   : > { %v1695_v28 = vpop.f32.mrf.mxu1 }
 0x46f   : > { %v7935_v30 = vpack.c.bf16 %v1704_v27, %v1701_v26  ;;  %v1696_v1 = vadd.f32 %v6153_v22, %v1695_v28  ;;  %v7008_v48 = vpack.i.bf16 %v1704_v27, %v1701_v26 }
 0x470   : > { %v6585_v31 = vpop.f32.mrf.mxu1 }
 0x471   : > { %v7937_v33 = vpack.c.bf16 %v1696_v1, %v1693_v29  ;;  %v1717_v37 = vadd.f32 %v6585_v31, %v6153_v22  ;;  %v7013_v49 = vpack.i.bf16 %v1696_v1, %v1693_v29  ;;  %v1766_v1 = vld [vmem:[%s7621_s4 + $0x18] sm:$0xff] }
 0x472   : > { %v1708_v35 = vpop.f32.mrf.mxu1 }
 0x473   : > { %6595 = vmatprep.mubr.msk.bf16.mxu1 %vm1783_vm2, %v7937_v33  ;;  %v1709_v40 = vadd.f32 %v6153_v22, %v1708_v35  ;;  %v1764_v35 = vld [vmem:[%s7621_s4 + $0x8] sm:$0xff] }
 0x474   : > { %v6586_v36 = vpop.f32.mrf.mxu1 }
 0x475   : > { %v1720_v38 = vadd.f32 %v6586_v36, %v6153_v22 }
 0x476   : > { %v1711_v39 = vpop.f32.mrf.mxu1 }
 0x477   : > { %v6998_v42 = vpack.i.bf16 %v1720_v38, %v1717_v37  ;;  %v7941_v44 = vpack.c.bf16 %v1720_v38, %v1717_v37  ;;  %v1712_v45 = vadd.f32 %v6153_v22, %v1711_v39  ;;  %v1765_v22 = vld [vmem:[%s7621_s4 + $0x10] sm:$0xff] }
 0x479   : > { %v7003_v46 = vpack.i.bf16 %v1712_v45, %v1709_v40  ;;  %v7943_v47 = vpack.c.bf16 %v1712_v45, %v1709_v40  ;;  %6999 = vrot.lane.b32.xlu0 %v6998_v42, %s7521_s26  ;;  %v1767_v42 = vld [vmem:[%s7621_s4 + $0x20] sm:$0xff] }
 0x47b   : > { %7004 = vrot.lane.b32.xlu1 %v7003_v46, %s7521_s26 }
 0x47f   : > { %7009 = vrot.lane.b32.xlu1 %v7008_v48, %s7521_s26 }
 0x483   : > { %7014 = vrot.lane.b32.xlu1 %v7013_v49, %s7521_s26 }
 0x4eb   : > { %v7000_v50 = vpop.permute.xlu0 %6999 }
 0x4ec   : > { %v7002_v54 = vunpack.i.h.bf16 %v7000_v50  ;;  %v7001_v59 = vunpack.i.l.bf16 %v7000_v50 }
 0x4ed   : > { %v7005_v60 = vpop.permute.xlu1 %7004 }
 0x4ee   : > { %v7007_v61 = vunpack.i.h.bf16 %v7005_v60  ;;  %v7006_v62 = vunpack.i.l.bf16 %v7005_v60  ;;  %v7949_v63 = vpack.c.bf16 %v7002_v54, %v7001_v59  ;;  %v1769_v54 = vld [vmem:[%s7621_s4 + $0x30] sm:$0xff] }
 0x4f0   : > { %1883 = vrot.lane.b32.xlu0 %v7949_v63, %s9387_s28  ;;  %v7953_v2 = vpack.c.bf16 %v7007_v61, %v7006_v62 }
 0x4f1   : > { %v7010_v4 = vpop.permute.xlu1 %7009 }
 0x4f2   : > { %v7012_v17 = vunpack.i.h.bf16 %v7010_v4  ;;  %v7011_v58 = vunpack.i.l.bf16 %v7010_v4  ;;  %1881 = vrot.lane.b32.xlu1 %v7953_v2, %s9387_s28 }
 0x4f4   : > { %v7957_v51 = vpack.c.bf16 %v7012_v17, %v7011_v58 }
 0x4f5   : > { %v7015_v5 = vpop.permute.xlu1 %7014 }
 0x4f6   : > { %v7017_v6 = vunpack.i.h.bf16 %v7015_v5  ;;  %v7016_v32 = vunpack.i.l.bf16 %v7015_v5  ;;  %1879 = vrot.lane.b32.xlu0 %v7957_v51, %s9387_s28 }
 0x4f8   : > { %v7961_v7 = vpack.c.bf16 %v7017_v6, %v7016_v32 }
 0x4fa   : > { %6611 = vmatprep.mubr.msk.bf16.mxu0 %vm1783_vm2, %v7961_v7  ;;  %1781 = vrot.lane.b32.xlu0 %v7941_v44, %s9387_s28 }
 0x4fb   : > { %1877 = vrot.lane.b32.xlu1 %v7961_v7, %s9387_s28 }
 0x4fe   : > { %1777 = vrot.lane.b32.xlu0 %v7935_v30, %s9387_s28 }
 0x4ff   : > { %1779 = vrot.lane.b32.xlu1 %v7943_v47, %s9387_s28 }
 0x503   : > { %1775 = vrot.lane.b32.xlu1 %v7937_v33, %s9387_s28 }
 0x562   : > { %v1884_v34 = vpop.permute.xlu0 %1883 }
 0x563   : > { %6923 = vmatprep.subr.msk.bf16.mxu0 %vm1783_vm2, %v1884_v34  ;;  %v1907_v8 = vsel %vm1783_vm2, %v1884_v34, 0 }
 0x564   : > { %6604 = vmatpush3.bf16.xpose.msra.mxu0 %v1907_v8  ;;  %v1882_v57 = vpop.permute.xlu1 %1881 }
 0x565   : > { %6924 = vmatprep.subr.msk.bf16.mxu0 %vm1783_vm2, %v1882_v57  ;;  %v1904_v13 = vsel %vm1783_vm2, %v1882_v57, 0 }
 0x568   : > { %v1880_v0 = vpop.permute.xlu0 %1879 }
 0x569   : > { %v1901_v16 = vsel %vm1783_vm2, %v1880_v0, 0 }
 0x56c   : > { %v1782_v41 = vpop.permute.xlu0 %1781  ;;  %6606 = vmatpush3.bf16.xpose.msra.mxu0 %v1904_v13 }
 0x56d   : > { %v1878_v43 = vpop.permute.xlu1 %1877  ;;  %6919 = vmatprep.subr.msk.bf16.mxu1 %vm1783_vm2, %v1782_v41  ;;  %6925 = vmatprep.subr.msk.bf16.mxu0 %vm1783_vm2, %v1880_v0  ;;  %v1806_v14 = vsel %vm1783_vm2, %v1782_v41, 0 }
 0x56e   : > { %6588 = vmatpush3.bf16.xpose.msra.mxu1 %v1806_v14  ;;  %v1898_v10 = vsel %vm1783_vm2, %v1878_v43, 0  ;;  %v1768_v14 = vld [vmem:[%s7621_s4 + $0x28] sm:$0xff] }
 0x570   : > { %v1778_v20 = vpop.permute.xlu0 %1777 }
 0x571   : > { %v1780_v15 = vpop.permute.xlu1 %1779  ;;  %v1800_v53 = vsel %vm1783_vm2, %v1778_v20, 0 }
 0x572   : > { %6920 = vmatprep.subr.msk.bf16.mxu1 %vm1783_vm2, %v1780_v15  ;;  %v1803_v18 = vsel %vm1783_vm2, %v1780_v15, 0 }
 0x574   : > { %6608 = vmatpush3.bf16.xpose.msra.mxu0 %v1901_v16  ;;  %v1770_v16 = vld [vmem:[%s7621_s4 + $0x38] sm:$0xff] }
 0x575   : > { %6926 = vmatprep.subr.msk.bf16.mxu0 %vm1783_vm2, %v1878_v43  ;;  %v1776_v21 = vpop.permute.xlu1 %1775 }
 0x576   : > { %6590 = vmatpush3.bf16.xpose.msra.mxu1 %v1803_v18  ;;  %v1797_v56 = vsel %vm1783_vm2, %v1776_v21, 0 }
 0x577   : > { %6921 = vmatprep.subr.msk.bf16.mxu1 %vm1783_vm2, %v1778_v20 }
 0x57c   : > { %6610 = vmatpush3.bf16.xpose.msra.mxu0 %v1898_v10 }
 0x57e   : > { %6592 = vmatpush3.bf16.xpose.msra.mxu1 %v1800_v53 }
 0x57f   : > { %6922 = vmatprep.subr.msk.bf16.mxu1 %vm1783_vm2, %v1776_v21 }
 0x583   : > { %6612 = vmatmul.mubr.msk.bf16.vlgmr.msra.gmra.mxu0 %vm1783_vm2, %v7957_v51 }
 0x584   : > { %6615 = vmatprep.mubr.msk.bf16.mxu0 %vm1783_vm2, %v7953_v2 }
 0x586   : > { %6594 = vmatpush3.bf16.xpose.msra.mxu1 %v1797_v56 }
 0x58b   : > { %6616 = vmatmul.mubr.msk.bf16.gmra.mxu0 %vm1783_vm2, %v7949_v63 }
 0x58d   : > { %6596 = vmatmul.mubr.msk.bf16.vlgmr.msra.gmra.mxu1 %vm1783_vm2, %v7935_v30 }
 0x58e   : > { %6599 = vmatprep.mubr.msk.bf16.mxu1 %vm1783_vm2, %v7943_v47 }
 0x595   : > { %6600 = vmatmul.mubr.msk.bf16.gmra.mxu1 %vm1783_vm2, %v7941_v44 }
 0x643   : > { %v6613_v24 = vpop.f32.mrf.mxu0 }
 0x644   : > { %v8005_v26 = vadd.f32 %v6613_v24, %v1765_v22 }
 0x645   : > { %v1943_v27 = vpop.f32.mrf.mxu0 }
 0x646   : > { %v8007_v28 = vadd.f32 %v1943_v27, %v1763_v25  ;;  %v2005_v29 = vsel %vm1974_vm3, %v8005_v26, -inf }
 0x647   : > { %2006 = vmax.xlane.f32.xlu0 %v2005_v29  ;;  %v6614_v31 = vpop.f32.mrf.mxu0 }
 0x648   : > { %v8013_v37 = vadd.f32 %v6614_v31, %v1766_v1  ;;  %v1999_v39 = vsel %vm1974_vm3, %v8007_v28, -inf }
 0x649   : > { %v1946_v36 = vpop.f32.mrf.mxu0 }
 0x64a   : > { %v8015_v38 = vadd.f32 %v1946_v36, %v1764_v35  ;;  %v2008_v50 = vsel %vm1974_vm3, %v8013_v37, -inf }
 0x64b   : > { %v6617_v40 = vpop.f32.mrf.mxu0  ;;  %2000 = vmax.xlane.f32.xlu0 %v1999_v39 }
 0x64c   : > { %v2002_v45 = vsel %vm1974_vm3, %v8015_v38, -inf  ;;  %v8027_v61 = vadd.f32 %v6617_v40, %v1769_v54 }
 0x64d   : > { %v1959_v46 = vpop.f32.mrf.mxu0  ;;  %2003 = vmax.xlane.f32.xlu1 %v2002_v45  ;;  %v6597_v48 = vpop.f32.mrf.mxu1 }
 0x64e   : > { %v8022_v49 = vadd.f32 %v1959_v46, %v1767_v42  ;;  %v2017_v32 = vsel %vm1974_vm3, %v8027_v61, -inf  ;;  %v8041_v0 = vadd.f32 %v6597_v48, %v1765_v22 }
 0x64f   : > { %2009 = vmax.xlane.f32.xlu0 %v2008_v50  ;;  %v1842_v59 = vpop.f32.mrf.mxu1  ;;  %v6618_v21 = vpop.f32.mrf.mxu0 }
 0x650   : > { %v2011_v62 = vsel %vm1974_vm3, %v8022_v49, -inf  ;;  %v8033_v5 = vadd.f32 %v1842_v59, %v1763_v25  ;;  %v1981_v53 = vsel %vm1974_vm3, %v8041_v0, -inf  ;;  %v8059_v56 = vadd.f32 %v6618_v21, %v1770_v16 }
 0x651   : > { %v6598_v60 = vpop.f32.mrf.mxu1  ;;  %v1962_v27 = vpop.f32.mrf.mxu0 }
 0x652   : > { %v8035_v6 = vadd.f32 %v6598_v60, %v1766_v1  ;;  %v1975_v41 = vsel %vm1974_vm3, %v8033_v5, -inf  ;;  %v2020_v29 = vsel %vm1974_vm3, %v8059_v56, -inf  ;;  %v8071_v31 = vadd.f32 %v1962_v27, %v1768_v14 }
 0x653   : > { %2012 = vmax.xlane.f32.xlu0 %v2011_v62  ;;  %v1845_v4 = vpop.f32.mrf.mxu1 }
 0x654   : > { %v8031_v17 = vadd.f32 %v1845_v4, %v1764_v35  ;;  %v1984_v13 = vsel %vm1974_vm3, %v8035_v6, -inf  ;;  %v2014_v35 = vsel %vm1974_vm3, %v8071_v31, -inf }
 0x655   : > { %v6601_v58 = vpop.f32.mrf.mxu1 }
 0x656   : > { %v1978_v34 = vsel %vm1974_vm3, %v8031_v17, -inf  ;;  %v8061_v22 = vadd.f32 %v6601_v58, %v1769_v54 }
 0x657   : > { %2018 = vmax.xlane.f32.xlu0 %v2017_v32  ;;  %v1858_v8 = vpop.f32.mrf.mxu1  ;;  %1979 = vmax.xlane.f32.xlu1 %v1978_v34 }
 0x658   : > { %v8051_v18 = vadd.f32 %v1858_v8, %v1767_v42  ;;  %v1993_v1 = vsel %vm1974_vm3, %v8061_v22, -inf }
 0x659   : > { %v6602_v57 = vpop.f32.mrf.mxu1 }
 0x65a   : > { %v8053_v20 = vadd.f32 %v6602_v57, %v1770_v16  ;;  %v1987_v25 = vsel %vm1974_vm3, %v8051_v18, -inf }
 0x65b   : > { %v1861_v43 = vpop.f32.mrf.mxu1  ;;  %1985 = vmax.xlane.f32.xlu1 %v1984_v13  ;;  %1976 = vmax.xlane.f32.xlu0 %v1975_v41 }
 0x65c   : > { %v8048_v15 = vadd.f32 %v1861_v43, %v1768_v14  ;;  %v1996_v24 = vsel %vm1974_vm3, %v8053_v20, -inf }
 0x65e   : > { %v1990_v10 = vsel %vm1974_vm3, %v8048_v15, -inf }
 0x65f   : > { %1991 = vmax.xlane.f32.xlu1 %v1990_v10  ;;  %1982 = vmax.xlane.f32.xlu0 %v1981_v53 }
 0x663   : > { %1997 = vmax.xlane.f32.xlu1 %v1996_v24  ;;  %1988 = vmax.xlane.f32.xlu0 %v1987_v25 }
 0x667   : > { %2021 = vmax.xlane.f32.xlu1 %v2020_v29  ;;  %1994 = vmax.xlane.f32.xlu0 %v1993_v1 }
 0x66b   : > { %2015 = vmax.xlane.f32.xlu1 %v2014_v35 }
 0x6d0   : > { %v2007_v36 = vpop.xlane.xlu0 %2006 }
 0x6d1   : > { %v2033_v39 = vsub.f32 %v8005_v26, %v2007_v36 }
 0x6d3   : > { %v2059_v40 = vmul.f32 1.442695, %v2033_v39 }
 0x6d4   : > { %v2001_v42 = vpop.xlane.xlu0 %2000 }
 0x6d5   : > { %7199 = vpow2.f32 %v2059_v40  ;;  %v2031_v45 = vsub.f32 %v8007_v28, %v2001_v42 }
 0x6d6   : > { %v2004_v46 = vpop.xlane.xlu1 %2003 }
 0x6d7   : > { %v2055_v48 = vmul.f32 1.442695, %v2031_v45  ;;  %v2032_v50 = vsub.f32 %v8015_v38, %v2004_v46 }
 0x6d8   : > { %v2010_v54 = vpop.xlane.xlu0 %2009 }
 0x6d9   : > { %7201 = vpow2.f32 %v2055_v48  ;;  %v2034_v59 = vsub.f32 %v8013_v37, %v2010_v54  ;;  %v2057_v60 = vmul.f32 1.442695, %v2032_v50 }
 0x6db   : > { %v2061_v62 = vmul.f32 1.442695, %v2034_v59 }
 0x6dc   : > { %v2013_v4 = vpop.xlane.xlu0 %2012 }
 0x6dd   : > { %7203 = vpow2.f32 %v2061_v62  ;;  %v2035_v26 = vsub.f32 %v8022_v49, %v2013_v4 }
 0x6de   : > { %7205 = vpow2.f32 %v2057_v60 }
 0x6df   : > { %v2063_v28 = vmul.f32 1.442695, %v2035_v26 }
 0x6e0   : > { %v2019_v58 = vpop.xlane.xlu0 %2018  ;;  %v8099_v14 = vpop.xlane.xlu1 %1979 }
 0x6e1   : > { %v2037_v32 = vsub.f32 %v8027_v61, %v2019_v58 }
 0x6e2   : > { %v8081_v34 = vpop.eup %7199 }
 0x6e3   : > { %v2067_v8 = vmul.f32 1.442695, %v2037_v32  ;;  %v2101_v38 = vsel %vm1974_vm3, %v8081_v34, 0.0 }
 0x6e4   : > { %2102 = vadd.xlane.f32.xlu0 %v2101_v38  ;;  %v1986_v21 = vpop.xlane.xlu1 %1985  ;;  %v1977_v29 = vpop.xlane.xlu0 %1976 }
 0x6e5   : > { %7207 = vpow2.f32 %v2067_v8  ;;  %v2023_v36 = vsub.f32 %v8033_v5, %v1977_v29  ;;  %v2026_v48 = vsub.f32 %v8035_v6, %v1986_v21 }
 0x6e6   : > { %v8085_v37 = vpop.eup %7201  ;;  %7209 = vpow2.f32 %v2063_v28 }
 0x6e7   : > { %v2095_v57 = vsel %vm1974_vm3, %v8085_v37, 0.0  ;;  %v2039_v45 = vmul.f32 1.442695, %v2023_v36  ;;  %v2045_v50 = vmul.f32 1.442695, %v2026_v48 }
 0x6e8   : > { %2096 = vadd.xlane.f32.xlu0 %v2095_v57  ;;  %v1992_v24 = vpop.xlane.xlu1 %1991  ;;  %v1983_v42 = vpop.xlane.xlu0 %1982 }
 0x6ea   : > { %v8089_v49 = vpop.eup %7203 }
 0x6eb   : > { %v2104_v61 = vsel %vm1974_vm3, %v8089_v49, 0.0  ;;  %v8093_v13 = vpop.eup %7205 }
 0x6ec   : > { %2105 = vadd.xlane.f32.xlu1 %v2104_v61  ;;  %v2098_v41 = vsel %vm1974_vm3, %v8093_v13, 0.0  ;;  %v1998_v25 = vpop.xlane.xlu1 %1997  ;;  %v2024_v61 = vsub.f32 %v8031_v17, %v8099_v14 }
 0x6ed   : > { %v2030_v21 = vsub.f32 %v8053_v20, %v1998_v25 }
 0x6f0   : > { %2099 = vadd.xlane.f32.xlu1 %v2098_v41  ;;  %v2022_v27 = vpop.xlane.xlu1 %2021  ;;  %v2041_v41 = vmul.f32 1.442695, %v2024_v61 }
 0x6f1   : > { %v2038_v1 = vsub.f32 %v8059_v56, %v2022_v27  ;;  %v2053_v27 = vmul.f32 1.442695, %v2030_v21 }
 0x6f2   : > { %v8097_v43 = vpop.eup %7207 }
 0x6f3   : > { %v2113_v16 = vsel %vm1974_vm3, %v8097_v43, 0.0  ;;  %v8103_v10 = vpop.eup %7209  ;;  %v2069_v39 = vmul.f32 1.442695, %v2038_v1 }
 0x6f4   : > { %2114 = vadd.xlane.f32.xlu0 %v2113_v16  ;;  %v2107_v53 = vsel %vm1974_vm3, %v8103_v10, 0.0  ;;  %v2016_v35 = vpop.xlane.xlu1 %2015  ;;  %v2028_v16 = vsub.f32 %v8048_v15, %v1992_v24 }
 0x6f5   : > { %v2036_v40 = vsub.f32 %v8071_v31, %v2016_v35  ;;  %7211 = vpow2.f32 %v2069_v39 }
 0x6f6   : > { %7213 = vpow2.f32 %v2039_v45 }
 0x6f7   : > { %v2065_v46 = vmul.f32 1.442695, %v2036_v40 }
 0x6f8   : > { %2108 = vadd.xlane.f32.xlu0 %v2107_v53  ;;  %v2049_v53 = vmul.f32 1.442695, %v2028_v16 }
 0x6f9   : > { %7215 = vpow2.f32 %v2065_v46 }
 0x701   : > { %2252 = vrot.lane.b32.xlu1 %v7953_v2, %s9383_s1  ;;  %v2025_v2 = vsub.f32 %v8041_v0, %v1983_v42 }
 0x702   : > { %v8120_v59 = vpop.eup %7211 }
 0x703   : > { %v8122_v0 = vpop.eup %7213  ;;  %v2116_v6 = vsel %vm1974_vm3, %v8120_v59, 0.0 }
 0x705   : > { %2250 = vrot.lane.b32.xlu1 %v7957_v51, %s9383_s1  ;;  %v1989_v51 = vpop.xlane.xlu0 %1988 }
 0x706   : > { %v2027_v56 = vsub.f32 %v8051_v18, %v1989_v51  ;;  %v8126_v62 = vpop.eup %7215  ;;  %v2071_v18 = vsel %vm1974_vm3, %v8122_v0, 0.0 }
 0x707   : > { %v2110_v4 = vsel %vm1974_vm3, %v8126_v62, 0.0 }
 0x708   : > { %v2047_v54 = vmul.f32 1.442695, %v2027_v56 }
 0x709   : > { %v1995_v5 = vpop.xlane.xlu0 %1994 }
 0x70a   : > { %v2029_v31 = vsub.f32 %v8061_v22, %v1995_v5 }
 0x70c   : > { %v2051_v60 = vmul.f32 1.442695, %v2029_v31 }
 0x70e   : > { %2254 = vrot.lane.b32.xlu0 %v7949_v63, %s9383_s1  ;;  %v2043_v63 = vmul.f32 1.442695, %v2025_v2 }
 0x710   : > { %7217 = vpow2.f32 %v2043_v63 }
 0x711   : > { %7219 = vpow2.f32 %v2045_v50 }
 0x712   : > { %7221 = vpow2.f32 %v2047_v54 }
 0x713   : > { %7223 = vpow2.f32 %v2051_v60 }
 0x714   : > { %7225 = vpow2.f32 %v2041_v41 }
 0x715   : > { %7227 = vpow2.f32 %v2049_v53 }
 0x716   : > { %7229 = vpow2.f32 %v2053_v27 }
 0x71d   : > { %v8132_v22 = vpop.eup %7217 }
 0x71e   : > { %v2077_v26 = vsel %vm1974_vm3, %v8132_v22, 0.0  ;;  %v8136_v58 = vpop.eup %7219 }
 0x71f   : > { %v2080_v32 = vsel %vm1974_vm3, %v8136_v58, 0.0  ;;  %v8140_v28 = vpop.eup %7221 }
 0x720   : > { %v2083_v8 = vsel %vm1974_vm3, %v8140_v28, 0.0  ;;  %v8144_v38 = vpop.eup %7223 }
 0x721   : > { %v2089_v57 = vsel %vm1974_vm3, %v8144_v38, 0.0  ;;  %v8156_v29 = vpop.eup %7225 }
 0x722   : > { %v8160_v1 = vpop.eup %7227 }
 0x723   : > { %v2086_v17 = vsel %vm1974_vm3, %v8160_v1, 0.0  ;;  %v8164_v15 = vpop.eup %7229 }
 0x729   : > { %2117 = vadd.xlane.f32.xlu1 %v2116_v6 }
 0x72d   : > { %2072 = vadd.xlane.f32.xlu0 %v2071_v18  ;;  %2111 = vadd.xlane.f32.xlu1 %v2110_v4 }
 0x731   : > { %2078 = vadd.xlane.f32.xlu0 %v2077_v26 }
 0x735   : > { %2081 = vadd.xlane.f32.xlu0 %v2080_v32 }
 0x739   : > { %2084 = vadd.xlane.f32.xlu0 %v2083_v8 }
 0x73d   : > { %2090 = vadd.xlane.f32.xlu0 %v2089_v57 }
 0x73e   : > { %2248 = vrot.lane.b32.xlu1 %v7961_v7, %s9383_s1  ;;  %v2074_v7 = vsel %vm1974_vm3, %v8156_v29, 0.0 }
 0x753   : > { %2165 = vrot.lane.b32.xlu0 %v7941_v44, %s9383_s1  ;;  %v2092_v44 = vsel %vm1974_vm3, %v8164_v15, 0.0 }
 0x762   : > { %2075 = vadd.xlane.f32.xlu1 %v2074_v7 }
 0x766   : > { %2087 = vadd.xlane.f32.xlu1 %v2086_v17 }
 0x76a   : > { %2093 = vadd.xlane.f32.xlu1 %v2092_v44 }
 0x76d   : > { %v2103_v20 = vpop.xlane.xlu0 %2102 }
 0x771   : > { %v2097_v14 = vpop.xlane.xlu0 %2096 }
 0x772   : > { %7231 = vrcp.f32 %v2097_v14 }
 0x775   : > { %v2106_v24 = vpop.xlane.xlu1 %2105 }
 0x779   : > { %v2100_v25 = vpop.xlane.xlu1 %2099 }
 0x77a   : > { %7233 = vrcp.f32 %v2100_v25 }
 0x77b   : > { %2163 = vrot.lane.b32.xlu1 %v7943_v47, %s9383_s1  ;;  %7235 = vrcp.f32 %v2106_v24 }
 0x77c   : > { %7237 = vrcp.f32 %v2103_v20 }
 0x77d   : > { %v2115_v35 = vpop.xlane.xlu0 %2114  ;;  %v2253_v40 = vpop.permute.xlu1 %2252 }
 0x77f   : > { %2161 = vrot.lane.b32.xlu1 %v7935_v30, %s9383_s1  ;;  %v7232_v39 = vpop.eup %7231 }
 0x780   : > { %v2143_v2 = vmul.f32 %v7232_v39, %v8085_v37 }
 0x781   : > { %v2109_v36 = vpop.xlane.xlu0 %2108  ;;  %v2251_v51 = vpop.permute.xlu1 %2250 }
 0x783   : > { %2159 = vrot.lane.b32.xlu1 %v7937_v33, %s9383_s1 }
 0x785   : > { %v2255_v42 = vpop.permute.xlu0 %2254 }
 0x786   : > { %6635 = vmatprep.subr.bf16.mxu0 %v2255_v42 }
 0x787   : > { %v7234_v45 = vpop.eup %7233  ;;  %6636 = vmatpush3.bf16.msra.mxu0 %v2255_v42 }
 0x788   : > { %6637 = vmatprep.subr.bf16.mxu0 %v2253_v40  ;;  %v2144_v46 = vmul.f32 %v7234_v45, %v8093_v13  ;;  %v7236_v33 = vpop.eup %7235 }
 0x789   : > { %v7238_v50 = vpop.eup %7237  ;;  %v2146_v37 = vmul.f32 %v7236_v33, %v8089_v49 }
 0x78a   : > { %v2155_v47 = vpack.c.bf16 %v2144_v46, %v2143_v2  ;;  %v2145_v5 = vmul.f32 %v7238_v50, %v8081_v34 }
 0x78b   : > { %6638 = vmatpush3.bf16.msra.mxu0 %v2253_v40 }
 0x78c   : > { %6639 = vmatprep.subr.bf16.mxu0 %v2251_v51  ;;  %6643 = vmatprep.mubr.msk.bf16.mxu0 %vm1974_vm3, %v2155_v47  ;;  %v2156_v54 = vpack.c.bf16 %v2146_v37, %v2145_v5  ;;  %v2380_v47 = vld [vmem:[%s7581_s14 + $0x18] sm:$0xff] }
 0x78f   : > { %6640 = vmatpush3.bf16.msra.mxu0 %v2251_v51  ;;  %v2377_v51 = vld [vmem:[%s7581_s14] sm:$0xff] }
 0x7b2   : > { %v2118_v30 = vpop.xlane.xlu1 %2117 }
 0x7b3   : > { %7239 = vrcp.f32 %v2118_v30  ;;  %v2378_v30 = vld [vmem:[%s7581_s14 + $0x8] sm:$0xff] }
 0x7b4   : > { %7241 = vrcp.f32 %v2109_v36  ;;  %v2385_v33 = vpack.c.bf16 %v2378_v30, %v2377_v51 }
 0x7b5   : > { %7243 = vrcp.f32 %v2115_v35 }
 0x7b6   : > { %v2073_v48 = vpop.xlane.xlu0 %2072  ;;  %v2112_v63 = vpop.xlane.xlu1 %2111 }
 0x7b7   : > { %7245 = vrcp.f32 %v2112_v63 }
 0x7b8   : > { %7247 = vrcp.f32 %v2073_v48 }
 0x7ba   : > { %v2079_v13 = vpop.xlane.xlu0 %2078  ;;  %v2249_v56 = vpop.permute.xlu1 %2248 }
 0x7bb   : > { %6641 = vmatprep.subr.bf16.mxu0 %v2249_v56 }
 0x7bc   : > { %6642 = vmatpush3.bf16.msra.mxu0 %v2249_v56 }
 0x7be   : > { %v2082_v31 = vpop.xlane.xlu0 %2081 }
 0x7bf   : > { %6644 = vmatmul.mubr.msk.bf16.vlgmr.msra.gmra.mxu0 %vm1974_vm3, %v2156_v54 }
 0x7c0   : > { %v7240_v60 = vpop.eup %7239 }
 0x7c1   : > { %v7242_v18 = vpop.eup %7241  ;;  %v2150_v32 = vmul.f32 %v7240_v60, %v8120_v59 }
 0x7c2   : > { %v2085_v6 = vpop.xlane.xlu0 %2084  ;;  %v7244_v4 = vpop.eup %7243  ;;  %v2147_v49 = vmul.f32 %v7242_v18, %v8103_v10 }
 0x7c3   : > { %v2149_v34 = vmul.f32 %v7244_v4, %v8097_v43 }
 0x7c4   : > { %v7246_v26 = vpop.eup %7245 }
 0x7c5   : > { %v2148_v57 = vmul.f32 %v7246_v26, %v8126_v62  ;;  %v2158_v41 = vpack.c.bf16 %v2150_v32, %v2149_v34  ;;  %v7248_v43 = vpop.eup %7247 }
 0x7c6   : > { %v2091_v8 = vpop.xlane.xlu0 %2090  ;;  %v2135_v27 = vmul.f32 %v7248_v43, %v8122_v0 }
 0x7c7   : > { %v2157_v61 = vpack.c.bf16 %v2148_v57, %v2147_v49 }
 0x7c9   : > { %6647 = vmatprep.mubr.msk.bf16.mxu0 %vm1974_vm3, %v2157_v61 }
 0x7ca   : > { %v2166_v16 = vpop.permute.xlu0 %2165  ;;  %6648 = vmatmul.mubr.msk.bf16.gmra.mxu0 %vm1974_vm3, %v2158_v41 }
 0x7cb   : > { %6619 = vmatprep.subr.bf16.mxu1 %v2166_v16 }
 0x7cc   : > { %6620 = vmatpush3.bf16.msra.mxu1 %v2166_v16 }
 0x7eb   : > { %v2076_v53 = vpop.xlane.xlu1 %2075 }
 0x7ec   : > { %7249 = vrcp.f32 %v2076_v53 }
 0x7ed   : > { %7251 = vrcp.f32 %v2082_v31 }
 0x7ee   : > { %7253 = vrcp.f32 %v2079_v13 }
 0x7ef   : > { %v2088_v59 = vpop.xlane.xlu1 %2087 }
 0x7f0   : > { %7255 = vrcp.f32 %v2088_v59 }
 0x7f1   : > { %7257 = vrcp.f32 %v2085_v6 }
 0x7f3   : > { %v2094_v10 = vpop.xlane.xlu1 %2093 }
 0x7f4   : > { %7259 = vrcp.f32 %v2094_v10 }
 0x7f5   : > { %7261 = vrcp.f32 %v2091_v8 }
 0x7f7   : > { %v2164_v62 = vpop.permute.xlu1 %2163 }
 0x7f8   : > { %6621 = vmatprep.subr.bf16.mxu1 %v2164_v62 }
 0x7f9   : > { %v7250_v21 = vpop.eup %7249  ;;  %6622 = vmatpush3.bf16.msra.mxu1 %v2164_v62 }
 0x7fa   : > { %v2136_v7 = vmul.f32 %v7250_v21, %v8156_v29  ;;  %v7252_v17 = vpop.eup %7251 }
 0x7fb   : > { %v2162_v44 = vpop.permute.xlu1 %2161  ;;  %v7254_v20 = vpop.eup %7253  ;;  %v2138_v35 = vmul.f32 %v7252_v17, %v8136_v58 }
 0x7fc   : > { %6623 = vmatprep.subr.bf16.mxu1 %v2162_v44  ;;  %v2151_v14 = vpack.c.bf16 %v2136_v7, %v2135_v27  ;;  %v2137_v0 = vmul.f32 %v7254_v20, %v8132_v22  ;;  %v2379_v22 = vld [vmem:[%s7581_s14 + $0x10] sm:$0xff] }
 0x7fd   : > { %v7256_v24 = vpop.eup %7255  ;;  %6624 = vmatpush3.bf16.msra.mxu1 %v2162_v44 }
 0x7fe   : > { %v7258_v25 = vpop.eup %7257  ;;  %6627 = vmatprep.mubr.msk.bf16.mxu1 %vm1974_vm3, %v2151_v14  ;;  %v2140_v39 = vmul.f32 %v7256_v24, %v8160_v1  ;;  %v2152_v40 = vpack.c.bf16 %v2138_v35, %v2137_v0 }
 0x7ff   : > { %v2160_v36 = vpop.permute.xlu1 %2159  ;;  %v2139_v29 = vmul.f32 %v7258_v25, %v8140_v28  ;;  %v2386_v28 = vpack.c.bf16 %v2380_v47, %v2379_v22 }
 0x800   : > { %6625 = vmatprep.subr.bf16.mxu1 %v2160_v36 }
 0x801   : > { %6626 = vmatpush3.bf16.msra.mxu1 %v2160_v36  ;;  %v7260_v42 = vpop.eup %7259  ;;  %v2153_v45 = vpack.c.bf16 %v2140_v39, %v2139_v29 }
 0x802   : > { %v7262_v58 = vpop.eup %7261  ;;  %v2142_v2 = vmul.f32 %v7260_v42, %v8164_v15  ;;  %6651 = vmatprep.subr.bf16.mxu1 %v2386_v28 }
 0x803   : > { %v2141_v1 = vmul.f32 %v7262_v58, %v8144_v38 }
 0x804   : > { %6628 = vmatmul.mubr.msk.bf16.vlgmr.msra.gmra.mxu1 %vm1974_vm3, %v2152_v40 }
 0x805   : > { %6631 = vmatprep.mubr.msk.bf16.mxu1 %vm1974_vm3, %v2153_v45  ;;  %v2154_v46 = vpack.c.bf16 %v2142_v2, %v2141_v1  ;;  %6652 = vmatpush3.bf16.msra.mxu1 %v2386_v28  ;;  %v6178_v1 = vld [vmem:[%s7586_s19] ss:$0 sm:$0xff] }
 0x806   : > { %6653 = vmatprep.subr.bf16.mxu1 %v2385_v33 }
 0x809   : > { %6654 = vmatpush3.bf16.msra.mxu1 %v2385_v33 }
 0x80c   : > { %6632 = vmatmul.mubr.msk.bf16.gmra.mxu1 %vm1974_vm3, %v2154_v46 }
 0x87f   : > { %v6645_v48 = vpop.f32.mrf.mxu0 }
 0x881   : > { %v2306_v63 = vpop.f32.mrf.mxu0 }
 0x883   : > { %v6646_v50 = vpop.f32.mrf.mxu0 }
 0x884   : > { %v7023_v37 = vpack.i.bf16 %v6646_v50, %v6645_v48 }
 0x885   : > { %v2309_v15 = vpop.f32.mrf.mxu0 }
 0x886   : > { %v7018_v13 = vpack.i.bf16 %v2309_v15, %v2306_v63  ;;  %7024 = vrot.lane.b32.xlu1 %v7023_v37, %s9385_s2 }
 0x888   : > { %7019 = vrot.lane.b32.xlu0 %v7018_v13, %s9385_s2 }
 0x88a   : > { %v6649_v38 = vpop.f32.mrf.mxu0 }
 0x88c   : > { %v2322_v56 = vpop.f32.mrf.mxu0 }
 0x88e   : > { %v6650_v5 = vpop.f32.mrf.mxu0 }
 0x88f   : > { %v7033_v54 = vpack.i.bf16 %v6650_v5, %v6649_v38 }
 0x890   : > { %v2325_v31 = vpop.f32.mrf.mxu0 }
 0x891   : > { %v7028_v60 = vpack.i.bf16 %v2325_v31, %v2322_v56  ;;  %7034 = vrot.lane.b32.xlu1 %v7033_v54, %s9385_s2 }
 0x893   : > { %7029 = vrot.lane.b32.xlu0 %v7028_v60, %s9385_s2  ;;  %s9434_s2 = sld [smem:[#allocation20_spill]] }
 0x8c4   : > { %v6629_v6 = vpop.f32.mrf.mxu1 }
 0x8c6   : > { %v2217_v18 = vpop.f32.mrf.mxu1 }
 0x8c8   : > { %v6630_v4 = vpop.f32.mrf.mxu1 }
 0x8ca   : > { %v2220_v26 = vpop.f32.mrf.mxu1 }
 0x8cc   : > { %v6633_v41 = vpop.f32.mrf.mxu1 }
 0x8ce   : > { %v2233_v21 = vpop.f32.mrf.mxu1 }
 0x8d0   : > { %v6634_v27 = vpop.f32.mrf.mxu1 }
 0x8d2   : > { %v2236_v25 = vpop.f32.mrf.mxu1 }
 0x8f8   : > { %v7025_v32 = vpop.permute.xlu1 %7024 }
 0x8f9   : > { %v7027_v8 = vunpack.i.h.bf16 %v7025_v32  ;;  %v7026_v49 = vunpack.i.l.bf16 %v7025_v32 }
 0x8fa   : > { %v7020_v57 = vpop.permute.xlu0 %7019 }
 0x8fb   : > { %v7022_v34 = vunpack.i.h.bf16 %v7020_v57  ;;  %v7021_v61 = vunpack.i.l.bf16 %v7020_v57  ;;  %v2372_v16 = vsel %vm1783_vm2, %v6630_v4, %v7027_v8  ;;  %v2371_v53 = vsel %vm1783_vm2, %v6629_v6, %v7026_v49 }
 0x8fc   : > { %v2382_v62 = vpack.c.bf16 %v2372_v16, %v2371_v53 }
 0x8fd   : > { %v2369_v59 = vsel %vm1783_vm2, %v2217_v18, %v7021_v61  ;;  %v2370_v10 = vsel %vm1783_vm2, %v2220_v26, %v7022_v34 }
 0x8fe   : > { %v2381_v43 = vpack.c.bf16 %v2370_v10, %v2369_v59 }
 0x900   : > { %6655 = vmatprep.mubr.msk.bf16.mxu1 %vm1361_vm1, %v2381_v43 }
 0x901   : > { %6656 = vmatmul.mubr.msk.bf16.vlgmr.msra.gmra.mxu1 %vm1361_vm1, %v2382_v62 }
 0x903   : > { %v7035_v7 = vpop.permute.xlu1 %7034 }
 0x904   : > { %v7037_v17 = vunpack.i.h.bf16 %v7035_v7  ;;  %v7036_v44 = vunpack.i.l.bf16 %v7035_v7 }
 0x905   : > { %v7030_v20 = vpop.permute.xlu0 %7029 }
 0x906   : > { %v7032_v14 = vunpack.i.h.bf16 %v7030_v20  ;;  %v7031_v24 = vunpack.i.l.bf16 %v7030_v20  ;;  %v2376_v35 = vsel %vm1783_vm2, %v6634_v27, %v7037_v17  ;;  %v2375_v36 = vsel %vm1783_vm2, %v6633_v41, %v7036_v44 }
 0x907   : > { %v2384_v40 = vpack.c.bf16 %v2376_v35, %v2375_v36 }
 0x908   : > { %v2373_v39 = vsel %vm1783_vm2, %v2233_v21, %v7031_v24  ;;  %v2374_v0 = vsel %vm1783_vm2, %v2236_v25, %v7032_v14 }
 0x909   : > { %v2383_v29 = vpack.c.bf16 %v2374_v0, %v2373_v39 }
 0x90b   : > { %6659 = vmatprep.mubr.msk.bf16.mxu1 %vm1361_vm1, %v2383_v29 }
 0x90c   : > { %6660 = vmatmul.mubr.msk.bf16.gmra.mxu1 %vm1361_vm1, %v2384_v40 }
 0x9c1   : > { %v6657_v42 = vpop.f32.mrf.mxu1 }
 0x9c2   : > { %v2466_v58 = vadd.f32 %v6657_v42, %v7838_v3 }
 0x9c3   : > { %v2433_v45 = vpop.f32.mrf.mxu1 }
 0x9c4   : > { %v2464_v2 = vadd.f32 %v2433_v45, %v7829_v55  ;;  %v8223_v28 = vadd.f32 %v6178_v1, %v2466_v58 }
 0x9c5   : > { %v6658_v46 = vpop.f32.mrf.mxu1 }
 0x9c6   : > { %v8221_v22 = vadd.f32 %v6178_v1, %v2464_v2  ;;  %v2467_v51 = vadd.f32 %v6658_v46, %v7845_v11  ;;  %v2495_v55 = vsel %vm1361_vm1, %v8223_v28, 0.0 }
 0x9c7   : > { %v2436_v47 = vpop.f32.mrf.mxu1 }
 0x9c8   : > { %v2465_v30 = vadd.f32 %v2436_v47, %v7835_v52  ;;  %v2489_v33 = vsel %vm1361_vm1, %v8221_v22, 0.0  ;;  %v8231_v3 = vadd.f32 %v6178_v1, %v2467_v51 }
 0x9c9   : > { %2490 = vadd.xlane.f32.xlu0 %v2489_v33  ;;  %v2623_v33 = vld [vmem:[%s7601_s6 + $0x10] sm:$0xff] }
 0x9ca   : > { %v8229_v48 = vadd.f32 %v6178_v1, %v2465_v30  ;;  %v2498_v15 = vsel %vm1361_vm1, %v8231_v3, 0.0 }
 0x9cc   : > { %v2492_v63 = vsel %vm1361_vm1, %v8229_v48, 0.0  ;;  %v6661_v50 = vpop.f32.mrf.mxu1 }
 0x9cd   : > { %2496 = vadd.xlane.f32.xlu0 %v2495_v55  ;;  %2493 = vadd.xlane.f32.xlu1 %v2492_v63  ;;  %v2470_v52 = vadd.f32 %v6661_v50, %v7858_v9  ;;  %v2624_v55 = vld [vmem:[%s7601_s6 + $0x18] sm:$0xff]  ;;  %v2621_v50 = vld [vmem:[%s7601_s6] sm:$0xff] }
 0x9ce   : > { %v2449_v11 = vpop.f32.mrf.mxu1  ;;  %v2630_v63 = vpack.c.bf16 %v2624_v55, %v2623_v33 }
 0x9cf   : > { %v2468_v37 = vadd.f32 %v2449_v11, %v7848_v12  ;;  %v8243_v5 = vadd.f32 %v6178_v1, %v2470_v52  ;;  %v2622_v11 = vld [vmem:[%s7601_s6 + $0x8] sm:$0xff] }
 0x9d0   : > { %v6662_v13 = vpop.f32.mrf.mxu1  ;;  %6663 = vmatprep.subr.bf16.mxu0 %v2630_v63  ;;  %v2629_v52 = vpack.c.bf16 %v2622_v11, %v2621_v50 }
 0x9d1   : > { %2499 = vadd.xlane.f32.xlu0 %v2498_v15  ;;  %v8241_v38 = vadd.f32 %v6178_v1, %v2468_v37  ;;  %v2471_v54 = vadd.f32 %v6662_v13, %v7864_v23  ;;  %v2507_v18 = vsel %vm1361_vm1, %v8243_v5, 0.0  ;;  %6664 = vmatpush3.bf16.msra.mxu0 %v2630_v63 }
 0x9d2   : > { %v2452_v56 = vpop.f32.mrf.mxu1  ;;  %6665 = vmatprep.subr.bf16.mxu0 %v2629_v52 }
 0x9d3   : > { %v2469_v31 = vadd.f32 %v2452_v56, %v7855_v19  ;;  %v2501_v60 = vsel %vm1361_vm1, %v8241_v38, 0.0  ;;  %v8251_v12 = vadd.f32 %v6178_v1, %v2471_v54 }
 0x9d5   : > { %2502 = vadd.xlane.f32.xlu0 %v2501_v60  ;;  %v8249_v9 = vadd.f32 %v6178_v1, %v2469_v31  ;;  %v2510_v23 = vsel %vm1361_vm1, %v8251_v12, 0.0  ;;  %6666 = vmatpush3.bf16.msra.mxu0 %v2629_v52 }
 0x9d7   : > { %v2504_v6 = vsel %vm1361_vm1, %v8249_v9, 0.0 }
 0x9d8   : > { %2505 = vadd.xlane.f32.xlu1 %v2504_v6 }
 0x9d9   : > { %2508 = vadd.xlane.f32.xlu0 %v2507_v18 }
 0x9dc   : > { %2511 = vadd.xlane.f32.xlu1 %v2510_v23 }
 0xa52   : > { %v2491_v19 = vpop.xlane.xlu0 %2490 }
 0xa53   : > { %v2513_v4 = vmul.f32 0.03125, %v2491_v19 }
 0xa55   : > { %v8260_v26 = vsub.f32 %v8221_v22, %v2513_v4 }
 0xa56   : > { %v2497_v32 = vpop.xlane.xlu0 %2496  ;;  %v2494_v8 = vpop.xlane.xlu1 %2493 }
 0xa57   : > { %v2515_v49 = vmul.f32 0.03125, %v2497_v32  ;;  %v2514_v57 = vmul.f32 0.03125, %v2494_v8  ;;  %v2529_v34 = vmul.f32 %v8260_v26, %v8260_v26 }
 0xa59   : > { %v8265_v61 = vsub.f32 %v8223_v28, %v2515_v49  ;;  %v8268_v41 = vsub.f32 %v8229_v48, %v2514_v57  ;;  %v2537_v16 = vsel %vm1361_vm1, %v2529_v34, 0.0 }
 0xa5a   : > { %v2500_v53 = vpop.xlane.xlu0 %2499  ;;  %2538 = vadd.xlane.f32.xlu0 %v2537_v16 }
 0xa5b   : > { %v2516_v59 = vmul.f32 0.03125, %v2500_v53  ;;  %v2531_v10 = vmul.f32 %v8265_v61, %v8265_v61  ;;  %v2530_v43 = vmul.f32 %v8268_v41, %v8268_v41 }
 0xa5d   : > { %v8276_v62 = vsub.f32 %v8231_v3, %v2516_v59  ;;  %v2543_v21 = vsel %vm1361_vm1, %v2531_v10, 0.0  ;;  %v2540_v27 = vsel %vm1361_vm1, %v2530_v43, 0.0 }
 0xa5e   : > { %2544 = vadd.xlane.f32.xlu0 %v2543_v21  ;;  %v2503_v7 = vpop.xlane.xlu0 %2502  ;;  %2541 = vadd.xlane.f32.xlu1 %v2540_v27 }
 0xa5f   : > { %v2517_v17 = vmul.f32 0.03125, %v2503_v7  ;;  %v2532_v44 = vmul.f32 %v8276_v62, %v8276_v62  ;;  %v6179_v7 = vld [vmem:[%s7591_s24] ss:$0 sm:$0xff] }
 0xa61   : > { %v8283_v20 = vsub.f32 %v8241_v38, %v2517_v17  ;;  %v2546_v14 = vsel %vm1361_vm1, %v2532_v44, 0.0  ;;  %v2506_v24 = vpop.xlane.xlu1 %2505 }
 0xa62   : > { %v2509_v25 = vpop.xlane.xlu0 %2508  ;;  %2547 = vadd.xlane.f32.xlu1 %v2546_v14  ;;  %v2518_v35 = vmul.f32 0.03125, %v2506_v24 }
 0xa63   : > { %v2519_v36 = vmul.f32 0.03125, %v2509_v25  ;;  %v2533_v39 = vmul.f32 %v8283_v20, %v8283_v20 }
 0xa64   : > { %v8289_v0 = vsub.f32 %v8249_v9, %v2518_v35 }
 0xa65   : > { %v8292_v29 = vsub.f32 %v8243_v5, %v2519_v36  ;;  %v2549_v40 = vsel %vm1361_vm1, %v2533_v39, 0.0  ;;  %v2512_v42 = vpop.xlane.xlu1 %2511  ;;  %v6180_v39 = vld [vmem:[%s9416_s11] ss:$0 sm:$0xff]  ;;  %s9425_s11 = sld [smem:[#allocation14_spill]] }
 0xa66   : > { %2550 = vadd.xlane.f32.xlu0 %v2549_v40  ;;  %v2520_v45 = vmul.f32 0.03125, %v2512_v42  ;;  %v2534_v58 = vmul.f32 %v8289_v0, %v8289_v0 }
 0xa67   : > { %v2535_v2 = vmul.f32 %v8292_v29, %v8292_v29 }
 0xa68   : > { %v8300_v1 = vsub.f32 %v8251_v12, %v2520_v45  ;;  %v2552_v46 = vsel %vm1361_vm1, %v2534_v58, 0.0 }
 0xa69   : > { %v2555_v47 = vsel %vm1361_vm1, %v2535_v2, 0.0  ;;  %2553 = vadd.xlane.f32.xlu1 %v2552_v46 }
 0xa6a   : > { %2556 = vadd.xlane.f32.xlu0 %v2555_v47  ;;  %v2536_v51 = vmul.f32 %v8300_v1, %v8300_v1 }
 0xa6c   : > { %v2558_v30 = vsel %vm1361_vm1, %v2536_v51, 0.0 }
 0xa6d   : > { %2559 = vadd.xlane.f32.xlu1 %v2558_v30 }
 0xae3   : > { %v2539_v37 = vpop.xlane.xlu0 %2538 }
 0xae4   : > { %v2561_v15 = vmul.f32 0.03125, %v2539_v37 }
 0xae6   : > { %v2569_v13 = vadd.f32 1e-06, %v2561_v15 }
 0xae7   : > { %v2545_v56 = vpop.xlane.xlu0 %2544  ;;  %v2542_v54 = vpop.xlane.xlu1 %2541 }
 0xae8   : > { %7263 = vrsqrt.f32 %v2569_v13  ;;  %v2563_v31 = vmul.f32 0.03125, %v2545_v56  ;;  %v2562_v60 = vmul.f32 0.03125, %v2542_v54 }
 0xaea   : > { %v2571_v6 = vadd.f32 1e-06, %v2563_v31  ;;  %v2570_v18 = vadd.f32 1e-06, %v2562_v60 }
 0xaeb   : > { %v2548_v23 = vpop.xlane.xlu1 %2547 }
 0xaec   : > { %7265 = vrsqrt.f32 %v2571_v6  ;;  %v2564_v19 = vmul.f32 0.03125, %v2548_v23 }
 0xaed   : > { %7267 = vrsqrt.f32 %v2570_v18  ;;  %v2946_v18 = vld [vmem:[%s9417_s0 + $0x78] sm:$0xff] }
 0xaee   : > { %v2572_v4 = vadd.f32 1e-06, %v2564_v19  ;;  %v2944_v19 = vld [vmem:[%s9417_s0 + $0x68] sm:$0xff] }
 0xaef   : > { %v2551_v32 = vpop.xlane.xlu0 %2550 }
 0xaf0   : > { %7269 = vrsqrt.f32 %v2572_v4  ;;  %v2565_v8 = vmul.f32 0.03125, %v2551_v32  ;;  %v2941_v32 = vld [vmem:[%s9417_s0 + $0x50] sm:$0xff] }
 0xaf2   : > { %v2573_v49 = vadd.f32 1e-06, %v2565_v8  ;;  %v2554_v57 = vpop.xlane.xlu1 %2553  ;;  %v2942_v8 = vld [vmem:[%s9417_s0 + $0x58] sm:$0xff] }
 0xaf3   : > { %v2557_v34 = vpop.xlane.xlu0 %2556  ;;  %v2566_v16 = vmul.f32 0.03125, %v2554_v57  ;;  %v2939_v57 = vld [vmem:[%s9417_s0 + $0x40] sm:$0xff] }
 0xaf4   : > { %7271 = vrsqrt.f32 %v2573_v49  ;;  %v2567_v53 = vmul.f32 0.03125, %v2557_v34  ;;  %v2956_v49 = vpack.c.bf16 %v2942_v8, %v2941_v32  ;;  %v2940_v34 = vld [vmem:[%s9417_s0 + $0x48] sm:$0xff] }
 0xaf5   : > { %v7264_v59 = vpop.eup %7263  ;;  %v2574_v10 = vadd.f32 1e-06, %v2566_v16  ;;  %v2955_v16 = vpack.c.bf16 %v2940_v34, %v2939_v57 }
 0xaf6   : > { %v2575_v43 = vadd.f32 1e-06, %v2567_v53  ;;  %v2560_v21 = vpop.xlane.xlu1 %2559  ;;  %v2585_v27 = vmul.f32 %v7264_v59, %v8260_v26  ;;  %v2937_v53 = vld [vmem:[%s9417_s0 + $0x30] sm:$0xff]  ;;  %v2938_v59 = vld [vmem:[%s9417_s0 + $0x38] sm:$0xff] }
 0xaf7   : > { %7273 = vrsqrt.f32 %v2574_v10  ;;  %v2568_v17 = vmul.f32 0.03125, %v2560_v21  ;;  %v2954_v10 = vpack.c.bf16 %v2938_v59, %v2937_v53  ;;  %v2936_v21 = vld [vmem:[%s9417_s0 + $0x28] sm:$0xff] }
 0xaf8   : > { %7275 = vrsqrt.f32 %v2575_v43  ;;  %v2599_v36 = vmul.f32 %v6179_v7, %v2585_v27  ;;  %v2935_v43 = vld [vmem:[%s9417_s0 + $0x20] sm:$0xff] }
 0xaf9   : > { %v7266_v44 = vpop.eup %7265  ;;  %v2576_v25 = vadd.f32 1e-06, %v2568_v17  ;;  %v2953_v27 = vpack.c.bf16 %v2936_v21, %v2935_v43  ;;  %v2934_v17 = vld [vmem:[%s9417_s0 + $0x18] sm:$0xff] }
 0xafa   : > { %v7268_v14 = vpop.eup %7267  ;;  %v2587_v24 = vmul.f32 %v7266_v44, %v8265_v61  ;;  %v2613_v26 = vadd.f32 %v6180_v39, %v2599_v36 }
 0xafb   : > { %v2586_v35 = vmul.f32 %v7268_v14, %v8268_v41  ;;  %7277 = vrsqrt.f32 %v2576_v25  ;;  %v2931_v14 = vld [vmem:[%s9417_s0] sm:$0xff] }
 0xafc   : > { %v2601_v45 = vmul.f32 %v6179_v7, %v2587_v24  ;;  %v2932_v24 = vld [vmem:[%s9417_s0 + $0x8] sm:$0xff] }
 0xafd   : > { %v7270_v40 = vpop.eup %7269  ;;  %v2600_v42 = vmul.f32 %v6179_v7, %v2586_v35  ;;  %v2951_v25 = vpack.c.bf16 %v2932_v24, %v2931_v14  ;;  %v6181_v35 = vld [vmem:[%s9418_s15] ss:$0 sm:$0xff]  ;;  %s9426_s15 = sld [smem:[#allocation12_spill]] }
 0xafe   : > { %v2588_v58 = vmul.f32 %v7270_v40, %v8276_v62  ;;  %v2615_v30 = vadd.f32 %v6180_v39, %v2601_v45 }
 0xaff   : > { %v2614_v2 = vadd.f32 %v6180_v39, %v2600_v42 }
 0xb00   : > { %v2602_v46 = vmul.f32 %v6179_v7, %v2588_v58 }
 0xb01   : > { %v7272_v47 = vpop.eup %7271  ;;  %v2625_v51 = vpack.c.bf16 %v2614_v2, %v2613_v26 }
 0xb02   : > { %v2616_v33 = vadd.f32 %v6180_v39, %v2602_v46  ;;  %v2589_v61 = vmul.f32 %v7272_v47, %v8283_v20 }
 0xb03   : > { %6667 = vmatprep.mubr.msk.bf16.mxu0 %vm1361_vm1, %v2625_v51 }
 0xb04   : > { %v2626_v41 = vpack.c.bf16 %v2616_v33, %v2615_v30  ;;  %v7274_v55 = vpop.eup %7273  ;;  %v2603_v62 = vmul.f32 %v6179_v7, %v2589_v61 }
 0xb05   : > { %v7276_v63 = vpop.eup %7275  ;;  %v2590_v50 = vmul.f32 %v7274_v55, %v8289_v0 }
 0xb06   : > { %6668 = vmatmul.mubr.msk.bf16.vlgmr.msra.gmra.mxu0 %vm1361_vm1, %v2626_v41  ;;  %v2591_v11 = vmul.f32 %v7276_v63, %v8292_v29  ;;  %v2617_v15 = vadd.f32 %v6180_v39, %v2603_v62  ;;  %v2945_v29 = vld [vmem:[%s9417_s0 + $0x70] sm:$0xff] }
 0xb07   : > { %v2604_v52 = vmul.f32 %v6179_v7, %v2590_v50  ;;  %v2958_v23 = vpack.c.bf16 %v2946_v18, %v2945_v29 }
 0xb08   : > { %v7278_v37 = vpop.eup %7277  ;;  %v2605_v56 = vmul.f32 %v6179_v7, %v2591_v11 }
 0xb09   : > { %v2618_v13 = vadd.f32 %v6180_v39, %v2604_v52  ;;  %v2592_v20 = vmul.f32 %v7278_v37, %v8300_v1  ;;  %6675 = vmatprep.subr.bf16.mxu1 %v2958_v23  ;;  %v2943_v1 = vld [vmem:[%s9417_s0 + $0x60] sm:$0xff] }
 0xb0a   : > { %v2619_v0 = vadd.f32 %v6180_v39, %v2605_v56  ;;  %6676 = vmatpush3.bf16.msra.mxu1 %v2958_v23  ;;  %v2957_v4 = vpack.c.bf16 %v2944_v19, %v2943_v1 }
 0xb0b   : > { %v2627_v54 = vpack.c.bf16 %v2618_v13, %v2617_v15  ;;  %v2606_v31 = vmul.f32 %v6179_v7, %v2592_v20  ;;  %v2933_v7 = vld [vmem:[%s9417_s0 + $0x10] sm:$0xff]  ;;  %s9442_s0 = sld [smem:[#allocation26_spill]] }
 0xb0c   : > { %6677 = vmatprep.subr.bf16.mxu1 %v2957_v4  ;;  %v2952_v44 = vpack.c.bf16 %v2934_v17, %v2933_v7 }
 0xb0d   : > { %6671 = vmatprep.mubr.msk.bf16.mxu0 %vm1361_vm1, %v2627_v54  ;;  %v2620_v60 = vadd.f32 %v6180_v39, %v2606_v31 }
 0xb0e   : > { %6678 = vmatpush3.bf16.msra.mxu1 %v2957_v4 }
 0xb0f   : > { %v2628_v6 = vpack.c.bf16 %v2620_v60, %v2619_v0  ;;  %6679 = vmatprep.subr.bf16.mxu1 %v2956_v49 }
 0xb11   : > { %6672 = vmatmul.mubr.msk.bf16.gmra.mxu0 %vm1361_vm1, %v2628_v6 }
 0xb12   : > { %6680 = vmatpush3.bf16.msra.mxu1 %v2956_v49 }
 0xb13   : > { %6681 = vmatprep.subr.bf16.mxu1 %v2955_v16 }
 0xb16   : > { %6682 = vmatpush3.bf16.msra.mxu1 %v2955_v16 }
 0xb17   : > { %6683 = vmatprep.subr.bf16.mxu1 %v2954_v10 }
 0xb1a   : > { %6684 = vmatpush3.bf16.msra.mxu1 %v2954_v10 }
 0xb1b   : > { %6685 = vmatprep.subr.bf16.mxu1 %v2953_v27 }
 0xb1e   : > { %6686 = vmatpush3.bf16.msra.mxu1 %v2953_v27 }
 0xb1f   : > { %6687 = vmatprep.subr.bf16.mxu1 %v2952_v44 }
 0xb22   : > { %6688 = vmatpush3.bf16.msra.mxu1 %v2952_v44 }
 0xb23   : > { %6689 = vmatprep.subr.bf16.mxu1 %v2951_v25 }
 0xb26   : > { %6690 = vmatpush3.bf16.msra.mxu1 %v2951_v25 }
 0xbc6   : > { %v6669_v36 = vpop.f32.mrf.mxu0 }
 0xbc7   : > { %v8342_v39 = vadd.f32 %v6669_v36, %v6181_v35 }
 0xbc8   : > { %v2684_v40 = vpop.f32.mrf.mxu0 }
 0xbc9   : > { %v8345_v42 = vmul.f32 0.70710677, %v8342_v39  ;;  %v8347_v45 = vadd.f32 %v6181_v35, %v2684_v40 }
 0xbca   : > { %v6670_v58 = vpop.f32.mrf.mxu0 }
 0xbcb   : > { %v2725_v26 = vand.u32 2147483647, %v8345_v42  ;;  %v8351_v2 = vmul.f32 0.70710677, %v8347_v45  ;;  %v8353_v46 = vadd.f32 %v6670_v58, %v6181_v35  ;;  %vm2885_vm4 = vcmp.ge.f32.partialorder %v8345_v42, 0.0 }
 0xbcc   : > { %v2687_v47 = vpop.f32.mrf.mxu0 }
 0xbcd   : > { %v2733_v51 = vmul.f32 0.3275911, %v2725_v26  ;;  %v2723_v30 = vand.u32 2147483647, %v8351_v2  ;;  %v8357_v33 = vmul.f32 0.70710677, %v8353_v46  ;;  %v8359_v61 = vadd.f32 %v6181_v35, %v2687_v47 }
 0xbce   : > { %v2837_v31 = vsub.f32 0.0, %v2725_v26  ;;  %vm2883_vm5 = vcmp.ge.f32.partialorder %v8351_v2, 0.0 }
 0xbcf   : > { %v2741_v41 = vadd.f32 1.0, %v2733_v51  ;;  %v2731_v55 = vmul.f32 0.3275911, %v2723_v30  ;;  %v2726_v63 = vand.u32 2147483647, %v8357_v33  ;;  %v2835_v23 = vsub.f32 0.0, %v2723_v30 }
 0xbd0   : > { %v8363_v50 = vmul.f32 0.70710677, %v8359_v61  ;;  %v2845_v32 = vmul.f32 %v2837_v31, %v2725_v26  ;;  %vm2886_vm6 = vcmp.ge.f32.partialorder %v8357_v33, 0.0  ;;  %v2910_v33 = vmul.f32 0.5, %v8353_v46 }
 0xbd1   : > { %7279 = vrcp.f32 %v2741_v41  ;;  %v2739_v62 = vadd.f32 1.0, %v2731_v55  ;;  %v2734_v11 = vmul.f32 0.3275911, %v2726_v63  ;;  %v6673_v37 = vpop.f32.mrf.mxu0  ;;  %v2843_v16 = vmul.f32 %v2835_v23, %v2723_v30 }
 0xbd2   : > { %v2724_v52 = vand.u32 2147483647, %v8363_v50  ;;  %v8366_v15 = vadd.f32 %v6673_v37, %v6181_v35  ;;  %v2838_v53 = vsub.f32 0.0, %v2726_v63  ;;  %v2855_v27 = vmul.f32 1.442695, %v2845_v32 }
 0xbd3   : > { %7281 = vrcp.f32 %v2739_v62  ;;  %v2742_v13 = vadd.f32 1.0, %v2734_v11  ;;  %v2700_v56 = vpop.f32.mrf.mxu0  ;;  %v2851_v25 = vmul.f32 1.442695, %v2843_v16  ;;  %vm2884_vm7 = vcmp.ge.f32.partialorder %v8363_v50, 0.0 }
 0xbd4   : > { %v2732_v20 = vmul.f32 0.3275911, %v2724_v52  ;;  %v8369_v54 = vmul.f32 0.70710677, %v8366_v15  ;;  %v8371_v60 = vadd.f32 %v6181_v35, %v2700_v56  ;;  %v2836_v7 = vsub.f32 0.0, %v2724_v52 }
 0xbd5   : > { %7283 = vrcp.f32 %v2742_v13  ;;  %v6674_v6 = vpop.f32.mrf.mxu0 }
 0xbd6   : > { %v2740_v0 = vadd.f32 1.0, %v2732_v20  ;;  %v2729_v29 = vand.u32 2147483647, %v8369_v54  ;;  %v8374_v18 = vadd.f32 %v6674_v6, %v6181_v35  ;;  %v8377_v1 = vmul.f32 0.70710677, %v8371_v60 }
 0xbd7   : > { %v2703_v19 = vpop.f32.mrf.mxu0  ;;  %v2844_v30 = vmul.f32 %v2836_v7, %v2724_v52  ;;  %vm2889_vm10 = vcmp.ge.f32.partialorder %v8369_v54, 0.0  ;;  %v2913_v54 = vmul.f32 0.5, %v8366_v15 }
 0xbd8   : > { %7285 = vrcp.f32 %v2740_v0  ;;  %v2737_v4 = vmul.f32 0.3275911, %v2729_v29  ;;  %v2727_v8 = vand.u32 2147483647, %v8377_v1  ;;  %v8381_v49 = vmul.f32 0.70710677, %v8374_v18 }
 0xbd9   : > { %v8383_v34 = vadd.f32 %v6181_v35, %v2703_v19  ;;  %v2846_v35 = vmul.f32 %v2838_v53, %v2726_v63  ;;  %v2841_v26 = vsub.f32 0.0, %v2729_v29  ;;  %v2853_v6 = vmul.f32 1.442695, %v2844_v30 }
 0xbda   : > { %v2745_v57 = vadd.f32 1.0, %v2737_v4  ;;  %v2735_v59 = vmul.f32 0.3275911, %v2727_v8  ;;  %v2730_v10 = vand.u32 2147483647, %v8381_v49  ;;  %v2839_v62 = vsub.f32 0.0, %v2727_v8 }
 0xbdb   : > { %v8387_v43 = vmul.f32 0.70710677, %v8383_v34  ;;  %v2857_v13 = vmul.f32 1.442695, %v2846_v35  ;;  %v2849_v56 = vmul.f32 %v2841_v26, %v2729_v29  ;;  %vm2887_vm8 = vcmp.ge.f32.partialorder %v8377_v1, 0.0 }
 0xbdc   : > { %7287 = vrcp.f32 %v2745_v57  ;;  %v2743_v17 = vadd.f32 1.0, %v2735_v59  ;;  %v2738_v44 = vmul.f32 0.3275911, %v2730_v10  ;;  %v2842_v23 = vsub.f32 0.0, %v2730_v10 }
 0xbdd   : > { %v8393_v24 = vand.u32 2147483647, %v8387_v43  ;;  %v2847_v32 = vmul.f32 %v2839_v62, %v2727_v8  ;;  %v2863_v29 = vmul.f32 1.442695, %v2849_v56  ;;  %vm2890_vm9 = vcmp.ge.f32.partialorder %v8381_v49, 0.0 }
 0xbde   : > { %v8389_v21 = vpop.eup %7279  ;;  %7289 = vrcp.f32 %v2743_v17  ;;  %v2746_v36 = vadd.f32 1.0, %v2738_v44  ;;  %v2850_v44 = vmul.f32 %v2842_v23, %v2730_v10  ;;  %vm2888_vm11 = vcmp.ge.f32.partialorder %v8387_v43, 0.0  ;;  %v7123_v43 = vld [vmem:[%s9419_s16] sm:$0xff]  }
 0xbdf   : > { %v2765_v14 = vmul.f32 1.0614054, %v8389_v21  ;;  %v2736_v47 = vmul.f32 0.3275911, %v8393_v24  ;;  %7291 = vpow2.f32 %v2855_v27  ;;  %v2859_v35 = vmul.f32 1.442695, %v2847_v32  ;;  %6707 = vmatprep.mubr.msk.bf16.mxu0 %vm1974_vm3, %v7123_v43 }
 0xbe0   : > { %v8395_v40 = vpop.eup %7281  ;;  %7293 = vrcp.f32 %v2746_v36  ;;  %v2840_v26 = vsub.f32 0.0, %v8393_v24  ;;  %v2911_v1 = vmul.f32 0.5, %v8371_v60  ;;  %v2912_v49 = vmul.f32 0.5, %v8383_v34  ;;  %v7158_v43 = vld [vmem:[%s9419_s16 + $0x118] sm:$0xff]  }
 0xbe1   : > { %v2773_v58 = vadd.f32 -1.4531521, %v2765_v14  ;;  %v2763_v51 = vmul.f32 1.0614054, %v8395_v40  ;;  %v2744_v11 = vadd.f32 1.0, %v2736_v47  ;;  %7295 = vpow2.f32 %v2851_v25 }
 0xbe2   : > { %v8399_v41 = vpop.eup %7283 }
 0xbe3   : > { %v2781_v55 = vmul.f32 %v8389_v21, %v2773_v58  ;;  %v2771_v63 = vadd.f32 -1.4531521, %v2763_v51  ;;  %v2766_v37 = vmul.f32 1.0614054, %v8399_v41  ;;  %7297 = vrcp.f32 %v2744_v11 }
 0xbe4   : > { %7299 = vpow2.f32 %v2857_v13 }
 0xbe5   : > { %v2789_v20 = vadd.f32 1.4214138, %v2781_v55  ;;  %v8403_v31 = vpop.eup %7285  ;;  %v2779_v0 = vmul.f32 %v8395_v40, %v2771_v63  ;;  %v2774_v52 = vadd.f32 -1.4531521, %v2766_v37  ;;  %7301 = vpow2.f32 %v2853_v6 }
 0xbe6   : > { %v2764_v4 = vmul.f32 1.0614054, %v8403_v31  ;;  %7303 = vpow2.f32 %v2863_v29  ;;  %v2865_v63 = vmul.f32 1.442695, %v2850_v44 }
 0xbe7   : > { %v2797_v19 = vmul.f32 %v8389_v21, %v2789_v20  ;;  %v2787_v57 = vadd.f32 1.4214138, %v2779_v0  ;;  %v2782_v16 = vmul.f32 %v8399_v41, %v2774_v52  ;;  %7305 = vpow2.f32 %v2859_v35 }
 0xbe8   : > { %v2772_v59 = vadd.f32 -1.4531521, %v2764_v4  ;;  %7307 = vpow2.f32 %v2865_v63 }
 0xbe9   : > { %v2805_v53 = vadd.f32 -0.28449672, %v2797_v19  ;;  %v8409_v27 = vpop.eup %7287  ;;  %v2795_v7 = vmul.f32 %v8395_v40, %v2787_v57  ;;  %v2790_v17 = vadd.f32 1.4214138, %v2782_v16  ;;  %v2848_v19 = vmul.f32 %v2840_v26, %v8393_v24 }
 0xbea   : > { %v2780_v25 = vmul.f32 %v8403_v31, %v2772_v59  ;;  %v2769_v8 = vmul.f32 1.0614054, %v8409_v27 }
 0xbeb   : > { %v2813_v14 = vmul.f32 %v8389_v21, %v2805_v53  ;;  %v2803_v36 = vadd.f32 -0.28449672, %v2795_v7  ;;  %v2798_v58 = vmul.f32 %v8399_v41, %v2790_v17  ;;  %v8417_v47 = vpop.eup %7289 }
 0xbec   : > { %v2788_v30 = vadd.f32 1.4214138, %v2780_v25  ;;  %v2777_v55 = vadd.f32 -1.4531521, %v2769_v8  ;;  %v2767_v11 = vmul.f32 1.0614054, %v8417_v47  ;;  %v7292_v37 = vpop.eup %7291 }
 0xbed   : > { %v2821_v51 = vadd.f32 0.2548296, %v2813_v14  ;;  %v2811_v10 = vmul.f32 %v8395_v40, %v2803_v36  ;;  %v2806_v62 = vadd.f32 -0.28449672, %v2798_v58  ;;  %v8424_v0 = vpop.eup %7293 }
 0xbee   : > { %v2796_v20 = vmul.f32 %v8403_v31, %v2788_v30  ;;  %v2785_v56 = vmul.f32 %v8409_v27, %v2777_v55  ;;  %v2775_v23 = vadd.f32 -1.4531521, %v2767_v11  ;;  %v7296_v4 = vpop.eup %7295  ;;  %v2770_v53 = vmul.f32 1.0614054, %v8424_v0 }
 0xbef   : > { %v2829_v13 = vmul.f32 %v8389_v21, %v2821_v51  ;;  %v2819_v52 = vadd.f32 0.2548296, %v2811_v10  ;;  %v2814_v6 = vmul.f32 %v8399_v41, %v2806_v62  ;;  %v2861_v30 = vmul.f32 1.442695, %v2848_v19 }
 0xbf0   : > { %v2804_v57 = vadd.f32 -0.28449672, %v2796_v20  ;;  %v2793_v16 = vadd.f32 1.4214138, %v2785_v56  ;;  %v8429_v21 = vpop.eup %7297  ;;  %v2783_v7 = vmul.f32 %v8417_v47, %v2775_v23  ;;  %v2778_v14 = vadd.f32 -1.4531521, %v2770_v53 }
 0xbf1   : > { %v2869_v32 = vmul.f32 %v7292_v37, %v2829_v13  ;;  %v2827_v59 = vmul.f32 %v8395_v40, %v2819_v52  ;;  %v2822_v29 = vadd.f32 0.2548296, %v2814_v6  ;;  %v2768_v36 = vmul.f32 1.0614054, %v8429_v21  ;;  %v7300_v58 = vpop.eup %7299 }
 0xbf2   : > { %v2812_v44 = vmul.f32 %v8403_v31, %v2804_v57  ;;  %v2801_v24 = vmul.f32 %v8409_v27, %v2793_v16  ;;  %v2791_v35 = vadd.f32 1.4214138, %v2783_v7  ;;  %v2786_v40 = vmul.f32 %v8424_v0, %v2778_v14  ;;  %v7302_v63 = vpop.eup %7301 }
 0xbf3   : > { %v2877_v17 = vsub.f32 1.0, %v2869_v32  ;;  %v2867_v25 = vmul.f32 %v7296_v4, %v2827_v59  ;;  %v2830_v8 = vmul.f32 %v8399_v41, %v2822_v29  ;;  %v2776_v11 = vadd.f32 -1.4531521, %v2768_v36  ;;  %v7304_v57 = vpop.eup %7303 }
 0xbf4   : > { %v2820_v26 = vadd.f32 0.2548296, %v2812_v44  ;;  %v2809_v51 = vadd.f32 -0.28449672, %v2801_v24  ;;  %v2799_v62 = vmul.f32 %v8417_v47, %v2791_v35  ;;  %v2794_v20 = vadd.f32 1.4214138, %v2786_v40  ;;  %v7306_v44 = vpop.eup %7305 }
 0xbf5   : > { %v2875_v55 = vsub.f32 1.0, %v2867_v25  ;;  %v2870_v10 = vmul.f32 %v7300_v58, %v2830_v8  ;;  %v2893_v37 = vsub.f32 0.0, %v2877_v17  ;;  %v2784_v32 = vmul.f32 %v8429_v21, %v2776_v11 }
 0xbf6   : > { %v2828_v13 = vmul.f32 %v8403_v31, %v2820_v26  ;;  %v2817_v41 = vmul.f32 %v8409_v27, %v2809_v51  ;;  %v2807_v6 = vadd.f32 -0.28449672, %v2799_v62  ;;  %v2802_v19 = vmul.f32 %v8424_v0, %v2794_v20  ;;  %v7308_v26 = vpop.eup %7307 }
 0xbf7   : > { %v2891_v56 = vsub.f32 0.0, %v2875_v55  ;;  %v2878_v52 = vsub.f32 1.0, %v2870_v10  ;;  %7309 = vpow2.f32 %v2861_v30  ;;  %v2901_v53 = vsel %vm2885_vm4, %v2877_v17, %v2893_v37 }
 0xbf8   : > { %v2868_v23 = vmul.f32 %v7302_v63, %v2828_v13  ;;  %v2825_v4 = vadd.f32 0.2548296, %v2817_v41  ;;  %v2815_v31 = vmul.f32 %v8417_v47, %v2807_v6  ;;  %v2810_v7 = vadd.f32 -0.28449672, %v2802_v19 }
 0xbf9   : > { %v2894_v16 = vsub.f32 0.0, %v2878_v52  ;;  %v2899_v24 = vsel %vm2883_vm5, %v2875_v55, %v2891_v56  ;;  %v2792_v8 = vadd.f32 1.4214138, %v2784_v32  ;;  %v2908_v58 = vmul.f32 0.5, %v8359_v61 }
 0xbfa   : > { %v2876_v59 = vsub.f32 1.0, %v2868_v23  ;;  %v2833_v29 = vmul.f32 %v8409_v27, %v2825_v4  ;;  %v2823_v25 = vadd.f32 0.2548296, %v2815_v31  ;;  %v2818_v27 = vmul.f32 %v8424_v0, %v2810_v7 }
 0xbfb   : > { %v2902_v14 = vsel %vm2886_vm6, %v2878_v52, %v2894_v16  ;;  %v2800_v17 = vmul.f32 %v8429_v21, %v2792_v8  ;;  %v2917_v2 = vadd.f32 1.0, %v2901_v53  ;;  %v2915_v51 = vadd.f32 1.0, %v2899_v24 }
 0xbfc   : > { %v2918_v35 = vadd.f32 1.0, %v2902_v14  ;;  %v2892_v36 = vsub.f32 0.0, %v2876_v59  ;;  %v2831_v42 = vmul.f32 %v8417_v47, %v2823_v25  ;;  %v2873_v30 = vmul.f32 %v7304_v57, %v2833_v29 }
 0xbfd   : > { %v2826_v46 = vadd.f32 0.2548296, %v2818_v27  ;;  %v2808_v62 = vadd.f32 -0.28449672, %v2800_v17  ;;  %v2909_v11 = vmul.f32 0.5, %v8342_v39  ;;  %v2907_v61 = vmul.f32 0.5, %v8347_v45 }
 0xbfe   : > { %v2900_v40 = vsel %vm2884_vm7, %v2876_v59, %v2892_v36  ;;  %v2871_v10 = vmul.f32 %v7306_v44, %v2831_v42  ;;  %v2926_v50 = vmul.f32 %v2918_v35, %v2910_v33  ;;  %v2881_v20 = vsub.f32 1.0, %v2873_v30 }
 0xbff   : > { %v2916_v55 = vadd.f32 1.0, %v2900_v40  ;;  %v2834_v37 = vmul.f32 %v8424_v0, %v2826_v46  ;;  %v2816_v13 = vmul.f32 %v8429_v21, %v2808_v62  ;;  %v2923_v41 = vmul.f32 %v2915_v51, %v2907_v61 }
 0xc00   : > { %v2879_v47 = vsub.f32 1.0, %v2871_v10  ;;  %v2925_v56 = vmul.f32 %v2917_v2, %v2909_v11  ;;  %v2897_v45 = vsub.f32 0.0, %v2881_v20  ;;  %v2914_v14 = vmul.f32 0.5, %v8374_v18 }
 0xc01   : > { %v2924_v63 = vmul.f32 %v2916_v55, %v2908_v58  ;;  %v2874_v52 = vmul.f32 %v7308_v26, %v2834_v37  ;;  %v2824_v6 = vadd.f32 0.2548296, %v2816_v13  ;;  %v6186_v55 = vld [vmem:[%s9420_s18] ss:$0 sm:$0xff]  ;;  %s9427_s18 = sld [smem:[#allocation13_spill]] }
 0xc02   : > { %v2948_v4 = vpack.c.bf16 %v2926_v50, %v2925_v56  ;;  %v2895_v19 = vsub.f32 0.0, %v2879_v47  ;;  %v2905_v29 = vsel %vm2889_vm10, %v2881_v20, %v2897_v45  ;;  %v7125_v20 = vld [vmem:[%s9419_s16 + $0x10] sm:$0xff]   ;;  %v7126_v56 = vld [vmem:[%s9419_s16 + $0x18] sm:$0xff]   ;;  %v7135_v45 = vld [vmem:[%s9419_s16 + $0x60] sm:$0xff]  }
 0xc03   : > { %v2947_v23 = vpack.c.bf16 %v2924_v63, %v2923_v41  ;;  %v2882_v32 = vsub.f32 1.0, %v2874_v52  ;;  %v2832_v39 = vmul.f32 %v8429_v21, %v2824_v6  ;;  %v2921_v21 = vadd.f32 1.0, %v2905_v29  ;;  %v7127_v52 = vld [vmem:[%s9419_s16 + $0x20] sm:$0xff]   ;;  %v7128_v6 = vld [vmem:[%s9419_s16 + $0x28] sm:$0xff]   ;;  %v7141_v29 = vld [vmem:[%s9419_s16 + $0x90] sm:$0xff]  }
 0xc04   : > { %v7310_v57 = vpop.eup %7309  ;;  %v2903_v0 = vsel %vm2887_vm8, %v2879_v47, %v2895_v19  ;;  %v7131_v19 = vld [vmem:[%s9419_s16 + $0x40] sm:$0xff]  }
 0xc05   : > { %6691 = vmatprep.mubr.bf16.mxu1 %v2947_v23  ;;  %v2898_v16 = vsub.f32 0.0, %v2882_v32  ;;  %v2872_v31 = vmul.f32 %v7310_v57, %v2832_v39  ;;  %v2919_v24 = vadd.f32 1.0, %v2903_v0  ;;  %v2929_v58 = vmul.f32 %v2921_v21, %v2913_v54  ;;  %v7129_v23 = vld [vmem:[%s9419_s16 + $0x30] sm:$0xff]   ;;  %v7134_v57 = vld [vmem:[%s9419_s16 + $0x58] sm:$0xff]   ;;  %v7151_v54 = vld [vmem:[%s9419_s16 + $0xe0] sm:$0xff]  }
 0xc06   : > { %6692 = vmatmul.mubr.bf16.vlgmr.msra.gmra.mxu1 %v2948_v4  ;;  %v7130_v4 = vld [vmem:[%s9419_s16 + $0x38] sm:$0xff]   ;;  %v7133_v39 = vld [vmem:[%s9419_s16 + $0x50] sm:$0xff]  }
 0xc07   : > { %v2906_v53 = vsel %vm2890_vm9, %v2882_v32, %v2898_v16  ;;  %v2880_v59 = vsub.f32 1.0, %v2872_v31  ;;  %v2927_v35 = vmul.f32 %v2919_v24, %v2911_v1  ;;  %v7132_v32 = vld [vmem:[%s9419_s16 + $0x48] sm:$0xff]   ;;  %v7137_v31 = vld [vmem:[%s9419_s16 + $0x70] sm:$0xff]   ;;  %v7138_v0 = vld [vmem:[%s9419_s16 + $0x78] sm:$0xff]  }
 0xc08   : > { %v2922_v7 = vadd.f32 1.0, %v2906_v53  ;;  %v7136_v16 = vld [vmem:[%s9419_s16 + $0x68] sm:$0xff]   ;;  %v7139_v53 = vld [vmem:[%s9419_s16 + $0x80] sm:$0xff]   ;;  %v7145_v21 = vld [vmem:[%s9419_s16 + $0xb0] sm:$0xff]  }
 0xc09   : > { %v2896_v44 = vsub.f32 0.0, %v2880_v59  ;;  %v7144_v24 = vld [vmem:[%s9419_s16 + $0xa8] sm:$0xff]  }
 0xc0a   : > { %v2930_v33 = vmul.f32 %v2922_v7, %v2914_v14  ;;  %v7142_v7 = vld [vmem:[%s9419_s16 + $0x98] sm:$0xff]   ;;  %v7148_v1 = vld [vmem:[%s9419_s16 + $0xc8] sm:$0xff]  }
 0xc0b   : > { %v2904_v25 = vsel %vm2888_vm11, %v2880_v59, %v2896_v44  ;;  %v7140_v59 = vld [vmem:[%s9419_s16 + $0x88] sm:$0xff]   ;;  %v7143_v44 = vld [vmem:[%s9419_s16 + $0xa0] sm:$0xff]   ;;  %v7146_v14 = vld [vmem:[%s9419_s16 + $0xb8] sm:$0xff]  }
 0xc0c   : > { %v2920_v8 = vadd.f32 1.0, %v2904_v25  ;;  %v2950_v27 = vpack.c.bf16 %v2930_v33, %v2929_v58  ;;  %v7147_v25 = vld [vmem:[%s9419_s16 + $0xc0] sm:$0xff]   ;;  %v7152_v33 = vld [vmem:[%s9419_s16 + $0xe8] sm:$0xff]  }
 0xc0d   : > { %v7155_v58 = vld [vmem:[%s9419_s16 + $0x100] sm:$0xff]  }
 0xc0e   : > { %v2928_v36 = vmul.f32 %v2920_v8, %v2912_v49  ;;  %v7149_v49 = vld [vmem:[%s9419_s16 + $0xd0] sm:$0xff]   ;;  %v7150_v8 = vld [vmem:[%s9419_s16 + $0xd8] sm:$0xff]  }
 0xc10   : > { %v2949_v42 = vpack.c.bf16 %v2928_v36, %v2927_v35  ;;  %v7153_v35 = vld [vmem:[%s9419_s16 + $0xf0] sm:$0xff]   ;;  %v7154_v36 = vld [vmem:[%s9419_s16 + $0xf8] sm:$0xff]  }
 0xc12   : > { %6695 = vmatprep.mubr.bf16.mxu1 %v2949_v42  ;;  %v7156_v42 = vld [vmem:[%s9419_s16 + $0x108] sm:$0xff]  }
 0xc13   : > { %6696 = vmatmul.mubr.bf16.gmra.mxu1 %v2950_v27  ;;  %v7157_v27 = vld [vmem:[%s9419_s16 + $0x110] sm:$0xff]  }
 0xcc6   : > { %v6693_v18 = vpop.f32.mrf.mxu1 }
 0xcc7   : > { %v3026_v50 = vadd.f32 %v6693_v18, %v8223_v28 }
 0xcc8   : > { %v2993_v17 = vpop.f32.mrf.mxu1 }
 0xcc9   : > { %v3024_v28 = vadd.f32 %v2993_v17, %v8221_v22  ;;  %v7124_v22 = vld [vmem:[%s9419_s16 + $0x8] sm:$0xff]  }
 0xcca   : > { %v6694_v60 = vpop.f32.mrf.mxu1 }
 0xccb   : > { %v3027_v46 = vadd.f32 %v6694_v60, %v8231_v3 }
 0xccc   : > { %v2996_v26 = vpop.f32.mrf.mxu1 }
 0xccd   : > { %v3025_v3 = vadd.f32 %v2996_v26, %v8229_v48  ;;  %v8502_v48 = vadd.f32 %v6186_v55, %v3024_v28 }
 0xccf   : > { %v8498_v37 = vadd.f32 %v6186_v55, %v3025_v3 }
 0xcd1   : > { %v3119_v41 = vpack.c.bf16 %v8498_v37, %v8502_v48 }
 0xcd3   : > { %v6697_v34 = vpop.f32.mrf.mxu1 }
 0xcd4   : > { %v3030_v15 = vadd.f32 %v6697_v34, %v8243_v5 }
 0xcd5   : > { %v3009_v2 = vpop.f32.mrf.mxu1 }
 0xcd6   : > { %v3028_v40 = vadd.f32 %v3009_v2, %v8241_v38  ;;  %v8478_v62 = vadd.f32 %v6186_v55, %v3030_v15 }
 0xcd7   : > { %v6698_v51 = vpop.f32.mrf.mxu1 }
 0xcd8   : > { %v3031_v30 = vadd.f32 %v6698_v51, %v8251_v12  ;;  %v8484_v63 = vadd.f32 %v6186_v55, %v3028_v40  ;;  %v8490_v12 = vadd.f32 %v6186_v55, %v3027_v46  ;;  %v6259_v51 = vld [vmem:[%s9422_s22] ss:$0 sm:$0xff] }
 0xcd9   : > { %v3012_v10 = vpop.f32.mrf.mxu1 }
 0xcda   : > { %v8480_v11 = vadd.f32 %v6186_v55, %v3031_v30  ;;  %v3029_v61 = vadd.f32 %v3012_v10, %v8249_v9  ;;  %v8495_v9 = vadd.f32 %v6186_v55, %v3026_v50  ;;  %v6260_v30 = vld [vmem:[%s9422_s22 + $0x1] ss:$0 sm:$0xff] }
 0xcdc   : > { %v8486_v5 = vadd.f32 %v6186_v55, %v3029_v61  ;;  %v3122_v38 = vpack.c.bf16 %v8480_v11, %v8478_v62  ;;  %v3120_v13 = vpack.c.bf16 %v8490_v12, %v8495_v9 }
 0xcde   : > { %9421 = vst [vmem:[#allocation29_spill] sm:$0xff] %v8486_v5  ;;  %6699 = vmatprep.subr.bf16.mxu0 %v3122_v38  ;;  %v3121_v47 = vpack.c.bf16 %v8486_v5, %v8484_v63 }
 0xcdf   : > { %6700 = vmatpush3.bf16.msra.mxu0 %v3122_v38 }
 0xce0   : > { %6701 = vmatprep.subr.bf16.mxu0 %v3121_v47 }
 0xce3   : > { %6702 = vmatpush3.bf16.msra.mxu0 %v3121_v47 }
 0xce4   : > { %6703 = vmatprep.subr.bf16.mxu0 %v3120_v13 }
 0xce7   : > { %6704 = vmatpush3.bf16.msra.mxu0 %v3120_v13 }
 0xce8   : > { %6705 = vmatprep.subr.bf16.mxu0 %v3119_v41 }
 0xceb   : > { %6706 = vmatpush3.bf16.msra.mxu0 %v3119_v41 }
 0xcee   : > { %6708 = vmatmul.mubr.msk.bf16.vlgmr.msra.gmra.mxu0 %vm1974_vm3, %v7124_v22 }
 0xcef   : > { %6711 = vmatprep.mubr.msk.bf16.mxu0 %vm1974_vm3, %v7125_v20 }
 0xcf6   : > { %6712 = vmatmul.mubr.msk.bf16.gmra.mxu0 %vm1974_vm3, %v7126_v56 }
 0xcf7   : > { %6715 = vmatprep.mubr.msk.bf16.mxu0 %vm1974_vm3, %v7127_v52 }
 0xcfe   : > { %6716 = vmatmul.mubr.msk.bf16.gmra.mxu0 %vm1974_vm3, %v7128_v6 }
 0xcff   : > { %6719 = vmatprep.mubr.msk.bf16.mxu0 %vm1974_vm3, %v7129_v23 }
 0xd06   : > { %6720 = vmatmul.mubr.msk.bf16.gmra.mxu0 %vm1974_vm3, %v7130_v4 }
 0xd07   : > { %6723 = vmatprep.mubr.msk.bf16.mxu0 %vm1974_vm3, %v7131_v19 }
 0xd0e   : > { %6724 = vmatmul.mubr.msk.bf16.gmra.mxu0 %vm1974_vm3, %v7132_v32 }
 0xd0f   : > { %6727 = vmatprep.mubr.msk.bf16.mxu0 %vm1974_vm3, %v7133_v39 }
 0xd16   : > { %6728 = vmatmul.mubr.msk.bf16.gmra.mxu0 %vm1974_vm3, %v7134_v57 }
 0xd17   : > { %6731 = vmatprep.mubr.msk.bf16.mxu0 %vm1974_vm3, %v7135_v45 }
 0xd1e   : > { %6732 = vmatmul.mubr.msk.bf16.gmra.mxu0 %vm1974_vm3, %v7136_v16 }
 0xd1f   : > { %6735 = vmatprep.mubr.msk.bf16.mxu0 %vm1974_vm3, %v7137_v31 }
 0xd26   : > { %6736 = vmatmul.mubr.msk.bf16.gmra.mxu0 %vm1974_vm3, %v7138_v0 }
 0xd27   : > { %6739 = vmatprep.mubr.msk.bf16.mxu0 %vm1974_vm3, %v7139_v53 }
 0xd2e   : > { %6740 = vmatmul.mubr.msk.bf16.gmra.mxu0 %vm1974_vm3, %v7140_v59 }
 0xd2f   : > { %6743 = vmatprep.mubr.msk.bf16.mxu0 %vm1974_vm3, %v7141_v29  ;;  %v6261_v29 = vld [vmem:[%s9422_s22 + $0x2] ss:$0 sm:$0xff] }
 0xd36   : > { %6744 = vmatmul.mubr.msk.bf16.gmra.mxu0 %vm1974_vm3, %v7142_v7 }
 0xd37   : > { %6747 = vmatprep.mubr.msk.bf16.mxu0 %vm1974_vm3, %v7143_v44 }
 0xd3e   : > { %6748 = vmatmul.mubr.msk.bf16.gmra.mxu0 %vm1974_vm3, %v7144_v24 }
 0xd3f   : > { %6751 = vmatprep.mubr.msk.bf16.mxu0 %vm1974_vm3, %v7145_v21 }
 0xd46   : > { %6752 = vmatmul.mubr.msk.bf16.gmra.mxu0 %vm1974_vm3, %v7146_v14 }
 0xd47   : > { %6755 = vmatprep.mubr.msk.bf16.mxu0 %vm1974_vm3, %v7147_v25 }
 0xd4e   : > { %6756 = vmatmul.mubr.msk.bf16.gmra.mxu0 %vm1974_vm3, %v7148_v1 }
 0xd4f   : > { %6759 = vmatprep.mubr.msk.bf16.mxu0 %vm1974_vm3, %v7149_v49 }
 0xd56   : > { %6760 = vmatmul.mubr.msk.bf16.gmra.mxu0 %vm1974_vm3, %v7150_v8 }
 0xd57   : > { %6763 = vmatprep.mubr.msk.bf16.mxu0 %vm1974_vm3, %v7151_v54 }
 0xd5e   : > { %6764 = vmatmul.mubr.msk.bf16.gmra.mxu0 %vm1974_vm3, %v7152_v33 }
 0xd5f   : > { %6767 = vmatprep.mubr.msk.bf16.mxu0 %vm1974_vm3, %v7153_v35 }
 0xd66   : > { %6768 = vmatmul.mubr.msk.bf16.gmra.mxu0 %vm1974_vm3, %v7154_v36 }
 0xd67   : > { %6771 = vmatprep.mubr.msk.bf16.mxu0 %vm1974_vm3, %v7155_v58 }
 0xd6e   : > { %6772 = vmatmul.mubr.msk.bf16.gmra.mxu0 %vm1974_vm3, %v7156_v42 }
 0xd6f   : > { %6775 = vmatprep.mubr.msk.bf16.mxu0 %vm1974_vm3, %v7157_v27 }
 0xd76   : > { %6776 = vmatmul.mubr.msk.bf16.gmra.mxu0 %vm1974_vm3, %v7158_v43 }
 0xdae   : > { %v6709_v18 = vpop.f32.mrf.mxu0 }
 0xdaf   : > { %v3739_v10 = vmul.f32 %v6709_v18, %v6259_v51 }
 0xdb0   : > { %v3445_v17 = vpop.f32.mrf.mxu0 }
 0xdb1   : > { %v3737_v50 = vmul.f32 %v6259_v51, %v3445_v17 }
 0xdb2   : > { %v6710_v60 = vpop.f32.mrf.mxu0 }
 0xdb3   : > { %v3740_v28 = vmul.f32 %v6710_v60, %v6259_v51 }
 0xdb4   : > { %v3448_v26 = vpop.f32.mrf.mxu0 }
 0xdb5   : > { %v3738_v20 = vmul.f32 %v6259_v51, %v3448_v26 }
 0xdb6   : > { %v6713_v34 = vpop.f32.mrf.mxu0 }
 0xdb7   : > { %v3743_v23 = vmul.f32 %v6713_v34, %v6259_v51 }
 0xdb8   : > { %v3461_v2 = vpop.f32.mrf.mxu0 }
 0xdb9   : > { %v3741_v39 = vmul.f32 %v6259_v51, %v3461_v2 }
 0xdba   : > { %v6714_v15 = vpop.f32.mrf.mxu0 }
 0xdbb   : > { %v3744_v31 = vmul.f32 %v6714_v15, %v6259_v51 }
 0xdbc   : > { %v3464_v40 = vpop.f32.mrf.mxu0 }
 0xdbd   : > { %v3742_v7 = vmul.f32 %v6259_v51, %v3464_v40  ;;  %v6262_v40 = vld [vmem:[%s9422_s22 + $0x3] ss:$0 sm:$0xff] }
 0xdbe   : > { %v6717_v55 = vpop.f32.mrf.mxu0 }
 0xdbf   : > { %v3752_v46 = vmul.f32 %v6717_v55, %v6260_v30 }
 0xdc0   : > { %v3477_v61 = vpop.f32.mrf.mxu0 }
 0xdc1   : > { %v3760_v38 = vadd.f32 %v3752_v46, %v3739_v10  ;;  %v3750_v3 = vmul.f32 %v6260_v30, %v3477_v61 }
 0xdc2   : > { %v6718_v47 = vpop.f32.mrf.mxu0 }
 0xdc3   : > { %v3758_v13 = vadd.f32 %v3750_v3, %v3737_v50  ;;  %v3753_v41 = vmul.f32 %v6718_v47, %v6260_v30 }
 0xdc4   : > { %v3480_v22 = vpop.f32.mrf.mxu0 }
 0xdc5   : > { %v3761_v56 = vadd.f32 %v3753_v41, %v3740_v28  ;;  %v3751_v52 = vmul.f32 %v6260_v30, %v3480_v22 }
 0xdc6   : > { %v6721_v6 = vpop.f32.mrf.mxu0 }
 0xdc7   : > { %v3759_v4 = vadd.f32 %v3751_v52, %v3738_v20  ;;  %v3756_v19 = vmul.f32 %v6721_v6, %v6260_v30 }
 0xdc8   : > { %v3493_v32 = vpop.f32.mrf.mxu0 }
 0xdc9   : > { %v3764_v57 = vadd.f32 %v3756_v19, %v3743_v23  ;;  %v3754_v45 = vmul.f32 %v6260_v30, %v3493_v32 }
 0xdca   : > { %v6722_v16 = vpop.f32.mrf.mxu0 }
 0xdcb   : > { %v3762_v0 = vadd.f32 %v3754_v45, %v3741_v39  ;;  %v3757_v53 = vmul.f32 %v6722_v16, %v6260_v30 }
 0xdcc   : > { %v3496_v59 = vpop.f32.mrf.mxu0 }
 0xdcd   : > { %v3765_v44 = vadd.f32 %v3757_v53, %v3744_v31  ;;  %v3755_v24 = vmul.f32 %v6260_v30, %v3496_v59 }
 0xdce   : > { %v6725_v21 = vpop.f32.mrf.mxu0 }
 0xdcf   : > { %v3763_v14 = vadd.f32 %v3755_v24, %v3742_v7  ;;  %v3773_v25 = vmul.f32 %v6725_v21, %v6261_v29 }
 0xdd0   : > { %v3509_v1 = vpop.f32.mrf.mxu0 }
 0xdd1   : > { %v3781_v49 = vadd.f32 %v3773_v25, %v3760_v38  ;;  %v3771_v8 = vmul.f32 %v6261_v29, %v3509_v1 }
 0xdd2   : > { %v6726_v54 = vpop.f32.mrf.mxu0 }
 0xdd3   : > { %v3779_v33 = vadd.f32 %v3771_v8, %v3758_v13  ;;  %v3774_v35 = vmul.f32 %v6726_v54, %v6261_v29 }
 0xdd4   : > { %v3512_v36 = vpop.f32.mrf.mxu0 }
 0xdd5   : > { %v3782_v58 = vadd.f32 %v3774_v35, %v3761_v56  ;;  %v3772_v42 = vmul.f32 %v6261_v29, %v3512_v36 }
 0xdd6   : > { %v6729_v27 = vpop.f32.mrf.mxu0 }
 0xdd7   : > { %v3780_v43 = vadd.f32 %v3772_v42, %v3759_v4  ;;  %v3777_v18 = vmul.f32 %v6729_v27, %v6261_v29 }
 0xdd8   : > { %v3525_v17 = vpop.f32.mrf.mxu0 }
 0xdd9   : > { %v3785_v60 = vadd.f32 %v3777_v18, %v3764_v57  ;;  %v3775_v26 = vmul.f32 %v6261_v29, %v3525_v17 }
 0xdda   : > { %v6730_v34 = vpop.f32.mrf.mxu0 }
 0xddb   : > { %v3783_v2 = vadd.f32 %v3775_v26, %v3762_v0  ;;  %v3778_v15 = vmul.f32 %v6730_v34, %v6261_v29 }
 0xddc   : > { %v3528_v51 = vpop.f32.mrf.mxu0 }
 0xddd   : > { %v3786_v30 = vadd.f32 %v3778_v15, %v3765_v44  ;;  %v3776_v55 = vmul.f32 %v6261_v29, %v3528_v51  ;;  %v6263_v15 = vld [vmem:[%s9422_s22 + $0x4] ss:$0 sm:$0xff] }
 0xdde   : > { %v6733_v10 = vpop.f32.mrf.mxu0 }
 0xddf   : > { %v3784_v46 = vadd.f32 %v3776_v55, %v3763_v14  ;;  %v3794_v61 = vmul.f32 %v6733_v10, %v6262_v40  ;;  %v6264_v55 = vld [vmem:[%s9422_s22 + $0x5] ss:$0 sm:$0xff] }
 0xde0   : > { %v3541_v50 = vpop.f32.mrf.mxu0 }
 0xde1   : > { %v3802_v38 = vadd.f32 %v3794_v61, %v3781_v49  ;;  %v3792_v3 = vmul.f32 %v6262_v40, %v3541_v50 }
 0xde2   : > { %v6734_v47 = vpop.f32.mrf.mxu0 }
 0xde3   : > { %v3800_v28 = vadd.f32 %v3792_v3, %v3779_v33  ;;  %v3795_v13 = vmul.f32 %v6734_v47, %v6262_v40  ;;  %v8589_v47 = vld [vmem:[%s9422_s22 + $0x6] ss:$0 sm:$0xff] }
 0xde4   : > { %v3544_v41 = vpop.f32.mrf.mxu0 }
 0xde5   : > { %v3803_v22 = vadd.f32 %v3795_v13, %v3782_v58  ;;  %v3793_v20 = vmul.f32 %v6262_v40, %v3544_v41 }
 0xde6   : > { %v6737_v56 = vpop.f32.mrf.mxu0 }
 0xde7   : > { %v3801_v52 = vadd.f32 %v3793_v20, %v3780_v43  ;;  %v3798_v6 = vmul.f32 %v6737_v56, %v6262_v40 }
 0xde8   : > { %v3557_v23 = vpop.f32.mrf.mxu0 }
 0xde9   : > { %v3806_v4 = vadd.f32 %v3798_v6, %v3785_v60  ;;  %v3796_v19 = vmul.f32 %v6262_v40, %v3557_v23 }
 0xdea   : > { %v6738_v32 = vpop.f32.mrf.mxu0 }
 0xdeb   : > { %v3804_v39 = vadd.f32 %v3796_v19, %v3783_v2  ;;  %v3799_v57 = vmul.f32 %v6738_v32, %v6262_v40  ;;  %v8592_v32 = vld [vmem:[%s9422_s22 + $0x7] ss:$0 sm:$0xff] }
 0xdec   : > { %v3560_v45 = vpop.f32.mrf.mxu0 }
 0xded   : > { %v3807_v16 = vadd.f32 %v3799_v57, %v3786_v30  ;;  %v3797_v31 = vmul.f32 %v6262_v40, %v3560_v45 }
 0xdee   : > { %v6741_v0 = vpop.f32.mrf.mxu0 }
 0xdef   : > { %v3805_v53 = vadd.f32 %v3797_v31, %v3784_v46  ;;  %v3815_v40 = vmul.f32 %v6741_v0, %v6263_v15 }
 0xdf0   : > { %v3573_v59 = vpop.f32.mrf.mxu0 }
 0xdf1   : > { %v3813_v30 = vmul.f32 %v6263_v15, %v3573_v59  ;;  %v3823_v56 = vadd.f32 %v3815_v40, %v3802_v38 }
 0xdf2   : > { %v6742_v29 = vpop.f32.mrf.mxu0 }
 0xdf3   : > { %v3816_v46 = vmul.f32 %v6742_v29, %v6263_v15  ;;  %v3821_v6 = vadd.f32 %v3813_v30, %v3800_v28 }
 0xdf4   : > { %v3576_v7 = vpop.f32.mrf.mxu0 }
 0xdf5   : > { %v3814_v61 = vmul.f32 %v6263_v15, %v3576_v7  ;;  %v3824_v45 = vadd.f32 %v3816_v46, %v3803_v22 }
 0xdf6   : > { %v6745_v44 = vpop.f32.mrf.mxu0 }
 0xdf7   : > { %v3819_v50 = vmul.f32 %v6745_v44, %v6263_v15  ;;  %v3822_v31 = vadd.f32 %v3814_v61, %v3801_v52 }
 0xdf8   : > { %v3589_v24 = vpop.f32.mrf.mxu0 }
 0xdf9   : > { %v3817_v3 = vmul.f32 %v6263_v15, %v3589_v24  ;;  %v3827_v29 = vadd.f32 %v3819_v50, %v3806_v4 }
 0xdfa   : > { %v6746_v21 = vpop.f32.mrf.mxu0 }
 0xdfb   : > { %v3820_v41 = vmul.f32 %v6746_v21, %v6263_v15  ;;  %v3825_v7 = vadd.f32 %v3817_v3, %v3804_v39 }
 0xdfc   : > { %v3592_v14 = vpop.f32.mrf.mxu0 }
 0xdfd   : > { %v3818_v23 = vmul.f32 %v6263_v15, %v3592_v14  ;;  %v3828_v21 = vadd.f32 %v3820_v41, %v3807_v16 }
 0xdfe   : > { %v6749_v25 = vpop.f32.mrf.mxu0 }
 0xdff   : > { %v3836_v20 = vmul.f32 %v6749_v25, %v6264_v55  ;;  %v3826_v14 = vadd.f32 %v3818_v23, %v3805_v53  ;;  %v6268_v23 = vld [vmem:[%s9423_s23] ss:$0 sm:$0xff]  ;;  %s9428_s23 = sld [smem:[#allocation16_spill]] }
 0xe00   : > { %v3605_v1 = vpop.f32.mrf.mxu0 }
 0xe01   : > { %v3834_v19 = vmul.f32 %v6264_v55, %v3605_v1  ;;  %v3844_v25 = vadd.f32 %v3836_v20, %v3823_v56 }
 0xe02   : > { %v6750_v49 = vpop.f32.mrf.mxu0 }
 0xe03   : > { %v3837_v0 = vmul.f32 %v6750_v49, %v6264_v55  ;;  %v3842_v1 = vadd.f32 %v3834_v19, %v3821_v6  ;;  %v8598_v49 = vld [vmem:[%s9422_s22 + $0x8] ss:$0 sm:$0xff] }
 0xe04   : > { %v3608_v8 = vpop.f32.mrf.mxu0 }
 0xe05   : > { %v3835_v44 = vmul.f32 %v6264_v55, %v3608_v8  ;;  %v3845_v40 = vadd.f32 %v3837_v0, %v3824_v45 }
 0xe06   : > { %v6753_v54 = vpop.f32.mrf.mxu0 }
 0xe07   : > { %v3840_v24 = vmul.f32 %v6753_v54, %v6264_v55  ;;  %v3843_v8 = vadd.f32 %v3835_v44, %v3822_v31 }
 0xe08   : > { %v3621_v33 = vpop.f32.mrf.mxu0 }
 0xe09   : > { %v3838_v15 = vmul.f32 %v6264_v55, %v3621_v33  ;;  %v3848_v16 = vadd.f32 %v3840_v24, %v3827_v29 }
 0xe0a   : > { %v6754_v35 = vpop.f32.mrf.mxu0 }
 0xe0b   : > { %v3841_v22 = vmul.f32 %v6754_v35, %v6264_v55  ;;  %v3846_v46 = vadd.f32 %v3838_v15, %v3825_v7 }
 0xe0c   : > { %v3624_v36 = vpop.f32.mrf.mxu0 }
 0xe0d   : > { %v3839_v54 = vmul.f32 %v6264_v55, %v3624_v36  ;;  %v3849_v61 = vadd.f32 %v3841_v22, %v3828_v21 }
 0xe0e   : > { %v6757_v58 = vpop.f32.mrf.mxu0 }
 0xe0f   : > { %v3857_v59 = vmul.f32 %v6757_v58, %v8589_v47  ;;  %v3847_v55 = vadd.f32 %v3839_v54, %v3826_v14 }
 0xe10   : > { %v3637_v42 = vpop.f32.mrf.mxu0 }
 0xe11   : > { %v3855_v38 = vmul.f32 %v8589_v47, %v3637_v42  ;;  %v3865_v58 = vadd.f32 %v3857_v59, %v3844_v25 }
 0xe12   : > { %v6758_v27 = vpop.f32.mrf.mxu0 }
 0xe13   : > { %v3858_v4 = vmul.f32 %v6758_v27, %v8589_v47 }
 0xe14   : > { %v3640_v43 = vpop.f32.mrf.mxu0 }
 0xe15   : > { %v3856_v42 = vmul.f32 %v8589_v47, %v3640_v43  ;;  %v3866_v3 = vadd.f32 %v3858_v4, %v3845_v40 }
 0xe16   : > { %v6761_v18 = vpop.f32.mrf.mxu0 }
 0xe17   : > { %v3861_v50 = vmul.f32 %v6761_v18, %v8589_v47  ;;  %v3864_v20 = vadd.f32 %v3856_v42, %v3843_v8 }
 0xe18   : > { %v8580_v17 = vpop.f32.mrf.mxu0 }
 0xe19   : > { %v3869_v31 = vadd.f32 %v3861_v50, %v3848_v16 }
 0xe1a   : > { %v8582_v60 = vpop.f32.mrf.mxu0 }
 0xe1b   : > { %v3862_v0 = vmul.f32 %v8582_v60, %v8589_v47 }
 0xe1c   : > { %v8584_v26 = vpop.f32.mrf.mxu0 }
 0xe1e   : > { %v6765_v34 = vpop.f32.mrf.mxu0 }
 0xe1f   : > { %v3878_v28 = vmul.f32 %v6765_v34, %v8592_v32  ;;  %v3863_v34 = vadd.f32 %v3855_v38, %v3842_v1  ;;  %v3870_v1 = vadd.f32 %v3862_v0, %v3849_v61 }
 0xe20   : > { %v3669_v2 = vpop.f32.mrf.mxu0 }
 0xe21   : > { %v3876_v39 = vmul.f32 %v8592_v32, %v3669_v2  ;;  %v3886_v53 = vadd.f32 %v3878_v28, %v3865_v58 }
 0xe22   : > { %v6766_v51 = vpop.f32.mrf.mxu0 }
 0xe23   : > { %v3879_v33 = vmul.f32 %v6766_v51, %v8592_v32  ;;  %v3884_v41 = vadd.f32 %v3876_v39, %v3863_v34  ;;  %v3859_v51 = vmul.f32 %v8589_v47, %v8580_v17 }
 0xe24   : > { %v3672_v10 = vpop.f32.mrf.mxu0 }
 0xe25   : > { %v3877_v27 = vmul.f32 %v8592_v32, %v3672_v10  ;;  %v3887_v19 = vadd.f32 %v3879_v33, %v3866_v3  ;;  %v3867_v21 = vadd.f32 %v3859_v51, %v3846_v46  ;;  %v9424_v3 = vld [vmem:[#allocation29_spill] sm:$0xff] }
 0xe26   : > { %v6769_v13 = vpop.f32.mrf.mxu0 }
 0xe27   : > { %v3882_v56 = vmul.f32 %v6769_v13, %v8592_v32  ;;  %v3885_v59 = vadd.f32 %v3877_v27, %v3864_v20 }
 0xe28   : > { %v3685_v57 = vpop.f32.mrf.mxu0 }
 0xe29   : > { %v3880_v29 = vmul.f32 %v8592_v32, %v3685_v57  ;;  %v3890_v25 = vadd.f32 %v3882_v56, %v3869_v31 }
 0xe2a   : > { %v6770_v5 = vpop.f32.mrf.mxu0 }
 0xe2b   : > { %v3883_v38 = vmul.f32 %v6770_v5, %v8592_v32  ;;  %v3888_v15 = vadd.f32 %v3880_v29, %v3867_v21 }
 0xe2c   : > { %v3688_v52 = vpop.f32.mrf.mxu0 }
 0xe2d   : > { %v3881_v22 = vmul.f32 %v8592_v32, %v3688_v52  ;;  %v3891_v39 = vadd.f32 %v3883_v38, %v3870_v1 }
 0xe2e   : > { %v6773_v30 = vpop.f32.mrf.mxu0 }
 0xe2f   : > { %v3899_v35 = vmul.f32 %v6773_v30, %v8598_v49 }
 0xe30   : > { %v3701_v2 = vpop.f32.mrf.mxu0 }
 0xe31   : > { %v3907_v36 = vadd.f32 %v3899_v35, %v3886_v53  ;;  %v3897_v43 = vmul.f32 %v8598_v49, %v3701_v2 }
 0xe32   : > { %v6774_v6 = vpop.f32.mrf.mxu0 }
 0xe33   : > { %v3915_v18 = vadd.f32 %v3907_v36, %v8495_v9  ;;  %v3905_v45 = vadd.f32 %v3897_v43, %v3884_v41  ;;  %v3900_v10 = vmul.f32 %v6774_v6, %v8598_v49  ;;  %v3860_v9 = vmul.f32 %v8589_v47, %v8584_v26 }
 0xe34   : > { %v3704_v7 = vpop.f32.mrf.mxu0 }
 0xe35   : > { %v3913_v17 = vadd.f32 %v3905_v45, %v8502_v48  ;;  %v3908_v44 = vadd.f32 %v3900_v10, %v3887_v19  ;;  %v3898_v13 = vmul.f32 %v8598_v49, %v3704_v7  ;;  %v8619_v24 = vadd.f32 %v6268_v23, %v3915_v18 }
 0xe36   : > { %v6777_v28 = vpop.f32.mrf.mxu0  ;;  %v3868_v4 = vadd.f32 %v3860_v9, %v3847_v55 }
 0xe37   : > { %v3916_v60 = vadd.f32 %v3908_v44, %v8490_v12  ;;  %v3906_v14 = vadd.f32 %v3898_v13, %v3885_v59  ;;  %v3903_v57 = vmul.f32 %v6777_v28, %v8598_v49  ;;  %v3944_v48 = vsel %vm1361_vm1, %v8619_v24, 0.0 }
 0xe38   : > { %3945 = vadd.xlane.f32.xlu0 %v3944_v48  ;;  %v3717_v40 = vpop.f32.mrf.mxu0  ;;  %v8629_v58 = vadd.f32 %v6268_v23, %v3913_v17 }
 0xe39   : > { %v3914_v26 = vadd.f32 %v3906_v14, %v8498_v37  ;;  %v3911_v5 = vadd.f32 %v3903_v57, %v3890_v25  ;;  %v3901_v47 = vmul.f32 %v8598_v49, %v3717_v40  ;;  %v8633_v12 = vadd.f32 %v6268_v23, %v3916_v60 }
 0xe3a   : > { %v6778_v8 = vpop.f32.mrf.mxu0  ;;  %v3938_v16 = vsel %vm1361_vm1, %v8629_v58, 0.0  ;;  %v3889_v37 = vadd.f32 %v3881_v22, %v3868_v4 }
 0xe3b   : > { %v3919_v54 = vadd.f32 %v3911_v5, %v8478_v62  ;;  %v3909_v32 = vadd.f32 %v3901_v47, %v3888_v15  ;;  %v3904_v52 = vmul.f32 %v6778_v8, %v8598_v49  ;;  %v3947_v42 = vsel %vm1361_vm1, %v8633_v12, 0.0 }
 0xe3c   : > { %3939 = vadd.xlane.f32.xlu0 %v3938_v16  ;;  %3948 = vadd.xlane.f32.xlu1 %v3947_v42  ;;  %v3720_v30 = vpop.f32.mrf.mxu0  ;;  %v8641_v34 = vadd.f32 %v6268_v23, %v3914_v26  ;;  %v4073_v42 = vld [vmem:[%s9425_s11 + $0x18] sm:$0xff] }
 0xe3d   : > { %v3917_v53 = vadd.f32 %v3909_v32, %v8484_v63  ;;  %v3912_v33 = vadd.f32 %v3904_v52, %v3891_v39  ;;  %v3902_v35 = vmul.f32 %v8598_v49, %v3720_v30  ;;  %v8645_v46 = vadd.f32 %v6268_v23, %v3919_v54  ;;  %v4072_v52 = vld [vmem:[%s9425_s11 + $0x10] sm:$0xff] }
 0xe3e   : > { %v3941_v62 = vsel %vm1361_vm1, %v8641_v34, 0.0  ;;  %v4079_v30 = vpack.c.bf16 %v4073_v42, %v4072_v52 }
 0xe3f   : > { %v3920_v61 = vadd.f32 %v3912_v33, %v8480_v11  ;;  %v3910_v50 = vadd.f32 %v3902_v35, %v3889_v37  ;;  %v3956_v27 = vsel %vm1361_vm1, %v8645_v46, 0.0  ;;  %v8652_v2 = vadd.f32 %v6268_v23, %v3917_v53  ;;  %v4070_v37 = vld [vmem:[%s9425_s11] sm:$0xff]  ;;  %v4071_v53 = vld [vmem:[%s9425_s11 + $0x8] sm:$0xff] }
 0xe40   : > { %3942 = vadd.xlane.f32.xlu1 %v3941_v62  ;;  %3957 = vadd.xlane.f32.xlu0 %v3956_v27  ;;  %v4078_v33 = vpack.c.bf16 %v4071_v53, %v4070_v37 }
 0xe41   : > { %v3918_v63 = vadd.f32 %v3910_v50, %v9424_v3  ;;  %v8655_v41 = vadd.f32 %v6268_v23, %v3920_v61  ;;  %v3950_v49 = vsel %vm1361_vm1, %v8652_v2, 0.0  ;;  %6779 = vmatprep.subr.bf16.mxu1 %v4079_v30 }
 0xe42   : > { %6780 = vmatpush3.bf16.msra.mxu1 %v4079_v30 }
 0xe43   : > { %v3959_v36 = vsel %vm1361_vm1, %v8655_v41, 0.0  ;;  %v8661_v43 = vadd.f32 %v6268_v23, %v3918_v63  ;;  %6781 = vmatprep.subr.bf16.mxu1 %v4078_v33 }
 0xe44   : > { %3951 = vadd.xlane.f32.xlu0 %v3950_v49  ;;  %3960 = vadd.xlane.f32.xlu1 %v3959_v36 }
 0xe45   : > { %v3953_v11 = vsel %vm1361_vm1, %v8661_v43, 0.0 }
 0xe46   : > { %6782 = vmatpush3.bf16.msra.mxu1 %v4078_v33 }
 0xe48   : > { %3954 = vadd.xlane.f32.xlu1 %v3953_v11 }
 0xec1   : > { %v3946_v55 = vpop.xlane.xlu0 %3945 }
 0xec2   : > { %v3964_v20 = vmul.f32 0.03125, %v3946_v55 }
 0xec4   : > { %v8666_v51 = vsub.f32 %v8619_v24, %v3964_v20 }
 0xec5   : > { %v3940_v56 = vpop.xlane.xlu0 %3939  ;;  %v3949_v6 = vpop.xlane.xlu1 %3948 }
 0xec6   : > { %v3962_v19 = vmul.f32 0.03125, %v3940_v56  ;;  %v3965_v18 = vmul.f32 0.03125, %v3949_v6  ;;  %v3980_v45 = vmul.f32 %v8666_v51, %v8666_v51 }
 0xec8   : > { %v8671_v23 = vsub.f32 %v8629_v58, %v3962_v19  ;;  %v8674_v10 = vsub.f32 %v8633_v12, %v3965_v18  ;;  %v3992_v31 = vsel %vm1361_vm1, %v3980_v45, 0.0 }
 0xec9   : > { %v3943_v0 = vpop.xlane.xlu1 %3942  ;;  %v3958_v59 = vpop.xlane.xlu0 %3957  ;;  %3993 = vadd.xlane.f32.xlu0 %v3992_v31 }
 0xeca   : > { %v3963_v29 = vmul.f32 0.03125, %v3943_v0  ;;  %v3968_v7 = vmul.f32 0.03125, %v3958_v59  ;;  %v3978_v17 = vmul.f32 %v8671_v23, %v8671_v23  ;;  %v3981_v44 = vmul.f32 %v8674_v10, %v8674_v10 }
 0xecc   : > { %v8682_v13 = vsub.f32 %v8641_v34, %v3963_v29  ;;  %v8685_v21 = vsub.f32 %v8645_v46, %v3968_v7  ;;  %v3986_v9 = vsel %vm1361_vm1, %v3978_v17, 0.0  ;;  %v3995_v25 = vsel %vm1361_vm1, %v3981_v44, 0.0 }
 0xecd   : > { %3987 = vadd.xlane.f32.xlu0 %v3986_v9  ;;  %v3952_v38 = vpop.xlane.xlu0 %3951  ;;  %v3961_v28 = vpop.xlane.xlu1 %3960  ;;  %3996 = vadd.xlane.f32.xlu1 %v3995_v25 }
 0xece   : > { %v3966_v60 = vmul.f32 0.03125, %v3952_v38  ;;  %v3969_v14 = vmul.f32 0.03125, %v3961_v28  ;;  %v3984_v57 = vmul.f32 %v8685_v21, %v8685_v21  ;;  %v3979_v48 = vmul.f32 %v8682_v13, %v8682_v13 }
 0xed0   : > { %v8694_v1 = vsub.f32 %v8652_v2, %v3966_v60  ;;  %v8697_v15 = vsub.f32 %v8655_v41, %v3969_v14  ;;  %v4004_v22 = vsel %vm1361_vm1, %v3984_v57, 0.0  ;;  %v3989_v40 = vsel %vm1361_vm1, %v3979_v48, 0.0  ;;  %v6269_v48 = vld [vmem:[%s9426_s15] ss:$0 sm:$0xff]  ;;  %s9429_s15 = sld [smem:[#allocation17_spill]] }
 0xed1   : > { %4005 = vadd.xlane.f32.xlu0 %v4004_v22  ;;  %3990 = vadd.xlane.f32.xlu1 %v3989_v40  ;;  %v3955_v26 = vpop.xlane.xlu1 %3954 }
 0xed2   : > { %v3967_v5 = vmul.f32 0.03125, %v3955_v26  ;;  %v3982_v47 = vmul.f32 %v8694_v1, %v8694_v1  ;;  %v3985_v4 = vmul.f32 %v8697_v15, %v8697_v15 }
 0xed4   : > { %v8706_v39 = vsub.f32 %v8661_v43, %v3967_v5  ;;  %v3998_v8 = vsel %vm1361_vm1, %v3982_v47, 0.0  ;;  %v4007_v16 = vsel %vm1361_vm1, %v3985_v4, 0.0 }
 0xed5   : > { %3999 = vadd.xlane.f32.xlu0 %v3998_v8  ;;  %4008 = vadd.xlane.f32.xlu1 %v4007_v16  ;;  %v6270_v16 = vld [vmem:[%s9427_s18] ss:$0 sm:$0xff]  ;;  %s9430_s18 = sld [smem:[#allocation15_spill]] }
 0xed6   : > { %v3983_v54 = vmul.f32 %v8706_v39, %v8706_v39 }
 0xed8   : > { %v4001_v32 = vsel %vm1361_vm1, %v3983_v54, 0.0 }
 0xed9   : > { %4002 = vadd.xlane.f32.xlu1 %v4001_v32 }
 0xf52   : > { %v3994_v35 = vpop.xlane.xlu0 %3993 }
 0xf53   : > { %v4012_v62 = vmul.f32 0.03125, %v3994_v35 }
 0xf55   : > { %v4020_v61 = vadd.f32 1e-06, %v4012_v62 }
 0xf56   : > { %v3988_v50 = vpop.xlane.xlu0 %3987  ;;  %v3997_v27 = vpop.xlane.xlu1 %3996 }
 0xf57   : > { %v4010_v3 = vmul.f32 0.03125, %v3988_v50  ;;  %v4013_v63 = vmul.f32 0.03125, %v3997_v27  ;;  %7311 = vrsqrt.f32 %v4020_v61 }
 0xf59   : > { %v4018_v49 = vadd.f32 1e-06, %v4010_v3  ;;  %v4021_v36 = vadd.f32 1e-06, %v4013_v63 }
 0xf5a   : > { %v4006_v11 = vpop.xlane.xlu0 %4005  ;;  %v3991_v55 = vpop.xlane.xlu1 %3990 }
 0xf5b   : > { %7313 = vrsqrt.f32 %v4018_v49  ;;  %v4016_v20 = vmul.f32 0.03125, %v4006_v11  ;;  %v4011_v56 = vmul.f32 0.03125, %v3991_v55  ;;  %v7159_v49 = vld [vmem:[%s9428_s23] sm:$0xff]   ;;  %v7162_v11 = vld [vmem:[%s9428_s23 + $0x18] sm:$0xff]   ;;  %v4364_v55 = vld [vmem:[%s9429_s15 + $0xf0] sm:$0xff] }
 0xf5c   : > { %7315 = vrsqrt.f32 %v4021_v36  ;;  %v7161_v36 = vld [vmem:[%s9428_s23 + $0x10] sm:$0xff]  }
 0xf5d   : > { %v4024_v6 = vadd.f32 1e-06, %v4016_v20  ;;  %v4019_v19 = vadd.f32 1e-06, %v4011_v56  ;;  %v4365_v20 = vld [vmem:[%s9429_s15 + $0xf8] sm:$0xff]  ;;  %v4348_v56 = vld [vmem:[%s9429_s15 + $0x70] sm:$0xff] }
 0xf5e   : > { %v4000_v18 = vpop.xlane.xlu0 %3999  ;;  %v4009_v45 = vpop.xlane.xlu1 %4008 }
 0xf5f   : > { %7317 = vrsqrt.f32 %v4024_v6  ;;  %v4014_v31 = vmul.f32 0.03125, %v4000_v18  ;;  %v4017_v0 = vmul.f32 0.03125, %v4009_v45  ;;  %v4417_v6 = vpack.c.bf16 %v4365_v20, %v4364_v55  ;;  %v4362_v18 = vld [vmem:[%s9429_s15 + $0xe0] sm:$0xff]  ;;  %v4363_v45 = vld [vmem:[%s9429_s15 + $0xe8] sm:$0xff]  ;;  %v4352_v55 = vld [vmem:[%s9429_s15 + $0x90] sm:$0xff] }
 0xf60   : > { %7319 = vrsqrt.f32 %v4019_v19  ;;  %v4349_v19 = vld [vmem:[%s9429_s15 + $0x78] sm:$0xff] }
 0xf61   : > { %v4022_v59 = vadd.f32 1e-06, %v4014_v31  ;;  %v4025_v29 = vadd.f32 1e-06, %v4017_v0  ;;  %v4409_v31 = vpack.c.bf16 %v4349_v19, %v4348_v56  ;;  %v4416_v0 = vpack.c.bf16 %v4363_v45, %v4362_v18  ;;  %v4353_v20 = vld [vmem:[%s9429_s15 + $0x98] sm:$0xff]  ;;  %v4336_v45 = vld [vmem:[%s9429_s15 + $0x10] sm:$0xff] }
 0xf62   : > { %v4003_v7 = vpop.xlane.xlu1 %4002  ;;  %v4411_v18 = vpack.c.bf16 %v4353_v20, %v4352_v55 }
 0xf63   : > { %7321 = vrsqrt.f32 %v4022_v59  ;;  %v4015_v17 = vmul.f32 0.03125, %v4003_v7  ;;  %v4346_v59 = vld [vmem:[%s9429_s15 + $0x60] sm:$0xff]  ;;  %v4360_v7 = vld [vmem:[%s9429_s15 + $0xd0] sm:$0xff] }
 0xf64   : > { %7323 = vrsqrt.f32 %v4025_v29  ;;  %v7312_v9 = vpop.eup %7311  ;;  %v4347_v29 = vld [vmem:[%s9429_s15 + $0x68] sm:$0xff] }
 0xf65   : > { %v4023_v44 = vadd.f32 1e-06, %v4015_v17  ;;  %v4036_v14 = vmul.f32 %v7312_v9, %v8666_v51  ;;  %v4361_v17 = vld [vmem:[%s9429_s15 + $0xd8] sm:$0xff] }
 0xf66   : > { %v4415_v9 = vpack.c.bf16 %v4361_v17, %v4360_v7  ;;  %v4350_v7 = vld [vmem:[%s9429_s15 + $0x80] sm:$0xff]  ;;  %v4351_v17 = vld [vmem:[%s9429_s15 + $0x88] sm:$0xff] }
 0xf67   : > { %7325 = vrsqrt.f32 %v4023_v44  ;;  %v4050_v4 = vmul.f32 %v6269_v48, %v4036_v14  ;;  %v4408_v44 = vpack.c.bf16 %v4347_v29, %v4346_v59 }
 0xf68   : > { %v7314_v25 = vpop.eup %7313 }
 0xf69   : > { %v7316_v38 = vpop.eup %7315  ;;  %v4034_v60 = vmul.f32 %v7314_v25, %v8671_v23  ;;  %v4064_v30 = vadd.f32 %v6270_v16, %v4050_v4  ;;  %v4344_v25 = vld [vmem:[%s9429_s15 + $0x50] sm:$0xff] }
 0xf6a   : > { %v4037_v28 = vmul.f32 %v7316_v38, %v8674_v10  ;;  %v4345_v38 = vld [vmem:[%s9429_s15 + $0x58] sm:$0xff]  ;;  %v4340_v4 = vld [vmem:[%s9429_s15 + $0x30] sm:$0xff] }
 0xf6b   : > { %v4048_v5 = vmul.f32 %v6269_v48, %v4034_v60  ;;  %v4359_v60 = vld [vmem:[%s9429_s15 + $0xc8] sm:$0xff]  ;;  %v4407_v14 = vpack.c.bf16 %v4345_v38, %v4344_v25 }
 0xf6c   : > { %v7318_v57 = vpop.eup %7317  ;;  %v4051_v40 = vmul.f32 %v6269_v48, %v4037_v28  ;;  %v4358_v28 = vld [vmem:[%s9429_s15 + $0xc0] sm:$0xff]  ;;  %v4335_v25 = vld [vmem:[%s9429_s15 + $0x8] sm:$0xff] }
 0xf6d   : > { %v7320_v22 = vpop.eup %7319  ;;  %v4040_v47 = vmul.f32 %v7318_v57, %v8685_v21  ;;  %v4062_v23 = vadd.f32 %v6270_v16, %v4048_v5  ;;  %v4414_v57 = vpack.c.bf16 %v4359_v60, %v4358_v28 }
 0xf6e   : > { %v4035_v26 = vmul.f32 %v7320_v22, %v8682_v13  ;;  %v4065_v52 = vadd.f32 %v6270_v16, %v4051_v40  ;;  %v4343_v22 = vld [vmem:[%s9429_s15 + $0x48] sm:$0xff]  ;;  %v4356_v40 = vld [vmem:[%s9429_s15 + $0xb0] sm:$0xff] }
 0xf6f   : > { %v4054_v37 = vmul.f32 %v6269_v48, %v4040_v47 }
 0xf70   : > { %v7322_v8 = vpop.eup %7321  ;;  %v4049_v54 = vmul.f32 %v6269_v48, %v4035_v26  ;;  %v4075_v35 = vpack.c.bf16 %v4065_v52, %v4064_v30  ;;  %v4357_v26 = vld [vmem:[%s9429_s15 + $0xb8] sm:$0xff] }
 0xf71   : > { %v7324_v32 = vpop.eup %7323  ;;  %v4038_v10 = vmul.f32 %v7322_v8, %v8694_v1  ;;  %v4068_v61 = vadd.f32 %v6270_v16, %v4054_v37  ;;  %v4413_v47 = vpack.c.bf16 %v4357_v26, %v4356_v40  ;;  %v4341_v8 = vld [vmem:[%s9429_s15 + $0x38] sm:$0xff] }
 0xf72   : > { %v4063_v42 = vadd.f32 %v6270_v16, %v4049_v54  ;;  %v4041_v51 = vmul.f32 %v7324_v32, %v8697_v15  ;;  %v4355_v54 = vld [vmem:[%s9429_s15 + $0xa8] sm:$0xff]  ;;  %v4405_v32 = vpack.c.bf16 %v4341_v8, %v4340_v4 }
 0xf73   : > { %v4052_v62 = vmul.f32 %v6269_v48, %v4038_v10  ;;  %v6271_v10 = vld [vmem:[%s9430_s18] ss:$0 sm:$0xff]  ;;  %s9384_s18 = smov 32  }
 0xf74   : > { %v7326_v53 = vpop.eup %7325  ;;  %v4074_v33 = vpack.c.bf16 %v4063_v42, %v4062_v23  ;;  %v4055_v13 = vmul.f32 %v6269_v48, %v4041_v51 }
 0xf75   : > { %v4039_v21 = vmul.f32 %v7326_v53, %v8706_v39  ;;  %v4066_v15 = vadd.f32 %v6270_v16, %v4052_v62  ;;  %v7160_v39 = vld [vmem:[%s9428_s23 + $0x8] sm:$0xff]  }
 0xf76   : > { %6783 = vmatprep.mubr.msk.bf16.mxu1 %vm1361_vm1, %v4074_v33  ;;  %v4069_v50 = vadd.f32 %v6270_v16, %v4055_v13 }
 0xf77   : > { %6784 = vmatmul.mubr.msk.bf16.vlgmr.msra.gmra.mxu1 %vm1361_vm1, %v4075_v35  ;;  %v4053_v1 = vmul.f32 %v6269_v48, %v4039_v21  ;;  %v4342_v48 = vld [vmem:[%s9429_s15 + $0x40] sm:$0xff] }
 0xf78   : > { %v4077_v27 = vpack.c.bf16 %v4069_v50, %v4068_v61  ;;  %v4406_v5 = vpack.c.bf16 %v4343_v22, %v4342_v48 }
 0xf79   : > { %v4067_v3 = vadd.f32 %v6270_v16, %v4053_v1  ;;  %v4354_v16 = vld [vmem:[%s9429_s15 + $0xa0] sm:$0xff] }
 0xf7a   : > { %6791 = vmatprep.subr.bf16.mxu1 %v4077_v27  ;;  %v4412_v52 = vpack.c.bf16 %v4355_v54, %v4354_v16 }
 0xf7b   : > { %6792 = vmatpush3.bf16.msra.mxu1 %v4077_v27  ;;  %v4076_v63 = vpack.c.bf16 %v4067_v3, %v4066_v15  ;;  %v4338_v15 = vld [vmem:[%s9429_s15 + $0x20] sm:$0xff]  ;;  %v4339_v3 = vld [vmem:[%s9429_s15 + $0x28] sm:$0xff] }
 0xf7d   : > { %6787 = vmatprep.mubr.msk.bf16.mxu1 %vm1361_vm1, %v4076_v63  ;;  %6793 = vmatprep.subr.bf16.mxu1 %v4076_v63 }
 0xf7f   : > { %6788 = vmatmul.mubr.msk.bf16.gmra.mxu1 %vm1361_vm1, %v4077_v27 }
 0xf80   : > { %6794 = vmatpush3.bf16.msra.mxu1 %v4076_v63  ;;  %6799 = vmatprep.mubr.msk.bf16.mxu1 %vm1974_vm3, %v7159_v49  ;;  %v4404_v49 = vpack.c.bf16 %v4339_v3, %v4338_v15 }
 0xf81   : > { %6795 = vmatprep.subr.bf16.mxu1 %v4075_v35 }
 0xf84   : > { %6796 = vmatpush3.bf16.msra.mxu1 %v4075_v35 }
 0xf85   : > { %6797 = vmatprep.subr.bf16.mxu1 %v4074_v33 }
 0xf88   : > { %6798 = vmatpush3.bf16.msra.mxu1 %v4074_v33 }
 0xf89   : > { %6462 = vmatprep.subr.bf16.mxu1 %v4417_v6 }
 0xf8b   : > { %6800 = vmatmul.mubr.msk.bf16.vlgmr.msra.gmra.mxu1 %vm1974_vm3, %v7160_v39 }
 0xf8c   : > { %6803 = vmatprep.mubr.msk.bf16.mxu1 %vm1974_vm3, %v7161_v36  ;;  %6463 = vmatpush3.bf16.msra.mxu1 %v4409_v31  ;;  %v4337_v31 = vld [vmem:[%s9429_s15 + $0x18] sm:$0xff] }
 0xf8d   : > { %6464 = vmatprep.subr.bf16.mxu1 %v4416_v0  ;;  %v4403_v0 = vpack.c.bf16 %v4337_v31, %v4336_v45 }
 0xf90   : > { %6465 = vmatpush3.bf16.msra.mxu1 %v4408_v44  ;;  %v4410_v44 = vpack.c.bf16 %v4351_v17, %v4350_v7 }
 0xf91   : > { %6466 = vmatprep.subr.bf16.mxu1 %v4415_v9  ;;  %v4334_v9 = vld [vmem:[%s9429_s15] sm:$0xff] }
 0xf92   : > { %v4402_v28 = vpack.c.bf16 %v4335_v25, %v4334_v9  ;;  %v4381_v9 = vld [vmem:[%s9429_s15 + $0x178] sm:$0xff] }
 0xf93   : > { %6804 = vmatmul.mubr.msk.bf16.gmra.mxu1 %vm1974_vm3, %v7162_v11 }
 0xf94   : > { %6467 = vmatpush3.bf16.msra.mxu1 %v4407_v14  ;;  %v4396_v14 = vld [vmem:[%s9429_s15 + $0x1f0] sm:$0xff] }
 0xf95   : > { %6468 = vmatprep.subr.bf16.mxu1 %v4414_v57  ;;  %v4397_v57 = vld [vmem:[%s9429_s15 + $0x1f8] sm:$0xff] }
 0xf96   : > { %v4433_v40 = vpack.c.bf16 %v4397_v57, %v4396_v14  ;;  %v4394_v14 = vld [vmem:[%s9429_s15 + $0x1e0] sm:$0xff]  ;;  %v4395_v57 = vld [vmem:[%s9429_s15 + $0x1e8] sm:$0xff] }
 0xf98   : > { %6469 = vmatpush3.bf16.msra.mxu1 %v4406_v5 }
 0xf99   : > { %6470 = vmatprep.subr.bf16.mxu1 %v4413_v47 }
 0xf9c   : > { %6471 = vmatpush3.bf16.msra.mxu1 %v4405_v32 }
 0xf9d   : > { %6472 = vmatprep.subr.bf16.mxu1 %v4412_v52 }
 0xfa0   : > { %6473 = vmatpush3.bf16.msra.mxu1 %v4404_v49 }
 0xfa1   : > { %6474 = vmatprep.subr.bf16.mxu1 %v4411_v18 }
 0xfa4   : > { %6475 = vmatpush3.bf16.msra.mxu1 %v4403_v0 }
 0xfa5   : > { %6476 = vmatprep.subr.bf16.mxu1 %v4410_v44  ;;  %v4380_v44 = vld [vmem:[%s9429_s15 + $0x170] sm:$0xff] }
 0xfa8   : > { %6477 = vmatpush3.bf16.msra.mxu1 %v4402_v28 }
 0xfa9   : > { %6484 = vmatprep.subr.bf16.mxu1 %v4433_v40 }
0x1037   : > { %v6785_v23 = vpop.f32.mrf.mxu1 }
0x1038   : > { %v8762_v42 = vadd.f32 %v6785_v23, %v6271_v10 }
0x1039   : > { %v4133_v51 = vpop.f32.mrf.mxu1 }
0x103a   : > { %v8766_v33 = vadd.f32 %v6271_v10, %v4133_v51 }
0x103b   : > { %v6786_v37 = vpop.f32.mrf.mxu1 }
0x103c   : > { %v8764_v30 = vadd.f32 %v6786_v37, %v6271_v10 }
0x103d   : > { %v4136_v53 = vpop.f32.mrf.mxu1 }
0x103e   : > { %v7073_v13 = vpack.i.bf16 %v8764_v30, %v8762_v42  ;;  %v4645_v35 = vpack.c.bf16 %v8764_v30, %v8762_v42  ;;  %v8772_v21 = vadd.f32 %v6271_v10, %v4136_v53 }
0x103f   : > { %v6789_v62 = vpop.f32.mrf.mxu1 }
0x1040   : > { %v7068_v61 = vpack.i.bf16 %v8772_v21, %v8766_v33  ;;  %v4644_v50 = vpack.c.bf16 %v8772_v21, %v8766_v33  ;;  %v8778_v1 = vadd.f32 %v6789_v62, %v6271_v10 }
0x1041   : > { %v4149_v27 = vpop.f32.mrf.mxu1 }
0x1042   : > { %v8784_v36 = vadd.f32 %v6271_v10, %v4149_v27 }
0x1043   : > { %v6790_v63 = vpop.f32.mrf.mxu1 }
0x1044   : > { %v8782_v39 = vadd.f32 %v6790_v63, %v6271_v10 }
0x1045   : > { %v4152_v11 = vpop.f32.mrf.mxu1 }
0x1046   : > { %v7083_v56 = vpack.i.bf16 %v8782_v39, %v8778_v1  ;;  %v4647_v6 = vpack.c.bf16 %v8782_v39, %v8778_v1  ;;  %v8792_v19 = vadd.f32 %v6271_v10, %v4152_v11 }
0x1048   : > { %v7078_v59 = vpack.i.bf16 %v8792_v19, %v8784_v36  ;;  %v4646_v29 = vpack.c.bf16 %v8792_v19, %v8784_v36 }
0x104b   : > { %v6801_v38 = vpop.f32.mrf.mxu1 }
0x104c   : > { %v4279_v48 = vcombine.high %v6801_v38, %v6801_v38 }
0x104d   : > { %v4238_v60 = vpop.f32.mrf.mxu1 }
0x104e   : > { %v4277_v22 = vcombine.high %v4238_v60, %v4238_v60 }
0x104f   : > { %v6802_v26 = vpop.f32.mrf.mxu1 }
0x1050   : > { %v7038_v5 = vpack.i.bf16 %v4277_v22, %v4279_v48  ;;  %v4280_v54 = vcombine.high %v6802_v26, %v6802_v26 }
0x1051   : > { %v4241_v47 = vpop.f32.mrf.mxu1 }
0x1052   : > { %v7043_v4 = vpack.i.bf16 %v4241_v47, %v6802_v26  ;;  %v4278_v8 = vcombine.high %v4241_v47, %v4241_v47  ;;  %7039 = vrot.lane.b32.xlu0 %v7038_v5, %s9384_s18  ;;  %v4425_v5 = vpack.c.bf16 %v4381_v9, %v4380_v44  ;;  %v4372_v9 = vld [vmem:[%s9429_s15 + $0x130] sm:$0xff] }
0x1053   : > { %v6805_v16 = vpop.f32.mrf.mxu1 }
0x1054   : > { %7044 = vrot.lane.b32.xlu1 %v7043_v4, %s9383_s1  ;;  %v4283_v32 = vcombine.high %v6805_v16, %v6805_v16  ;;  %v7048_v10 = vpack.i.bf16 %v4278_v8, %v4280_v54  ;;  %v4432_v4 = vpack.c.bf16 %v4395_v57, %v4394_v14  ;;  %v4378_v8 = vld [vmem:[%s9429_s15 + $0x160] sm:$0xff]  ;;  %v4379_v54 = vld [vmem:[%s9429_s15 + $0x168] sm:$0xff] }
0x1055   : > { %v8808_v52 = vpop.f32.mrf.mxu1  ;;  %v4387_v14 = vld [vmem:[%s9429_s15 + $0x1a8] sm:$0xff] }
0x1056   : > { %v4281_v23 = vcombine.high %v8808_v52, %v8808_v52 }
0x1057   : > { %v6806_v51 = vpop.f32.mrf.mxu1 }
0x1058   : > { %v7053_v37 = vpack.i.bf16 %v4281_v23, %v4283_v32  ;;  %7049 = vrot.lane.b32.xlu1 %v7048_v10, %s9387_s28  ;;  %v4284_v53 = vcombine.high %v6806_v51, %v6806_v51  ;;  %v4392_v10 = vld [vmem:[%s9429_s15 + $0x1d0] sm:$0xff]  ;;  %v4393_v23 = vld [vmem:[%s9429_s15 + $0x1d8] sm:$0xff] }
0x1059   : > { %v4257_v62 = vpop.f32.mrf.mxu1 }
0x105a   : > { %v7058_v27 = vpack.i.bf16 %v4257_v62, %v6806_v51  ;;  %v4282_v15 = vcombine.high %v4257_v62, %v4257_v62 }
0x105c   : > { %v7063_v3 = vpack.i.bf16 %v4282_v15, %v4284_v53  ;;  %7054 = vrot.lane.b32.xlu1 %v7053_v37, %s9384_s18  ;;  %7059 = vrot.lane.b32.xlu0 %v7058_v27, %s9383_s1  ;;  %v4424_v53 = vpack.c.bf16 %v4379_v54, %v4378_v8  ;;  %v4431_v27 = vpack.c.bf16 %v4393_v23, %v4392_v10  ;;  %v4376_v15 = vld [vmem:[%s9429_s15 + $0x150] sm:$0xff]  ;;  %v4369_v54 = vld [vmem:[%s9429_s15 + $0x118] sm:$0xff]  ;;  %s9431_s1 = sld [smem:[#allocation18_spill]] }
0x105d   : > { %v4368_v8 = vld [vmem:[%s9429_s15 + $0x110] sm:$0xff]  ;;  %v4382_v10 = vld [vmem:[%s9429_s15 + $0x180] sm:$0xff]  ;;  %v4383_v23 = vld [vmem:[%s9429_s15 + $0x188] sm:$0xff]  ;;  %s9432_s18 = sld [smem:[#allocation21_spill]] }
0x1060   : > { %7064 = vrot.lane.b32.xlu1 %v7063_v3, %s9387_s28  ;;  %v4377_v3 = vld [vmem:[%s9429_s15 + $0x158] sm:$0xff]  ;;  %s9435_s28 = sld [smem:[#allocation22_spill]] }
0x10c4   : > { %v7040_v63 = vpop.permute.xlu0 %7039 }
0x10c5   : > { %v7042_v49 = vunpack.i.h.bf16 %v7040_v63  ;;  %v7041_v11 = vunpack.i.l.bf16 %v7040_v63 }
0x10c6   : > { %v7045_v55 = vpop.permute.xlu1 %7044 }
0x10c7   : > { %v7047_v20 = vunpack.i.h.bf16 %v7045_v55  ;;  %v7046_v18 = vunpack.i.l.bf16 %v7045_v55  ;;  %v4321_v45 = vsel %vm1361_vm1, %v4238_v60, %v7042_v49  ;;  %v4325_v31 = vsel %vm1361_vm1, %v6801_v38, %v7041_v11  ;;  %v4390_v49 = vld [vmem:[%s9429_s15 + $0x1c0] sm:$0xff]  ;;  %v4391_v11 = vld [vmem:[%s9429_s15 + $0x1c8] sm:$0xff] }
0x10c9   : > { %v4322_v25 = vsel %vm1974_vm3, %v4321_v45, %v7047_v20  ;;  %v4326_v28 = vsel %vm1974_vm3, %v4325_v31, %v7046_v18  ;;  %v4423_v20 = vpack.c.bf16 %v4377_v3, %v4376_v15  ;;  %v4430_v18 = vpack.c.bf16 %v4391_v11, %v4390_v49  ;;  %v4374_v45 = vld [vmem:[%s9429_s15 + $0x140] sm:$0xff]  ;;  %v4375_v31 = vld [vmem:[%s9429_s15 + $0x148] sm:$0xff] }
0x10ca   : > { %v7050_v0 = vpop.permute.xlu1 %7049  ;;  %v4367_v15 = vld [vmem:[%s9429_s15 + $0x108] sm:$0xff] }
0x10cb   : > { %v7052_v7 = vunpack.i.h.bf16 %v7050_v0  ;;  %v7051_v17 = vunpack.i.l.bf16 %v7050_v0  ;;  %v4388_v0 = vld [vmem:[%s9429_s15 + $0x1b0] sm:$0xff] }
0x10cd   : > { %v4324_v60 = vsel %vm4323_vm12, %v4322_v25, %v7052_v7  ;;  %v4327_v38 = vsel %vm4323_vm12, %v4326_v28, %v7051_v17  ;;  %v4389_v7 = vld [vmem:[%s9429_s15 + $0x1b8] sm:$0xff]  ;;  %v4422_v17 = vpack.c.bf16 %v4375_v31, %v4374_v45  ;;  %v4386_v28 = vld [vmem:[%s9429_s15 + $0x1a0] sm:$0xff] }
0x10ce   : > { %v4398_v48 = vpack.c.bf16 %v4324_v60, %v4324_v60  ;;  %v8826_v22 = vpop.permute.xlu1 %7054  ;;  %v8828_v40 = vpop.permute.xlu0 %7059  ;;  %v4399_v26 = vpack.c.bf16 %v4327_v38, %v4327_v38  ;;  %v4429_v44 = vpack.c.bf16 %v4389_v7, %v4388_v0  ;;  %v4373_v25 = vld [vmem:[%s9429_s15 + $0x138] sm:$0xff]  ;;  %v4428_v60 = vpack.c.bf16 %v4387_v14, %v4386_v28  ;;  %v4370_v38 = vld [vmem:[%s9429_s15 + $0x120] sm:$0xff] }
0x10cf   : > { %v7056_v47 = vunpack.i.l.bf16 %v8826_v22  ;;  %v7061_v32 = vunpack.i.l.bf16 %v8828_v40  ;;  %v4421_v57 = vpack.c.bf16 %v4373_v25, %v4372_v9  ;;  %v6284_v31 = vld [vmem:[%s9431_s1] ss:$0 sm:$0xff]  ;;  %s9433_s1 = sld [smem:[#allocation19_spill]] }
0x10d0   : > { %4473 = vmatprep.mubr.bf16.mxu1 %v4399_v26  ;;  %v4384_v26 = vld [vmem:[%s9429_s15 + $0x190] sm:$0xff] }
0x10d1   : > { %v4331_v51 = vsel %vm1361_vm1, %v6805_v16, %v7056_v47  ;;  %4474 = vmatmul.mubr.bf16.vlgmr.msra.gmra.mxu1 %v4398_v48  ;;  %v4371_v48 = vld [vmem:[%s9429_s15 + $0x128] sm:$0xff] }
0x10d2   : > { %6485 = vmatpush3.bf16.msra.mxu1 %v4425_v5  ;;  %v7065_v37 = vpop.permute.xlu1 %7064  ;;  %v4332_v63 = vsel %vm1974_vm3, %v4331_v51, %v7061_v32  ;;  %v4385_v5 = vld [vmem:[%s9429_s15 + $0x198] sm:$0xff]  ;;  %v4420_v47 = vpack.c.bf16 %v4371_v48, %v4370_v38  ;;  %v7057_v32 = vunpack.i.h.bf16 %v8826_v22  ;;  %v4419_v51 = vpack.c.bf16 %v4369_v54, %v4368_v8  ;;  %v4553_v48 = vld [vmem:[%s9432_s18 + $0x10] sm:$0xff]  ;;  %v4552_v8 = vld [vmem:[%s9432_s18 + $0x8] sm:$0xff] }
0x10d3   : > { %v7066_v62 = vunpack.i.l.bf16 %v7065_v37  ;;  %6486 = vmatprep.subr.bf16.mxu1 %v4432_v4  ;;  %v4427_v4 = vpack.c.bf16 %v4385_v5, %v4384_v26  ;;  %v4554_v26 = vld [vmem:[%s9432_s18 + $0x18] sm:$0xff] }
0x10d4   : > { %v4328_v3 = vsel %vm1361_vm1, %v8808_v52, %v7057_v32  ;;  %v4557_v5 = vpack.c.bf16 %v4554_v26, %v4553_v48 }
0x10d5   : > { %v4333_v16 = vsel %vm4323_vm12, %v4332_v63, %v7066_v62  ;;  %v4426_v62 = vpack.c.bf16 %v4383_v23, %v4382_v10  ;;  %v7067_v63 = vunpack.i.h.bf16 %v7065_v37  ;;  %v6285_v23 = vld [vmem:[%s9433_s1] ss:$0 sm:$0xff]  ;;  %s9439_s1 = sld [smem:[#allocation24_spill]] }
0x10d6   : > { %6487 = vmatpush3.bf16.msra.mxu1 %v4424_v53  ;;  %v4401_v55 = vpack.c.bf16 %v4333_v16, %v4333_v16  ;;  %v7062_v53 = vunpack.i.h.bf16 %v8828_v40 }
0x10d7   : > { %6488 = vmatprep.subr.bf16.mxu1 %v4431_v27  ;;  %v4366_v27 = vld [vmem:[%s9429_s15 + $0x100] sm:$0xff] }
0x10d8   : > { %4513 = vmatprep.mubr.bf16.mxu1 %v4401_v55  ;;  %v4418_v49 = vpack.c.bf16 %v4367_v15, %v4366_v27  ;;  %v4329_v11 = vsel %vm1974_vm3, %v4328_v3, %v7062_v53  ;;  %v6286_v53 = vld [vmem:[%s9434_s2] ss:$0 sm:$0xff]  ;;  %s9438_s2 = smov 16  }
0x10d9   : > { %v4330_v22 = vsel %vm4323_vm12, %v4329_v11, %v7067_v63  ;;  %v6287_v3 = vld [vmem:[%s9435_s28] ss:$0 sm:$0xff]  ;;  %s9437_s28 = sld [smem:[#allocation23_spill]] }
0x10da   : > { %6489 = vmatpush3.bf16.msra.mxu1 %v4423_v20  ;;  %v4400_v16 = vpack.c.bf16 %v4330_v22, %v4330_v22 }
0x10db   : > { %6490 = vmatprep.subr.bf16.mxu1 %v4430_v18 }
0x10de   : > { %6491 = vmatpush3.bf16.msra.mxu1 %v4422_v17 }
0x10df   : > { %6492 = vmatprep.subr.bf16.mxu1 %v4429_v44 }
0x10e2   : > { %6493 = vmatpush3.bf16.msra.mxu1 %v4421_v57 }
0x10e3   : > { %6494 = vmatprep.subr.bf16.mxu1 %v4428_v60 }
0x10e6   : > { %6495 = vmatpush3.bf16.msra.mxu1 %v4420_v47  ;;  %v7526_v47 = vmov 0.0  }
0x10e7   : > { %6496 = vmatprep.subr.bf16.mxu1 %v4427_v4  ;;  %v4551_v4 = vld [vmem:[%s9432_s18] sm:$0xff] }
0x10e8   : > { %v4556_v54 = vpack.c.bf16 %v4552_v8, %v4551_v4 }
0x10ea   : > { %6497 = vmatpush3.bf16.msra.mxu1 %v4419_v51 }
0x10eb   : > { %6498 = vmatprep.subr.bf16.mxu1 %v4426_v62 }
0x10ee   : > { %6499 = vmatpush3.bf16.msra.mxu1 %v4418_v49 }
0x10ef   : > { %6807 = vmatprep.subr.bf16.mxu1 %v7526_v47 }
0x10f1   : > { %4514 = vmatmul.mubr.bf16.vlgmr.msra.gmra.mxu1 %v4400_v16 }
0x10f2   : > { %6808 = vmatpush3.bf16.msra.mxu1 %v4557_v5  ;;  %6811 = vmatprep.mubr.msk.bf16.mxu1 %vm7527_vm14, %v7526_v47 }
0x10f3   : > { %6809 = vmatprep.subr.bf16.mxu1 %v7526_v47 }
0x10f6   : > { %6810 = vmatpush3.bf16.msra.mxu1 %v4556_v54 }
0x1191   : > { %v6478_v40 = vpop.f32.mrf.mxu1 }
0x1193   : > { %v6479_v55 = vpop.f32.mrf.mxu1 }
0x1194   : > { %v6480_v45 = vadd.f32 %v6479_v55, %v6478_v40 }
0x1195   : > { %v6481_v20 = vpop.f32.mrf.mxu1 }
0x1196   : > { %v4476_v52 = vadd.f32 %v6480_v45, %v6284_v31 }
0x1197   : > { %v6482_v18 = vpop.f32.mrf.mxu1 }
0x11b1   : > { %v6500_v0 = vpop.f32.mrf.mxu1 }
0x11b3   : > { %v6501_v7 = vpop.f32.mrf.mxu1 }
0x11b4   : > { %v6502_v37 = vadd.f32 %v6501_v7, %v6500_v0 }
0x11b5   : > { %v6503_v17 = vpop.f32.mrf.mxu1 }
0x11b6   : > { %v4516_v44 = vadd.f32 %v6502_v37, %v4476_v52 }
0x11b7   : > { %v6504_v9 = vpop.f32.mrf.mxu1 }
0x11b8   : > { %v4524_v25 = vsel %vm4523_vm13, %v4516_v44, 0.0 }
0x11b9   : > { %4525 = vadd.xlane.f32.xlu0 %v4524_v25 }
0x1242   : > { %v4526_v28 = vpop.xlane.xlu0 %4525 }
0x1243   : > { %v4527_v14 = vmul.f32 0.03125, %v4526_v28 }
0x1245   : > { %v4528_v57 = vsub.f32 %v4516_v44, %v4527_v14 }
0x1247   : > { %v4529_v60 = vmul.f32 %v4528_v57, %v4528_v57 }
0x1249   : > { %v4530_v38 = vsel %vm4523_vm13, %v4529_v60, 0.0 }
0x124a   : > { %4531 = vadd.xlane.f32.xlu1 %v4530_v38 }
0x125b   : > { %7069 = vrot.lane.b32.xlu1 %v7068_v61, %s7521_s26 }
0x125f   : > { %7079 = vrot.lane.b32.xlu1 %v7078_v59, %s7521_s26 }
0x12d3   : > { %v4532_v61 = vpop.xlane.xlu1 %4531 }
0x12d4   : > { %v4533_v32 = vmul.f32 0.03125, %v4532_v61 }
0x12d6   : > { %v4534_v10 = vadd.f32 1e-05, %v4533_v32 }
0x12d7   : > { %v7070_v33 = vpop.permute.xlu1 %7069 }
0x12d8   : > { %7327 = vrsqrt.f32 %v4534_v10  ;;  %v7072_v21 = vunpack.i.h.bf16 %v7070_v33 }
0x12db   : > { %v7080_v42 = vpop.permute.xlu1 %7079 }
0x12dc   : > { %v7081_v1 = vunpack.i.l.bf16 %v7080_v42 }
0x12e5   : > { %v7328_v59 = vpop.eup %7327 }
0x12e6   : > { %v4536_v51 = vmul.f32 %v7328_v59, %v4528_v57 }
0x12e8   : > { %v4543_v62 = vmul.f32 %v6285_v23, %v4536_v51 }
0x12ea   : > { %v4550_v27 = vadd.f32 %v6286_v53, %v4543_v62 }
0x12ec   : > { %v4555_v15 = vpack.c.bf16 %v4550_v27, %v4550_v27 }
0x12ee   : > { %6812 = vmatmul.mubr.msk.bf16.vlgmr.msra.gmra.mxu1 %vm1361_vm1, %v4555_v15 }
0x12ef   : > { %6817 = vmatprep.mubr.msk.bf16.mxu1 %vm1783_vm2, %v4644_v50  ;;  %v7071_v50 = vunpack.i.l.bf16 %v7070_v33 }
0x12f1   : > { %v4648_v20 = vpack.c.bf16 %v7072_v21, %v7071_v50 }
0x13ae   : > { %v4602_v63 = vpop.f32.mrf.mxu1 }
0x13af   : > { %v4603_v49 = vadd.f32 %v6287_v3, %v4602_v63 }
0x13b0   : > { %v6813_v11 = vpop.f32.mrf.mxu1 }
0x13b1   : > { %v8888_v22 = vpack.c.bf16 %v4603_v49, %v4603_v49  ;;  %4641 = vrot.lane.b32.xlu0 %v4603_v49, %s7521_s26 }
0x13b2   : > { %v4605_v16 = vpop.f32.mrf.mxu1 }
0x13b3   : > { %6927 = vmatprep.subr.msk.bf16.mxu1 %vm1783_vm2, %v8888_v22  ;;  %v4667_v40 = vsel %vm1783_vm2, %v8888_v22, 0 }
0x13b4   : > { %v6814_v55 = vpop.f32.mrf.mxu1  ;;  %6816 = vmatpush3.bf16.xpose.msra.mxu1 %v4667_v40 }
0x13b5   : > { %7074 = vrot.lane.b32.xlu0 %v7073_v13, %s7521_s26 }
0x13b9   : > { %7084 = vrot.lane.b32.xlu0 %v7083_v56, %s7521_s26  ;;  %s9436_s26 = smov 96  }
0x13bb   : > { %6818 = vmatmul.mubr.msk.bf16.vlgmr.msra.gmra.mxu1 %vm1783_vm2, %v4645_v35 }
0x13bc   : > { %6821 = vmatprep.mubr.msk.bf16.mxu1 %vm1783_vm2, %v4646_v29  ;;  %v7082_v29 = vunpack.i.h.bf16 %v7080_v42 }
0x13c3   : > { %6822 = vmatmul.mubr.msk.bf16.gmra.mxu1 %vm1783_vm2, %v4647_v6  ;;  %v4650_v6 = vpack.c.bf16 %v7082_v29, %v7081_v1 }
0x13c4   : > { %6827 = vmatprep.mubr.msk.bf16.mxu1 %vm1783_vm2, %v4648_v20 }
0x1423   : > { %v4642_v13 = vpop.permute.xlu0 %4641 }
0x1424   : > { %v8916_v56 = vpack.c.bf16 %v4642_v13, %v4642_v13 }
0x1426   : > { %6928 = vmatprep.subr.msk.bf16.mxu1 %vm1783_vm2, %v8916_v56  ;;  %v4747_v30 = vsel %vm1783_vm2, %v8916_v56, 0 }
0x1427   : > { %v7075_v35 = vpop.permute.xlu0 %7074  ;;  %6826 = vmatpush3.bf16.xpose.msra.mxu1 %v4747_v30 }
0x1428   : > { %v7077_v36 = vunpack.i.h.bf16 %v7075_v35  ;;  %v7076_v19 = vunpack.i.l.bf16 %v7075_v35 }
0x142a   : > { %v4649_v39 = vpack.c.bf16 %v7077_v36, %v7076_v19 }
0x142b   : > { %v7085_v18 = vpop.permute.xlu0 %7084 }
0x142c   : > { %v7087_v45 = vunpack.i.h.bf16 %v7085_v18  ;;  %v7086_v31 = vunpack.i.l.bf16 %v7085_v18 }
0x142e   : > { %6828 = vmatmul.mubr.msk.bf16.vlgmr.msra.gmra.mxu1 %vm1783_vm2, %v4649_v39  ;;  %v4651_v0 = vpack.c.bf16 %v7087_v45, %v7086_v31 }
0x142f   : > { %6831 = vmatprep.mubr.msk.bf16.mxu1 %vm1783_vm2, %v4650_v6 }
0x1436   : > { %6832 = vmatmul.mubr.msk.bf16.gmra.mxu1 %vm1783_vm2, %v4651_v0 }
0x147b   : > { %v8925_v7 = vpop.f32.mrf.mxu1 }
0x147c   : > { %v4821_v53 = vsel %vm4814_vm15, %v8925_v7, -inf }
0x147d   : > { %v8927_v52 = vpop.f32.mrf.mxu1 }
0x147e   : > { %v4815_v23 = vsel %vm4814_vm15, %v8927_v52, -inf }
0x147f   : > { %v8929_v37 = vpop.f32.mrf.mxu1 }
0x1480   : > { %v4824_v15 = vsel %vm4814_vm15, %v8929_v37, -inf }
0x1481   : > { %v8931_v17 = vpop.f32.mrf.mxu1 }
0x1482   : > { %v4818_v62 = vsel %vm4814_vm15, %v8931_v17, -inf }
0x1483   : > { %v8933_v44 = vpop.f32.mrf.mxu1 }
0x1484   : > { %v4833_v3 = vsel %vm4814_vm15, %v8933_v44, -inf }
0x1485   : > { %v8935_v9 = vpop.f32.mrf.mxu1 }
0x1486   : > { %v4827_v27 = vsel %vm4814_vm15, %v8935_v9, -inf }
0x1487   : > { %v8937_v25 = vpop.f32.mrf.mxu1 }
0x1488   : > { %v4836_v49 = vsel %vm4814_vm15, %v8937_v25, -inf }
0x1489   : > { %v8939_v28 = vpop.f32.mrf.mxu1 }
0x148a   : > { %v4830_v63 = vsel %vm4814_vm15, %v8939_v28, -inf }
0x14ee   : > { %v6829_v14 = vpop.f32.mrf.mxu1 }
0x14ef   : > { %v4845_v57 = vsel %vm4814_vm15, %v6829_v14, -inf }
0x14f0   : > { %4846 = vmax.xlane.f32.xlu0 %v4845_v57  ;;  %v4783_v60 = vpop.f32.mrf.mxu1 }
0x14f1   : > { %v4839_v38 = vsel %vm4814_vm15, %v4783_v60, -inf }
0x14f2   : > { %4840 = vmax.xlane.f32.xlu1 %v4839_v38  ;;  %v6830_v48 = vpop.f32.mrf.mxu1 }
0x14f3   : > { %v4848_v8 = vsel %vm4814_vm15, %v6830_v48, -inf }
0x14f4   : > { %v4786_v26 = vpop.f32.mrf.mxu1 }
0x14f5   : > { %v4842_v5 = vsel %vm4814_vm15, %v4786_v26, -inf }
0x14f6   : > { %4843 = vmax.xlane.f32.xlu0 %v4842_v5  ;;  %v6833_v47 = vpop.f32.mrf.mxu1 }
0x14f7   : > { %v4857_v10 = vsel %vm4814_vm15, %v6833_v47, -inf }
0x14f8   : > { %v4799_v4 = vpop.f32.mrf.mxu1 }
0x14f9   : > { %v4851_v54 = vsel %vm4814_vm15, %v4799_v4, -inf }
0x14fa   : > { %4849 = vmax.xlane.f32.xlu0 %v4848_v8  ;;  %4852 = vmax.xlane.f32.xlu1 %v4851_v54  ;;  %v6834_v61 = vpop.f32.mrf.mxu1 }
0x14fb   : > { %v4860_v51 = vsel %vm4814_vm15, %v6834_v61, -inf }
0x14fc   : > { %v4802_v32 = vpop.f32.mrf.mxu1 }
0x14fd   : > { %v4854_v59 = vsel %vm4814_vm15, %v4802_v32, -inf }
0x14fe   : > { %4858 = vmax.xlane.f32.xlu1 %v4857_v10  ;;  %4855 = vmax.xlane.f32.xlu0 %v4854_v59 }
0x1502   : > { %4816 = vmax.xlane.f32.xlu1 %v4815_v23  ;;  %4861 = vmax.xlane.f32.xlu0 %v4860_v51 }
0x1506   : > { %4822 = vmax.xlane.f32.xlu1 %v4821_v53  ;;  %4819 = vmax.xlane.f32.xlu0 %v4818_v62 }
0x150a   : > { %4828 = vmax.xlane.f32.xlu1 %v4827_v27  ;;  %4825 = vmax.xlane.f32.xlu0 %v4824_v15 }
0x150e   : > { %4834 = vmax.xlane.f32.xlu1 %v4833_v3  ;;  %4831 = vmax.xlane.f32.xlu0 %v4830_v63 }
0x1512   : > { %4837 = vmax.xlane.f32.xlu0 %v4836_v49 }
0x1579   : > { %v4847_v11 = vpop.xlane.xlu0 %4846 }
0x157a   : > { %v4873_v16 = vsub.f32 %v6829_v14, %v4847_v11 }
0x157b   : > { %v4841_v40 = vpop.xlane.xlu1 %4840 }
0x157c   : > { %v4899_v55 = vmul.f32 1.442695, %v4873_v16  ;;  %v4871_v33 = vsub.f32 %v4783_v60, %v4841_v40 }
0x157e   : > { %7329 = vpow2.f32 %v4899_v55  ;;  %v4895_v21 = vmul.f32 1.442695, %v4871_v33 }
0x157f   : > { %v4844_v50 = vpop.xlane.xlu0 %4843 }
0x1580   : > { %7331 = vpow2.f32 %v4895_v21  ;;  %v4872_v20 = vsub.f32 %v4786_v26, %v4844_v50 }
0x1582   : > { %v4897_v13 = vmul.f32 1.442695, %v4872_v20 }
0x1583   : > { %v4850_v42 = vpop.xlane.xlu0 %4849  ;;  %v4853_v30 = vpop.xlane.xlu1 %4852 }
0x1584   : > { %7333 = vpow2.f32 %v4897_v13  ;;  %v4874_v35 = vsub.f32 %v6830_v48, %v4850_v42  ;;  %v4875_v19 = vsub.f32 %v4799_v4, %v4853_v30 }
0x1586   : > { %v4901_v36 = vmul.f32 1.442695, %v4874_v35  ;;  %v4903_v18 = vmul.f32 1.442695, %v4875_v19 }
0x1587   : > { %v4859_v29 = vpop.xlane.xlu1 %4858  ;;  %v4856_v1 = vpop.xlane.xlu0 %4855 }
0x1588   : > { %7335 = vpow2.f32 %v4901_v36  ;;  %v4877_v39 = vsub.f32 %v6833_v47, %v4859_v29  ;;  %v4876_v6 = vsub.f32 %v4802_v32, %v4856_v1 }
0x158a   : > { %v4907_v45 = vmul.f32 1.442695, %v4877_v39  ;;  %v4905_v31 = vmul.f32 1.442695, %v4876_v6 }
0x158b   : > { %v8965_v0 = vpop.eup %7329  ;;  %v4817_v14 = vpop.xlane.xlu1 %4816 }
0x158c   : > { %v4862_v57 = vpop.xlane.xlu0 %4861  ;;  %7337 = vpow2.f32 %v4907_v45  ;;  %v4863_v60 = vsub.f32 %v8927_v52, %v4817_v14  ;;  %v4941_v48 = vsel %vm4814_vm15, %v8965_v0, 0.0 }
0x158d   : > { %v4878_v38 = vsub.f32 %v6834_v61, %v4862_v57  ;;  %v8970_v26 = vpop.eup %7331  ;;  %7339 = vpow2.f32 %v4905_v31  ;;  %4942 = vadd.xlane.f32.xlu1 %v4941_v48 }
0x158e   : > { %7341 = vpow2.f32 %v4903_v18  ;;  %v4879_v47 = vmul.f32 1.442695, %v4863_v60  ;;  %v4935_v32 = vsel %vm4814_vm15, %v8970_v26, 0.0 }
0x158f   : > { %v4909_v5 = vmul.f32 1.442695, %v4878_v38  ;;  %v4823_v8 = vpop.xlane.xlu1 %4822 }
0x1590   : > { %v4820_v4 = vpop.xlane.xlu0 %4819  ;;  %v4865_v61 = vsub.f32 %v8925_v7, %v4823_v8 }
0x1591   : > { %v4864_v54 = vsub.f32 %v8931_v17, %v4820_v4  ;;  %v8975_v10 = vpop.eup %7333  ;;  %7343 = vpow2.f32 %v4909_v5  ;;  %4936 = vadd.xlane.f32.xlu1 %v4935_v32 }
0x1592   : > { %v4938_v52 = vsel %vm4814_vm15, %v8975_v10, 0.0  ;;  %7345 = vpow2.f32 %v4879_v47  ;;  %v4883_v62 = vmul.f32 1.442695, %v4865_v61 }
0x1593   : > { %v4881_v59 = vmul.f32 1.442695, %v4864_v54  ;;  %4939 = vadd.xlane.f32.xlu0 %v4938_v52  ;;  %v4829_v53 = vpop.xlane.xlu1 %4828 }
0x1594   : > { %v4826_v23 = vpop.xlane.xlu0 %4825  ;;  %v4867_v57 = vsub.f32 %v8935_v9, %v4829_v53 }
0x1595   : > { %v8980_v51 = vpop.eup %7335  ;;  %7347 = vpow2.f32 %v4881_v59  ;;  %v4866_v27 = vsub.f32 %v8929_v37, %v4826_v23 }
0x1596   : > { %v4944_v17 = vsel %vm4814_vm15, %v8980_v51, 0.0  ;;  %7349 = vpow2.f32 %v4883_v62  ;;  %v4887_v38 = vmul.f32 1.442695, %v4867_v57 }
0x1597   : > { %4945 = vadd.xlane.f32.xlu0 %v4944_v17  ;;  %v4885_v11 = vmul.f32 1.442695, %v4866_v27  ;;  %v4835_v37 = vpop.xlane.xlu1 %4834 }
0x1598   : > { %v4832_v15 = vpop.xlane.xlu0 %4831  ;;  %v4869_v21 = vsub.f32 %v8933_v44, %v4835_v37 }
0x1599   : > { %v8985_v3 = vpop.eup %7337  ;;  %v4868_v16 = vsub.f32 %v8939_v28, %v4832_v15  ;;  %7351 = vpow2.f32 %v4885_v11 }
0x159a   : > { %v8987_v63 = vpop.eup %7339  ;;  %v4953_v7 = vsel %vm4814_vm15, %v8985_v3, 0.0  ;;  %v4891_v42 = vmul.f32 1.442695, %v4869_v21 }
0x159b   : > { %v8991_v49 = vpop.eup %7341  ;;  %4954 = vadd.xlane.f32.xlu1 %v4953_v7  ;;  %v4950_v40 = vsel %vm4814_vm15, %v8987_v63, 0.0  ;;  %v4889_v50 = vmul.f32 1.442695, %v4868_v16 }
0x159c   : > { %4951 = vadd.xlane.f32.xlu0 %v4950_v40  ;;  %v4947_v33 = vsel %vm4814_vm15, %v8991_v49, 0.0  ;;  %v4838_v13 = vpop.xlane.xlu0 %4837 }
0x159d   : > { %7353 = vpow2.f32 %v4889_v50  ;;  %v4870_v30 = vsub.f32 %v8937_v25, %v4838_v13 }
0x159e   : > { %v8996_v55 = vpop.eup %7343  ;;  %7355 = vpow2.f32 %v4891_v42 }
0x159f   : > { %4948 = vadd.xlane.f32.xlu1 %v4947_v33  ;;  %v4956_v20 = vsel %vm4814_vm15, %v8996_v55, 0.0  ;;  %v9003_v28 = vpop.eup %7345  ;;  %v4893_v44 = vmul.f32 1.442695, %v4870_v30 }
0x15a0   : > { %4957 = vadd.xlane.f32.xlu0 %v4956_v20  ;;  %v4911_v35 = vsel %vm4814_vm15, %v9003_v28, 0.0 }
0x15a1   : > { %7357 = vpow2.f32 %v4893_v44 }
0x15a2   : > { %v9008_v36 = vpop.eup %7347  ;;  %7359 = vpow2.f32 %v4887_v38 }
0x15a3   : > { %v4914_v19 = vsel %vm4814_vm15, %v9008_v36, 0.0  ;;  %v9012_v29 = vpop.eup %7349 }
0x15a4   : > { %4912 = vadd.xlane.f32.xlu0 %v4911_v35  ;;  %v4917_v1 = vsel %vm4814_vm15, %v9012_v29, 0.0 }
0x15a6   : > { %v9016_v39 = vpop.eup %7351 }
0x15a7   : > { %v4920_v25 = vsel %vm4814_vm15, %v9016_v39, 0.0 }
0x15a8   : > { %4915 = vadd.xlane.f32.xlu0 %v4914_v19 }
0x15aa   : > { %v9020_v6 = vpop.eup %7353 }
0x15ab   : > { %v4926_v18 = vsel %vm4814_vm15, %v9020_v6, 0.0  ;;  %v9026_v45 = vpop.eup %7355 }
0x15ac   : > { %4918 = vadd.xlane.f32.xlu0 %v4917_v1  ;;  %v4929_v31 = vsel %vm4814_vm15, %v9026_v45, 0.0 }
0x15ae   : > { %v9030_v14 = vpop.eup %7357 }
0x15af   : > { %v4932_v60 = vsel %vm4814_vm15, %v9030_v14, 0.0 }
0x15b0   : > { %4921 = vadd.xlane.f32.xlu0 %v4920_v25  ;;  %5084 = vrot.lane.b32.xlu1 %v8916_v56, %s9436_s26  ;;  %v9035_v56 = vpop.eup %7359 }
0x15b1   : > { %v4923_v48 = vsel %vm4814_vm15, %v9035_v56, 0.0 }
0x15b4   : > { %4927 = vadd.xlane.f32.xlu0 %v4926_v18 }
0x15b8   : > { %4930 = vadd.xlane.f32.xlu0 %v4929_v31 }
0x15bc   : > { %4933 = vadd.xlane.f32.xlu0 %v4932_v60 }
0x15d2   : > { %5000 = vrot.lane.b32.xlu0 %v8888_v22, %s9436_s26 }
0x15d4   : > { %4924 = vadd.xlane.f32.xlu1 %v4923_v48 }
0x1616   : > { %v4943_v5 = vpop.xlane.xlu1 %4942 }
0x161a   : > { %v4937_v47 = vpop.xlane.xlu1 %4936 }
0x161b   : > { %7361 = vrcp.f32 %v4937_v47 }
0x161c   : > { %v4940_v4 = vpop.xlane.xlu0 %4939 }
0x161d   : > { %7363 = vrcp.f32 %v4940_v4 }
0x161e   : > { %7365 = vrcp.f32 %v4943_v5 }
0x1620   : > { %v4946_v9 = vpop.xlane.xlu0 %4945 }
0x1621   : > { %7367 = vrcp.f32 %v4946_v9 }
0x1624   : > { %v4955_v8 = vpop.xlane.xlu1 %4954 }
0x1625   : > { %v4952_v54 = vpop.xlane.xlu0 %4951 }
0x1626   : > { %7369 = vrcp.f32 %v4952_v54 }
0x1627   : > { %7371 = vrcp.f32 %v4955_v8 }
0x1628   : > { %v7362_v32 = vpop.eup %7361  ;;  %v4949_v52 = vpop.xlane.xlu1 %4948 }
0x1629   : > { %7373 = vrcp.f32 %v4949_v52  ;;  %v4958_v22 = vpop.xlane.xlu0 %4957  ;;  %v4983_v59 = vmul.f32 %v7362_v32, %v8970_v26 }
0x162a   : > { %v7364_v61 = vpop.eup %7363  ;;  %7375 = vrcp.f32 %v4958_v22  ;;  %v5208_v22 = vld [vmem:[%s9437_s28 + $0x10] sm:$0xff] }
0x162b   : > { %v4984_v23 = vmul.f32 %v7364_v61, %v8975_v10  ;;  %v7366_v53 = vpop.eup %7365  ;;  %v5209_v61 = vld [vmem:[%s9437_s28 + $0x18] sm:$0xff] }
0x162c   : > { %v5085_v17 = vpop.permute.xlu1 %5084  ;;  %v4985_v11 = vmul.f32 %v7366_v53, %v8965_v0  ;;  %v5207_v53 = vld [vmem:[%s9437_s28 + $0x8] sm:$0xff] }
0x162d   : > { %v5099_v62 = vsel %vm5014_vm0, %v5085_v17, 0  ;;  %v4913_v27 = vpop.xlane.xlu0 %4912  ;;  %6930 = vmatprep.subr.msk.bf16.mxu1 %vm5014_vm0, %v5085_v17  ;;  %v4995_v15 = vpack.c.bf16 %v4984_v23, %v4983_v59  ;;  %v5215_v59 = vpack.c.bf16 %v5209_v61, %v5208_v22  ;;  %v5206_v23 = vld [vmem:[%s9437_s28] sm:$0xff] }
0x162e   : > { %v7368_v7 = vpop.eup %7367  ;;  %6846 = vmatpush3.bf16.msra.mxu1 %v5099_v62  ;;  %7377 = vrcp.f32 %v4913_v27 }
0x162f   : > { %v4986_v16 = vmul.f32 %v7368_v7, %v8980_v51  ;;  %6847 = vmatprep.mubr.msk.bf16.mxu1 %vm4814_vm15, %v4995_v15 }
0x1631   : > { %v4996_v26 = vpack.c.bf16 %v4986_v16, %v4985_v11  ;;  %v4916_v40 = vpop.xlane.xlu0 %4915 }
0x1632   : > { %7379 = vrcp.f32 %v4916_v40 }
0x1633   : > { %6848 = vmatmul.mubr.msk.bf16.vlgmr.msra.gmra.mxu1 %vm4814_vm15, %v4996_v26  ;;  %v7370_v10 = vpop.eup %7369 }
0x1634   : > { %v7372_v37 = vpop.eup %7371  ;;  %v4988_v13 = vmul.f32 %v7370_v10, %v8987_v63 }
0x1635   : > { %v4919_v33 = vpop.xlane.xlu0 %4918  ;;  %v4989_v0 = vmul.f32 %v7372_v37, %v8985_v3 }
0x1636   : > { %v7374_v21 = vpop.eup %7373  ;;  %7381 = vrcp.f32 %v4919_v33 }
0x1637   : > { %v7376_v50 = vpop.eup %7375  ;;  %v4987_v20 = vmul.f32 %v7374_v21, %v8991_v49 }
0x1638   : > { %v4990_v51 = vmul.f32 %v7376_v50, %v8996_v55 }
0x1639   : > { %v4922_v42 = vpop.xlane.xlu0 %4921  ;;  %v4997_v30 = vpack.c.bf16 %v4988_v13, %v4987_v20 }
0x163a   : > { %7383 = vrcp.f32 %v4922_v42  ;;  %v4998_v35 = vpack.c.bf16 %v4990_v51, %v4989_v0 }
0x163b   : > { %6851 = vmatprep.mubr.msk.bf16.mxu1 %vm4814_vm15, %v4997_v30  ;;  %v7378_v44 = vpop.eup %7377 }
0x163c   : > { %6852 = vmatmul.mubr.msk.bf16.gmra.mxu1 %vm4814_vm15, %v4998_v35  ;;  %v4975_v49 = vmul.f32 %v7378_v44, %v9003_v28 }
0x163d   : > { %v4928_v19 = vpop.xlane.xlu0 %4927 }
0x163f   : > { %v7380_v1 = vpop.eup %7379 }
0x1640   : > { %v4976_v63 = vmul.f32 %v7380_v1, %v9008_v36 }
0x1641   : > { %v4931_v25 = vpop.xlane.xlu0 %4930 }
0x1642   : > { %v4991_v3 = vpack.c.bf16 %v4976_v63, %v4975_v49 }
0x1643   : > { %v7382_v18 = vpop.eup %7381 }
0x1644   : > { %6837 = vmatprep.mubr.msk.bf16.mxu0 %vm4814_vm15, %v4991_v3  ;;  %v4977_v38 = vmul.f32 %v7382_v18, %v9012_v29 }
0x1645   : > { %v4934_v55 = vpop.xlane.xlu0 %4933 }
0x1646   : > { %7385 = vrcp.f32 %v4934_v55 }
0x1647   : > { %v7384_v31 = vpop.eup %7383  ;;  %7387 = vrcp.f32 %v4928_v19 }
0x1648   : > { %v4978_v57 = vmul.f32 %v7384_v31, %v9016_v39  ;;  %7389 = vrcp.f32 %v4931_v25 }
0x1649   : > { %v5001_v60 = vpop.permute.xlu0 %5000 }
0x164a   : > { %v5016_v48 = vsel %vm5014_vm0, %v5001_v60, 0  ;;  %6929 = vmatprep.subr.msk.bf16.mxu0 %vm5014_vm0, %v5001_v60  ;;  %v4992_v28 = vpack.c.bf16 %v4978_v57, %v4977_v38 }
0x164b   : > { %6836 = vmatpush3.bf16.msra.mxu0 %v5016_v48 }
0x164c   : > { %6855 = vmatprep.subr.bf16.mxu0 %v5215_v59 }
0x164e   : > { %6838 = vmatmul.mubr.msk.bf16.vlgmr.msra.gmra.mxu0 %vm4814_vm15, %v4992_v28 }
0x164f   : > { %6856 = vmatpush3.bf16.msra.mxu0 %v5215_v59 }
0x1653   : > { %v7386_v5 = vpop.eup %7385 }
0x1654   : > { %v7388_v39 = vpop.eup %7387  ;;  %v4982_v4 = vmul.f32 %v7386_v5, %v9030_v14  ;;  %v5214_v14 = vpack.c.bf16 %v5207_v53, %v5206_v23 }
0x1655   : > { %v7390_v47 = vpop.eup %7389  ;;  %v4980_v8 = vmul.f32 %v7388_v39, %v9020_v6 }
0x1656   : > { %v4981_v54 = vmul.f32 %v7390_v47, %v9026_v45  ;;  %6857 = vmatprep.subr.bf16.mxu0 %v5214_v14 }
0x1657   : > { %6858 = vmatpush3.bf16.msra.mxu0 %v5214_v14 }
0x1658   : > { %v4994_v52 = vpack.c.bf16 %v4982_v4, %v4981_v54 }
0x165d   : > { %v4925_v36 = vpop.xlane.xlu1 %4924 }
0x165e   : > { %7391 = vrcp.f32 %v4925_v36 }
0x166b   : > { %v7392_v29 = vpop.eup %7391 }
0x166c   : > { %v4979_v9 = vmul.f32 %v7392_v29, %v9035_v56 }
0x166e   : > { %v4993_v32 = vpack.c.bf16 %v4980_v8, %v4979_v9 }
0x1670   : > { %6841 = vmatprep.mubr.msk.bf16.mxu0 %vm4814_vm15, %v4993_v32  ;;  %v6309_v32 = vld [vmem:[%s9439_s1] ss:$0 sm:$0xff]  ;;  %s9441_s1 = sld [smem:[#allocation25_spill]] }
0x1671   : > { %6842 = vmatmul.mubr.msk.bf16.gmra.mxu0 %vm4814_vm15, %v4994_v52 }
0x16f3   : > { %v6849_v56 = vpop.f32.mrf.mxu1 }
0x16f5   : > { %v5135_v6 = vpop.f32.mrf.mxu1 }
0x16f7   : > { %v6850_v17 = vpop.f32.mrf.mxu1 }
0x16f8   : > { %v7093_v45 = vpack.i.bf16 %v6850_v17, %v6849_v56 }
0x16f9   : > { %v5138_v62 = vpop.f32.mrf.mxu1 }
0x16fa   : > { %v7088_v27 = vpack.i.bf16 %v5138_v62, %v5135_v6  ;;  %7094 = vrot.lane.b32.xlu0 %v7093_v45, %s9438_s2 }
0x16fc   : > { %7089 = vrot.lane.b32.xlu1 %v7088_v27, %s9438_s2  ;;  %v6853_v15 = vpop.f32.mrf.mxu1 }
0x16fe   : > { %v5151_v7 = vpop.f32.mrf.mxu1 }
0x1700   : > { %v6854_v11 = vpop.f32.mrf.mxu1 }
0x1701   : > { %v7103_v40 = vpack.i.bf16 %v6854_v11, %v6853_v15 }
0x1702   : > { %v5154_v16 = vpop.f32.mrf.mxu1 }
0x1703   : > { %v7098_v26 = vpack.i.bf16 %v5154_v16, %v5151_v7 }
0x1705   : > { %7099 = vrot.lane.b32.xlu0 %v7098_v26, %s9438_s2 }
0x1709   : > { %7104 = vrot.lane.b32.xlu0 %v7103_v40, %s9438_s2  ;;  %s9440_s2 = sld [smem:[#allocation27_spill]] }
0x170e   : > { %v6839_v10 = vpop.f32.mrf.mxu0 }
0x1710   : > { %v5052_v37 = vpop.f32.mrf.mxu0 }
0x1712   : > { %v6840_v33 = vpop.f32.mrf.mxu0 }
0x1714   : > { %v5055_v21 = vpop.f32.mrf.mxu0 }
0x1731   : > { %v6843_v20 = vpop.f32.mrf.mxu0 }
0x1733   : > { %v5068_v19 = vpop.f32.mrf.mxu0 }
0x1735   : > { %v6844_v3 = vpop.f32.mrf.mxu0 }
0x1737   : > { %v5071_v57 = vpop.f32.mrf.mxu0 }
0x176c   : > { %v7095_v50 = vpop.permute.xlu0 %7094 }
0x176d   : > { %v7097_v13 = vunpack.i.h.bf16 %v7095_v50  ;;  %v7096_v0 = vunpack.i.l.bf16 %v7095_v50 }
0x176e   : > { %v7090_v51 = vpop.permute.xlu1 %7089 }
0x176f   : > { %v7092_v42 = vunpack.i.h.bf16 %v7090_v51  ;;  %v7091_v30 = vunpack.i.l.bf16 %v7090_v51  ;;  %v5201_v35 = vsel %vm1783_vm2, %v6840_v33, %v7097_v13  ;;  %v5200_v44 = vsel %vm1783_vm2, %v6839_v10, %v7096_v0 }
0x1770   : > { %v5211_v25 = vpack.c.bf16 %v5201_v35, %v5200_v44 }
0x1771   : > { %v5198_v1 = vsel %vm1783_vm2, %v5052_v37, %v7091_v30  ;;  %v5199_v49 = vsel %vm1783_vm2, %v5055_v21, %v7092_v42 }
0x1772   : > { %v5210_v63 = vpack.c.bf16 %v5199_v49, %v5198_v1 }
0x1774   : > { %6859 = vmatprep.mubr.msk.bf16.mxu0 %vm1361_vm1, %v5210_v63 }
0x1775   : > { %6860 = vmatmul.mubr.msk.bf16.vlgmr.msra.gmra.mxu0 %vm1361_vm1, %v5211_v25 }
0x1777   : > { %v7100_v55 = vpop.permute.xlu0 %7099 }
0x1778   : > { %v7102_v18 = vunpack.i.h.bf16 %v7100_v55  ;;  %v7101_v31 = vunpack.i.l.bf16 %v7100_v55 }
0x177a   : > { %v5203_v60 = vsel %vm1783_vm2, %v5071_v57, %v7102_v18  ;;  %v5202_v38 = vsel %vm1783_vm2, %v5068_v19, %v7101_v31 }
0x177b   : > { %v5212_v48 = vpack.c.bf16 %v5203_v60, %v5202_v38  ;;  %v7105_v28 = vpop.permute.xlu0 %7104 }
0x177c   : > { %v7107_v36 = vunpack.i.h.bf16 %v7105_v28  ;;  %v7106_v5 = vunpack.i.l.bf16 %v7105_v28 }
0x177d   : > { %6863 = vmatprep.mubr.msk.bf16.mxu0 %vm1361_vm1, %v5212_v48 }
0x177e   : > { %v5205_v39 = vsel %vm1783_vm2, %v6844_v3, %v7107_v36  ;;  %v5204_v47 = vsel %vm1783_vm2, %v6843_v20, %v7106_v5 }
0x177f   : > { %v5213_v29 = vpack.c.bf16 %v5205_v39, %v5204_v47 }
0x1781   : > { %6864 = vmatmul.mubr.msk.bf16.gmra.mxu0 %vm1361_vm1, %v5213_v29 }
0x1835   : > { %v6861_v4 = vpop.f32.mrf.mxu0 }
0x1836   : > { %v5295_v8 = vadd.f32 %v6861_v4, %v8619_v24 }
0x1837   : > { %v5262_v9 = vpop.f32.mrf.mxu0 }
0x1838   : > { %v5293_v54 = vadd.f32 %v5262_v9, %v8629_v58  ;;  %v9094_v59 = vadd.f32 %v6309_v32, %v5295_v8 }
0x1839   : > { %v6862_v52 = vpop.f32.mrf.mxu0 }
0x183a   : > { %v9092_v22 = vadd.f32 %v6309_v32, %v5293_v54  ;;  %v5296_v23 = vadd.f32 %v6862_v52, %v8633_v12  ;;  %v5324_v58 = vsel %vm1361_vm1, %v9094_v59, 0.0 }
0x183b   : > { %v5265_v61 = vpop.f32.mrf.mxu0 }
0x183c   : > { %v5294_v53 = vadd.f32 %v5265_v61, %v8641_v34  ;;  %v5318_v14 = vsel %vm1361_vm1, %v9092_v22, 0.0  ;;  %v9102_v24 = vadd.f32 %v6309_v32, %v5296_v23 }
0x183d   : > { %5319 = vadd.xlane.f32.xlu0 %v5318_v14  ;;  %v5452_v14 = vld [vmem:[%s9440_s2 + $0x10] sm:$0xff] }
0x183e   : > { %v9100_v56 = vadd.f32 %v6309_v32, %v5294_v53  ;;  %v5327_v62 = vsel %vm1361_vm1, %v9102_v24, 0.0 }
0x1840   : > { %v5321_v6 = vsel %vm1361_vm1, %v9100_v56, 0.0 }
0x1841   : > { %5325 = vadd.xlane.f32.xlu0 %v5324_v58  ;;  %5322 = vadd.xlane.f32.xlu1 %v5321_v6  ;;  %v6865_v17 = vpop.f32.mrf.mxu0  ;;  %v5453_v58 = vld [vmem:[%s9440_s2 + $0x18] sm:$0xff] }
0x1842   : > { %v5299_v34 = vadd.f32 %v6865_v17, %v8645_v46  ;;  %v5459_v6 = vpack.c.bf16 %v5453_v58, %v5452_v14  ;;  %v5450_v17 = vld [vmem:[%s9440_s2] sm:$0xff] }
0x1843   : > { %v5278_v12 = vpop.f32.mrf.mxu0 }
0x1844   : > { %v5297_v45 = vadd.f32 %v5278_v12, %v8652_v2  ;;  %v9114_v11 = vadd.f32 %v6309_v32, %v5299_v34  ;;  %6867 = vmatprep.subr.bf16.mxu1 %v5459_v6  ;;  %v5451_v12 = vld [vmem:[%s9440_s2 + $0x8] sm:$0xff]  ;;  %s6331_s2 = sshll.u32 %s9447_s10, 3 }
0x1845   : > { %5328 = vadd.xlane.f32.xlu0 %v5327_v62  ;;  %v6866_v27 = vpop.f32.mrf.mxu0  ;;  %6868 = vmatpush3.bf16.msra.mxu1 %v5459_v6  ;;  %v5458_v34 = vpack.c.bf16 %v5451_v12, %v5450_v17 }
0x1846   : > { %v9112_v15 = vadd.f32 %v6309_v32, %v5297_v45  ;;  %v5300_v16 = vadd.f32 %v6866_v27, %v8655_v41  ;;  %v5336_v10 = vsel %vm1361_vm1, %v9114_v11, 0.0 }
0x1847   : > { %v5281_v7 = vpop.f32.mrf.mxu0  ;;  %6869 = vmatprep.subr.bf16.mxu1 %v5458_v34 }
0x1848   : > { %v5298_v26 = vadd.f32 %v5281_v7, %v8661_v43  ;;  %v5330_v40 = vsel %vm1361_vm1, %v9112_v15, 0.0  ;;  %v9122_v2 = vadd.f32 %v6309_v32, %v5300_v16 }
0x1849   : > { %5331 = vadd.xlane.f32.xlu0 %v5330_v40  ;;  %6870 = vmatpush3.bf16.msra.mxu1 %v5458_v34 }
0x184a   : > { %v9120_v46 = vadd.f32 %v6309_v32, %v5298_v26  ;;  %v5339_v41 = vsel %vm1361_vm1, %v9122_v2, 0.0 }
0x184c   : > { %v5333_v37 = vsel %vm1361_vm1, %v9120_v46, 0.0 }
0x184d   : > { %5337 = vadd.xlane.f32.xlu0 %v5336_v10  ;;  %5334 = vadd.xlane.f32.xlu1 %v5333_v37 }
0x1851   : > { %5340 = vadd.xlane.f32.xlu1 %v5339_v41 }
0x18c6   : > { %v5320_v43 = vpop.xlane.xlu0 %5319 }
0x18c7   : > { %v5342_v33 = vmul.f32 0.03125, %v5320_v43 }
0x18c9   : > { %v9131_v21 = vsub.f32 %v9092_v22, %v5342_v33 }
0x18ca   : > { %v5326_v50 = vpop.xlane.xlu0 %5325  ;;  %v5323_v20 = vpop.xlane.xlu1 %5322 }
0x18cb   : > { %v5344_v13 = vmul.f32 0.03125, %v5326_v50  ;;  %v5343_v0 = vmul.f32 0.03125, %v5323_v20  ;;  %v5358_v51 = vmul.f32 %v9131_v21, %v9131_v21 }
0x18cd   : > { %v9136_v42 = vsub.f32 %v9094_v59, %v5344_v13  ;;  %v9139_v30 = vsub.f32 %v9100_v56, %v5343_v0  ;;  %v5366_v35 = vsel %vm1361_vm1, %v5358_v51, 0.0 }
0x18ce   : > { %v5329_v44 = vpop.xlane.xlu0 %5328  ;;  %5367 = vadd.xlane.f32.xlu0 %v5366_v35 }
0x18cf   : > { %v5345_v19 = vmul.f32 0.03125, %v5329_v44  ;;  %v5360_v1 = vmul.f32 %v9136_v42, %v9136_v42  ;;  %v5359_v49 = vmul.f32 %v9139_v30, %v9139_v30 }
0x18d1   : > { %v9147_v63 = vsub.f32 %v9102_v24, %v5345_v19  ;;  %v5372_v25 = vsel %vm1361_vm1, %v5360_v1, 0.0  ;;  %v5369_v3 = vsel %vm1361_vm1, %v5359_v49, 0.0 }
0x18d2   : > { %5373 = vadd.xlane.f32.xlu0 %v5372_v25  ;;  %v5332_v55 = vpop.xlane.xlu0 %5331  ;;  %5370 = vadd.xlane.f32.xlu1 %v5369_v3 }
0x18d3   : > { %v5346_v18 = vmul.f32 0.03125, %v5332_v55  ;;  %v5361_v31 = vmul.f32 %v9147_v63, %v9147_v63  ;;  %v6310_v55 = vld [vmem:[%s9441_s1] ss:$0 sm:$0xff]  ;;  %s9444_s1 = smov 32  }
0x18d5   : > { %v9154_v57 = vsub.f32 %v9112_v15, %v5346_v18  ;;  %v5375_v60 = vsel %vm1361_vm1, %v5361_v31, 0.0 }
0x18d6   : > { %v5338_v38 = vpop.xlane.xlu0 %5337  ;;  %5376 = vadd.xlane.f32.xlu1 %v5375_v60  ;;  %v5335_v48 = vpop.xlane.xlu1 %5334 }
0x18d7   : > { %v5348_v28 = vmul.f32 0.03125, %v5338_v38  ;;  %v5347_v36 = vmul.f32 0.03125, %v5335_v48  ;;  %v5362_v5 = vmul.f32 %v9154_v57, %v9154_v57 }
0x18d9   : > { %v9160_v39 = vsub.f32 %v9114_v11, %v5348_v28  ;;  %v9163_v47 = vsub.f32 %v9120_v46, %v5347_v36  ;;  %v5378_v29 = vsel %vm1361_vm1, %v5362_v5, 0.0  ;;  %v6311_v5 = vld [vmem:[%s9442_s0] ss:$0 sm:$0xff]  ;;  %s9443_s0 = sld [smem:[#allocation28_spill]] }
0x18da   : > { %5379 = vadd.xlane.f32.xlu0 %v5378_v29  ;;  %v5341_v4 = vpop.xlane.xlu1 %5340 }
0x18db   : > { %v5349_v9 = vmul.f32 0.03125, %v5341_v4  ;;  %v5364_v8 = vmul.f32 %v9160_v39, %v9160_v39  ;;  %v5363_v54 = vmul.f32 %v9163_v47, %v9163_v47 }
0x18dd   : > { %v9171_v32 = vsub.f32 %v9122_v2, %v5349_v9  ;;  %v5384_v52 = vsel %vm1361_vm1, %v5364_v8, 0.0  ;;  %v5381_v61 = vsel %vm1361_vm1, %v5363_v54, 0.0 }
0x18de   : > { %5385 = vadd.xlane.f32.xlu0 %v5384_v52  ;;  %5382 = vadd.xlane.f32.xlu1 %v5381_v61 }
0x18df   : > { %v5365_v23 = vmul.f32 %v9171_v32, %v9171_v32 }
0x18e1   : > { %v5387_v53 = vsel %vm1361_vm1, %v5365_v23, 0.0 }
0x18e2   : > { %5388 = vadd.xlane.f32.xlu1 %v5387_v53 }
0x1957   : > { %v5368_v45 = vpop.xlane.xlu0 %5367 }
0x1958   : > { %v5390_v62 = vmul.f32 0.03125, %v5368_v45 }
0x195a   : > { %v5398_v27 = vadd.f32 1e-06, %v5390_v62 }
0x195b   : > { %v5374_v7 = vpop.xlane.xlu0 %5373  ;;  %v5371_v16 = vpop.xlane.xlu1 %5370 }
0x195c   : > { %7393 = vrsqrt.f32 %v5398_v27  ;;  %v5392_v26 = vmul.f32 0.03125, %v5374_v7  ;;  %v5391_v40 = vmul.f32 0.03125, %v5371_v16 }
0x195e   : > { %v5400_v10 = vadd.f32 1e-06, %v5392_v26  ;;  %v5399_v37 = vadd.f32 1e-06, %v5391_v40 }
0x195f   : > { %v5377_v41 = vpop.xlane.xlu1 %5376 }
0x1960   : > { %7395 = vrsqrt.f32 %v5400_v10  ;;  %v5393_v43 = vmul.f32 0.03125, %v5377_v41  ;;  %v5774_v10 = vld [vmem:[%s7726_s12 + $0x70] sm:$0xff]  ;;  %v5772_v41 = vld [vmem:[%s7726_s12 + $0x60] sm:$0xff] }
0x1961   : > { %7397 = vrsqrt.f32 %v5399_v37 }
0x1962   : > { %v5401_v33 = vadd.f32 1e-06, %v5393_v43  ;;  %v5773_v43 = vld [vmem:[%s7726_s12 + $0x68] sm:$0xff] }
0x1963   : > { %v5380_v50 = vpop.xlane.xlu0 %5379 }
0x1964   : > { %7399 = vrsqrt.f32 %v5401_v33  ;;  %v5394_v20 = vmul.f32 0.03125, %v5380_v50  ;;  %v5786_v33 = vpack.c.bf16 %v5773_v43, %v5772_v41  ;;  %v5770_v50 = vld [vmem:[%s7726_s12 + $0x50] sm:$0xff] }
0x1966   : > { %v5402_v13 = vadd.f32 1e-06, %v5394_v20  ;;  %v5771_v20 = vld [vmem:[%s7726_s12 + $0x58] sm:$0xff] }
0x1967   : > { %v5386_v0 = vpop.xlane.xlu0 %5385  ;;  %v5383_v51 = vpop.xlane.xlu1 %5382 }
0x1968   : > { %7401 = vrsqrt.f32 %v5402_v13  ;;  %v5396_v35 = vmul.f32 0.03125, %v5386_v0  ;;  %v5395_v44 = vmul.f32 0.03125, %v5383_v51  ;;  %v5785_v13 = vpack.c.bf16 %v5771_v20, %v5770_v50  ;;  %v5768_v0 = vld [vmem:[%s7726_s12 + $0x40] sm:$0xff]  ;;  %v5769_v51 = vld [vmem:[%s7726_s12 + $0x48] sm:$0xff] }
0x1969   : > { %v7394_v19 = vpop.eup %7393 }
0x196a   : > { %v5404_v1 = vadd.f32 1e-06, %v5396_v35  ;;  %v5403_v49 = vadd.f32 1e-06, %v5395_v44  ;;  %v5414_v3 = vmul.f32 %v7394_v19, %v9131_v21  ;;  %v5784_v35 = vpack.c.bf16 %v5769_v51, %v5768_v0  ;;  %v5766_v44 = vld [vmem:[%s7726_s12 + $0x30] sm:$0xff]  ;;  %v5767_v19 = vld [vmem:[%s7726_s12 + $0x38] sm:$0xff] }
0x196b   : > { %v5389_v25 = vpop.xlane.xlu1 %5388 }
0x196c   : > { %7403 = vrsqrt.f32 %v5404_v1  ;;  %v5397_v18 = vmul.f32 0.03125, %v5389_v25  ;;  %v5428_v36 = vmul.f32 %v6310_v55, %v5414_v3  ;;  %v5783_v1 = vpack.c.bf16 %v5767_v19, %v5766_v44  ;;  %v5765_v25 = vld [vmem:[%s7726_s12 + $0x28] sm:$0xff] }
0x196d   : > { %v7396_v31 = vpop.eup %7395  ;;  %7405 = vrsqrt.f32 %v5403_v49  ;;  %v5764_v49 = vld [vmem:[%s7726_s12 + $0x20] sm:$0xff] }
0x196e   : > { %v7398_v60 = vpop.eup %7397  ;;  %v5416_v38 = vmul.f32 %v7396_v31, %v9136_v42  ;;  %v5405_v48 = vadd.f32 1e-06, %v5397_v18  ;;  %v5442_v21 = vadd.f32 %v6311_v5, %v5428_v36  ;;  %v5782_v3 = vpack.c.bf16 %v5765_v25, %v5764_v49  ;;  %v5763_v18 = vld [vmem:[%s7726_s12 + $0x18] sm:$0xff] }
0x196f   : > { %v5415_v28 = vmul.f32 %v7398_v60, %v9139_v30  ;;  %v5760_v60 = vld [vmem:[%s7726_s12] sm:$0xff] }
0x1970   : > { %7407 = vrsqrt.f32 %v5405_v48  ;;  %v5430_v9 = vmul.f32 %v6310_v55, %v5416_v38  ;;  %v5761_v38 = vld [vmem:[%s7726_s12 + $0x8] sm:$0xff] }
0x1971   : > { %v7400_v29 = vpop.eup %7399  ;;  %v5429_v4 = vmul.f32 %v6310_v55, %v5415_v28  ;;  %v5780_v48 = vpack.c.bf16 %v5761_v38, %v5760_v60  ;;  %v6312_v28 = vld [vmem:[%s9443_s0] ss:$0 sm:$0xff]  ;;  %s9445_s0 = smov 64  }
0x1972   : > { %v5417_v8 = vmul.f32 %v7400_v29, %v9147_v63  ;;  %v5444_v53 = vadd.f32 %v6311_v5, %v5430_v9 }
0x1973   : > { %v5443_v54 = vadd.f32 %v6311_v5, %v5429_v4 }
0x1974   : > { %v5431_v52 = vmul.f32 %v6310_v55, %v5417_v8 }
0x1975   : > { %v7402_v61 = vpop.eup %7401  ;;  %v5454_v23 = vpack.c.bf16 %v5443_v54, %v5442_v21 }
0x1976   : > { %v5445_v14 = vadd.f32 %v6311_v5, %v5431_v52  ;;  %v5418_v42 = vmul.f32 %v7402_v61, %v9154_v57 }
0x1977   : > { %6871 = vmatprep.mubr.msk.bf16.mxu1 %vm1361_vm1, %v5454_v23 }
0x1978   : > { %v5455_v30 = vpack.c.bf16 %v5445_v14, %v5444_v53  ;;  %v5432_v12 = vmul.f32 %v6310_v55, %v5418_v42 }
0x1979   : > { %v7404_v58 = vpop.eup %7403 }
0x197a   : > { %v7406_v6 = vpop.eup %7405  ;;  %6872 = vmatmul.mubr.msk.bf16.vlgmr.msra.gmra.mxu1 %vm1361_vm1, %v5455_v30  ;;  %v5420_v17 = vmul.f32 %v7404_v58, %v9160_v39  ;;  %v5446_v57 = vadd.f32 %v6311_v5, %v5432_v12 }
0x197b   : > { %v5419_v63 = vmul.f32 %v7406_v6, %v9163_v47 }
0x197c   : > { %v5434_v27 = vmul.f32 %v6310_v55, %v5420_v17 }
0x197d   : > { %v7408_v34 = vpop.eup %7407  ;;  %v5433_v45 = vmul.f32 %v6310_v55, %v5419_v63 }
0x197e   : > { %v5421_v62 = vmul.f32 %v7408_v34, %v9171_v32  ;;  %v5448_v40 = vadd.f32 %v6311_v5, %v5434_v27  ;;  %v5775_v32 = vld [vmem:[%s7726_s12 + $0x78] sm:$0xff] }
0x197f   : > { %v5447_v7 = vadd.f32 %v6311_v5, %v5433_v45  ;;  %v5787_v37 = vpack.c.bf16 %v5775_v32, %v5774_v10 }
0x1980   : > { %v5435_v16 = vmul.f32 %v6310_v55, %v5421_v62  ;;  %v5762_v55 = vld [vmem:[%s7726_s12 + $0x10] sm:$0xff] }
0x1981   : > { %v5456_v26 = vpack.c.bf16 %v5447_v7, %v5446_v57  ;;  %6879 = vmatprep.subr.bf16.mxu0 %v5787_v37  ;;  %v5781_v31 = vpack.c.bf16 %v5763_v18, %v5762_v55 }
0x1982   : > { %v5449_v39 = vadd.f32 %v6311_v5, %v5435_v16  ;;  %6880 = vmatpush3.bf16.msra.mxu0 %v5787_v37 }
0x1983   : > { %6875 = vmatprep.mubr.msk.bf16.mxu1 %vm1361_vm1, %v5456_v26  ;;  %6881 = vmatprep.subr.bf16.mxu0 %v5786_v33 }
0x1984   : > { %v5457_v47 = vpack.c.bf16 %v5449_v39, %v5448_v40 }
0x1986   : > { %6876 = vmatmul.mubr.msk.bf16.gmra.mxu1 %vm1361_vm1, %v5457_v47  ;;  %6882 = vmatpush3.bf16.msra.mxu0 %v5786_v33 }
0x1987   : > { %6883 = vmatprep.subr.bf16.mxu0 %v5785_v13 }
0x198a   : > { %6884 = vmatpush3.bf16.msra.mxu0 %v5785_v13 }
0x198b   : > { %6885 = vmatprep.subr.bf16.mxu0 %v5784_v35 }
0x198e   : > { %6886 = vmatpush3.bf16.msra.mxu0 %v5784_v35 }
0x198f   : > { %6887 = vmatprep.subr.bf16.mxu0 %v5783_v1 }
0x1992   : > { %6888 = vmatpush3.bf16.msra.mxu0 %v5783_v1 }
0x1993   : > { %6889 = vmatprep.subr.bf16.mxu0 %v5782_v3 }
0x1996   : > { %6890 = vmatpush3.bf16.msra.mxu0 %v5782_v3 }
0x1997   : > { %6891 = vmatprep.subr.bf16.mxu0 %v5781_v31 }
0x199a   : > { %6892 = vmatpush3.bf16.msra.mxu0 %v5781_v31 }
0x199b   : > { %6893 = vmatprep.subr.bf16.mxu0 %v5780_v48 }
0x199e   : > { %6894 = vmatpush3.bf16.msra.mxu0 %v5780_v48 }
0x1a3a   : > { %v6873_v36 = vpop.f32.mrf.mxu1 }
0x1a3b   : > { %v9213_v5 = vadd.f32 %v6873_v36, %v6312_v28 }
0x1a3c   : > { %v5513_v29 = vpop.f32.mrf.mxu1 }
0x1a3d   : > { %v9216_v4 = vmul.f32 0.70710677, %v9213_v5  ;;  %v9218_v9 = vadd.f32 %v6312_v28, %v5513_v29 }
0x1a3e   : > { %v6874_v8 = vpop.f32.mrf.mxu1 }
0x1a3f   : > { %v5554_v21 = vand.u32 2147483647, %v9216_v4  ;;  %v9222_v54 = vmul.f32 0.70710677, %v9218_v9  ;;  %v9224_v52 = vadd.f32 %v6874_v8, %v6312_v28  ;;  %vm5714_vm2 = vcmp.ge.f32.partialorder %v9216_v4, 0.0 }
0x1a40   : > { %v5516_v61 = vpop.f32.mrf.mxu1 }
0x1a41   : > { %v5562_v23 = vmul.f32 0.3275911, %v5554_v21  ;;  %v5552_v53 = vand.u32 2147483647, %v9222_v54  ;;  %v9228_v14 = vmul.f32 0.70710677, %v9224_v52  ;;  %v9230_v42 = vadd.f32 %v6312_v28, %v5516_v61 }
0x1a42   : > { %v5666_v26 = vsub.f32 0.0, %v5554_v21  ;;  %vm5712_vm4 = vcmp.ge.f32.partialorder %v9222_v54, 0.0 }
0x1a43   : > { %v5570_v30 = vadd.f32 1.0, %v5562_v23  ;;  %v5560_v58 = vmul.f32 0.3275911, %v5552_v53  ;;  %v5555_v6 = vand.u32 2147483647, %v9228_v14  ;;  %v5664_v37 = vsub.f32 0.0, %v5552_v53 }
0x1a44   : > { %v9234_v17 = vmul.f32 0.70710677, %v9230_v42  ;;  %v5674_v50 = vmul.f32 %v5666_v26, %v5554_v21  ;;  %vm5715_vm5 = vcmp.ge.f32.partialorder %v9228_v14, 0.0  ;;  %v5739_v14 = vmul.f32 0.5, %v9224_v52 }
0x1a45   : > { %7409 = vrcp.f32 %v5570_v30  ;;  %v5568_v63 = vadd.f32 1.0, %v5560_v58  ;;  %v5563_v12 = vmul.f32 0.3275911, %v5555_v6  ;;  %v5672_v35 = vmul.f32 %v5664_v37, %v5552_v53 }
0x1a46   : > { %v5553_v34 = vand.u32 2147483647, %v9234_v17  ;;  %v6877_v45 = vpop.f32.mrf.mxu1  ;;  %v5667_v44 = vsub.f32 0.0, %v5555_v6  ;;  %v5684_v3 = vmul.f32 1.442695, %v5674_v50  ;;  %vm5713_vm6 = vcmp.ge.f32.partialorder %v9234_v17, 0.0 }
0x1a47   : > { %v9237_v62 = vadd.f32 %v6877_v45, %v6312_v28  ;;  %7411 = vrcp.f32 %v5568_v63  ;;  %v5571_v27 = vadd.f32 1.0, %v5563_v12  ;;  %v5680_v48 = vmul.f32 1.442695, %v5672_v35 }
0x1a48   : > { %v5561_v57 = vmul.f32 0.3275911, %v5553_v34  ;;  %v5529_v7 = vpop.f32.mrf.mxu1  ;;  %v5665_v55 = vsub.f32 0.0, %v5553_v34 }
0x1a49   : > { %v9240_v16 = vmul.f32 0.70710677, %v9237_v62  ;;  %7413 = vrcp.f32 %v5571_v27  ;;  %v9242_v39 = vadd.f32 %v6312_v28, %v5529_v7 }
0x1a4a   : > { %v5569_v40 = vadd.f32 1.0, %v5561_v57  ;;  %v6878_v47 = vpop.f32.mrf.mxu1  ;;  %v5673_v53 = vmul.f32 %v5665_v55, %v5553_v34 }
0x1a4b   : > { %v5558_v10 = vand.u32 2147483647, %v9240_v16  ;;  %v9245_v32 = vadd.f32 %v6878_v47, %v6312_v28  ;;  %v9248_v41 = vmul.f32 0.70710677, %v9242_v39  ;;  %vm5718_vm9 = vcmp.ge.f32.partialorder %v9240_v16, 0.0 }
0x1a4c   : > { %v5532_v43 = vpop.f32.mrf.mxu1  ;;  %7415 = vrcp.f32 %v5569_v40  ;;  %v5682_v47 = vmul.f32 1.442695, %v5673_v53  ;;  %v5742_v16 = vmul.f32 0.5, %v9237_v62 }
0x1a4d   : > { %v5566_v33 = vmul.f32 0.3275911, %v5558_v10  ;;  %v5556_v20 = vand.u32 2147483647, %v9248_v41  ;;  %v9252_v13 = vmul.f32 0.70710677, %v9245_v32  ;;  %v9254_v51 = vadd.f32 %v6312_v28, %v5532_v43 }
0x1a4e   : > { %v5675_v28 = vmul.f32 %v5667_v44, %v5555_v6  ;;  %v5670_v21 = vsub.f32 0.0, %v5558_v10  ;;  %vm5716_vm7 = vcmp.ge.f32.partialorder %v9248_v41, 0.0  ;;  %v5740_v41 = vmul.f32 0.5, %v9242_v39 }
0x1a4f   : > { %v5574_v0 = vadd.f32 1.0, %v5566_v33  ;;  %v5564_v19 = vmul.f32 0.3275911, %v5556_v20  ;;  %v5559_v1 = vand.u32 2147483647, %v9252_v13  ;;  %v5668_v63 = vsub.f32 0.0, %v5556_v20 }
0x1a50   : > { %v9258_v49 = vmul.f32 0.70710677, %v9254_v51  ;;  %v5686_v27 = vmul.f32 1.442695, %v5675_v28  ;;  %v5678_v7 = vmul.f32 %v5670_v21, %v5558_v10  ;;  %vm5719_vm8 = vcmp.ge.f32.partialorder %v9252_v13, 0.0 }
0x1a51   : > { %7417 = vrcp.f32 %v5574_v0  ;;  %v5572_v18 = vadd.f32 1.0, %v5564_v19  ;;  %v5567_v31 = vmul.f32 0.3275911, %v5559_v1  ;;  %v5671_v37 = vsub.f32 0.0, %v5559_v1 }
0x1a52   : > { %v9260_v25 = vpop.eup %7409  ;;  %v9264_v38 = vand.u32 2147483647, %v9258_v49  ;;  %v5676_v50 = vmul.f32 %v5668_v63, %v5556_v20  ;;  %v5692_v10 = vmul.f32 1.442695, %v5678_v7  ;;  %vm5717_vm10 = vcmp.ge.f32.partialorder %v9258_v49, 0.0  ;;  %v7163_v49 = vld [vmem:[%s7736_s27] sm:$0xff]  }
0x1a53   : > { %v5594_v60 = vmul.f32 1.0614054, %v9260_v25  ;;  %7419 = vrcp.f32 %v5572_v18  ;;  %v5575_v36 = vadd.f32 1.0, %v5567_v31  ;;  %v5679_v31 = vmul.f32 %v5671_v37, %v5559_v1  ;;  %6911 = vmatprep.mubr.msk.bf16.mxu1 %vm1974_vm3, %v7163_v49 }
0x1a54   : > { %v9266_v29 = vpop.eup %7411  ;;  %v5565_v61 = vmul.f32 0.3275911, %v9264_v38  ;;  %7421 = vpow2.f32 %v5684_v3  ;;  %v5688_v28 = vmul.f32 1.442695, %v5676_v50  ;;  %v5669_v21 = vsub.f32 0.0, %v9264_v38 }
0x1a55   : > { %v5602_v8 = vadd.f32 -1.4531521, %v5594_v60  ;;  %v5592_v23 = vmul.f32 1.0614054, %v9266_v29  ;;  %7423 = vrcp.f32 %v5575_v36  ;;  %v5741_v13 = vmul.f32 0.5, %v9254_v51 }
0x1a56   : > { %v9270_v30 = vpop.eup %7413  ;;  %v5573_v12 = vadd.f32 1.0, %v5565_v61  ;;  %7425 = vpow2.f32 %v5680_v48 }
0x1a57   : > { %v5610_v58 = vmul.f32 %v9260_v25, %v5602_v8  ;;  %v5600_v6 = vadd.f32 -1.4531521, %v5592_v23  ;;  %v5595_v45 = vmul.f32 1.0614054, %v9270_v30 }
0x1a58   : > { %7427 = vrcp.f32 %v5573_v12 }
0x1a59   : > { %v5618_v57 = vadd.f32 1.4214138, %v5610_v58  ;;  %v9274_v26 = vpop.eup %7415  ;;  %v5608_v40 = vmul.f32 %v9266_v29, %v5600_v6  ;;  %v5603_v34 = vadd.f32 -1.4531521, %v5595_v45  ;;  %7429 = vpow2.f32 %v5686_v27 }
0x1a5a   : > { %v5593_v33 = vmul.f32 1.0614054, %v9274_v26  ;;  %7431 = vpow2.f32 %v5682_v47  ;;  %v5694_v6 = vmul.f32 1.442695, %v5679_v31 }
0x1a5b   : > { %v5626_v43 = vmul.f32 %v9260_v25, %v5618_v57  ;;  %v5616_v0 = vadd.f32 1.4214138, %v5608_v40  ;;  %v5611_v35 = vmul.f32 %v9270_v30, %v5603_v34  ;;  %7433 = vpow2.f32 %v5692_v10 }
0x1a5c   : > { %v5601_v19 = vadd.f32 -1.4531521, %v5593_v33  ;;  %7435 = vpow2.f32 %v5688_v28 }
0x1a5d   : > { %v5634_v44 = vadd.f32 -0.28449672, %v5626_v43  ;;  %v5624_v55 = vmul.f32 %v9266_v29, %v5616_v0  ;;  %v5619_v18 = vadd.f32 1.4214138, %v5611_v35  ;;  %v5677_v43 = vmul.f32 %v5669_v21, %v9264_v38 }
0x1a5e   : > { %v9280_v3 = vpop.eup %7417  ;;  %v5609_v48 = vmul.f32 %v9274_v26, %v5601_v19  ;;  %7437 = vpow2.f32 %v5694_v6 }
0x1a5f   : > { %v5642_v60 = vmul.f32 %v9260_v25, %v5634_v44  ;;  %v5598_v20 = vmul.f32 1.0614054, %v9280_v3  ;;  %v5632_v36 = vadd.f32 -0.28449672, %v5624_v55  ;;  %v5627_v8 = vmul.f32 %v9270_v30, %v5619_v18 }
0x1a60   : > { %v9288_v61 = vpop.eup %7419  ;;  %v5617_v53 = vadd.f32 1.4214138, %v5609_v48 }
0x1a61   : > { %v5650_v23 = vadd.f32 0.2548296, %v5642_v60  ;;  %v5606_v58 = vadd.f32 -1.4531521, %v5598_v20  ;;  %v5640_v1 = vmul.f32 %v9266_v29, %v5632_v36  ;;  %v5635_v63 = vadd.f32 -0.28449672, %v5627_v8  ;;  %v7422_v45 = vpop.eup %7421 }
0x1a62   : > { %v5596_v12 = vmul.f32 1.0614054, %v9288_v61  ;;  %v5625_v57 = vmul.f32 %v9274_v26, %v5617_v53  ;;  %v9295_v40 = vpop.eup %7423  ;;  %v5690_v53 = vmul.f32 1.442695, %v5677_v43 }
0x1a63   : > { %v5658_v27 = vmul.f32 %v9260_v25, %v5650_v23  ;;  %v5614_v7 = vmul.f32 %v9280_v3, %v5606_v58  ;;  %v5648_v34 = vadd.f32 0.2548296, %v5640_v1  ;;  %v5643_v47 = vmul.f32 %v9270_v30, %v5635_v63  ;;  %v7426_v33 = vpop.eup %7425 }
0x1a64   : > { %v5604_v37 = vadd.f32 -1.4531521, %v5596_v12  ;;  %v5633_v0 = vadd.f32 -0.28449672, %v5625_v57  ;;  %v5599_v44 = vmul.f32 1.0614054, %v9295_v40  ;;  %7439 = vpow2.f32 %v5690_v53 }
0x1a65   : > { %v5698_v50 = vmul.f32 %v7422_v45, %v5658_v27  ;;  %v5622_v35 = vadd.f32 1.4214138, %v5614_v7  ;;  %v9300_v25 = vpop.eup %7427  ;;  %v5656_v19 = vmul.f32 %v9266_v29, %v5648_v34  ;;  %v5651_v10 = vadd.f32 0.2548296, %v5643_v47 }
0x1a66   : > { %v5612_v55 = vmul.f32 %v9288_v61, %v5604_v37  ;;  %v5641_v31 = vmul.f32 %v9274_v26, %v5633_v0  ;;  %v5607_v60 = vadd.f32 -1.4531521, %v5599_v44  ;;  %v5597_v36 = vmul.f32 1.0614054, %v9300_v25  ;;  %v7430_v8 = vpop.eup %7429 }
0x1a67   : > { %v5706_v18 = vsub.f32 1.0, %v5698_v50  ;;  %v5630_v38 = vmul.f32 %v9280_v3, %v5622_v35  ;;  %v5696_v48 = vmul.f32 %v7426_v33, %v5656_v19  ;;  %v5659_v20 = vmul.f32 %v9270_v30, %v5651_v10  ;;  %v7432_v6 = vpop.eup %7431 }
0x1a68   : > { %v5620_v28 = vadd.f32 1.4214138, %v5612_v55  ;;  %v5649_v21 = vadd.f32 0.2548296, %v5641_v31  ;;  %v5615_v29 = vmul.f32 %v9295_v40, %v5607_v60  ;;  %v5605_v12 = vadd.f32 -1.4531521, %v5597_v36  ;;  %v7434_v0 = vpop.eup %7433 }
0x1a69   : > { %v5638_v23 = vadd.f32 -0.28449672, %v5630_v38  ;;  %v5704_v58 = vsub.f32 1.0, %v5696_v48  ;;  %v5699_v1 = vmul.f32 %v7430_v8, %v5659_v20  ;;  %v5722_v45 = vsub.f32 0.0, %v5706_v18  ;;  %v7436_v31 = vpop.eup %7435 }
0x1a6a   : > { %v5628_v63 = vmul.f32 %v9288_v61, %v5620_v28  ;;  %v5657_v27 = vmul.f32 %v9274_v26, %v5649_v21  ;;  %v5623_v57 = vadd.f32 1.4214138, %v5615_v29  ;;  %v5613_v50 = vmul.f32 %v9300_v25, %v5605_v12 }
0x1a6b   : > { %v5646_v30 = vmul.f32 %v9280_v3, %v5638_v23  ;;  %v5720_v7 = vsub.f32 0.0, %v5704_v58  ;;  %v5707_v34 = vsub.f32 1.0, %v5699_v1  ;;  %v5730_v44 = vsel %vm5714_vm2, %v5706_v18, %v5722_v45  ;;  %v7438_v21 = vpop.eup %7437 }
0x1a6c   : > { %v5636_v47 = vadd.f32 -0.28449672, %v5628_v63  ;;  %v5697_v37 = vmul.f32 %v7432_v6, %v5657_v27  ;;  %v5631_v43 = vmul.f32 %v9295_v40, %v5623_v57  ;;  %v5621_v20 = vadd.f32 1.4214138, %v5613_v50 }
0x1a6d   : > { %v5654_v33 = vadd.f32 0.2548296, %v5646_v30  ;;  %v5723_v35 = vsub.f32 0.0, %v5707_v34  ;;  %v5728_v38 = vsel %vm5712_vm4, %v5704_v58, %v5720_v7  ;;  %v5737_v8 = vmul.f32 0.5, %v9230_v42 }
0x1a6e   : > { %v5644_v26 = vmul.f32 %v9288_v61, %v5636_v47  ;;  %v5705_v19 = vsub.f32 1.0, %v5697_v37  ;;  %v5639_v55 = vadd.f32 -0.28449672, %v5631_v43  ;;  %v5629_v18 = vmul.f32 %v9300_v25, %v5621_v20 }
0x1a6f   : > { %v5662_v10 = vmul.f32 %v9280_v3, %v5654_v33  ;;  %v5731_v60 = vsel %vm5715_vm5, %v5707_v34, %v5723_v35  ;;  %v5746_v54 = vadd.f32 1.0, %v5730_v44  ;;  %v5744_v23 = vadd.f32 1.0, %v5728_v38 }
0x1a70   : > { %v5652_v48 = vadd.f32 0.2548296, %v5644_v26  ;;  %v5747_v28 = vadd.f32 1.0, %v5731_v60  ;;  %v5721_v36 = vsub.f32 0.0, %v5705_v19  ;;  %v5647_v3 = vmul.f32 %v9295_v40, %v5639_v55 }
0x1a71   : > { %v5702_v53 = vmul.f32 %v7434_v0, %v5662_v10  ;;  %v5637_v63 = vadd.f32 -0.28449672, %v5629_v18  ;;  %v5738_v12 = vmul.f32 0.5, %v9213_v5  ;;  %v5736_v42 = vmul.f32 0.5, %v9218_v9  ;;  %v7440_v0 = vpop.eup %7439 }
0x1a72   : > { %v5660_v4 = vmul.f32 %v9288_v61, %v5652_v48  ;;  %v5729_v29 = vsel %vm5713_vm6, %v5705_v19, %v5721_v36  ;;  %v5655_v52 = vadd.f32 0.2548296, %v5647_v3  ;;  %v5755_v17 = vmul.f32 %v5747_v28, %v5739_v14 }
0x1a73   : > { %v5745_v58 = vadd.f32 1.0, %v5729_v29  ;;  %v5645_v27 = vmul.f32 %v9300_v25, %v5637_v63  ;;  %v5752_v30 = vmul.f32 %v5744_v23, %v5736_v42  ;;  %v5710_v57 = vsub.f32 1.0, %v5702_v53 }
0x1a74   : > { %v5700_v1 = vmul.f32 %v7436_v31, %v5660_v4  ;;  %v5663_v45 = vmul.f32 %v9295_v40, %v5655_v52  ;;  %v5754_v7 = vmul.f32 %v5746_v54, %v5738_v12  ;;  %v5743_v60 = vmul.f32 0.5, %v9245_v32 }
0x1a75   : > { %v5753_v6 = vmul.f32 %v5745_v58, %v5737_v8  ;;  %v5653_v47 = vadd.f32 0.2548296, %v5645_v27  ;;  %v5726_v9 = vsub.f32 0.0, %v5710_v57  ;;  %v6317_v58 = vld [vmem:[#allocation2] ss:$0 sm:$0xff] }
0x1a76   : > { %v5708_v61 = vsub.f32 1.0, %v5700_v1  ;;  %v5703_v34 = vmul.f32 %v7438_v21, %v5663_v45  ;;  %v5777_v33 = vpack.c.bf16 %v5755_v17, %v5754_v7  ;;  %v7164_v7 = vld [vmem:[%s7736_s27 + $0x8] sm:$0xff]  }
0x1a77   : > { %v5776_v37 = vpack.c.bf16 %v5753_v6, %v5752_v30  ;;  %v5661_v5 = vmul.f32 %v9300_v25, %v5653_v47  ;;  %v5734_v10 = vsel %vm5718_vm9, %v5710_v57, %v5726_v9 }
0x1a78   : > { %v5724_v43 = vsub.f32 0.0, %v5708_v61  ;;  %v5711_v50 = vsub.f32 1.0, %v5703_v34  ;;  %v5750_v25 = vadd.f32 1.0, %v5734_v10  ;;  %v7166_v34 = vld [vmem:[%s7736_s27 + $0x18] sm:$0xff]  }
0x1a79   : > { %6895 = vmatprep.mubr.bf16.mxu0 %v5776_v37  ;;  %v5701_v26 = vmul.f32 %v7440_v0, %v5661_v5 }
0x1a7a   : > { %v5727_v35 = vsub.f32 0.0, %v5711_v50  ;;  %6896 = vmatmul.mubr.bf16.vlgmr.msra.gmra.mxu0 %v5777_v33  ;;  %v5732_v40 = vsel %vm5716_vm7, %v5708_v61, %v5724_v43  ;;  %v5758_v8 = vmul.f32 %v5750_v25, %v5742_v16 }
0x1a7b   : > { %v5709_v19 = vsub.f32 1.0, %v5701_v26  ;;  %v5748_v38 = vadd.f32 1.0, %v5732_v40 }
0x1a7c   : > { %v5735_v44 = vsel %vm5719_vm8, %v5711_v50, %v5727_v35 }
0x1a7d   : > { %v5751_v55 = vadd.f32 1.0, %v5735_v44  ;;  %v5725_v31 = vsub.f32 0.0, %v5709_v19  ;;  %v5756_v28 = vmul.f32 %v5748_v38, %v5740_v41 }
0x1a7f   : > { %v5733_v48 = vsel %vm5717_vm10, %v5709_v19, %v5725_v31  ;;  %v5759_v14 = vmul.f32 %v5751_v55, %v5743_v60 }
0x1a80   : > { %v5749_v20 = vadd.f32 1.0, %v5733_v48 }
0x1a81   : > { %v5779_v3 = vpack.c.bf16 %v5759_v14, %v5758_v8 }
0x1a82   : > { %v5757_v36 = vmul.f32 %v5749_v20, %v5741_v13 }
0x1a84   : > { %v5778_v4 = vpack.c.bf16 %v5757_v36, %v5756_v28 }
0x1a86   : > { %6899 = vmatprep.mubr.bf16.mxu0 %v5778_v4 }
0x1a87   : > { %6900 = vmatmul.mubr.bf16.gmra.mxu0 %v5779_v3 }
0x1b3a   : > { %v6897_v32 = vpop.f32.mrf.mxu0 }
0x1b3b   : > { %v5855_v17 = vadd.f32 %v6897_v32, %v9094_v59 }
0x1b3c   : > { %v5822_v18 = vpop.f32.mrf.mxu0 }
0x1b3e   : > { %v6898_v21 = vpop.f32.mrf.mxu0 }
0x1b3f   : > { %v5856_v52 = vadd.f32 %v6898_v21, %v9102_v24  ;;  %v5853_v24 = vadd.f32 %v5822_v18, %v9092_v22 }
0x1b40   : > { %v5825_v39 = vpop.f32.mrf.mxu0 }
0x1b41   : > { %v5871_v27 = vadd.f32 %v6317_v58, %v5856_v52  ;;  %v5868_v59 = vadd.f32 %v6317_v58, %v5853_v24 }
0x1b47   : > { %v6901_v54 = vpop.f32.mrf.mxu0 }
0x1b48   : > { %v5859_v23 = vadd.f32 %v6901_v54, %v9114_v11  ;;  %v5854_v11 = vadd.f32 %v5825_v39, %v9100_v56  ;;  %v7165_v56 = vld [vmem:[%s7736_s27 + $0x10] sm:$0xff]  }
0x1b49   : > { %v5838_v51 = vpop.f32.mrf.mxu0 }
0x1b4a   : > { %v5857_v29 = vadd.f32 %v5838_v51, %v9112_v15  ;;  %v5874_v63 = vadd.f32 %v6317_v58, %v5859_v23  ;;  %v5869_v30 = vadd.f32 %v6317_v58, %v5854_v11 }
0x1b4b   : > { %v6902_v62 = vpop.f32.mrf.mxu0 }
0x1b4c   : > { %v5860_v53 = vadd.f32 %v6902_v62, %v9122_v2  ;;  %v5872_v6 = vadd.f32 %v6317_v58, %v5857_v29  ;;  %v5870_v2 = vadd.f32 %v6317_v58, %v5855_v17  ;;  %v5884_v57 = vpack.c.bf16 %v5869_v30, %v5868_v59 }
0x1b4d   : > { %v5841_v1 = vpop.f32.mrf.mxu0 }
0x1b4e   : > { %v5875_v12 = vadd.f32 %v6317_v58, %v5860_v53  ;;  %v5858_v42 = vadd.f32 %v5841_v1, %v9120_v46  ;;  %v5885_v46 = vpack.c.bf16 %v5871_v27, %v5870_v2 }
0x1b50   : > { %v5873_v61 = vadd.f32 %v6317_v58, %v5858_v42  ;;  %v5887_v45 = vpack.c.bf16 %v5875_v12, %v5874_v63 }
0x1b52   : > { %6903 = vmatprep.subr.bf16.mxu1 %v5887_v45  ;;  %v5886_v15 = vpack.c.bf16 %v5873_v61, %v5872_v6 }
0x1b53   : > { %6904 = vmatpush3.bf16.msra.mxu1 %v5887_v45 }
0x1b54   : > { %6905 = vmatprep.subr.bf16.mxu1 %v5886_v15 }
0x1b57   : > { %6906 = vmatpush3.bf16.msra.mxu1 %v5886_v15 }
0x1b58   : > { %6907 = vmatprep.subr.bf16.mxu1 %v5885_v46 }
0x1b5b   : > { %6908 = vmatpush3.bf16.msra.mxu1 %v5885_v46 }
0x1b5c   : > { %6909 = vmatprep.subr.bf16.mxu1 %v5884_v57 }
0x1b5f   : > { %6910 = vmatpush3.bf16.msra.mxu1 %v5884_v57 }
0x1b62   : > { %6912 = vmatmul.mubr.msk.bf16.vlgmr.msra.gmra.mxu1 %vm1974_vm3, %v7164_v7 }
0x1b63   : > { %6915 = vmatprep.mubr.msk.bf16.mxu1 %vm1974_vm3, %v7165_v56 }
0x1b6a   : > { %6916 = vmatmul.mubr.msk.bf16.gmra.mxu1 %vm1974_vm3, %v7166_v34 }
0x1c22   : > { %v6913_v22 = vpop.f32.mrf.mxu1 }
0x1c24   : > { %v5954_v47 = vpop.f32.mrf.mxu1 }
0x1c26   : > { %v6914_v37 = vpop.f32.mrf.mxu1 }
0x1c27   : > { %v7108_v33 = vpack.i.bf16 %v6914_v37, %v6913_v22 }
0x1c28   : > { %v5957_v43 = vpop.f32.mrf.mxu1 }
0x1c29   : > { %7109 = vrot.lane.b32.xlu0 %v7108_v33, %s9444_s1  ;;  %s1251_s1 = scalar_lea.vmem %s7741_s30, %s6331_s2 }
0x1c2a   : > { %v6917_v50 = vpop.f32.mrf.mxu1 }
0x1c2c   : > { %v5970_v5 = vpop.f32.mrf.mxu1 }
0x1c2e   : > { %v6918_v0 = vpop.f32.mrf.mxu1 }
0x1c2f   : > { %v7118_v26 = vpack.i.bf16 %v6918_v0, %v6917_v50 }
0x1c30   : > { %v5973_v9 = vpop.f32.mrf.mxu1 }
0x1c31   : > { %v7113_v35 = vpack.i.bf16 %v5973_v9, %v5970_v5 }
0x1c33   : > { %7114 = vrot.lane.b32.xlu1 %v7113_v35, %s9445_s0 }
0x1c37   : > { %7119 = vrot.lane.b32.xlu1 %v7118_v26, %s9436_s26 }
0x1c9b   : > { %v7110_v40 = vpop.permute.xlu0 %7109 }
0x1c9c   : > { %v7112_v19 = vunpack.i.h.bf16 %v7110_v40  ;;  %v7111_v10 = vunpack.i.l.bf16 %v7110_v40 }
0x1c9e   : > { %v6009_v25 = vsel %vm1361_vm1, %v5954_v47, %v7111_v10  ;;  %v6010_v60 = vsel %vm1361_vm1, %v5957_v43, %v7112_v19 }
0x1ca5   : > { %v7115_v44 = vpop.permute.xlu1 %7114 }
0x1ca6   : > { %v7117_v55 = vunpack.i.h.bf16 %v7115_v44  ;;  %v7116_v31 = vunpack.i.l.bf16 %v7115_v44 }
0x1ca8   : > { %v6012_v13 = vsel %vm1974_vm3, %v6010_v60, %v7117_v55  ;;  %v6011_v20 = vsel %vm1974_vm3, %v6009_v25, %v7116_v31 }
0x1ca9   : > { %v7120_v38 = vpop.permute.xlu1 %7119 }
0x1caa   : > { %v7122_v48 = vunpack.i.h.bf16 %v7120_v38  ;;  %v7121_v41 = vunpack.i.l.bf16 %v7120_v38 }
0x1cac   : > { %v6013_v16 = vsel %vm4323_vm12, %v6011_v20, %v7121_v41  ;;  %v6014_v14 = vsel %vm4323_vm12, %v6012_v13, %v7122_v48 }
0x1cad   : > { %v6337_v28 = vpack.c.bf16 %v6014_v14, %v6013_v16 }
0x1caf   : > { %6338 = vst [vmem:[%s1251_s1] sm:$0xff] %v6337_v28  }
0x1cb0 PF: > { %s94_s7 = sadd.s32 1, %s7477_s7  }
0x1cb1   : > { %p91_p1 = scmp.ge.s32.totalorder %s94_s7, 4  }
0x1cb3   :  { %93 = sbr.rel (!%p91_p1) target bundleno = 73 (0x49), region = 260 }
0x1cb8   :  { %6046 = vsyncpa [#allocation3], 1 }
0x1cb9   :  { %6048 = vsyncpa [#allocation3 + $0x1], 1 }

</bundles_post_ra>
